<compile_context>
chip_gen: v6e
topology: v6e:2x2x1
jax: 0.10.0
libtpu: 0.0.40
codegen_flags: <defaults>
</compile_context>

<pallas_src>
import functools

import jax
import jax.numpy as jnp
from jax import lax
from jax.experimental import pallas as pl
from jax.experimental.pallas import tpu as pltpu

# ---------------------------------------------------------------------------
# Static geometry (28x28x3 input is implied by fc = Linear(128 * 7 * 7, 10)).
# ---------------------------------------------------------------------------
H1 = W1 = 28                  # conv1 spatial size
H2 = W2 = 14                  # after first 2x2 maxpool
HP2 = WP2 = 16                # zero-padded conv2 input grid
H3 = W3 = 7                   # after second 2x2 maxpool
C0, C1, C2 = 3, 64, 128
K1 = 9 * C0                   # 27   conv1 im2col contraction (kh, kw, cin)
K2 = 9 * C1                   # 576  conv2 contraction (kh, kw, cin)
CA_HID = C1 // 16             # 4    channel-attention hidden width
NUM_CLASSES = 10
P1_IMG = H1 * W1              # 784  conv1 output rows per image
HM1_IMG = H2 * W1             # 392  pool1 h-max staging rows per image
PAD_IMG = HP2 * WP2           # 256  padded pooled1 rows per image
L2 = (H2 - 1) * WP2 + W2      # 222  conv2 output flat span per image
Y2_IMG = 224                  # conv2 scratch stride per image (8-aligned)
HM2_IMG = 112                 # pool2 h-max stride per image (98 rows used)
FEAT_ROWS = H3 * W3           # 49


# ---------------------------------------------------------------------------
# Fused kernel (one grid step == img_tile images)
# ---------------------------------------------------------------------------
def fused_cnn_kernel(xcol_ref,                    # (T*784, 27) bf16  im2col'd input
                     w1_ref, b1_ref,              # (27, 64) bf16, (1, 64) f32
                     wa1_ref, ba1_ref,            # (64, 4),  (1, 4)  f32
                     wa2_ref, ba2_ref,            # (4, 64),  (1, 64) f32
                     w2_ref, b2_ref,              # (576, 128) bf16, (1, 128) f32
                     feat_ref,                    # (T, 49, 128) f32 pooled features
                     y1_ref,                      # scratch (T*784, 64)  f32
                     hm1_ref,                     # scratch (T*392, 64)  f32
                     p1_ref,                      # scratch (T*256, 64)  f32
                     y2_ref,                      # scratch (T*224, 128) f32
                     hm2_ref,                     # scratch (T*112, 128) f32
                     *, img_tile):
    f32 = jnp.float32
    bf16 = jnp.bfloat16
    taps = [(dh, dw) for dh in range(3) for dw in range(3)]

    b1v = b1_ref[...]                                              # (1, 64)
    b2v = b2_ref[...]                                              # (1, 128)

    # ---- conv1: a single MXU matmul over every image in this step ----------
    y1_ref[...] = jnp.dot(xcol_ref[...], w1_ref[...],
                          preferred_element_type=f32)              # (T*784, 64)

    # ---- channel attention: block-diag ones matmul -> per-image means ------
    rows = lax.broadcasted_iota(jnp.int32, (img_tile, img_tile * P1_IMG), 0)
    cols = lax.broadcasted_iota(jnp.int32, (img_tile, img_tile * P1_IMG), 1)
    lo = rows * P1_IMG
    sel = jnp.where((cols >= lo) & (cols < lo + P1_IMG),
                    1.0 / float(P1_IMG), 0.0).astype(f32)          # (T, T*784)
    mean1 = jnp.dot(sel, y1_ref[...],
                    preferred_element_type=f32) + b1v              # (T, 64)
    hid = jnp.maximum(
        jnp.dot(mean1, wa1_ref[...], preferred_element_type=f32) + ba1_ref[...],
        0.0)                                                       # (T, 4)
    z = jnp.dot(hid, wa2_ref[...], preferred_element_type=f32) + ba2_ref[...]
    gate = 1.0 / (1.0 + jnp.exp(-z))                               # sigmoid, (T, 64)

    # Zero the padded conv2 input each step (borders supply SAME padding).
    # Border-only zeroing with a first-step-only guard is unsafe under
    # megacore "parallel" grid partitioning, so keep the cheap full zero.
    p1_ref[...] = jnp.zeros_like(p1_ref)

    for img in range(img_tile):
        yb = img * P1_IMG
        hb = img * HM1_IMG
        pb = img * PAD_IMG
        y2b = img * Y2_IMG
        h2b = img * HM2_IMG

        # ---- pool1, H direction: row-pair maxes into contiguous staging ----
        for i in range(H2):
            a = y1_ref[pl.ds(yb + (2 * i) * W1, W1), :]            # (28, 64)
            b = y1_ref[pl.ds(yb + (2 * i + 1) * W1, W1), :]
            hm1_ref[pl.ds(hb + i * W1, W1), :] = jnp.maximum(a, b)

        # ---- pool1, W direction: two stride-2 reads + one max --------------
        ev = hm1_ref[pl.ds(hb, H2 * W2, stride=2), :]              # (196, 64)
        od = hm1_ref[pl.ds(hb + 1, H2 * W2, stride=2), :]
        pooled1 = jnp.maximum(ev, od)
        # sigmoid gate > 0 and +bias / ReLU are monotone -> commute with max.
        g = gate[img:img + 1, :]                                   # (1, 64)
        act1 = jnp.maximum((pooled1 + b1v) * g, 0.0)               # (196, 64)

        # scatter pooled rows into the zero-padded conv2 input
        for i in range(H2):
            p1_ref[pl.ds(pb + (i + 1) * WP2 + 1, W2), :] = \
                act1[i * W2:(i + 1) * W2, :]

        # ---- conv2: 9 shifted-slice taps, register-accumulated row tiles ----
        for c0, clen in ((0, 112), (112, L2 - 112)):
            acc = jnp.zeros((clen, C2), f32)
            for t, (dh, dw) in enumerate(taps):
                lhs = p1_ref[pl.ds(pb + c0 + dh * WP2 + dw, clen), :].astype(bf16)
                rhs = w2_ref[pl.ds(t * C1, C1), :]                 # (64, 128) bf16
                acc = acc + jnp.dot(lhs, rhs, preferred_element_type=f32)
            y2_ref[pl.ds(y2b + c0, clen), :] = acc                 # one store/tile

        # ---- pool2, H direction ---------------------------------------------
        for i in range(H3):
            a = y2_ref[pl.ds(y2b + (2 * i) * WP2, W2), :]          # (14, 128)
            b = y2_ref[pl.ds(y2b + (2 * i + 1) * WP2, W2), :]
            hm2_ref[pl.ds(h2b + i * W2, W2), :] = jnp.maximum(a, b)

        # ---- pool2, W direction + bias + ReLU -> (49, 128) features ---------
        ev2 = hm2_ref[pl.ds(h2b, H3 * W3, stride=2), :]            # (49, 128)
        od2 = hm2_ref[pl.ds(h2b + 1, H3 * W3, stride=2), :]
        pooled2 = jnp.maximum(ev2, od2)
        feat_ref[img] = jnp.maximum(pooled2 + b2v, 0.0)


# ---------------------------------------------------------------------------
# pallas_call wrapper
# ---------------------------------------------------------------------------
def _full_spec(a):
    nd = a.ndim
    return pl.BlockSpec(a.shape, lambda g, _nd=nd: (0,) * _nd)


def _vmem_limit_bytes(img_tile):
    f32, b16 = 4, 2
    scratch = img_tile * (P1_IMG * C1 * f32 + HM1_IMG * C1 * f32
                          + PAD_IMG * C1 * f32 + Y2_IMG * C2 * f32
                          + HM2_IMG * C2 * f32)
    io = 2 * img_tile * (P1_IMG * K1 * b16 + FEAT_ROWS * C2 * f32)
    wts = 2 * (K1 * C1 * b16 + K2 * C2 * b16
               + (C1 + CA_HID + C1 + C2) * f32
               + C1 * CA_HID * f32 + CA_HID * C1 * f32)
    total = scratch + io + wts
    return int(min(max(2 * total, 8 << 20), 64 << 20))


def _pick_img_tile(batch):
    for t in (8, 4, 2, 1):
        if batch % t == 0:
            return t
    return 1


def _fused_forward_call(xcol, w1, b1, wa1, ba1, wa2, ba2, w2, b2, img_tile):
    B = xcol.shape[0] // P1_IMG
    assert B % img_tile == 0
    steps = B // img_tile
    kernel = functools.partial(fused_cnn_kernel, img_tile=img_tile)
    return pl.pallas_call(
        kernel,
        out_shape=jax.ShapeDtypeStruct((B, FEAT_ROWS, C2), jnp.float32),
        grid=(steps,),
        in_specs=[
            pl.BlockSpec((img_tile * P1_IMG, K1), lambda g: (g, 0)),
            _full_spec(w1), _full_spec(b1), _full_spec(wa1), _full_spec(ba1),
            _full_spec(wa2), _full_spec(ba2), _full_spec(w2), _full_spec(b2),
        ],
        out_specs=pl.BlockSpec((img_tile, FEAT_ROWS, C2), lambda g: (g, 0, 0)),
        scratch_shapes=[
            pltpu.VMEM((img_tile * P1_IMG, C1), jnp.float32),    # conv1 out
            pltpu.VMEM((img_tile * HM1_IMG, C1), jnp.float32),   # pool1 h-max
            pltpu.VMEM((img_tile * PAD_IMG, C1), jnp.float32),   # padded pooled1
            pltpu.VMEM((img_tile * Y2_IMG, C2), jnp.float32),    # conv2 out
            pltpu.VMEM((img_tile * HM2_IMG, C2), jnp.float32),   # pool2 h-max
        ],
        compiler_params=pltpu.CompilerParams(
            dimension_semantics=("parallel",),
            vmem_limit_bytes=_vmem_limit_bytes(img_tile),
        ),
    )(xcol, w1, b1, wa1, ba1, wa2, ba2, w2, b2)


@jax.jit
def forward(x_nchw, params):
    (w1, b1, wa1, ba1, wa2, ba2, w2, b2, wfc, bfc) = params
    x = jnp.transpose(x_nchw, (0, 2, 3, 1)).astype(jnp.float32)    # NCHW -> NHWC
    B, H, W, C = x.shape
    assert (H, W, C) == (H1, W1, C0)
    # conv1 im2col on the XLA side: (B*784, 27), taps ordered (kh, kw, cin).
    xp = jnp.pad(x, ((0, 0), (1, 1), (1, 1), (0, 0)))
    cols = [xp[:, dh:dh + H1, dw:dw + W1, :]
            for dh in range(3) for dw in range(3)]
    xcol = jnp.concatenate(cols, axis=-1).reshape(B * P1_IMG, K1)
    xcol = xcol.astype(jnp.bfloat16)

    feat = _fused_forward_call(
        xcol, w1.astype(jnp.bfloat16), b1, wa1, ba1, wa2, ba2,
        w2.astype(jnp.bfloat16), b2, img_tile=_pick_img_tile(B))

    # fc hoisted to XLA on the (h, w, c)-flattened pooled features.
    feat = feat.reshape(B, FEAT_ROWS * C2)
    return feat @ wfc + bfc


# ---------------------------------------------------------------------------
# Pure-JAX reference (for correctness validation)
# ---------------------------------------------------------------------------
@jax.jit
def reference_forward(x_nchw, params):
    (w1, b1, wa1, ba1, wa2, ba2, w2, b2, wfc, bfc) = params
    x = jnp.transpose(x_nchw, (0, 2, 3, 1)).astype(jnp.float32)
    dn = ("NHWC", "HWIO", "NHWC")
    y = lax.conv_general_dilated(x, w1.reshape(3, 3, C0, C1), (1, 1), "SAME",
                                 dimension_numbers=dn) + b1.reshape(1, 1, 1, C1)
    m = jnp.mean(y, axis=(1, 2))                                   # (B, 64)
    h = jnp.maximum(m @ wa1 + ba1, 0.0)
    gate = jax.nn.sigmoid(h @ wa2 + ba2)                           # (B, 64)
    y = jnp.maximum(y * gate[:, None, None, :], 0.0)
    y = lax.reduce_window(y, -jnp.inf, lax.max, (1, 2, 2, 1), (1, 2, 2, 1), "VALID")
    y = lax.conv_general_dilated(y, w2.reshape(3, 3, C1, C2), (1, 1), "SAME",
                                 dimension_numbers=dn) + b2.reshape(1, 1, 1, C2)
    y = jnp.maximum(y, 0.0)
    y = lax.reduce_window(y, -jnp.inf, lax.max, (1, 2, 2, 1), (1, 2, 2, 1), "VALID")
    feat = y.reshape(y.shape[0], -1)                               # (h, w, c) order
    return feat @ wfc + bfc


# ---------------------------------------------------------------------------
# Deterministic synthetic parameters (already in kernel layout)
# ---------------------------------------------------------------------------
def make_params(key):
    ks = jax.random.split(key, 10)
    f32 = jnp.float32
    w1 = jax.random.normal(ks[0], (K1, C1), f32) * 0.10        # (kh,kw,cin) -> cout
    b1 = jax.random.normal(ks[1], (1, C1), f32) * 0.05
    wa1 = jax.random.normal(ks[2], (C1, CA_HID), f32) * 0.10   # Linear(64, 4).T
    ba1 = jax.random.normal(ks[3], (1, CA_HID), f32) * 0.05
    wa2 = jax.random.normal(ks[4], (CA_HID, C1), f32) * 0.10   # Linear(4, 64).T
    ba2 = jax.random.normal(ks[5], (1, C1), f32) * 0.05
    w2 = jax.random.normal(ks[6], (K2, C2), f32) * 0.05        # (kh,kw,cin) -> cout
    b2 = jax.random.normal(ks[7], (1, C2), f32) * 0.05
    wfc = jax.random.normal(ks[8], (FEAT_ROWS * C2, NUM_CLASSES), f32) * 0.02
    bfc = jax.random.normal(ks[9], (1, NUM_CLASSES), f32) * 0.02
    return (w1, b1, wa1, ba1, wa2, ba2, w2, b2, wfc, bfc)


if __name__ == "__main__":
    key = jax.random.PRNGKey(0)
    k_params, k_x = jax.random.split(key)
    params = make_params(k_params)
    # Input 28x28x3 is implied by fc = Linear(128 * 7 * 7, num_classes).
    x = jax.random.normal(k_x, (2, 3, 28, 28), jnp.float32)        # NCHW like PyTorch

    logits = jax.block_until_ready(forward(x, params))
    assert logits.shape == (2, NUM_CLASSES), logits.shape
    assert bool(jnp.all(jnp.isfinite(logits)))

    # Validate against the pure-JAX reference (bf16 MXU operands -> loose tol).
    ref = jax.block_until_ready(reference_forward(x, params))
    assert bool(jnp.allclose(logits, ref, atol=5e-2, rtol=5e-2)), (
        float(jnp.max(jnp.abs(logits - ref))))

    print("KERNEL_OK")
</pallas_src>

<mosaic_0001>
module attributes {stable_mosaic.version = 11 : i64} {
  func.func @fused_cnn_kernel(%arg0: i32, %arg1: memref<1568x27xbf16, #tpu.memory_space<vmem>>, %arg2: memref<27x64xbf16, #tpu.memory_space<vmem>>, %arg3: memref<1x64xf32, #tpu.memory_space<vmem>>, %arg4: memref<64x4xf32, #tpu.memory_space<vmem>>, %arg5: memref<1x4xf32, #tpu.memory_space<vmem>>, %arg6: memref<4x64xf32, #tpu.memory_space<vmem>>, %arg7: memref<1x64xf32, #tpu.memory_space<vmem>>, %arg8: memref<576x128xbf16, #tpu.memory_space<vmem>>, %arg9: memref<1x128xf32, #tpu.memory_space<vmem>>, %arg10: memref<2x49x128xf32, #tpu.memory_space<vmem>>, %arg11: memref<1568x64xf32, #tpu.memory_space<vmem>>, %arg12: memref<784x64xf32, #tpu.memory_space<vmem>>, %arg13: memref<512x64xf32, #tpu.memory_space<vmem>>, %arg14: memref<448x128xf32, #tpu.memory_space<vmem>>, %arg15: memref<224x128xf32, #tpu.memory_space<vmem>>) attributes {dimension_semantics = [#tpu.dimension_semantics<parallel>], iteration_bounds = array<i64: 1>, scalar_prefetch = 0 : i64, scratch_operands = 5 : i64, tpu.core_type = #tpu.core_type<tc>, window_params = [{transform_indices = @transform_0, window_bounds = array<i64: 1568, 27>}, {pipeline_mode = #tpu.pipeline_mode<synchronous>, transform_indices = @transform_1, window_bounds = array<i64: 27, 64>}, {pipeline_mode = #tpu.pipeline_mode<synchronous>, transform_indices = @transform_2, window_bounds = array<i64: 1, 64>}, {pipeline_mode = #tpu.pipeline_mode<synchronous>, transform_indices = @transform_3, window_bounds = array<i64: 64, 4>}, {pipeline_mode = #tpu.pipeline_mode<synchronous>, transform_indices = @transform_4, window_bounds = array<i64: 1, 4>}, {pipeline_mode = #tpu.pipeline_mode<synchronous>, transform_indices = @transform_5, window_bounds = array<i64: 4, 64>}, {pipeline_mode = #tpu.pipeline_mode<synchronous>, transform_indices = @transform_6, window_bounds = array<i64: 1, 64>}, {pipeline_mode = #tpu.pipeline_mode<synchronous>, transform_indices = @transform_7, window_bounds = array<i64: 576, 128>}, {pipeline_mode = #tpu.pipeline_mode<synchronous>, transform_indices = @transform_8, window_bounds = array<i64: 1, 128>}, {transform_indices = @transform_9, window_bounds = array<i64: 2, 49, 128>}]} {
    %c0 = arith.constant 0 : index
    %c0_0 = arith.constant 0 : index
    %0 = vector.load %arg3[%c0, %c0_0] : memref<1x64xf32, #tpu.memory_space<vmem>>, vector<1x64xf32>
    %c0_1 = arith.constant 0 : index
    %c0_2 = arith.constant 0 : index
    %1 = vector.load %arg9[%c0_1, %c0_2] : memref<1x128xf32, #tpu.memory_space<vmem>>, vector<1x128xf32>
    %c0_3 = arith.constant 0 : index
    %c0_4 = arith.constant 0 : index
    %2 = vector.load %arg1[%c0_3, %c0_4] : memref<1568x27xbf16, #tpu.memory_space<vmem>>, vector<1568x27xbf16>
    %c0_5 = arith.constant 0 : index
    %c0_6 = arith.constant 0 : index
    %3 = vector.load %arg2[%c0_5, %c0_6] : memref<27x64xbf16, #tpu.memory_space<vmem>>, vector<27x64xbf16>
    %cst = arith.constant dense<0.000000e+00> : vector<1568x64xf32>
    %4 = tpu.matmul %2, %3, %cst {dimension_numbers = #tpu.dot_dimension_numbers<[1], [0], [0], [1], [0, 0, 1, 1], [], []>} : vector<1568x27xbf16>, vector<27x64xbf16>, vector<1568x64xf32> -> vector<1568x64xf32>
    %c0_7 = arith.constant 0 : index
    %c0_8 = arith.constant 0 : index
    %5 = vector.load %arg11[%c0_7, %c0_8] : memref<1568x64xf32, #tpu.memory_space<vmem>>, vector<1568x64xf32>
    tpu.vector_store %arg11[%c0_7, %c0_8], %4 {strides = array<i32>} : memref<1568x64xf32, #tpu.memory_space<vmem>>, vector<1568x64xf32>,
    %6 = tpu.iota {dimensions = array<i32: 0>} : vector<2x1568xi32>
    %7 = tpu.iota {dimensions = array<i32: 1>} : vector<2x1568xi32>
    %c784_i32 = arith.constant 784 : i32
    %8 = vector.broadcast %c784_i32 : i32 to vector<2x1568xi32>
    %9 = arith.muli %6, %8 : vector<2x1568xi32>
    %10 = arith.cmpi sge, %7, %9 : vector<2x1568xi32>
    %c784_i32_9 = arith.constant 784 : i32
    %11 = vector.broadcast %c784_i32_9 : i32 to vector<2x1568xi32>
    %12 = arith.addi %9, %11 : vector<2x1568xi32>
    %13 = arith.cmpi slt, %7, %12 : vector<2x1568xi32>
    %14 = arith.andi %10, %13 : vector<2x1568xi1>
    %cst_10 = arith.constant 0.00127551018 : f32
    %cst_11 = arith.constant 0.000000e+00 : f32
    %15 = vector.broadcast %cst_10 : f32 to vector<2x1568xf32>
    %16 = vector.broadcast %cst_11 : f32 to vector<2x1568xf32>
    %17 = arith.select %14, %15, %16 : vector<2x1568xi1>, vector<2x1568xf32>
    %c0_12 = arith.constant 0 : index
    %c0_13 = arith.constant 0 : index
    %18 = vector.load %arg11[%c0_12, %c0_13] : memref<1568x64xf32, #tpu.memory_space<vmem>>, vector<1568x64xf32>
    %cst_14 = arith.constant dense<0.000000e+00> : vector<2x64xf32>
    %19 = tpu.matmul %17, %18, %cst_14 {dimension_numbers = #tpu.dot_dimension_numbers<[1], [0], [0], [1], [0, 0, 1, 1], [], []>} : vector<2x1568xf32>, vector<1568x64xf32>, vector<2x64xf32> -> vector<2x64xf32>
    %20 = vector.broadcast %0 : vector<1x64xf32> to vector<2x64xf32>
    %21 = arith.addf %19, %20 : vector<2x64xf32>
    %c0_15 = arith.constant 0 : index
    %c0_16 = arith.constant 0 : index
    %22 = vector.load %arg4[%c0_15, %c0_16] : memref<64x4xf32, #tpu.memory_space<vmem>>, vector<64x4xf32>
    %cst_17 = arith.constant dense<0.000000e+00> : vector<2x4xf32>
    %23 = tpu.matmul %21, %22, %cst_17 {dimension_numbers = #tpu.dot_dimension_numbers<[1], [0], [0], [1], [0, 0, 1, 1], [], []>} : vector<2x64xf32>, vector<64x4xf32>, vector<2x4xf32> -> vector<2x4xf32>
    %c0_18 = arith.constant 0 : index
    %c0_19 = arith.constant 0 : index
    %24 = vector.load %arg5[%c0_18, %c0_19] : memref<1x4xf32, #tpu.memory_space<vmem>>, vector<1x4xf32>
    %25 = vector.broadcast %24 : vector<1x4xf32> to vector<2x4xf32>
    %26 = arith.addf %23, %25 : vector<2x4xf32>
    %cst_20 = arith.constant 0.000000e+00 : f32
    %27 = vector.broadcast %cst_20 : f32 to vector<2x4xf32>
    %28 = arith.maximumf %26, %27 : vector<2x4xf32>
    %c0_21 = arith.constant 0 : index
    %c0_22 = arith.constant 0 : index
    %29 = vector.load %arg6[%c0_21, %c0_22] : memref<4x64xf32, #tpu.memory_space<vmem>>, vector<4x64xf32>
    %cst_23 = arith.constant dense<0.000000e+00> : vector<2x64xf32>
    %30 = tpu.matmul %28, %29, %cst_23 {dimension_numbers = #tpu.dot_dimension_numbers<[1], [0], [0], [1], [0, 0, 1, 1], [], []>} : vector<2x4xf32>, vector<4x64xf32>, vector<2x64xf32> -> vector<2x64xf32>
    %c0_24 = arith.constant 0 : index
    %c0_25 = arith.constant 0 : index
    %31 = vector.load %arg7[%c0_24, %c0_25] : memref<1x64xf32, #tpu.memory_space<vmem>>, vector<1x64xf32>
    %32 = vector.broadcast %31 : vector<1x64xf32> to vector<2x64xf32>
    %33 = arith.addf %30, %32 : vector<2x64xf32>
    %cst_26 = arith.constant 0.000000e+00 : f32
    %34 = vector.broadcast %cst_26 : f32 to vector<2x64xf32>
    %35 = arith.subf %34, %33 : vector<2x64xf32>
    %36 = math.exp %35 : vector<2x64xf32>
    %cst_27 = arith.constant 1.000000e+00 : f32
    %37 = vector.broadcast %cst_27 : f32 to vector<2x64xf32>
    %38 = arith.addf %37, %36 : vector<2x64xf32>
    %cst_28 = arith.constant 1.000000e+00 : f32
    %39 = vector.broadcast %cst_28 : f32 to vector<2x64xf32>
    %40 = arith.divf %39, %38 : vector<2x64xf32>
    %cst_29 = arith.constant 0.000000e+00 : f32
    %41 = vector.broadcast %cst_29 : f32 to vector<512x64xf32>
    %c0_30 = arith.constant 0 : index
    %c0_31 = arith.constant 0 : index
    %42 = vector.load %arg13[%c0_30, %c0_31] : memref<512x64xf32, #tpu.memory_space<vmem>>, vector<512x64xf32>
    tpu.vector_store %arg13[%c0_30, %c0_31], %41 {strides = array<i32>} : memref<512x64xf32, #tpu.memory_space<vmem>>, vector<512x64xf32>,
    %c0_32 = arith.constant 0 : index
    %c0_33 = arith.constant 0 : index
    %43 = vector.load %arg11[%c0_32, %c0_33] : memref<1568x64xf32, #tpu.memory_space<vmem>>, vector<28x64xf32>
    %c28 = arith.constant 28 : index
    %c0_34 = arith.constant 0 : index
    %44 = vector.load %arg11[%c28, %c0_34] : memref<1568x64xf32, #tpu.memory_space<vmem>>, vector<28x64xf32>
    %45 = arith.maximumf %43, %44 : vector<28x64xf32>
    %c0_35 = arith.constant 0 : index
    %c0_36 = arith.constant 0 : index
    %46 = vector.load %arg12[%c0_35, %c0_36] : memref<784x64xf32, #tpu.memory_space<vmem>>, vector<28x64xf32>
    tpu.vector_store %arg12[%c0_35, %c0_36], %45 {strides = array<i32>} : memref<784x64xf32, #tpu.memory_space<vmem>>, vector<28x64xf32>,
    %c56 = arith.constant 56 : index
    %c0_37 = arith.constant 0 : index
    %47 = vector.load %arg11[%c56, %c0_37] : memref<1568x64xf32, #tpu.memory_space<vmem>>, vector<28x64xf32>
    %c84 = arith.constant 84 : index
    %c0_38 = arith.constant 0 : index
    %48 = vector.load %arg11[%c84, %c0_38] : memref<1568x64xf32, #tpu.memory_space<vmem>>, vector<28x64xf32>
    %49 = arith.maximumf %47, %48 : vector<28x64xf32>
    %c28_39 = arith.constant 28 : index
    %c0_40 = arith.constant 0 : index
    %50 = vector.load %arg12[%c28_39, %c0_40] : memref<784x64xf32, #tpu.memory_space<vmem>>, vector<28x64xf32>
    tpu.vector_store %arg12[%c28_39, %c0_40], %49 {strides = array<i32>} : memref<784x64xf32, #tpu.memory_space<vmem>>, vector<28x64xf32>,
    %c112 = arith.constant 112 : index
    %c0_41 = arith.constant 0 : index
    %51 = vector.load %arg11[%c112, %c0_41] : memref<1568x64xf32, #tpu.memory_space<vmem>>, vector<28x64xf32>
    %c140 = arith.constant 140 : index
    %c0_42 = arith.constant 0 : index
    %52 = vector.load %arg11[%c140, %c0_42] : memref<1568x64xf32, #tpu.memory_space<vmem>>, vector<28x64xf32>
    %53 = arith.maximumf %51, %52 : vector<28x64xf32>
    %c56_43 = arith.constant 56 : index
    %c0_44 = arith.constant 0 : index
    %54 = vector.load %arg12[%c56_43, %c0_44] : memref<784x64xf32, #tpu.memory_space<vmem>>, vector<28x64xf32>
    tpu.vector_store %arg12[%c56_43, %c0_44], %53 {strides = array<i32>} : memref<784x64xf32, #tpu.memory_space<vmem>>, vector<28x64xf32>,
    %c168 = arith.constant 168 : index
    %c0_45 = arith.constant 0 : index
    %55 = vector.load %arg11[%c168, %c0_45] : memref<1568x64xf32, #tpu.memory_space<vmem>>, vector<28x64xf32>
    %c196 = arith.constant 196 : index
    %c0_46 = arith.constant 0 : index
    %56 = vector.load %arg11[%c196, %c0_46] : memref<1568x64xf32, #tpu.memory_space<vmem>>, vector<28x64xf32>
    %57 = arith.maximumf %55, %56 : vector<28x64xf32>
    %c84_47 = arith.constant 84 : index
    %c0_48 = arith.constant 0 : index
    %58 = vector.load %arg12[%c84_47, %c0_48] : memref<784x64xf32, #tpu.memory_space<vmem>>, vector<28x64xf32>
    tpu.vector_store %arg12[%c84_47, %c0_48], %57 {strides = array<i32>} : memref<784x64xf32, #tpu.memory_space<vmem>>, vector<28x64xf32>,
    %c224 = arith.constant 224 : index
    %c0_49 = arith.constant 0 : index
    %59 = vector.load %arg11[%c224, %c0_49] : memref<1568x64xf32, #tpu.memory_space<vmem>>, vector<28x64xf32>
    %c252 = arith.constant 252 : index
    %c0_50 = arith.constant 0 : index
    %60 = vector.load %arg11[%c252, %c0_50] : memref<1568x64xf32, #tpu.memory_space<vmem>>, vector<28x64xf32>
    %61 = arith.maximumf %59, %60 : vector<28x64xf32>
    %c112_51 = arith.constant 112 : index
    %c0_52 = arith.constant 0 : index
    %62 = vector.load %arg12[%c112_51, %c0_52] : memref<784x64xf32, #tpu.memory_space<vmem>>, vector<28x64xf32>
    tpu.vector_store %arg12[%c112_51, %c0_52], %61 {strides = array<i32>} : memref<784x64xf32, #tpu.memory_space<vmem>>, vector<28x64xf32>,
    %c280 = arith.constant 280 : index
    %c0_53 = arith.constant 0 : index
    %63 = vector.load %arg11[%c280, %c0_53] : memref<1568x64xf32, #tpu.memory_space<vmem>>, vector<28x64xf32>
    %c308 = arith.constant 308 : index
    %c0_54 = arith.constant 0 : index
    %64 = vector.load %arg11[%c308, %c0_54] : memref<1568x64xf32, #tpu.memory_space<vmem>>, vector<28x64xf32>
    %65 = arith.maximumf %63, %64 : vector<28x64xf32>
    %c140_55 = arith.constant 140 : index
    %c0_56 = arith.constant 0 : index
    %66 = vector.load %arg12[%c140_55, %c0_56] : memref<784x64xf32, #tpu.memory_space<vmem>>, vector<28x64xf32>
    tpu.vector_store %arg12[%c140_55, %c0_56], %65 {strides = array<i32>} : memref<784x64xf32, #tpu.memory_space<vmem>>, vector<28x64xf32>,
    %c336 = arith.constant 336 : index
    %c0_57 = arith.constant 0 : index
    %67 = vector.load %arg11[%c336, %c0_57] : memref<1568x64xf32, #tpu.memory_space<vmem>>, vector<28x64xf32>
    %c364 = arith.constant 364 : index
    %c0_58 = arith.constant 0 : index
    %68 = vector.load %arg11[%c364, %c0_58] : memref<1568x64xf32, #tpu.memory_space<vmem>>, vector<28x64xf32>
    %69 = arith.maximumf %67, %68 : vector<28x64xf32>
    %c168_59 = arith.constant 168 : index
    %c0_60 = arith.constant 0 : index
    %70 = vector.load %arg12[%c168_59, %c0_60] : memref<784x64xf32, #tpu.memory_space<vmem>>, vector<28x64xf32>
    tpu.vector_store %arg12[%c168_59, %c0_60], %69 {strides = array<i32>} : memref<784x64xf32, #tpu.memory_space<vmem>>, vector<28x64xf32>,
    %c392 = arith.constant 392 : index
    %c0_61 = arith.constant 0 : index
    %71 = vector.load %arg11[%c392, %c0_61] : memref<1568x64xf32, #tpu.memory_space<vmem>>, vector<28x64xf32>
    %c420 = arith.constant 420 : index
    %c0_62 = arith.constant 0 : index
    %72 = vector.load %arg11[%c420, %c0_62] : memref<1568x64xf32, #tpu.memory_space<vmem>>, vector<28x64xf32>
    %73 = arith.maximumf %71, %72 : vector<28x64xf32>
    %c196_63 = arith.constant 196 : index
    %c0_64 = arith.constant 0 : index
    %74 = vector.load %arg12[%c196_63, %c0_64] : memref<784x64xf32, #tpu.memory_space<vmem>>, vector<28x64xf32>
    tpu.vector_store %arg12[%c196_63, %c0_64], %73 {strides = array<i32>} : memref<784x64xf32, #tpu.memory_space<vmem>>, vector<28x64xf32>,
    %c448 = arith.constant 448 : index
    %c0_65 = arith.constant 0 : index
    %75 = vector.load %arg11[%c448, %c0_65] : memref<1568x64xf32, #tpu.memory_space<vmem>>, vector<28x64xf32>
    %c476 = arith.constant 476 : index
    %c0_66 = arith.constant 0 : index
    %76 = vector.load %arg11[%c476, %c0_66] : memref<1568x64xf32, #tpu.memory_space<vmem>>, vector<28x64xf32>
    %77 = arith.maximumf %75, %76 : vector<28x64xf32>
    %c224_67 = arith.constant 224 : index
    %c0_68 = arith.constant 0 : index
    %78 = vector.load %arg12[%c224_67, %c0_68] : memref<784x64xf32, #tpu.memory_space<vmem>>, vector<28x64xf32>
    tpu.vector_store %arg12[%c224_67, %c0_68], %77 {strides = array<i32>} : memref<784x64xf32, #tpu.memory_space<vmem>>, vector<28x64xf32>,
    %c504 = arith.constant 504 : index
    %c0_69 = arith.constant 0 : index
    %79 = vector.load %arg11[%c504, %c0_69] : memref<1568x64xf32, #tpu.memory_space<vmem>>, vector<28x64xf32>
    %c532 = arith.constant 532 : index
    %c0_70 = arith.constant 0 : index
    %80 = vector.load %arg11[%c532, %c0_70] : memref<1568x64xf32, #tpu.memory_space<vmem>>, vector<28x64xf32>
    %81 = arith.maximumf %79, %80 : vector<28x64xf32>
    %c252_71 = arith.constant 252 : index
    %c0_72 = arith.constant 0 : index
    %82 = vector.load %arg12[%c252_71, %c0_72] : memref<784x64xf32, #tpu.memory_space<vmem>>, vector<28x64xf32>
    tpu.vector_store %arg12[%c252_71, %c0_72], %81 {strides = array<i32>} : memref<784x64xf32, #tpu.memory_space<vmem>>, vector<28x64xf32>,
    %c560 = arith.constant 560 : index
    %c0_73 = arith.constant 0 : index
    %83 = vector.load %arg11[%c560, %c0_73] : memref<1568x64xf32, #tpu.memory_space<vmem>>, vector<28x64xf32>
    %c588 = arith.constant 588 : index
    %c0_74 = arith.constant 0 : index
    %84 = vector.load %arg11[%c588, %c0_74] : memref<1568x64xf32, #tpu.memory_space<vmem>>, vector<28x64xf32>
    %85 = arith.maximumf %83, %84 : vector<28x64xf32>
    %c280_75 = arith.constant 280 : index
    %c0_76 = arith.constant 0 : index
    %86 = vector.load %arg12[%c280_75, %c0_76] : memref<784x64xf32, #tpu.memory_space<vmem>>, vector<28x64xf32>
    tpu.vector_store %arg12[%c280_75, %c0_76], %85 {strides = array<i32>} : memref<784x64xf32, #tpu.memory_space<vmem>>, vector<28x64xf32>,
    %c616 = arith.constant 616 : index
    %c0_77 = arith.constant 0 : index
    %87 = vector.load %arg11[%c616, %c0_77] : memref<1568x64xf32, #tpu.memory_space<vmem>>, vector<28x64xf32>
    %c644 = arith.constant 644 : index
    %c0_78 = arith.constant 0 : index
    %88 = vector.load %arg11[%c644, %c0_78] : memref<1568x64xf32, #tpu.memory_space<vmem>>, vector<28x64xf32>
    %89 = arith.maximumf %87, %88 : vector<28x64xf32>
    %c308_79 = arith.constant 308 : index
    %c0_80 = arith.constant 0 : index
    %90 = vector.load %arg12[%c308_79, %c0_80] : memref<784x64xf32, #tpu.memory_space<vmem>>, vector<28x64xf32>
    tpu.vector_store %arg12[%c308_79, %c0_80], %89 {strides = array<i32>} : memref<784x64xf32, #tpu.memory_space<vmem>>, vector<28x64xf32>,
    %c672 = arith.constant 672 : index
    %c0_81 = arith.constant 0 : index
    %91 = vector.load %arg11[%c672, %c0_81] : memref<1568x64xf32, #tpu.memory_space<vmem>>, vector<28x64xf32>
    %c700 = arith.constant 700 : index
    %c0_82 = arith.constant 0 : index
    %92 = vector.load %arg11[%c700, %c0_82] : memref<1568x64xf32, #tpu.memory_space<vmem>>, vector<28x64xf32>
    %93 = arith.maximumf %91, %92 : vector<28x64xf32>
    %c336_83 = arith.constant 336 : index
    %c0_84 = arith.constant 0 : index
    %94 = vector.load %arg12[%c336_83, %c0_84] : memref<784x64xf32, #tpu.memory_space<vmem>>, vector<28x64xf32>
    tpu.vector_store %arg12[%c336_83, %c0_84], %93 {strides = array<i32>} : memref<784x64xf32, #tpu.memory_space<vmem>>, vector<28x64xf32>,
    %c728 = arith.constant 728 : index
    %c0_85 = arith.constant 0 : index
    %95 = vector.load %arg11[%c728, %c0_85] : memref<1568x64xf32, #tpu.memory_space<vmem>>, vector<28x64xf32>
    %c756 = arith.constant 756 : index
    %c0_86 = arith.constant 0 : index
    %96 = vector.load %arg11[%c756, %c0_86] : memref<1568x64xf32, #tpu.memory_space<vmem>>, vector<28x64xf32>
    %97 = arith.maximumf %95, %96 : vector<28x64xf32>
    %c364_87 = arith.constant 364 : index
    %c0_88 = arith.constant 0 : index
    %98 = vector.load %arg12[%c364_87, %c0_88] : memref<784x64xf32, #tpu.memory_space<vmem>>, vector<28x64xf32>
    tpu.vector_store %arg12[%c364_87, %c0_88], %97 {strides = array<i32>} : memref<784x64xf32, #tpu.memory_space<vmem>>, vector<28x64xf32>,
    %c0_89 = arith.constant 0 : index
    %c0_90 = arith.constant 0 : index
    %99 = tpu.strided_load %arg12[%c0_89, %c0_90] {strides = array<i32: 2, 1>} : memref<784x64xf32, #tpu.memory_space<vmem>>, vector<196x64xf32>
    %c1 = arith.constant 1 : index
    %c0_91 = arith.constant 0 : index
    %100 = tpu.strided_load %arg12[%c1, %c0_91] {strides = array<i32: 2, 1>} : memref<784x64xf32, #tpu.memory_space<vmem>>, vector<196x64xf32>
    %101 = arith.maximumf %99, %100 : vector<196x64xf32>
    %102 = vector.extract_strided_slice %40 {offsets = [0, 0], sizes = [1, 64], strides = [1, 1]} : vector<2x64xf32> to vector<1x64xf32>
    %103 = vector.broadcast %0 : vector<1x64xf32> to vector<196x64xf32>
    %104 = arith.addf %101, %103 : vector<196x64xf32>
    %105 = vector.broadcast %102 : vector<1x64xf32> to vector<196x64xf32>
    %106 = arith.mulf %104, %105 : vector<196x64xf32>
    %cst_92 = arith.constant 0.000000e+00 : f32
    %107 = vector.broadcast %cst_92 : f32 to vector<196x64xf32>
    %108 = arith.maximumf %106, %107 : vector<196x64xf32>
    %109 = vector.extract_strided_slice %108 {offsets = [0, 0], sizes = [14, 64], strides = [1, 1]} : vector<196x64xf32> to vector<14x64xf32>
    %c17 = arith.constant 17 : index
    %c0_93 = arith.constant 0 : index
    %110 = vector.load %arg13[%c17, %c0_93] : memref<512x64xf32, #tpu.memory_space<vmem>>, vector<14x64xf32>
    tpu.vector_store %arg13[%c17, %c0_93], %109 {strides = array<i32>} : memref<512x64xf32, #tpu.memory_space<vmem>>, vector<14x64xf32>,
    %111 = vector.extract_strided_slice %108 {offsets = [14, 0], sizes = [14, 64], strides = [1, 1]} : vector<196x64xf32> to vector<14x64xf32>
    %c33 = arith.constant 33 : index
    %c0_94 = arith.constant 0 : index
    %112 = vector.load %arg13[%c33, %c0_94] : memref<512x64xf32, #tpu.memory_space<vmem>>, vector<14x64xf32>
    tpu.vector_store %arg13[%c33, %c0_94], %111 {strides = array<i32>} : memref<512x64xf32, #tpu.memory_space<vmem>>, vector<14x64xf32>,
    %113 = vector.extract_strided_slice %108 {offsets = [28, 0], sizes = [14, 64], strides = [1, 1]} : vector<196x64xf32> to vector<14x64xf32>
    %c49 = arith.constant 49 : index
    %c0_95 = arith.constant 0 : index
    %114 = vector.load %arg13[%c49, %c0_95] : memref<512x64xf32, #tpu.memory_space<vmem>>, vector<14x64xf32>
    tpu.vector_store %arg13[%c49, %c0_95], %113 {strides = array<i32>} : memref<512x64xf32, #tpu.memory_space<vmem>>, vector<14x64xf32>,
    %115 = vector.extract_strided_slice %108 {offsets = [42, 0], sizes = [14, 64], strides = [1, 1]} : vector<196x64xf32> to vector<14x64xf32>
    %c65 = arith.constant 65 : index
    %c0_96 = arith.constant 0 : index
    %116 = vector.load %arg13[%c65, %c0_96] : memref<512x64xf32, #tpu.memory_space<vmem>>, vector<14x64xf32>
    tpu.vector_store %arg13[%c65, %c0_96], %115 {strides = array<i32>} : memref<512x64xf32, #tpu.memory_space<vmem>>, vector<14x64xf32>,
    %117 = vector.extract_strided_slice %108 {offsets = [56, 0], sizes = [14, 64], strides = [1, 1]} : vector<196x64xf32> to vector<14x64xf32>
    %c81 = arith.constant 81 : index
    %c0_97 = arith.constant 0 : index
    %118 = vector.load %arg13[%c81, %c0_97] : memref<512x64xf32, #tpu.memory_space<vmem>>, vector<14x64xf32>
    tpu.vector_store %arg13[%c81, %c0_97], %117 {strides = array<i32>} : memref<512x64xf32, #tpu.memory_space<vmem>>, vector<14x64xf32>,
    %119 = vector.extract_strided_slice %108 {offsets = [70, 0], sizes = [14, 64], strides = [1, 1]} : vector<196x64xf32> to vector<14x64xf32>
    %c97 = arith.constant 97 : index
    %c0_98 = arith.constant 0 : index
    %120 = vector.load %arg13[%c97, %c0_98] : memref<512x64xf32, #tpu.memory_space<vmem>>, vector<14x64xf32>
    tpu.vector_store %arg13[%c97, %c0_98], %119 {strides = array<i32>} : memref<512x64xf32, #tpu.memory_space<vmem>>, vector<14x64xf32>,
    %121 = vector.extract_strided_slice %108 {offsets = [84, 0], sizes = [14, 64], strides = [1, 1]} : vector<196x64xf32> to vector<14x64xf32>
    %c113 = arith.constant 113 : index
    %c0_99 = arith.constant 0 : index
    %122 = vector.load %arg13[%c113, %c0_99] : memref<512x64xf32, #tpu.memory_space<vmem>>, vector<14x64xf32>
    tpu.vector_store %arg13[%c113, %c0_99], %121 {strides = array<i32>} : memref<512x64xf32, #tpu.memory_space<vmem>>, vector<14x64xf32>,
    %123 = vector.extract_strided_slice %108 {offsets = [98, 0], sizes = [14, 64], strides = [1, 1]} : vector<196x64xf32> to vector<14x64xf32>
    %c129 = arith.constant 129 : index
    %c0_100 = arith.constant 0 : index
    %124 = vector.load %arg13[%c129, %c0_100] : memref<512x64xf32, #tpu.memory_space<vmem>>, vector<14x64xf32>
    tpu.vector_store %arg13[%c129, %c0_100], %123 {strides = array<i32>} : memref<512x64xf32, #tpu.memory_space<vmem>>, vector<14x64xf32>,
    %125 = vector.extract_strided_slice %108 {offsets = [112, 0], sizes = [14, 64], strides = [1, 1]} : vector<196x64xf32> to vector<14x64xf32>
    %c145 = arith.constant 145 : index
    %c0_101 = arith.constant 0 : index
    %126 = vector.load %arg13[%c145, %c0_101] : memref<512x64xf32, #tpu.memory_space<vmem>>, vector<14x64xf32>
    tpu.vector_store %arg13[%c145, %c0_101], %125 {strides = array<i32>} : memref<512x64xf32, #tpu.memory_space<vmem>>, vector<14x64xf32>,
    %127 = vector.extract_strided_slice %108 {offsets = [126, 0], sizes = [14, 64], strides = [1, 1]} : vector<196x64xf32> to vector<14x64xf32>
    %c161 = arith.constant 161 : index
    %c0_102 = arith.constant 0 : index
    %128 = vector.load %arg13[%c161, %c0_102] : memref<512x64xf32, #tpu.memory_space<vmem>>, vector<14x64xf32>
    tpu.vector_store %arg13[%c161, %c0_102], %127 {strides = array<i32>} : memref<512x64xf32, #tpu.memory_space<vmem>>, vector<14x64xf32>,
    %129 = vector.extract_strided_slice %108 {offsets = [140, 0], sizes = [14, 64], strides = [1, 1]} : vector<196x64xf32> to vector<14x64xf32>
    %c177 = arith.constant 177 : index
    %c0_103 = arith.constant 0 : index
    %130 = vector.load %arg13[%c177, %c0_103] : memref<512x64xf32, #tpu.memory_space<vmem>>, vector<14x64xf32>
    tpu.vector_store %arg13[%c177, %c0_103], %129 {strides = array<i32>} : memref<512x64xf32, #tpu.memory_space<vmem>>, vector<14x64xf32>,
    %131 = vector.extract_strided_slice %108 {offsets = [154, 0], sizes = [14, 64], strides = [1, 1]} : vector<196x64xf32> to vector<14x64xf32>
    %c193 = arith.constant 193 : index
    %c0_104 = arith.constant 0 : index
    %132 = vector.load %arg13[%c193, %c0_104] : memref<512x64xf32, #tpu.memory_space<vmem>>, vector<14x64xf32>
    tpu.vector_store %arg13[%c193, %c0_104], %131 {strides = array<i32>} : memref<512x64xf32, #tpu.memory_space<vmem>>, vector<14x64xf32>,
    %133 = vector.extract_strided_slice %108 {offsets = [168, 0], sizes = [14, 64], strides = [1, 1]} : vector<196x64xf32> to vector<14x64xf32>
    %c209 = arith.constant 209 : index
    %c0_105 = arith.constant 0 : index
    %134 = vector.load %arg13[%c209, %c0_105] : memref<512x64xf32, #tpu.memory_space<vmem>>, vector<14x64xf32>
    tpu.vector_store %arg13[%c209, %c0_105], %133 {strides = array<i32>} : memref<512x64xf32, #tpu.memory_space<vmem>>, vector<14x64xf32>,
    %135 = vector.extract_strided_slice %108 {offsets = [182, 0], sizes = [14, 64], strides = [1, 1]} : vector<196x64xf32> to vector<14x64xf32>
    %c225 = arith.constant 225 : index
    %c0_106 = arith.constant 0 : index
    %136 = vector.load %arg13[%c225, %c0_106] : memref<512x64xf32, #tpu.memory_space<vmem>>, vector<14x64xf32>
    tpu.vector_store %arg13[%c225, %c0_106], %135 {strides = array<i32>} : memref<512x64xf32, #tpu.memory_space<vmem>>, vector<14x64xf32>,
    %cst_107 = arith.constant 0.000000e+00 : f32
    %137 = vector.broadcast %cst_107 : f32 to vector<112x128xf32>
    %c0_108 = arith.constant 0 : index
    %c0_109 = arith.constant 0 : index
    %138 = vector.load %arg13[%c0_108, %c0_109] : memref<512x64xf32, #tpu.memory_space<vmem>>, vector<112x64xf32>
    %139 = arith.truncf %138 : vector<112x64xf32> to vector<112x64xbf16>
    %c0_110 = arith.constant 0 : index
    %c0_111 = arith.constant 0 : index
    %140 = vector.load %arg8[%c0_110, %c0_111] : memref<576x128xbf16, #tpu.memory_space<vmem>>, vector<64x128xbf16>
    %cst_112 = arith.constant dense<0.000000e+00> : vector<112x128xf32>
    %141 = tpu.matmul %139, %140, %cst_112 {dimension_numbers = #tpu.dot_dimension_numbers<[1], [0], [0], [1], [0, 0, 1, 1], [], []>} : vector<112x64xbf16>, vector<64x128xbf16>, vector<112x128xf32> -> vector<112x128xf32>
    %142 = arith.addf %137, %141 : vector<112x128xf32>
    %c1_113 = arith.constant 1 : index
    %c0_114 = arith.constant 0 : index
    %143 = vector.load %arg13[%c1_113, %c0_114] : memref<512x64xf32, #tpu.memory_space<vmem>>, vector<112x64xf32>
    %144 = arith.truncf %143 : vector<112x64xf32> to vector<112x64xbf16>
    %c64 = arith.constant 64 : index
    %c0_115 = arith.constant 0 : index
    %145 = vector.load %arg8[%c64, %c0_115] : memref<576x128xbf16, #tpu.memory_space<vmem>>, vector<64x128xbf16>
    %cst_116 = arith.constant dense<0.000000e+00> : vector<112x128xf32>
    %146 = tpu.matmul %144, %145, %cst_116 {dimension_numbers = #tpu.dot_dimension_numbers<[1], [0], [0], [1], [0, 0, 1, 1], [], []>} : vector<112x64xbf16>, vector<64x128xbf16>, vector<112x128xf32> -> vector<112x128xf32>
    %147 = arith.addf %142, %146 : vector<112x128xf32>
    %c2 = arith.constant 2 : index
    %c0_117 = arith.constant 0 : index
    %148 = vector.load %arg13[%c2, %c0_117] : memref<512x64xf32, #tpu.memory_space<vmem>>, vector<112x64xf32>
    %149 = arith.truncf %148 : vector<112x64xf32> to vector<112x64xbf16>
    %c128 = arith.constant 128 : index
    %c0_118 = arith.constant 0 : index
    %150 = vector.load %arg8[%c128, %c0_118] : memref<576x128xbf16, #tpu.memory_space<vmem>>, vector<64x128xbf16>
    %cst_119 = arith.constant dense<0.000000e+00> : vector<112x128xf32>
    %151 = tpu.matmul %149, %150, %cst_119 {dimension_numbers = #tpu.dot_dimension_numbers<[1], [0], [0], [1], [0, 0, 1, 1], [], []>} : vector<112x64xbf16>, vector<64x128xbf16>, vector<112x128xf32> -> vector<112x128xf32>
    %152 = arith.addf %147, %151 : vector<112x128xf32>
    %c16 = arith.constant 16 : index
    %c0_120 = arith.constant 0 : index
    %153 = vector.load %arg13[%c16, %c0_120] : memref<512x64xf32, #tpu.memory_space<vmem>>, vector<112x64xf32>
    %154 = arith.truncf %153 : vector<112x64xf32> to vector<112x64xbf16>
    %c192 = arith.constant 192 : index
    %c0_121 = arith.constant 0 : index
    %155 = vector.load %arg8[%c192, %c0_121] : memref<576x128xbf16, #tpu.memory_space<vmem>>, vector<64x128xbf16>
    %cst_122 = arith.constant dense<0.000000e+00> : vector<112x128xf32>
    %156 = tpu.matmul %154, %155, %cst_122 {dimension_numbers = #tpu.dot_dimension_numbers<[1], [0], [0], [1], [0, 0, 1, 1], [], []>} : vector<112x64xbf16>, vector<64x128xbf16>, vector<112x128xf32> -> vector<112x128xf32>
    %157 = arith.addf %152, %156 : vector<112x128xf32>
    %c17_123 = arith.constant 17 : index
    %c0_124 = arith.constant 0 : index
    %158 = vector.load %arg13[%c17_123, %c0_124] : memref<512x64xf32, #tpu.memory_space<vmem>>, vector<112x64xf32>
    %159 = arith.truncf %158 : vector<112x64xf32> to vector<112x64xbf16>
    %c256 = arith.constant 256 : index
    %c0_125 = arith.constant 0 : index
    %160 = vector.load %arg8[%c256, %c0_125] : memref<576x128xbf16, #tpu.memory_space<vmem>>, vector<64x128xbf16>
    %cst_126 = arith.constant dense<0.000000e+00> : vector<112x128xf32>
    %161 = tpu.matmul %159, %160, %cst_126 {dimension_numbers = #tpu.dot_dimension_numbers<[1], [0], [0], [1], [0, 0, 1, 1], [], []>} : vector<112x64xbf16>, vector<64x128xbf16>, vector<112x128xf32> -> vector<112x128xf32>
    %162 = arith.addf %157, %161 : vector<112x128xf32>
    %c18 = arith.constant 18 : index
    %c0_127 = arith.constant 0 : index
    %163 = vector.load %arg13[%c18, %c0_127] : memref<512x64xf32, #tpu.memory_space<vmem>>, vector<112x64xf32>
    %164 = arith.truncf %163 : vector<112x64xf32> to vector<112x64xbf16>
    %c320 = arith.constant 320 : index
    %c0_128 = arith.constant 0 : index
    %165 = vector.load %arg8[%c320, %c0_128] : memref<576x128xbf16, #tpu.memory_space<vmem>>, vector<64x128xbf16>
    %cst_129 = arith.constant dense<0.000000e+00> : vector<112x128xf32>
    %166 = tpu.matmul %164, %165, %cst_129 {dimension_numbers = #tpu.dot_dimension_numbers<[1], [0], [0], [1], [0, 0, 1, 1], [], []>} : vector<112x64xbf16>, vector<64x128xbf16>, vector<112x128xf32> -> vector<112x128xf32>
    %167 = arith.addf %162, %166 : vector<112x128xf32>
    %c32 = arith.constant 32 : index
    %c0_130 = arith.constant 0 : index
    %168 = vector.load %arg13[%c32, %c0_130] : memref<512x64xf32, #tpu.memory_space<vmem>>, vector<112x64xf32>
    %169 = arith.truncf %168 : vector<112x64xf32> to vector<112x64xbf16>
    %c384 = arith.constant 384 : index
    %c0_131 = arith.constant 0 : index
    %170 = vector.load %arg8[%c384, %c0_131] : memref<576x128xbf16, #tpu.memory_space<vmem>>, vector<64x128xbf16>
    %cst_132 = arith.constant dense<0.000000e+00> : vector<112x128xf32>
    %171 = tpu.matmul %169, %170, %cst_132 {dimension_numbers = #tpu.dot_dimension_numbers<[1], [0], [0], [1], [0, 0, 1, 1], [], []>} : vector<112x64xbf16>, vector<64x128xbf16>, vector<112x128xf32> -> vector<112x128xf32>
    %172 = arith.addf %167, %171 : vector<112x128xf32>
    %c33_133 = arith.constant 33 : index
    %c0_134 = arith.constant 0 : index
    %173 = vector.load %arg13[%c33_133, %c0_134] : memref<512x64xf32, #tpu.memory_space<vmem>>, vector<112x64xf32>
    %174 = arith.truncf %173 : vector<112x64xf32> to vector<112x64xbf16>
    %c448_135 = arith.constant 448 : index
    %c0_136 = arith.constant 0 : index
    %175 = vector.load %arg8[%c448_135, %c0_136] : memref<576x128xbf16, #tpu.memory_space<vmem>>, vector<64x128xbf16>
    %cst_137 = arith.constant dense<0.000000e+00> : vector<112x128xf32>
    %176 = tpu.matmul %174, %175, %cst_137 {dimension_numbers = #tpu.dot_dimension_numbers<[1], [0], [0], [1], [0, 0, 1, 1], [], []>} : vector<112x64xbf16>, vector<64x128xbf16>, vector<112x128xf32> -> vector<112x128xf32>
    %177 = arith.addf %172, %176 : vector<112x128xf32>
    %c34 = arith.constant 34 : index
    %c0_138 = arith.constant 0 : index
    %178 = vector.load %arg13[%c34, %c0_138] : memref<512x64xf32, #tpu.memory_space<vmem>>, vector<112x64xf32>
    %179 = arith.truncf %178 : vector<112x64xf32> to vector<112x64xbf16>
    %c512 = arith.constant 512 : index
    %c0_139 = arith.constant 0 : index
    %180 = vector.load %arg8[%c512, %c0_139] : memref<576x128xbf16, #tpu.memory_space<vmem>>, vector<64x128xbf16>
    %cst_140 = arith.constant dense<0.000000e+00> : vector<112x128xf32>
    %181 = tpu.matmul %179, %180, %cst_140 {dimension_numbers = #tpu.dot_dimension_numbers<[1], [0], [0], [1], [0, 0, 1, 1], [], []>} : vector<112x64xbf16>, vector<64x128xbf16>, vector<112x128xf32> -> vector<112x128xf32>
    %182 = arith.addf %177, %181 : vector<112x128xf32>
    %c0_141 = arith.constant 0 : index
    %c0_142 = arith.constant 0 : index
    %183 = vector.load %arg14[%c0_141, %c0_142] : memref<448x128xf32, #tpu.memory_space<vmem>>, vector<112x128xf32>
    tpu.vector_store %arg14[%c0_141, %c0_142], %182 {strides = array<i32>} : memref<448x128xf32, #tpu.memory_space<vmem>>, vector<112x128xf32>,
    %cst_143 = arith.constant 0.000000e+00 : f32
    %184 = vector.broadcast %cst_143 : f32 to vector<110x128xf32>
    %c112_144 = arith.constant 112 : index
    %c0_145 = arith.constant 0 : index
    %185 = vector.load %arg13[%c112_144, %c0_145] : memref<512x64xf32, #tpu.memory_space<vmem>>, vector<110x64xf32>
    %186 = arith.truncf %185 : vector<110x64xf32> to vector<110x64xbf16>
    %c0_146 = arith.constant 0 : index
    %c0_147 = arith.constant 0 : index
    %187 = vector.load %arg8[%c0_146, %c0_147] : memref<576x128xbf16, #tpu.memory_space<vmem>>, vector<64x128xbf16>
    %cst_148 = arith.constant dense<0.000000e+00> : vector<110x128xf32>
    %188 = tpu.matmul %186, %187, %cst_148 {dimension_numbers = #tpu.dot_dimension_numbers<[1], [0], [0], [1], [0, 0, 1, 1], [], []>} : vector<110x64xbf16>, vector<64x128xbf16>, vector<110x128xf32> -> vector<110x128xf32>
    %189 = arith.addf %184, %188 : vector<110x128xf32>
    %c113_149 = arith.constant 113 : index
    %c0_150 = arith.constant 0 : index
    %190 = vector.load %arg13[%c113_149, %c0_150] : memref<512x64xf32, #tpu.memory_space<vmem>>, vector<110x64xf32>
    %191 = arith.truncf %190 : vector<110x64xf32> to vector<110x64xbf16>
    %c64_151 = arith.constant 64 : index
    %c0_152 = arith.constant 0 : index
    %192 = vector.load %arg8[%c64_151, %c0_152] : memref<576x128xbf16, #tpu.memory_space<vmem>>, vector<64x128xbf16>
    %cst_153 = arith.constant dense<0.000000e+00> : vector<110x128xf32>
    %193 = tpu.matmul %191, %192, %cst_153 {dimension_numbers = #tpu.dot_dimension_numbers<[1], [0], [0], [1], [0, 0, 1, 1], [], []>} : vector<110x64xbf16>, vector<64x128xbf16>, vector<110x128xf32> -> vector<110x128xf32>
    %194 = arith.addf %189, %193 : vector<110x128xf32>
    %c114 = arith.constant 114 : index
    %c0_154 = arith.constant 0 : index
    %195 = vector.load %arg13[%c114, %c0_154] : memref<512x64xf32, #tpu.memory_space<vmem>>, vector<110x64xf32>
    %196 = arith.truncf %195 : vector<110x64xf32> to vector<110x64xbf16>
    %c128_155 = arith.constant 128 : index
    %c0_156 = arith.constant 0 : index
    %197 = vector.load %arg8[%c128_155, %c0_156] : memref<576x128xbf16, #tpu.memory_space<vmem>>, vector<64x128xbf16>
    %cst_157 = arith.constant dense<0.000000e+00> : vector<110x128xf32>
    %198 = tpu.matmul %196, %197, %cst_157 {dimension_numbers = #tpu.dot_dimension_numbers<[1], [0], [0], [1], [0, 0, 1, 1], [], []>} : vector<110x64xbf16>, vector<64x128xbf16>, vector<110x128xf32> -> vector<110x128xf32>
    %199 = arith.addf %194, %198 : vector<110x128xf32>
    %c128_158 = arith.constant 128 : index
    %c0_159 = arith.constant 0 : index
    %200 = vector.load %arg13[%c128_158, %c0_159] : memref<512x64xf32, #tpu.memory_space<vmem>>, vector<110x64xf32>
    %201 = arith.truncf %200 : vector<110x64xf32> to vector<110x64xbf16>
    %c192_160 = arith.constant 192 : index
    %c0_161 = arith.constant 0 : index
    %202 = vector.load %arg8[%c192_160, %c0_161] : memref<576x128xbf16, #tpu.memory_space<vmem>>, vector<64x128xbf16>
    %cst_162 = arith.constant dense<0.000000e+00> : vector<110x128xf32>
    %203 = tpu.matmul %201, %202, %cst_162 {dimension_numbers = #tpu.dot_dimension_numbers<[1], [0], [0], [1], [0, 0, 1, 1], [], []>} : vector<110x64xbf16>, vector<64x128xbf16>, vector<110x128xf32> -> vector<110x128xf32>
    %204 = arith.addf %199, %203 : vector<110x128xf32>
    %c129_163 = arith.constant 129 : index
    %c0_164 = arith.constant 0 : index
    %205 = vector.load %arg13[%c129_163, %c0_164] : memref<512x64xf32, #tpu.memory_space<vmem>>, vector<110x64xf32>
    %206 = arith.truncf %205 : vector<110x64xf32> to vector<110x64xbf16>
    %c256_165 = arith.constant 256 : index
    %c0_166 = arith.constant 0 : index
    %207 = vector.load %arg8[%c256_165, %c0_166] : memref<576x128xbf16, #tpu.memory_space<vmem>>, vector<64x128xbf16>
    %cst_167 = arith.constant dense<0.000000e+00> : vector<110x128xf32>
    %208 = tpu.matmul %206, %207, %cst_167 {dimension_numbers = #tpu.dot_dimension_numbers<[1], [0], [0], [1], [0, 0, 1, 1], [], []>} : vector<110x64xbf16>, vector<64x128xbf16>, vector<110x128xf32> -> vector<110x128xf32>
    %209 = arith.addf %204, %208 : vector<110x128xf32>
    %c130 = arith.constant 130 : index
    %c0_168 = arith.constant 0 : index
    %210 = vector.load %arg13[%c130, %c0_168] : memref<512x64xf32, #tpu.memory_space<vmem>>, vector<110x64xf32>
    %211 = arith.truncf %210 : vector<110x64xf32> to vector<110x64xbf16>
    %c320_169 = arith.constant 320 : index
    %c0_170 = arith.constant 0 : index
    %212 = vector.load %arg8[%c320_169, %c0_170] : memref<576x128xbf16, #tpu.memory_space<vmem>>, vector<64x128xbf16>
    %cst_171 = arith.constant dense<0.000000e+00> : vector<110x128xf32>
    %213 = tpu.matmul %211, %212, %cst_171 {dimension_numbers = #tpu.dot_dimension_numbers<[1], [0], [0], [1], [0, 0, 1, 1], [], []>} : vector<110x64xbf16>, vector<64x128xbf16>, vector<110x128xf32> -> vector<110x128xf32>
    %214 = arith.addf %209, %213 : vector<110x128xf32>
    %c144 = arith.constant 144 : index
    %c0_172 = arith.constant 0 : index
    %215 = vector.load %arg13[%c144, %c0_172] : memref<512x64xf32, #tpu.memory_space<vmem>>, vector<110x64xf32>
    %216 = arith.truncf %215 : vector<110x64xf32> to vector<110x64xbf16>
    %c384_173 = arith.constant 384 : index
    %c0_174 = arith.constant 0 : index
    %217 = vector.load %arg8[%c384_173, %c0_174] : memref<576x128xbf16, #tpu.memory_space<vmem>>, vector<64x128xbf16>
    %cst_175 = arith.constant dense<0.000000e+00> : vector<110x128xf32>
    %218 = tpu.matmul %216, %217, %cst_175 {dimension_numbers = #tpu.dot_dimension_numbers<[1], [0], [0], [1], [0, 0, 1, 1], [], []>} : vector<110x64xbf16>, vector<64x128xbf16>, vector<110x128xf32> -> vector<110x128xf32>
    %219 = arith.addf %214, %218 : vector<110x128xf32>
    %c145_176 = arith.constant 145 : index
    %c0_177 = arith.constant 0 : index
    %220 = vector.load %arg13[%c145_176, %c0_177] : memref<512x64xf32, #tpu.memory_space<vmem>>, vector<110x64xf32>
    %221 = arith.truncf %220 : vector<110x64xf32> to vector<110x64xbf16>
    %c448_178 = arith.constant 448 : index
    %c0_179 = arith.constant 0 : index
    %222 = vector.load %arg8[%c448_178, %c0_179] : memref<576x128xbf16, #tpu.memory_space<vmem>>, vector<64x128xbf16>
    %cst_180 = arith.constant dense<0.000000e+00> : vector<110x128xf32>
    %223 = tpu.matmul %221, %222, %cst_180 {dimension_numbers = #tpu.dot_dimension_numbers<[1], [0], [0], [1], [0, 0, 1, 1], [], []>} : vector<110x64xbf16>, vector<64x128xbf16>, vector<110x128xf32> -> vector<110x128xf32>
    %224 = arith.addf %219, %223 : vector<110x128xf32>
    %c146 = arith.constant 146 : index
    %c0_181 = arith.constant 0 : index
    %225 = vector.load %arg13[%c146, %c0_181] : memref<512x64xf32, #tpu.memory_space<vmem>>, vector<110x64xf32>
    %226 = arith.truncf %225 : vector<110x64xf32> to vector<110x64xbf16>
    %c512_182 = arith.constant 512 : index
    %c0_183 = arith.constant 0 : index
    %227 = vector.load %arg8[%c512_182, %c0_183] : memref<576x128xbf16, #tpu.memory_space<vmem>>, vector<64x128xbf16>
    %cst_184 = arith.constant dense<0.000000e+00> : vector<110x128xf32>
    %228 = tpu.matmul %226, %227, %cst_184 {dimension_numbers = #tpu.dot_dimension_numbers<[1], [0], [0], [1], [0, 0, 1, 1], [], []>} : vector<110x64xbf16>, vector<64x128xbf16>, vector<110x128xf32> -> vector<110x128xf32>
    %229 = arith.addf %224, %228 : vector<110x128xf32>
    %c112_185 = arith.constant 112 : index
    %c0_186 = arith.constant 0 : index
    %230 = vector.load %arg14[%c112_185, %c0_186] : memref<448x128xf32, #tpu.memory_space<vmem>>, vector<110x128xf32>
    tpu.vector_store %arg14[%c112_185, %c0_186], %229 {strides = array<i32>} : memref<448x128xf32, #tpu.memory_space<vmem>>, vector<110x128xf32>,
    %c0_187 = arith.constant 0 : index
    %c0_188 = arith.constant 0 : index
    %231 = vector.load %arg14[%c0_187, %c0_188] : memref<448x128xf32, #tpu.memory_space<vmem>>, vector<14x128xf32>
    %c16_189 = arith.constant 16 : index
    %c0_190 = arith.constant 0 : index
    %232 = vector.load %arg14[%c16_189, %c0_190] : memref<448x128xf32, #tpu.memory_space<vmem>>, vector<14x128xf32>
    %233 = arith.maximumf %231, %232 : vector<14x128xf32>
    %c0_191 = arith.constant 0 : index
    %c0_192 = arith.constant 0 : index
    %234 = vector.load %arg15[%c0_191, %c0_192] : memref<224x128xf32, #tpu.memory_space<vmem>>, vector<14x128xf32>
    tpu.vector_store %arg15[%c0_191, %c0_192], %233 {strides = array<i32>} : memref<224x128xf32, #tpu.memory_space<vmem>>, vector<14x128xf32>,
    %c32_193 = arith.constant 32 : index
    %c0_194 = arith.constant 0 : index
    %235 = vector.load %arg14[%c32_193, %c0_194] : memref<448x128xf32, #tpu.memory_space<vmem>>, vector<14x128xf32>
    %c48 = arith.constant 48 : index
    %c0_195 = arith.constant 0 : index
    %236 = vector.load %arg14[%c48, %c0_195] : memref<448x128xf32, #tpu.memory_space<vmem>>, vector<14x128xf32>
    %237 = arith.maximumf %235, %236 : vector<14x128xf32>
    %c14 = arith.constant 14 : index
    %c0_196 = arith.constant 0 : index
    %238 = vector.load %arg15[%c14, %c0_196] : memref<224x128xf32, #tpu.memory_space<vmem>>, vector<14x128xf32>
    tpu.vector_store %arg15[%c14, %c0_196], %237 {strides = array<i32>} : memref<224x128xf32, #tpu.memory_space<vmem>>, vector<14x128xf32>,
    %c64_197 = arith.constant 64 : index
    %c0_198 = arith.constant 0 : index
    %239 = vector.load %arg14[%c64_197, %c0_198] : memref<448x128xf32, #tpu.memory_space<vmem>>, vector<14x128xf32>
    %c80 = arith.constant 80 : index
    %c0_199 = arith.constant 0 : index
    %240 = vector.load %arg14[%c80, %c0_199] : memref<448x128xf32, #tpu.memory_space<vmem>>, vector<14x128xf32>
    %241 = arith.maximumf %239, %240 : vector<14x128xf32>
    %c28_200 = arith.constant 28 : index
    %c0_201 = arith.constant 0 : index
    %242 = vector.load %arg15[%c28_200, %c0_201] : memref<224x128xf32, #tpu.memory_space<vmem>>, vector<14x128xf32>
    tpu.vector_store %arg15[%c28_200, %c0_201], %241 {strides = array<i32>} : memref<224x128xf32, #tpu.memory_space<vmem>>, vector<14x128xf32>,
    %c96 = arith.constant 96 : index
    %c0_202 = arith.constant 0 : index
    %243 = vector.load %arg14[%c96, %c0_202] : memref<448x128xf32, #tpu.memory_space<vmem>>, vector<14x128xf32>
    %c112_203 = arith.constant 112 : index
    %c0_204 = arith.constant 0 : index
    %244 = vector.load %arg14[%c112_203, %c0_204] : memref<448x128xf32, #tpu.memory_space<vmem>>, vector<14x128xf32>
    %245 = arith.maximumf %243, %244 : vector<14x128xf32>
    %c42 = arith.constant 42 : index
    %c0_205 = arith.constant 0 : index
    %246 = vector.load %arg15[%c42, %c0_205] : memref<224x128xf32, #tpu.memory_space<vmem>>, vector<14x128xf32>
    tpu.vector_store %arg15[%c42, %c0_205], %245 {strides = array<i32>} : memref<224x128xf32, #tpu.memory_space<vmem>>, vector<14x128xf32>,
    %c128_206 = arith.constant 128 : index
    %c0_207 = arith.constant 0 : index
    %247 = vector.load %arg14[%c128_206, %c0_207] : memref<448x128xf32, #tpu.memory_space<vmem>>, vector<14x128xf32>
    %c144_208 = arith.constant 144 : index
    %c0_209 = arith.constant 0 : index
    %248 = vector.load %arg14[%c144_208, %c0_209] : memref<448x128xf32, #tpu.memory_space<vmem>>, vector<14x128xf32>
    %249 = arith.maximumf %247, %248 : vector<14x128xf32>
    %c56_210 = arith.constant 56 : index
    %c0_211 = arith.constant 0 : index
    %250 = vector.load %arg15[%c56_210, %c0_211] : memref<224x128xf32, #tpu.memory_space<vmem>>, vector<14x128xf32>
    tpu.vector_store %arg15[%c56_210, %c0_211], %249 {strides = array<i32>} : memref<224x128xf32, #tpu.memory_space<vmem>>, vector<14x128xf32>,
    %c160 = arith.constant 160 : index
    %c0_212 = arith.constant 0 : index
    %251 = vector.load %arg14[%c160, %c0_212] : memref<448x128xf32, #tpu.memory_space<vmem>>, vector<14x128xf32>
    %c176 = arith.constant 176 : index
    %c0_213 = arith.constant 0 : index
    %252 = vector.load %arg14[%c176, %c0_213] : memref<448x128xf32, #tpu.memory_space<vmem>>, vector<14x128xf32>
    %253 = arith.maximumf %251, %252 : vector<14x128xf32>
    %c70 = arith.constant 70 : index
    %c0_214 = arith.constant 0 : index
    %254 = vector.load %arg15[%c70, %c0_214] : memref<224x128xf32, #tpu.memory_space<vmem>>, vector<14x128xf32>
    tpu.vector_store %arg15[%c70, %c0_214], %253 {strides = array<i32>} : memref<224x128xf32, #tpu.memory_space<vmem>>, vector<14x128xf32>,
    %c192_215 = arith.constant 192 : index
    %c0_216 = arith.constant 0 : index
    %255 = vector.load %arg14[%c192_215, %c0_216] : memref<448x128xf32, #tpu.memory_space<vmem>>, vector<14x128xf32>
    %c208 = arith.constant 208 : index
    %c0_217 = arith.constant 0 : index
    %256 = vector.load %arg14[%c208, %c0_217] : memref<448x128xf32, #tpu.memory_space<vmem>>, vector<14x128xf32>
    %257 = arith.maximumf %255, %256 : vector<14x128xf32>
    %c84_218 = arith.constant 84 : index
    %c0_219 = arith.constant 0 : index
    %258 = vector.load %arg15[%c84_218, %c0_219] : memref<224x128xf32, #tpu.memory_space<vmem>>, vector<14x128xf32>
    tpu.vector_store %arg15[%c84_218, %c0_219], %257 {strides = array<i32>} : memref<224x128xf32, #tpu.memory_space<vmem>>, vector<14x128xf32>,
    %c0_220 = arith.constant 0 : index
    %c0_221 = arith.constant 0 : index
    %259 = tpu.strided_load %arg15[%c0_220, %c0_221] {strides = array<i32: 2, 1>} : memref<224x128xf32, #tpu.memory_space<vmem>>, vector<49x128xf32>
    %c1_222 = arith.constant 1 : index
    %c0_223 = arith.constant 0 : index
    %260 = tpu.strided_load %arg15[%c1_222, %c0_223] {strides = array<i32: 2, 1>} : memref<224x128xf32, #tpu.memory_space<vmem>>, vector<49x128xf32>
    %261 = arith.maximumf %259, %260 : vector<49x128xf32>
    %262 = vector.broadcast %1 : vector<1x128xf32> to vector<49x128xf32>
    %263 = arith.addf %261, %262 : vector<49x128xf32>
    %cst_224 = arith.constant 0.000000e+00 : f32
    %264 = vector.broadcast %cst_224 : f32 to vector<49x128xf32>
    %265 = arith.maximumf %263, %264 : vector<49x128xf32>
    %c0_225 = arith.constant 0 : index
    %c0_226 = arith.constant 0 : index
    %c0_227 = arith.constant 0 : index
    %266 = vector.load %arg10[%c0_225, %c0_226, %c0_227] : memref<2x49x128xf32, #tpu.memory_space<vmem>>, vector<1x49x128xf32>
    %267 = vector.shape_cast %266 : vector<1x49x128xf32> to vector<49x128xf32>
    %268 = vector.shape_cast %265 : vector<49x128xf32> to vector<1x49x128xf32>
    tpu.vector_store %arg10[%c0_225, %c0_226, %c0_227], %268 {strides = array<i32>} : memref<2x49x128xf32, #tpu.memory_space<vmem>>, vector<1x49x128xf32>,
    %c784 = arith.constant 784 : index
    %c0_228 = arith.constant 0 : index
    %269 = vector.load %arg11[%c784, %c0_228] : memref<1568x64xf32, #tpu.memory_space<vmem>>, vector<28x64xf32>
    %c812 = arith.constant 812 : index
    %c0_229 = arith.constant 0 : index
    %270 = vector.load %arg11[%c812, %c0_229] : memref<1568x64xf32, #tpu.memory_space<vmem>>, vector<28x64xf32>
    %271 = arith.maximumf %269, %270 : vector<28x64xf32>
    %c392_230 = arith.constant 392 : index
    %c0_231 = arith.constant 0 : index
    %272 = vector.load %arg12[%c392_230, %c0_231] : memref<784x64xf32, #tpu.memory_space<vmem>>, vector<28x64xf32>
    tpu.vector_store %arg12[%c392_230, %c0_231], %271 {strides = array<i32>} : memref<784x64xf32, #tpu.memory_space<vmem>>, vector<28x64xf32>,
    %c840 = arith.constant 840 : index
    %c0_232 = arith.constant 0 : index
    %273 = vector.load %arg11[%c840, %c0_232] : memref<1568x64xf32, #tpu.memory_space<vmem>>, vector<28x64xf32>
    %c868 = arith.constant 868 : index
    %c0_233 = arith.constant 0 : index
    %274 = vector.load %arg11[%c868, %c0_233] : memref<1568x64xf32, #tpu.memory_space<vmem>>, vector<28x64xf32>
    %275 = arith.maximumf %273, %274 : vector<28x64xf32>
    %c420_234 = arith.constant 420 : index
    %c0_235 = arith.constant 0 : index
    %276 = vector.load %arg12[%c420_234, %c0_235] : memref<784x64xf32, #tpu.memory_space<vmem>>, vector<28x64xf32>
    tpu.vector_store %arg12[%c420_234, %c0_235], %275 {strides = array<i32>} : memref<784x64xf32, #tpu.memory_space<vmem>>, vector<28x64xf32>,
    %c896 = arith.constant 896 : index
    %c0_236 = arith.constant 0 : index
    %277 = vector.load %arg11[%c896, %c0_236] : memref<1568x64xf32, #tpu.memory_space<vmem>>, vector<28x64xf32>
    %c924 = arith.constant 924 : index
    %c0_237 = arith.constant 0 : index
    %278 = vector.load %arg11[%c924, %c0_237] : memref<1568x64xf32, #tpu.memory_space<vmem>>, vector<28x64xf32>
    %279 = arith.maximumf %277, %278 : vector<28x64xf32>
    %c448_238 = arith.constant 448 : index
    %c0_239 = arith.constant 0 : index
    %280 = vector.load %arg12[%c448_238, %c0_239] : memref<784x64xf32, #tpu.memory_space<vmem>>, vector<28x64xf32>
    tpu.vector_store %arg12[%c448_238, %c0_239], %279 {strides = array<i32>} : memref<784x64xf32, #tpu.memory_space<vmem>>, vector<28x64xf32>,
    %c952 = arith.constant 952 : index
    %c0_240 = arith.constant 0 : index
    %281 = vector.load %arg11[%c952, %c0_240] : memref<1568x64xf32, #tpu.memory_space<vmem>>, vector<28x64xf32>
    %c980 = arith.constant 980 : index
    %c0_241 = arith.constant 0 : index
    %282 = vector.load %arg11[%c980, %c0_241] : memref<1568x64xf32, #tpu.memory_space<vmem>>, vector<28x64xf32>
    %283 = arith.maximumf %281, %282 : vector<28x64xf32>
    %c476_242 = arith.constant 476 : index
    %c0_243 = arith.constant 0 : index
    %284 = vector.load %arg12[%c476_242, %c0_243] : memref<784x64xf32, #tpu.memory_space<vmem>>, vector<28x64xf32>
    tpu.vector_store %arg12[%c476_242, %c0_243], %283 {strides = array<i32>} : memref<784x64xf32, #tpu.memory_space<vmem>>, vector<28x64xf32>,
    %c1008 = arith.constant 1008 : index
    %c0_244 = arith.constant 0 : index
    %285 = vector.load %arg11[%c1008, %c0_244] : memref<1568x64xf32, #tpu.memory_space<vmem>>, vector<28x64xf32>
    %c1036 = arith.constant 1036 : index
    %c0_245 = arith.constant 0 : index
    %286 = vector.load %arg11[%c1036, %c0_245] : memref<1568x64xf32, #tpu.memory_space<vmem>>, vector<28x64xf32>
    %287 = arith.maximumf %285, %286 : vector<28x64xf32>
    %c504_246 = arith.constant 504 : index
    %c0_247 = arith.constant 0 : index
    %288 = vector.load %arg12[%c504_246, %c0_247] : memref<784x64xf32, #tpu.memory_space<vmem>>, vector<28x64xf32>
    tpu.vector_store %arg12[%c504_246, %c0_247], %287 {strides = array<i32>} : memref<784x64xf32, #tpu.memory_space<vmem>>, vector<28x64xf32>,
    %c1064 = arith.constant 1064 : index
    %c0_248 = arith.constant 0 : index
    %289 = vector.load %arg11[%c1064, %c0_248] : memref<1568x64xf32, #tpu.memory_space<vmem>>, vector<28x64xf32>
    %c1092 = arith.constant 1092 : index
    %c0_249 = arith.constant 0 : index
    %290 = vector.load %arg11[%c1092, %c0_249] : memref<1568x64xf32, #tpu.memory_space<vmem>>, vector<28x64xf32>
    %291 = arith.maximumf %289, %290 : vector<28x64xf32>
    %c532_250 = arith.constant 532 : index
    %c0_251 = arith.constant 0 : index
    %292 = vector.load %arg12[%c532_250, %c0_251] : memref<784x64xf32, #tpu.memory_space<vmem>>, vector<28x64xf32>
    tpu.vector_store %arg12[%c532_250, %c0_251], %291 {strides = array<i32>} : memref<784x64xf32, #tpu.memory_space<vmem>>, vector<28x64xf32>,
    %c1120 = arith.constant 1120 : index
    %c0_252 = arith.constant 0 : index
    %293 = vector.load %arg11[%c1120, %c0_252] : memref<1568x64xf32, #tpu.memory_space<vmem>>, vector<28x64xf32>
    %c1148 = arith.constant 1148 : index
    %c0_253 = arith.constant 0 : index
    %294 = vector.load %arg11[%c1148, %c0_253] : memref<1568x64xf32, #tpu.memory_space<vmem>>, vector<28x64xf32>
    %295 = arith.maximumf %293, %294 : vector<28x64xf32>
    %c560_254 = arith.constant 560 : index
    %c0_255 = arith.constant 0 : index
    %296 = vector.load %arg12[%c560_254, %c0_255] : memref<784x64xf32, #tpu.memory_space<vmem>>, vector<28x64xf32>
    tpu.vector_store %arg12[%c560_254, %c0_255], %295 {strides = array<i32>} : memref<784x64xf32, #tpu.memory_space<vmem>>, vector<28x64xf32>,
    %c1176 = arith.constant 1176 : index
    %c0_256 = arith.constant 0 : index
    %297 = vector.load %arg11[%c1176, %c0_256] : memref<1568x64xf32, #tpu.memory_space<vmem>>, vector<28x64xf32>
    %c1204 = arith.constant 1204 : index
    %c0_257 = arith.constant 0 : index
    %298 = vector.load %arg11[%c1204, %c0_257] : memref<1568x64xf32, #tpu.memory_space<vmem>>, vector<28x64xf32>
    %299 = arith.maximumf %297, %298 : vector<28x64xf32>
    %c588_258 = arith.constant 588 : index
    %c0_259 = arith.constant 0 : index
    %300 = vector.load %arg12[%c588_258, %c0_259] : memref<784x64xf32, #tpu.memory_space<vmem>>, vector<28x64xf32>
    tpu.vector_store %arg12[%c588_258, %c0_259], %299 {strides = array<i32>} : memref<784x64xf32, #tpu.memory_space<vmem>>, vector<28x64xf32>,
    %c1232 = arith.constant 1232 : index
    %c0_260 = arith.constant 0 : index
    %301 = vector.load %arg11[%c1232, %c0_260] : memref<1568x64xf32, #tpu.memory_space<vmem>>, vector<28x64xf32>
    %c1260 = arith.constant 1260 : index
    %c0_261 = arith.constant 0 : index
    %302 = vector.load %arg11[%c1260, %c0_261] : memref<1568x64xf32, #tpu.memory_space<vmem>>, vector<28x64xf32>
    %303 = arith.maximumf %301, %302 : vector<28x64xf32>
    %c616_262 = arith.constant 616 : index
    %c0_263 = arith.constant 0 : index
    %304 = vector.load %arg12[%c616_262, %c0_263] : memref<784x64xf32, #tpu.memory_space<vmem>>, vector<28x64xf32>
    tpu.vector_store %arg12[%c616_262, %c0_263], %303 {strides = array<i32>} : memref<784x64xf32, #tpu.memory_space<vmem>>, vector<28x64xf32>,
    %c1288 = arith.constant 1288 : index
    %c0_264 = arith.constant 0 : index
    %305 = vector.load %arg11[%c1288, %c0_264] : memref<1568x64xf32, #tpu.memory_space<vmem>>, vector<28x64xf32>
    %c1316 = arith.constant 1316 : index
    %c0_265 = arith.constant 0 : index
    %306 = vector.load %arg11[%c1316, %c0_265] : memref<1568x64xf32, #tpu.memory_space<vmem>>, vector<28x64xf32>
    %307 = arith.maximumf %305, %306 : vector<28x64xf32>
    %c644_266 = arith.constant 644 : index
    %c0_267 = arith.constant 0 : index
    %308 = vector.load %arg12[%c644_266, %c0_267] : memref<784x64xf32, #tpu.memory_space<vmem>>, vector<28x64xf32>
    tpu.vector_store %arg12[%c644_266, %c0_267], %307 {strides = array<i32>} : memref<784x64xf32, #tpu.memory_space<vmem>>, vector<28x64xf32>,
    %c1344 = arith.constant 1344 : index
    %c0_268 = arith.constant 0 : index
    %309 = vector.load %arg11[%c1344, %c0_268] : memref<1568x64xf32, #tpu.memory_space<vmem>>, vector<28x64xf32>
    %c1372 = arith.constant 1372 : index
    %c0_269 = arith.constant 0 : index
    %310 = vector.load %arg11[%c1372, %c0_269] : memref<1568x64xf32, #tpu.memory_space<vmem>>, vector<28x64xf32>
    %311 = arith.maximumf %309, %310 : vector<28x64xf32>
    %c672_270 = arith.constant 672 : index
    %c0_271 = arith.constant 0 : index
    %312 = vector.load %arg12[%c672_270, %c0_271] : memref<784x64xf32, #tpu.memory_space<vmem>>, vector<28x64xf32>
    tpu.vector_store %arg12[%c672_270, %c0_271], %311 {strides = array<i32>} : memref<784x64xf32, #tpu.memory_space<vmem>>, vector<28x64xf32>,
    %c1400 = arith.constant 1400 : index
    %c0_272 = arith.constant 0 : index
    %313 = vector.load %arg11[%c1400, %c0_272] : memref<1568x64xf32, #tpu.memory_space<vmem>>, vector<28x64xf32>
    %c1428 = arith.constant 1428 : index
    %c0_273 = arith.constant 0 : index
    %314 = vector.load %arg11[%c1428, %c0_273] : memref<1568x64xf32, #tpu.memory_space<vmem>>, vector<28x64xf32>
    %315 = arith.maximumf %313, %314 : vector<28x64xf32>
    %c700_274 = arith.constant 700 : index
    %c0_275 = arith.constant 0 : index
    %316 = vector.load %arg12[%c700_274, %c0_275] : memref<784x64xf32, #tpu.memory_space<vmem>>, vector<28x64xf32>
    tpu.vector_store %arg12[%c700_274, %c0_275], %315 {strides = array<i32>} : memref<784x64xf32, #tpu.memory_space<vmem>>, vector<28x64xf32>,
    %c1456 = arith.constant 1456 : index
    %c0_276 = arith.constant 0 : index
    %317 = vector.load %arg11[%c1456, %c0_276] : memref<1568x64xf32, #tpu.memory_space<vmem>>, vector<28x64xf32>
    %c1484 = arith.constant 1484 : index
    %c0_277 = arith.constant 0 : index
    %318 = vector.load %arg11[%c1484, %c0_277] : memref<1568x64xf32, #tpu.memory_space<vmem>>, vector<28x64xf32>
    %319 = arith.maximumf %317, %318 : vector<28x64xf32>
    %c728_278 = arith.constant 728 : index
    %c0_279 = arith.constant 0 : index
    %320 = vector.load %arg12[%c728_278, %c0_279] : memref<784x64xf32, #tpu.memory_space<vmem>>, vector<28x64xf32>
    tpu.vector_store %arg12[%c728_278, %c0_279], %319 {strides = array<i32>} : memref<784x64xf32, #tpu.memory_space<vmem>>, vector<28x64xf32>,
    %c1512 = arith.constant 1512 : index
    %c0_280 = arith.constant 0 : index
    %321 = vector.load %arg11[%c1512, %c0_280] : memref<1568x64xf32, #tpu.memory_space<vmem>>, vector<28x64xf32>
    %c1540 = arith.constant 1540 : index
    %c0_281 = arith.constant 0 : index
    %322 = vector.load %arg11[%c1540, %c0_281] : memref<1568x64xf32, #tpu.memory_space<vmem>>, vector<28x64xf32>
    %323 = arith.maximumf %321, %322 : vector<28x64xf32>
    %c756_282 = arith.constant 756 : index
    %c0_283 = arith.constant 0 : index
    %324 = vector.load %arg12[%c756_282, %c0_283] : memref<784x64xf32, #tpu.memory_space<vmem>>, vector<28x64xf32>
    tpu.vector_store %arg12[%c756_282, %c0_283], %323 {strides = array<i32>} : memref<784x64xf32, #tpu.memory_space<vmem>>, vector<28x64xf32>,
    %c392_284 = arith.constant 392 : index
    %c0_285 = arith.constant 0 : index
    %325 = tpu.strided_load %arg12[%c392_284, %c0_285] {strides = array<i32: 2, 1>} : memref<784x64xf32, #tpu.memory_space<vmem>>, vector<196x64xf32>
    %c393 = arith.constant 393 : index
    %c0_286 = arith.constant 0 : index
    %326 = tpu.strided_load %arg12[%c393, %c0_286] {strides = array<i32: 2, 1>} : memref<784x64xf32, #tpu.memory_space<vmem>>, vector<196x64xf32>
    %327 = arith.maximumf %325, %326 : vector<196x64xf32>
    %328 = vector.extract_strided_slice %40 {offsets = [1, 0], sizes = [1, 64], strides = [1, 1]} : vector<2x64xf32> to vector<1x64xf32>
    %329 = vector.broadcast %0 : vector<1x64xf32> to vector<196x64xf32>
    %330 = arith.addf %327, %329 : vector<196x64xf32>
    %331 = vector.broadcast %328 : vector<1x64xf32> to vector<196x64xf32>
    %332 = arith.mulf %330, %331 : vector<196x64xf32>
    %cst_287 = arith.constant 0.000000e+00 : f32
    %333 = vector.broadcast %cst_287 : f32 to vector<196x64xf32>
    %334 = arith.maximumf %332, %333 : vector<196x64xf32>
    %335 = vector.extract_strided_slice %334 {offsets = [0, 0], sizes = [14, 64], strides = [1, 1]} : vector<196x64xf32> to vector<14x64xf32>
    %c273 = arith.constant 273 : index
    %c0_288 = arith.constant 0 : index
    %336 = vector.load %arg13[%c273, %c0_288] : memref<512x64xf32, #tpu.memory_space<vmem>>, vector<14x64xf32>
    tpu.vector_store %arg13[%c273, %c0_288], %335 {strides = array<i32>} : memref<512x64xf32, #tpu.memory_space<vmem>>, vector<14x64xf32>,
    %337 = vector.extract_strided_slice %334 {offsets = [14, 0], sizes = [14, 64], strides = [1, 1]} : vector<196x64xf32> to vector<14x64xf32>
    %c289 = arith.constant 289 : index
    %c0_289 = arith.constant 0 : index
    %338 = vector.load %arg13[%c289, %c0_289] : memref<512x64xf32, #tpu.memory_space<vmem>>, vector<14x64xf32>
    tpu.vector_store %arg13[%c289, %c0_289], %337 {strides = array<i32>} : memref<512x64xf32, #tpu.memory_space<vmem>>, vector<14x64xf32>,
    %339 = vector.extract_strided_slice %334 {offsets = [28, 0], sizes = [14, 64], strides = [1, 1]} : vector<196x64xf32> to vector<14x64xf32>
    %c305 = arith.constant 305 : index
    %c0_290 = arith.constant 0 : index
    %340 = vector.load %arg13[%c305, %c0_290] : memref<512x64xf32, #tpu.memory_space<vmem>>, vector<14x64xf32>
    tpu.vector_store %arg13[%c305, %c0_290], %339 {strides = array<i32>} : memref<512x64xf32, #tpu.memory_space<vmem>>, vector<14x64xf32>,
    %341 = vector.extract_strided_slice %334 {offsets = [42, 0], sizes = [14, 64], strides = [1, 1]} : vector<196x64xf32> to vector<14x64xf32>
    %c321 = arith.constant 321 : index
    %c0_291 = arith.constant 0 : index
    %342 = vector.load %arg13[%c321, %c0_291] : memref<512x64xf32, #tpu.memory_space<vmem>>, vector<14x64xf32>
    tpu.vector_store %arg13[%c321, %c0_291], %341 {strides = array<i32>} : memref<512x64xf32, #tpu.memory_space<vmem>>, vector<14x64xf32>,
    %343 = vector.extract_strided_slice %334 {offsets = [56, 0], sizes = [14, 64], strides = [1, 1]} : vector<196x64xf32> to vector<14x64xf32>
    %c337 = arith.constant 337 : index
    %c0_292 = arith.constant 0 : index
    %344 = vector.load %arg13[%c337, %c0_292] : memref<512x64xf32, #tpu.memory_space<vmem>>, vector<14x64xf32>
    tpu.vector_store %arg13[%c337, %c0_292], %343 {strides = array<i32>} : memref<512x64xf32, #tpu.memory_space<vmem>>, vector<14x64xf32>,
    %345 = vector.extract_strided_slice %334 {offsets = [70, 0], sizes = [14, 64], strides = [1, 1]} : vector<196x64xf32> to vector<14x64xf32>
    %c353 = arith.constant 353 : index
    %c0_293 = arith.constant 0 : index
    %346 = vector.load %arg13[%c353, %c0_293] : memref<512x64xf32, #tpu.memory_space<vmem>>, vector<14x64xf32>
    tpu.vector_store %arg13[%c353, %c0_293], %345 {strides = array<i32>} : memref<512x64xf32, #tpu.memory_space<vmem>>, vector<14x64xf32>,
    %347 = vector.extract_strided_slice %334 {offsets = [84, 0], sizes = [14, 64], strides = [1, 1]} : vector<196x64xf32> to vector<14x64xf32>
    %c369 = arith.constant 369 : index
    %c0_294 = arith.constant 0 : index
    %348 = vector.load %arg13[%c369, %c0_294] : memref<512x64xf32, #tpu.memory_space<vmem>>, vector<14x64xf32>
    tpu.vector_store %arg13[%c369, %c0_294], %347 {strides = array<i32>} : memref<512x64xf32, #tpu.memory_space<vmem>>, vector<14x64xf32>,
    %349 = vector.extract_strided_slice %334 {offsets = [98, 0], sizes = [14, 64], strides = [1, 1]} : vector<196x64xf32> to vector<14x64xf32>
    %c385 = arith.constant 385 : index
    %c0_295 = arith.constant 0 : index
    %350 = vector.load %arg13[%c385, %c0_295] : memref<512x64xf32, #tpu.memory_space<vmem>>, vector<14x64xf32>
    tpu.vector_store %arg13[%c385, %c0_295], %349 {strides = array<i32>} : memref<512x64xf32, #tpu.memory_space<vmem>>, vector<14x64xf32>,
    %351 = vector.extract_strided_slice %334 {offsets = [112, 0], sizes = [14, 64], strides = [1, 1]} : vector<196x64xf32> to vector<14x64xf32>
    %c401 = arith.constant 401 : index
    %c0_296 = arith.constant 0 : index
    %352 = vector.load %arg13[%c401, %c0_296] : memref<512x64xf32, #tpu.memory_space<vmem>>, vector<14x64xf32>
    tpu.vector_store %arg13[%c401, %c0_296], %351 {strides = array<i32>} : memref<512x64xf32, #tpu.memory_space<vmem>>, vector<14x64xf32>,
    %353 = vector.extract_strided_slice %334 {offsets = [126, 0], sizes = [14, 64], strides = [1, 1]} : vector<196x64xf32> to vector<14x64xf32>
    %c417 = arith.constant 417 : index
    %c0_297 = arith.constant 0 : index
    %354 = vector.load %arg13[%c417, %c0_297] : memref<512x64xf32, #tpu.memory_space<vmem>>, vector<14x64xf32>
    tpu.vector_store %arg13[%c417, %c0_297], %353 {strides = array<i32>} : memref<512x64xf32, #tpu.memory_space<vmem>>, vector<14x64xf32>,
    %355 = vector.extract_strided_slice %334 {offsets = [140, 0], sizes = [14, 64], strides = [1, 1]} : vector<196x64xf32> to vector<14x64xf32>
    %c433 = arith.constant 433 : index
    %c0_298 = arith.constant 0 : index
    %356 = vector.load %arg13[%c433, %c0_298] : memref<512x64xf32, #tpu.memory_space<vmem>>, vector<14x64xf32>
    tpu.vector_store %arg13[%c433, %c0_298], %355 {strides = array<i32>} : memref<512x64xf32, #tpu.memory_space<vmem>>, vector<14x64xf32>,
    %357 = vector.extract_strided_slice %334 {offsets = [154, 0], sizes = [14, 64], strides = [1, 1]} : vector<196x64xf32> to vector<14x64xf32>
    %c449 = arith.constant 449 : index
    %c0_299 = arith.constant 0 : index
    %358 = vector.load %arg13[%c449, %c0_299] : memref<512x64xf32, #tpu.memory_space<vmem>>, vector<14x64xf32>
    tpu.vector_store %arg13[%c449, %c0_299], %357 {strides = array<i32>} : memref<512x64xf32, #tpu.memory_space<vmem>>, vector<14x64xf32>,
    %359 = vector.extract_strided_slice %334 {offsets = [168, 0], sizes = [14, 64], strides = [1, 1]} : vector<196x64xf32> to vector<14x64xf32>
    %c465 = arith.constant 465 : index
    %c0_300 = arith.constant 0 : index
    %360 = vector.load %arg13[%c465, %c0_300] : memref<512x64xf32, #tpu.memory_space<vmem>>, vector<14x64xf32>
    tpu.vector_store %arg13[%c465, %c0_300], %359 {strides = array<i32>} : memref<512x64xf32, #tpu.memory_space<vmem>>, vector<14x64xf32>,
    %361 = vector.extract_strided_slice %334 {offsets = [182, 0], sizes = [14, 64], strides = [1, 1]} : vector<196x64xf32> to vector<14x64xf32>
    %c481 = arith.constant 481 : index
    %c0_301 = arith.constant 0 : index
    %362 = vector.load %arg13[%c481, %c0_301] : memref<512x64xf32, #tpu.memory_space<vmem>>, vector<14x64xf32>
    tpu.vector_store %arg13[%c481, %c0_301], %361 {strides = array<i32>} : memref<512x64xf32, #tpu.memory_space<vmem>>, vector<14x64xf32>,
    %cst_302 = arith.constant 0.000000e+00 : f32
    %363 = vector.broadcast %cst_302 : f32 to vector<112x128xf32>
    %c256_303 = arith.constant 256 : index
    %c0_304 = arith.constant 0 : index
    %364 = vector.load %arg13[%c256_303, %c0_304] : memref<512x64xf32, #tpu.memory_space<vmem>>, vector<112x64xf32>
    %365 = arith.truncf %364 : vector<112x64xf32> to vector<112x64xbf16>
    %c0_305 = arith.constant 0 : index
    %c0_306 = arith.constant 0 : index
    %366 = vector.load %arg8[%c0_305, %c0_306] : memref<576x128xbf16, #tpu.memory_space<vmem>>, vector<64x128xbf16>
    %cst_307 = arith.constant dense<0.000000e+00> : vector<112x128xf32>
    %367 = tpu.matmul %365, %366, %cst_307 {dimension_numbers = #tpu.dot_dimension_numbers<[1], [0], [0], [1], [0, 0, 1, 1], [], []>} : vector<112x64xbf16>, vector<64x128xbf16>, vector<112x128xf32> -> vector<112x128xf32>
    %368 = arith.addf %363, %367 : vector<112x128xf32>
    %c257 = arith.constant 257 : index
    %c0_308 = arith.constant 0 : index
    %369 = vector.load %arg13[%c257, %c0_308] : memref<512x64xf32, #tpu.memory_space<vmem>>, vector<112x64xf32>
    %370 = arith.truncf %369 : vector<112x64xf32> to vector<112x64xbf16>
    %c64_309 = arith.constant 64 : index
    %c0_310 = arith.constant 0 : index
    %371 = vector.load %arg8[%c64_309, %c0_310] : memref<576x128xbf16, #tpu.memory_space<vmem>>, vector<64x128xbf16>
    %cst_311 = arith.constant dense<0.000000e+00> : vector<112x128xf32>
    %372 = tpu.matmul %370, %371, %cst_311 {dimension_numbers = #tpu.dot_dimension_numbers<[1], [0], [0], [1], [0, 0, 1, 1], [], []>} : vector<112x64xbf16>, vector<64x128xbf16>, vector<112x128xf32> -> vector<112x128xf32>
    %373 = arith.addf %368, %372 : vector<112x128xf32>
    %c258 = arith.constant 258 : index
    %c0_312 = arith.constant 0 : index
    %374 = vector.load %arg13[%c258, %c0_312] : memref<512x64xf32, #tpu.memory_space<vmem>>, vector<112x64xf32>
    %375 = arith.truncf %374 : vector<112x64xf32> to vector<112x64xbf16>
    %c128_313 = arith.constant 128 : index
    %c0_314 = arith.constant 0 : index
    %376 = vector.load %arg8[%c128_313, %c0_314] : memref<576x128xbf16, #tpu.memory_space<vmem>>, vector<64x128xbf16>
    %cst_315 = arith.constant dense<0.000000e+00> : vector<112x128xf32>
    %377 = tpu.matmul %375, %376, %cst_315 {dimension_numbers = #tpu.dot_dimension_numbers<[1], [0], [0], [1], [0, 0, 1, 1], [], []>} : vector<112x64xbf16>, vector<64x128xbf16>, vector<112x128xf32> -> vector<112x128xf32>
    %378 = arith.addf %373, %377 : vector<112x128xf32>
    %c272 = arith.constant 272 : index
    %c0_316 = arith.constant 0 : index
    %379 = vector.load %arg13[%c272, %c0_316] : memref<512x64xf32, #tpu.memory_space<vmem>>, vector<112x64xf32>
    %380 = arith.truncf %379 : vector<112x64xf32> to vector<112x64xbf16>
    %c192_317 = arith.constant 192 : index
    %c0_318 = arith.constant 0 : index
    %381 = vector.load %arg8[%c192_317, %c0_318] : memref<576x128xbf16, #tpu.memory_space<vmem>>, vector<64x128xbf16>
    %cst_319 = arith.constant dense<0.000000e+00> : vector<112x128xf32>
    %382 = tpu.matmul %380, %381, %cst_319 {dimension_numbers = #tpu.dot_dimension_numbers<[1], [0], [0], [1], [0, 0, 1, 1], [], []>} : vector<112x64xbf16>, vector<64x128xbf16>, vector<112x128xf32> -> vector<112x128xf32>
    %383 = arith.addf %378, %382 : vector<112x128xf32>
    %c273_320 = arith.constant 273 : index
    %c0_321 = arith.constant 0 : index
    %384 = vector.load %arg13[%c273_320, %c0_321] : memref<512x64xf32, #tpu.memory_space<vmem>>, vector<112x64xf32>
    %385 = arith.truncf %384 : vector<112x64xf32> to vector<112x64xbf16>
    %c256_322 = arith.constant 256 : index
    %c0_323 = arith.constant 0 : index
    %386 = vector.load %arg8[%c256_322, %c0_323] : memref<576x128xbf16, #tpu.memory_space<vmem>>, vector<64x128xbf16>
    %cst_324 = arith.constant dense<0.000000e+00> : vector<112x128xf32>
    %387 = tpu.matmul %385, %386, %cst_324 {dimension_numbers = #tpu.dot_dimension_numbers<[1], [0], [0], [1], [0, 0, 1, 1], [], []>} : vector<112x64xbf16>, vector<64x128xbf16>, vector<112x128xf32> -> vector<112x128xf32>
    %388 = arith.addf %383, %387 : vector<112x128xf32>
    %c274 = arith.constant 274 : index
    %c0_325 = arith.constant 0 : index
    %389 = vector.load %arg13[%c274, %c0_325] : memref<512x64xf32, #tpu.memory_space<vmem>>, vector<112x64xf32>
    %390 = arith.truncf %389 : vector<112x64xf32> to vector<112x64xbf16>
    %c320_326 = arith.constant 320 : index
    %c0_327 = arith.constant 0 : index
    %391 = vector.load %arg8[%c320_326, %c0_327] : memref<576x128xbf16, #tpu.memory_space<vmem>>, vector<64x128xbf16>
    %cst_328 = arith.constant dense<0.000000e+00> : vector<112x128xf32>
    %392 = tpu.matmul %390, %391, %cst_328 {dimension_numbers = #tpu.dot_dimension_numbers<[1], [0], [0], [1], [0, 0, 1, 1], [], []>} : vector<112x64xbf16>, vector<64x128xbf16>, vector<112x128xf32> -> vector<112x128xf32>
    %393 = arith.addf %388, %392 : vector<112x128xf32>
    %c288 = arith.constant 288 : index
    %c0_329 = arith.constant 0 : index
    %394 = vector.load %arg13[%c288, %c0_329] : memref<512x64xf32, #tpu.memory_space<vmem>>, vector<112x64xf32>
    %395 = arith.truncf %394 : vector<112x64xf32> to vector<112x64xbf16>
    %c384_330 = arith.constant 384 : index
    %c0_331 = arith.constant 0 : index
    %396 = vector.load %arg8[%c384_330, %c0_331] : memref<576x128xbf16, #tpu.memory_space<vmem>>, vector<64x128xbf16>
    %cst_332 = arith.constant dense<0.000000e+00> : vector<112x128xf32>
    %397 = tpu.matmul %395, %396, %cst_332 {dimension_numbers = #tpu.dot_dimension_numbers<[1], [0], [0], [1], [0, 0, 1, 1], [], []>} : vector<112x64xbf16>, vector<64x128xbf16>, vector<112x128xf32> -> vector<112x128xf32>
    %398 = arith.addf %393, %397 : vector<112x128xf32>
    %c289_333 = arith.constant 289 : index
    %c0_334 = arith.constant 0 : index
    %399 = vector.load %arg13[%c289_333, %c0_334] : memref<512x64xf32, #tpu.memory_space<vmem>>, vector<112x64xf32>
    %400 = arith.truncf %399 : vector<112x64xf32> to vector<112x64xbf16>
    %c448_335 = arith.constant 448 : index
    %c0_336 = arith.constant 0 : index
    %401 = vector.load %arg8[%c448_335, %c0_336] : memref<576x128xbf16, #tpu.memory_space<vmem>>, vector<64x128xbf16>
    %cst_337 = arith.constant dense<0.000000e+00> : vector<112x128xf32>
    %402 = tpu.matmul %400, %401, %cst_337 {dimension_numbers = #tpu.dot_dimension_numbers<[1], [0], [0], [1], [0, 0, 1, 1], [], []>} : vector<112x64xbf16>, vector<64x128xbf16>, vector<112x128xf32> -> vector<112x128xf32>
    %403 = arith.addf %398, %402 : vector<112x128xf32>
    %c290 = arith.constant 290 : index
    %c0_338 = arith.constant 0 : index
    %404 = vector.load %arg13[%c290, %c0_338] : memref<512x64xf32, #tpu.memory_space<vmem>>, vector<112x64xf32>
    %405 = arith.truncf %404 : vector<112x64xf32> to vector<112x64xbf16>
    %c512_339 = arith.constant 512 : index
    %c0_340 = arith.constant 0 : index
    %406 = vector.load %arg8[%c512_339, %c0_340] : memref<576x128xbf16, #tpu.memory_space<vmem>>, vector<64x128xbf16>
    %cst_341 = arith.constant dense<0.000000e+00> : vector<112x128xf32>
    %407 = tpu.matmul %405, %406, %cst_341 {dimension_numbers = #tpu.dot_dimension_numbers<[1], [0], [0], [1], [0, 0, 1, 1], [], []>} : vector<112x64xbf16>, vector<64x128xbf16>, vector<112x128xf32> -> vector<112x128xf32>
    %408 = arith.addf %403, %407 : vector<112x128xf32>
    %c224_342 = arith.constant 224 : index
    %c0_343 = arith.constant 0 : index
    %409 = vector.load %arg14[%c224_342, %c0_343] : memref<448x128xf32, #tpu.memory_space<vmem>>, vector<112x128xf32>
    tpu.vector_store %arg14[%c224_342, %c0_343], %408 {strides = array<i32>} : memref<448x128xf32, #tpu.memory_space<vmem>>, vector<112x128xf32>,
    %cst_344 = arith.constant 0.000000e+00 : f32
    %410 = vector.broadcast %cst_344 : f32 to vector<110x128xf32>
    %c368 = arith.constant 368 : index
    %c0_345 = arith.constant 0 : index
    %411 = vector.load %arg13[%c368, %c0_345] : memref<512x64xf32, #tpu.memory_space<vmem>>, vector<110x64xf32>
    %412 = arith.truncf %411 : vector<110x64xf32> to vector<110x64xbf16>
    %c0_346 = arith.constant 0 : index
    %c0_347 = arith.constant 0 : index
    %413 = vector.load %arg8[%c0_346, %c0_347] : memref<576x128xbf16, #tpu.memory_space<vmem>>, vector<64x128xbf16>
    %cst_348 = arith.constant dense<0.000000e+00> : vector<110x128xf32>
    %414 = tpu.matmul %412, %413, %cst_348 {dimension_numbers = #tpu.dot_dimension_numbers<[1], [0], [0], [1], [0, 0, 1, 1], [], []>} : vector<110x64xbf16>, vector<64x128xbf16>, vector<110x128xf32> -> vector<110x128xf32>
    %415 = arith.addf %410, %414 : vector<110x128xf32>
    %c369_349 = arith.constant 369 : index
    %c0_350 = arith.constant 0 : index
    %416 = vector.load %arg13[%c369_349, %c0_350] : memref<512x64xf32, #tpu.memory_space<vmem>>, vector<110x64xf32>
    %417 = arith.truncf %416 : vector<110x64xf32> to vector<110x64xbf16>
    %c64_351 = arith.constant 64 : index
    %c0_352 = arith.constant 0 : index
    %418 = vector.load %arg8[%c64_351, %c0_352] : memref<576x128xbf16, #tpu.memory_space<vmem>>, vector<64x128xbf16>
    %cst_353 = arith.constant dense<0.000000e+00> : vector<110x128xf32>
    %419 = tpu.matmul %417, %418, %cst_353 {dimension_numbers = #tpu.dot_dimension_numbers<[1], [0], [0], [1], [0, 0, 1, 1], [], []>} : vector<110x64xbf16>, vector<64x128xbf16>, vector<110x128xf32> -> vector<110x128xf32>
    %420 = arith.addf %415, %419 : vector<110x128xf32>
    %c370 = arith.constant 370 : index
    %c0_354 = arith.constant 0 : index
    %421 = vector.load %arg13[%c370, %c0_354] : memref<512x64xf32, #tpu.memory_space<vmem>>, vector<110x64xf32>
    %422 = arith.truncf %421 : vector<110x64xf32> to vector<110x64xbf16>
    %c128_355 = arith.constant 128 : index
    %c0_356 = arith.constant 0 : index
    %423 = vector.load %arg8[%c128_355, %c0_356] : memref<576x128xbf16, #tpu.memory_space<vmem>>, vector<64x128xbf16>
    %cst_357 = arith.constant dense<0.000000e+00> : vector<110x128xf32>
    %424 = tpu.matmul %422, %423, %cst_357 {dimension_numbers = #tpu.dot_dimension_numbers<[1], [0], [0], [1], [0, 0, 1, 1], [], []>} : vector<110x64xbf16>, vector<64x128xbf16>, vector<110x128xf32> -> vector<110x128xf32>
    %425 = arith.addf %420, %424 : vector<110x128xf32>
    %c384_358 = arith.constant 384 : index
    %c0_359 = arith.constant 0 : index
    %426 = vector.load %arg13[%c384_358, %c0_359] : memref<512x64xf32, #tpu.memory_space<vmem>>, vector<110x64xf32>
    %427 = arith.truncf %426 : vector<110x64xf32> to vector<110x64xbf16>
    %c192_360 = arith.constant 192 : index
    %c0_361 = arith.constant 0 : index
    %428 = vector.load %arg8[%c192_360, %c0_361] : memref<576x128xbf16, #tpu.memory_space<vmem>>, vector<64x128xbf16>
    %cst_362 = arith.constant dense<0.000000e+00> : vector<110x128xf32>
    %429 = tpu.matmul %427, %428, %cst_362 {dimension_numbers = #tpu.dot_dimension_numbers<[1], [0], [0], [1], [0, 0, 1, 1], [], []>} : vector<110x64xbf16>, vector<64x128xbf16>, vector<110x128xf32> -> vector<110x128xf32>
    %430 = arith.addf %425, %429 : vector<110x128xf32>
    %c385_363 = arith.constant 385 : index
    %c0_364 = arith.constant 0 : index
    %431 = vector.load %arg13[%c385_363, %c0_364] : memref<512x64xf32, #tpu.memory_space<vmem>>, vector<110x64xf32>
    %432 = arith.truncf %431 : vector<110x64xf32> to vector<110x64xbf16>
    %c256_365 = arith.constant 256 : index
    %c0_366 = arith.constant 0 : index
    %433 = vector.load %arg8[%c256_365, %c0_366] : memref<576x128xbf16, #tpu.memory_space<vmem>>, vector<64x128xbf16>
    %cst_367 = arith.constant dense<0.000000e+00> : vector<110x128xf32>
    %434 = tpu.matmul %432, %433, %cst_367 {dimension_numbers = #tpu.dot_dimension_numbers<[1], [0], [0], [1], [0, 0, 1, 1], [], []>} : vector<110x64xbf16>, vector<64x128xbf16>, vector<110x128xf32> -> vector<110x128xf32>
    %435 = arith.addf %430, %434 : vector<110x128xf32>
    %c386 = arith.constant 386 : index
    %c0_368 = arith.constant 0 : index
    %436 = vector.load %arg13[%c386, %c0_368] : memref<512x64xf32, #tpu.memory_space<vmem>>, vector<110x64xf32>
    %437 = arith.truncf %436 : vector<110x64xf32> to vector<110x64xbf16>
    %c320_369 = arith.constant 320 : index
    %c0_370 = arith.constant 0 : index
    %438 = vector.load %arg8[%c320_369, %c0_370] : memref<576x128xbf16, #tpu.memory_space<vmem>>, vector<64x128xbf16>
    %cst_371 = arith.constant dense<0.000000e+00> : vector<110x128xf32>
    %439 = tpu.matmul %437, %438, %cst_371 {dimension_numbers = #tpu.dot_dimension_numbers<[1], [0], [0], [1], [0, 0, 1, 1], [], []>} : vector<110x64xbf16>, vector<64x128xbf16>, vector<110x128xf32> -> vector<110x128xf32>
    %440 = arith.addf %435, %439 : vector<110x128xf32>
    %c400 = arith.constant 400 : index
    %c0_372 = arith.constant 0 : index
    %441 = vector.load %arg13[%c400, %c0_372] : memref<512x64xf32, #tpu.memory_space<vmem>>, vector<110x64xf32>
    %442 = arith.truncf %441 : vector<110x64xf32> to vector<110x64xbf16>
    %c384_373 = arith.constant 384 : index
    %c0_374 = arith.constant 0 : index
    %443 = vector.load %arg8[%c384_373, %c0_374] : memref<576x128xbf16, #tpu.memory_space<vmem>>, vector<64x128xbf16>
    %cst_375 = arith.constant dense<0.000000e+00> : vector<110x128xf32>
    %444 = tpu.matmul %442, %443, %cst_375 {dimension_numbers = #tpu.dot_dimension_numbers<[1], [0], [0], [1], [0, 0, 1, 1], [], []>} : vector<110x64xbf16>, vector<64x128xbf16>, vector<110x128xf32> -> vector<110x128xf32>
    %445 = arith.addf %440, %444 : vector<110x128xf32>
    %c401_376 = arith.constant 401 : index
    %c0_377 = arith.constant 0 : index
    %446 = vector.load %arg13[%c401_376, %c0_377] : memref<512x64xf32, #tpu.memory_space<vmem>>, vector<110x64xf32>
    %447 = arith.truncf %446 : vector<110x64xf32> to vector<110x64xbf16>
    %c448_378 = arith.constant 448 : index
    %c0_379 = arith.constant 0 : index
    %448 = vector.load %arg8[%c448_378, %c0_379] : memref<576x128xbf16, #tpu.memory_space<vmem>>, vector<64x128xbf16>
    %cst_380 = arith.constant dense<0.000000e+00> : vector<110x128xf32>
    %449 = tpu.matmul %447, %448, %cst_380 {dimension_numbers = #tpu.dot_dimension_numbers<[1], [0], [0], [1], [0, 0, 1, 1], [], []>} : vector<110x64xbf16>, vector<64x128xbf16>, vector<110x128xf32> -> vector<110x128xf32>
    %450 = arith.addf %445, %449 : vector<110x128xf32>
    %c402 = arith.constant 402 : index
    %c0_381 = arith.constant 0 : index
    %451 = vector.load %arg13[%c402, %c0_381] : memref<512x64xf32, #tpu.memory_space<vmem>>, vector<110x64xf32>
    %452 = arith.truncf %451 : vector<110x64xf32> to vector<110x64xbf16>
    %c512_382 = arith.constant 512 : index
    %c0_383 = arith.constant 0 : index
    %453 = vector.load %arg8[%c512_382, %c0_383] : memref<576x128xbf16, #tpu.memory_space<vmem>>, vector<64x128xbf16>
    %cst_384 = arith.constant dense<0.000000e+00> : vector<110x128xf32>
    %454 = tpu.matmul %452, %453, %cst_384 {dimension_numbers = #tpu.dot_dimension_numbers<[1], [0], [0], [1], [0, 0, 1, 1], [], []>} : vector<110x64xbf16>, vector<64x128xbf16>, vector<110x128xf32> -> vector<110x128xf32>
    %455 = arith.addf %450, %454 : vector<110x128xf32>
    %c336_385 = arith.constant 336 : index
    %c0_386 = arith.constant 0 : index
    %456 = vector.load %arg14[%c336_385, %c0_386] : memref<448x128xf32, #tpu.memory_space<vmem>>, vector<110x128xf32>
    tpu.vector_store %arg14[%c336_385, %c0_386], %455 {strides = array<i32>} : memref<448x128xf32, #tpu.memory_space<vmem>>, vector<110x128xf32>,
    %c224_387 = arith.constant 224 : index
    %c0_388 = arith.constant 0 : index
    %457 = vector.load %arg14[%c224_387, %c0_388] : memref<448x128xf32, #tpu.memory_space<vmem>>, vector<14x128xf32>
    %c240 = arith.constant 240 : index
    %c0_389 = arith.constant 0 : index
    %458 = vector.load %arg14[%c240, %c0_389] : memref<448x128xf32, #tpu.memory_space<vmem>>, vector<14x128xf32>
    %459 = arith.maximumf %457, %458 : vector<14x128xf32>
    %c112_390 = arith.constant 112 : index
    %c0_391 = arith.constant 0 : index
    %460 = vector.load %arg15[%c112_390, %c0_391] : memref<224x128xf32, #tpu.memory_space<vmem>>, vector<14x128xf32>
    tpu.vector_store %arg15[%c112_390, %c0_391], %459 {strides = array<i32>} : memref<224x128xf32, #tpu.memory_space<vmem>>, vector<14x128xf32>,
    %c256_392 = arith.constant 256 : index
    %c0_393 = arith.constant 0 : index
    %461 = vector.load %arg14[%c256_392, %c0_393] : memref<448x128xf32, #tpu.memory_space<vmem>>, vector<14x128xf32>
    %c272_394 = arith.constant 272 : index
    %c0_395 = arith.constant 0 : index
    %462 = vector.load %arg14[%c272_394, %c0_395] : memref<448x128xf32, #tpu.memory_space<vmem>>, vector<14x128xf32>
    %463 = arith.maximumf %461, %462 : vector<14x128xf32>
    %c126 = arith.constant 126 : index
    %c0_396 = arith.constant 0 : index
    %464 = vector.load %arg15[%c126, %c0_396] : memref<224x128xf32, #tpu.memory_space<vmem>>, vector<14x128xf32>
    tpu.vector_store %arg15[%c126, %c0_396], %463 {strides = array<i32>} : memref<224x128xf32, #tpu.memory_space<vmem>>, vector<14x128xf32>,
    %c288_397 = arith.constant 288 : index
    %c0_398 = arith.constant 0 : index
    %465 = vector.load %arg14[%c288_397, %c0_398] : memref<448x128xf32, #tpu.memory_space<vmem>>, vector<14x128xf32>
    %c304 = arith.constant 304 : index
    %c0_399 = arith.constant 0 : index
    %466 = vector.load %arg14[%c304, %c0_399] : memref<448x128xf32, #tpu.memory_space<vmem>>, vector<14x128xf32>
    %467 = arith.maximumf %465, %466 : vector<14x128xf32>
    %c140_400 = arith.constant 140 : index
    %c0_401 = arith.constant 0 : index
    %468 = vector.load %arg15[%c140_400, %c0_401] : memref<224x128xf32, #tpu.memory_space<vmem>>, vector<14x128xf32>
    tpu.vector_store %arg15[%c140_400, %c0_401], %467 {strides = array<i32>} : memref<224x128xf32, #tpu.memory_space<vmem>>, vector<14x128xf32>,
    %c320_402 = arith.constant 320 : index
    %c0_403 = arith.constant 0 : index
    %469 = vector.load %arg14[%c320_402, %c0_403] : memref<448x128xf32, #tpu.memory_space<vmem>>, vector<14x128xf32>
    %c336_404 = arith.constant 336 : index
    %c0_405 = arith.constant 0 : index
    %470 = vector.load %arg14[%c336_404, %c0_405] : memref<448x128xf32, #tpu.memory_space<vmem>>, vector<14x128xf32>
    %471 = arith.maximumf %469, %470 : vector<14x128xf32>
    %c154 = arith.constant 154 : index
    %c0_406 = arith.constant 0 : index
    %472 = vector.load %arg15[%c154, %c0_406] : memref<224x128xf32, #tpu.memory_space<vmem>>, vector<14x128xf32>
    tpu.vector_store %arg15[%c154, %c0_406], %471 {strides = array<i32>} : memref<224x128xf32, #tpu.memory_space<vmem>>, vector<14x128xf32>,
    %c352 = arith.constant 352 : index
    %c0_407 = arith.constant 0 : index
    %473 = vector.load %arg14[%c352, %c0_407] : memref<448x128xf32, #tpu.memory_space<vmem>>, vector<14x128xf32>
    %c368_408 = arith.constant 368 : index
    %c0_409 = arith.constant 0 : index
    %474 = vector.load %arg14[%c368_408, %c0_409] : memref<448x128xf32, #tpu.memory_space<vmem>>, vector<14x128xf32>
    %475 = arith.maximumf %473, %474 : vector<14x128xf32>
    %c168_410 = arith.constant 168 : index
    %c0_411 = arith.constant 0 : index
    %476 = vector.load %arg15[%c168_410, %c0_411] : memref<224x128xf32, #tpu.memory_space<vmem>>, vector<14x128xf32>
    tpu.vector_store %arg15[%c168_410, %c0_411], %475 {strides = array<i32>} : memref<224x128xf32, #tpu.memory_space<vmem>>, vector<14x128xf32>,
    %c384_412 = arith.constant 384 : index
    %c0_413 = arith.constant 0 : index
    %477 = vector.load %arg14[%c384_412, %c0_413] : memref<448x128xf32, #tpu.memory_space<vmem>>, vector<14x128xf32>
    %c400_414 = arith.constant 400 : index
    %c0_415 = arith.constant 0 : index
    %478 = vector.load %arg14[%c400_414, %c0_415] : memref<448x128xf32, #tpu.memory_space<vmem>>, vector<14x128xf32>
    %479 = arith.maximumf %477, %478 : vector<14x128xf32>
    %c182 = arith.constant 182 : index
    %c0_416 = arith.constant 0 : index
    %480 = vector.load %arg15[%c182, %c0_416] : memref<224x128xf32, #tpu.memory_space<vmem>>, vector<14x128xf32>
    tpu.vector_store %arg15[%c182, %c0_416], %479 {strides = array<i32>} : memref<224x128xf32, #tpu.memory_space<vmem>>, vector<14x128xf32>,
    %c416 = arith.constant 416 : index
    %c0_417 = arith.constant 0 : index
    %481 = vector.load %arg14[%c416, %c0_417] : memref<448x128xf32, #tpu.memory_space<vmem>>, vector<14x128xf32>
    %c432 = arith.constant 432 : index
    %c0_418 = arith.constant 0 : index
    %482 = vector.load %arg14[%c432, %c0_418] : memref<448x128xf32, #tpu.memory_space<vmem>>, vector<14x128xf32>
    %483 = arith.maximumf %481, %482 : vector<14x128xf32>
    %c196_419 = arith.constant 196 : index
    %c0_420 = arith.constant 0 : index
    %484 = vector.load %arg15[%c196_419, %c0_420] : memref<224x128xf32, #tpu.memory_space<vmem>>, vector<14x128xf32>
    tpu.vector_store %arg15[%c196_419, %c0_420], %483 {strides = array<i32>} : memref<224x128xf32, #tpu.memory_space<vmem>>, vector<14x128xf32>,
    %c112_421 = arith.constant 112 : index
    %c0_422 = arith.constant 0 : index
    %485 = tpu.strided_load %arg15[%c112_421, %c0_422] {strides = array<i32: 2, 1>} : memref<224x128xf32, #tpu.memory_space<vmem>>, vector<49x128xf32>
    %c113_423 = arith.constant 113 : index
    %c0_424 = arith.constant 0 : index
    %486 = tpu.strided_load %arg15[%c113_423, %c0_424] {strides = array<i32: 2, 1>} : memref<224x128xf32, #tpu.memory_space<vmem>>, vector<49x128xf32>
    %487 = arith.maximumf %485, %486 : vector<49x128xf32>
    %488 = vector.broadcast %1 : vector<1x128xf32> to vector<49x128xf32>
    %489 = arith.addf %487, %488 : vector<49x128xf32>
    %cst_425 = arith.constant 0.000000e+00 : f32
    %490 = vector.broadcast %cst_425 : f32 to vector<49x128xf32>
    %491 = arith.maximumf %489, %490 : vector<49x128xf32>
    %c1_426 = arith.constant 1 : index
    %c0_427 = arith.constant 0 : index
    %c0_428 = arith.constant 0 : index
    %492 = vector.load %arg10[%c1_426, %c0_427, %c0_428] : memref<2x49x128xf32, #tpu.memory_space<vmem>>, vector<1x49x128xf32>
    %493 = vector.shape_cast %492 : vector<1x49x128xf32> to vector<49x128xf32>
    %494 = vector.shape_cast %491 : vector<49x128xf32> to vector<1x49x128xf32>
    tpu.vector_store %arg10[%c1_426, %c0_427, %c0_428], %494 {strides = array<i32>} : memref<2x49x128xf32, #tpu.memory_space<vmem>>, vector<1x49x128xf32>,
    return
  }
  func.func @transform_0(%arg0: i32) -> (i32, i32) {
    %c0_i32 = arith.constant 0 : i32
    %c0_i32_0 = arith.constant 0 : i32
    return %arg0, %c0_i32 : i32, i32
  }
  func.func @transform_1(%arg0: i32) -> (i32, i32) {
    %c0_i32 = arith.constant 0 : i32
    %c0_i32_0 = arith.constant 0 : i32
    %c0_i32_1 = arith.constant 0 : i32
    return %c0_i32, %c0_i32_0 : i32, i32
  }
  func.func @transform_2(%arg0: i32) -> (i32, i32) {
    %c0_i32 = arith.constant 0 : i32
    %c0_i32_0 = arith.constant 0 : i32
    %c0_i32_1 = arith.constant 0 : i32
    return %c0_i32, %c0_i32_0 : i32, i32
  }
  func.func @transform_3(%arg0: i32) -> (i32, i32) {
    %c0_i32 = arith.constant 0 : i32
    %c0_i32_0 = arith.constant 0 : i32
    %c0_i32_1 = arith.constant 0 : i32
    return %c0_i32, %c0_i32_0 : i32, i32
  }
  func.func @transform_4(%arg0: i32) -> (i32, i32) {
    %c0_i32 = arith.constant 0 : i32
    %c0_i32_0 = arith.constant 0 : i32
    %c0_i32_1 = arith.constant 0 : i32
    return %c0_i32, %c0_i32_0 : i32, i32
  }
  func.func @transform_5(%arg0: i32) -> (i32, i32) {
    %c0_i32 = arith.constant 0 : i32
    %c0_i32_0 = arith.constant 0 : i32
    %c0_i32_1 = arith.constant 0 : i32
    return %c0_i32, %c0_i32_0 : i32, i32
  }
  func.func @transform_6(%arg0: i32) -> (i32, i32) {
    %c0_i32 = arith.constant 0 : i32
    %c0_i32_0 = arith.constant 0 : i32
    %c0_i32_1 = arith.constant 0 : i32
    return %c0_i32, %c0_i32_0 : i32, i32
  }
  func.func @transform_7(%arg0: i32) -> (i32, i32) {
    %c0_i32 = arith.constant 0 : i32
    %c0_i32_0 = arith.constant 0 : i32
    %c0_i32_1 = arith.constant 0 : i32
    return %c0_i32, %c0_i32_0 : i32, i32
  }
  func.func @transform_8(%arg0: i32) -> (i32, i32) {
    %c0_i32 = arith.constant 0 : i32
    %c0_i32_0 = arith.constant 0 : i32
    %c0_i32_1 = arith.constant 0 : i32
    return %c0_i32, %c0_i32_0 : i32, i32
  }
  func.func @transform_9(%arg0: i32) -> (i32, i32, i32) {
    %c0_i32 = arith.constant 0 : i32
    %c0_i32_0 = arith.constant 0 : i32
    %c0_i32_1 = arith.constant 0 : i32
    return %arg0, %c0_i32, %c0_i32_0 : i32, i32, i32
  }
}

</mosaic_0001>

<bundles_post_ra>
// kernel: forward.1
= control target key start
LH: loop header
LB: loop body
LE: loop exit
PB: predicated region body
PF: predicated region fallthrough
CT: control target
= control target key end

     0   :  { %vm1031_vm0 = vcmask 1044480   ;;  %vm1032_vm1 = vcmask 1045504   ;;  %v13682_v1 = vmov 65535   ;;  %vm736_vm2 = vcmask 220160   ;;  %s18485_s1 = inlined_call_operand.vmem [shape: bf16[27,64], index: 1, kind: input, shape index: {}]   ;;  %s18486_s0 = inlined_call_operand.vmem [shape: bf16[1568,27], index: 0, kind: input, shape index: {}]   ;;  %s18487_s3 = inlined_call_operand.vmem [shape: f32[64,4], index: 3, kind: input, shape index: {}]   ;;  %s18488_s7 = inlined_call_operand.vmem [shape: bf16[576,128], index: 7, kind: input, shape index: {}]   ;;  %s18489_s2 = inlined_call_operand.vmem [shape: f32[1,64], index: 2, kind: input, shape index: {}]   ;;  %s18490_s5 = inlined_call_operand.vmem [shape: f32[4,64], index: 5, kind: input, shape index: {}]   ;;  %s18491_s4 = inlined_call_operand.vmem [shape: f32[1,4], index: 4, kind: input, shape index: {}]   ;;  %s18492_s6 = inlined_call_operand.vmem [shape: f32[1,64], index: 6, kind: input, shape index: {}]   ;;  %s18493_s8 = inlined_call_operand.vmem [shape: f32[1,128], index: 8, kind: input, shape index: {}]   ;;  %s18494_s9 = inlined_call_operand.vmem [shape: f32[2,49,128], index: 9, kind: output, shape index: {}]  }
   0x1   :  { %v13426_v0 = vld [vmem:[%s18485_s1 + $0x8] sm:$0x3f]   ;;  %v1033_v2 = vsel %vm1031_vm0, 4294967295, %v13682_v1  ;;  %v13428_v4 = vld [vmem:[%s18486_s0] sm:$0xff]   ;;  %v13430_v8 = vld [vmem:[%s18486_s0 + $0x10] sm:$0xff]   ;;  %v2052_v62 = vlaneseq  ;;  %vm1855_vm3 = vcmask 523264  }
   0x2   :  { %v1034_v3 = vsel %vm1032_vm1, %v1033_v2, 0  ;;  %v13427_v6 = vld [vmem:[%s18485_s1] sm:$0xff]   ;;  %11891 = vmatprep.mubr.msk.bf16.mxu0 %vm736_vm2, %v13428_v4  ;;  %v13429_v7 = vld [vmem:[%s18486_s0 + $0x8] sm:$0xff]   ;;  %v13431_v9 = vld [vmem:[%s18486_s0 + $0x18] sm:$0xff]   ;;  %vm3078_vm7 = vcmask 519168  }
   0x3   :  { %v1036_v5 = vand.u32 %v13426_v0, %v1034_v3  ;;  %v13432_v10 = vld [vmem:[%s18486_s0 + $0x20] sm:$0xff]   ;;  %v13433_v11 = vld [vmem:[%s18486_s0 + $0x28] sm:$0xff]   ;;  %v13434_v12 = vld [vmem:[%s18486_s0 + $0x30] sm:$0xff]   ;;  %v13975_v2 = vshrl.u32 %v2052_v62, 7  ;;  %v13978_v3 = vand.u32 127, %v2052_v62 }
   0x4   :  { %v13435_v13 = vld [vmem:[%s18486_s0 + $0x38] sm:$0xff]   ;;  %v13436_v14 = vld [vmem:[%s18486_s0 + $0x40] sm:$0xff]   ;;  %v13437_v15 = vld [vmem:[%s18486_s0 + $0x48] sm:$0xff]  }
   0x5   :  { %11887 = vmatprep.subr.bf16.mxu0 %v1036_v5  ;;  %13418 = vmatprep.subr.bf16.mxu1 %v1036_v5  ;;  %v13438_v16 = vld [vmem:[%s18486_s0 + $0x50] sm:$0xff]   ;;  %v13439_v17 = vld [vmem:[%s18486_s0 + $0x58] sm:$0xff]   ;;  %v13440_v18 = vld [vmem:[%s18486_s0 + $0x60] sm:$0xff]   ;;  %v13981_v4 = vmul.u32 784, %v13975_v2 }
   0x6   :  { %11888 = vmatpush3.bf16.msra.mxu0 %v1036_v5  ;;  %13420 = vmatpush3.bf16.msra.mxu1 %v1036_v5  ;;  %v13441_v19 = vld [vmem:[%s18486_s0 + $0x68] sm:$0xff]   ;;  %v13442_v20 = vld [vmem:[%s18486_s0 + $0x70] sm:$0xff]   ;;  %v13443_v21 = vld [vmem:[%s18486_s0 + $0x78] sm:$0xff]  }
   0x7   :  { %11889 = vmatprep.subr.bf16.mxu0 %v13427_v6  ;;  %13419 = vmatprep.subr.bf16.mxu1 %v13427_v6  ;;  %v13444_v22 = vld [vmem:[%s18486_s0 + $0x80] sm:$0xff]   ;;  %v13445_v23 = vld [vmem:[%s18486_s0 + $0x88] sm:$0xff]   ;;  %v13446_v24 = vld [vmem:[%s18486_s0 + $0x90] sm:$0xff]   ;;  %vm2069_vm8 = vcmp.ge.s32.totalorder %v13978_v3, %v13981_v4 }
   0x8   :  { %v13447_v25 = vld [vmem:[%s18486_s0 + $0x98] sm:$0xff]   ;;  %v13448_v26 = vld [vmem:[%s18486_s0 + $0xa0] sm:$0xff]   ;;  %v13449_v27 = vld [vmem:[%s18486_s0 + $0xa8] sm:$0xff]  }
   0x9   :  { %v13450_v28 = vld [vmem:[%s18486_s0 + $0xb0] sm:$0xff]   ;;  %v13451_v29 = vld [vmem:[%s18486_s0 + $0xb8] sm:$0xff]   ;;  %v13452_v30 = vld [vmem:[%s18486_s0 + $0xc0] sm:$0xff]  }
   0xa   :  { %11890 = vmatpush3.bf16.msra.mxu0 %v13427_v6  ;;  %13421 = vmatpush3.bf16.msra.mxu1 %v13427_v6  ;;  %v13453_v31 = vld [vmem:[%s18486_s0 + $0xc8] sm:$0xff]   ;;  %v13454_v32 = vld [vmem:[%s18486_s0 + $0xd0] sm:$0xff]   ;;  %v13455_v33 = vld [vmem:[%s18486_s0 + $0xd8] sm:$0xff]   ;;  %v2056_v6 = vadd.s32 128, %v13978_v3 }
   0xb   :  { %v13456_v34 = vld [vmem:[%s18486_s0 + $0xe0] sm:$0xff]   ;;  %v13457_v35 = vld [vmem:[%s18486_s0 + $0xe8] sm:$0xff]   ;;  %v13458_v36 = vld [vmem:[%s18486_s0 + $0xf0] sm:$0xff]  }
   0xc   :  { %v13459_v37 = vld [vmem:[%s18486_s0 + $0xf8] sm:$0xff]   ;;  %v13460_v38 = vld [vmem:[%s18486_s0 + $0x100] sm:$0xff]   ;;  %v13461_v39 = vld [vmem:[%s18486_s0 + $0x108] sm:$0xff]   ;;  %vm2070_vm4 = vcmp.ge.s32.totalorder %v2056_v6, %v13981_v4 }
   0xd   :  { %11892 = vmatmul.mubr.msk.bf16.vlgmr.msra.gmra.mxu0 %vm736_vm2, %v13429_v7  ;;  %v13462_v40 = vld [vmem:[%s18486_s0 + $0x110] sm:$0xff]   ;;  %v13463_v42 = vld [vmem:[%s18486_s0 + $0x118] sm:$0xff]   ;;  %v13464_v44 = vld [vmem:[%s18486_s0 + $0x120] sm:$0xff]   ;;  %v13988_v7 = vadd.s32 784, %v13981_v4 }
   0xe   :  { %11895 = vmatprep.mubr.msk.bf16.mxu0 %vm736_vm2, %v13430_v8  ;;  %v13494_v41 = vld [vmem:[%s18486_s0 + $0x2d0] sm:$0xff]   ;;  %v13495_v43 = vld [vmem:[%s18486_s0 + $0x2d8] sm:$0xff]   ;;  %v13465_v45 = vld [vmem:[%s18486_s0 + $0x128] sm:$0xff]  }
   0xf   :  { %12071 = vmatprep.mubr.msk.bf16.mxu1 %vm736_vm2, %v13494_v41  ;;  %v13466_v46 = vld [vmem:[%s18486_s0 + $0x130] sm:$0xff]   ;;  %v13467_v47 = vld [vmem:[%s18486_s0 + $0x138] sm:$0xff]   ;;  %v13468_v48 = vld [vmem:[%s18486_s0 + $0x140] sm:$0xff]   ;;  %vm2084_vm5 = vcmp.lt.s32.totalorder %v2056_v6, %v13988_v7  ;;  %vm2083_vm9 = vcmp.lt.s32.totalorder %v13978_v3, %v13988_v7 }
  0x10   :  { %12072 = vmatmul.mubr.msk.bf16.vlgmr.msra.gmra.mxu1 %vm736_vm2, %v13495_v43  ;;  %v13469_v49 = vld [vmem:[%s18486_s0 + $0x148] sm:$0xff]   ;;  %v13470_v50 = vld [vmem:[%s18486_s0 + $0x150] sm:$0xff]   ;;  %v13471_v51 = vld [vmem:[%s18486_s0 + $0x158] sm:$0xff]  }
  0x11   :  { %v13472_v52 = vld [vmem:[%s18486_s0 + $0x160] sm:$0xff]   ;;  %v13473_v54 = vld [vmem:[%s18486_s0 + $0x168] sm:$0xff]   ;;  %v13474_v56 = vld [vmem:[%s18486_s0 + $0x170] sm:$0xff]  }
  0x12   :  { %v13506_v53 = vld [vmem:[%s18486_s0 + $0x2e0] sm:$0xff]   ;;  %v13507_v55 = vld [vmem:[%s18486_s0 + $0x2e8] sm:$0xff]   ;;  %v13510_v57 = vld [vmem:[%s18486_s0 + $0x2f0] sm:$0xff]  }
  0x13   :  { %12075 = vmatprep.mubr.msk.bf16.mxu1 %vm736_vm2, %v13506_v53  ;;  %v13475_v58 = vld [vmem:[%s18486_s0 + $0x178] sm:$0xff]   ;;  %v13476_v60 = vld [vmem:[%s18486_s0 + $0x180] sm:$0xff]   ;;  %v13477_v63 = vld [vmem:[%s18486_s0 + $0x188] sm:$0xff]  }
  0x14   :  { %v13511_v59 = vld [vmem:[%s18486_s0 + $0x2f8] sm:$0xff]   ;;  %v13514_v61 = vld [vmem:[%s18486_s0 + $0x300] sm:$0xff]   ;;  %v13515_v0 = vld [vmem:[%s18486_s0 + $0x308] sm:$0xff]  }
  0x15   :  { %11896 = vmatmul.mubr.msk.bf16.gmra.mxu0 %vm736_vm2, %v13431_v9  ;;  %v13478_v1 = vld [vmem:[%s18486_s0 + $0x190] sm:$0xff]   ;;  %vm2097_vm6 = vmand %vm2070_vm4, %vm2084_vm5  ;;  %v13485_v43 = vld [vmem:[%s18486_s0 + $0x1c8] sm:$0xff]  }
  0x16   :  { %11899 = vmatprep.mubr.msk.bf16.mxu0 %vm736_vm2, %v13432_v10  ;;  %v13479_v10 = vld [vmem:[%s18486_s0 + $0x198] sm:$0xff]   ;;  %v13489_v6 = vld [vmem:[%s18486_s0 + $0x1e8] sm:$0xff]   ;;  %vm2096_vm12 = vmand %vm2069_vm8, %vm2083_vm9 }
  0x17   :  { %v13487_v53 = vld [vmem:[%s18486_s0 + $0x1d8] sm:$0xff]  }
  0x18   :  { %12076 = vmatmul.mubr.msk.bf16.gmra.mxu1 %vm736_vm2, %v13507_v55  ;;  %v13488_v55 = vld [vmem:[%s18486_s0 + $0x1e0] sm:$0xff]  }
  0x19   :  { %12079 = vmatprep.mubr.msk.bf16.mxu1 %vm736_vm2, %v13510_v57 }
  0x1d   :  { %11900 = vmatmul.mubr.msk.bf16.gmra.mxu0 %vm736_vm2, %v13433_v11  ;;  %v13480_v11 = vld [vmem:[%s18486_s0 + $0x1a0] sm:$0xff]  }
  0x1e   :  { %11903 = vmatprep.mubr.msk.bf16.mxu0 %vm736_vm2, %v13434_v12  ;;  %v13683_v12 = vmov 0.0012755102  }
  0x20   :  { %12080 = vmatmul.mubr.msk.bf16.gmra.mxu1 %vm736_vm2, %v13511_v59 }
  0x21   :  { %12083 = vmatprep.mubr.msk.bf16.mxu1 %vm736_vm2, %v13514_v61 }
  0x25   :  { %11904 = vmatmul.mubr.msk.bf16.gmra.mxu0 %vm736_vm2, %v13435_v13 }
  0x26   :  { %11907 = vmatprep.mubr.msk.bf16.mxu0 %vm736_vm2, %v13436_v14 }
  0x28   :  { %12084 = vmatmul.mubr.msk.bf16.gmra.mxu1 %vm736_vm2, %v13515_v0 }
  0x29   :  { %10743 = vmatprep.mubr.msk.f32.mxu1 %vm2097_vm6, %v13683_v12 }
  0x2d   :  { %11908 = vmatmul.mubr.msk.bf16.gmra.mxu0 %vm736_vm2, %v13437_v15 }
  0x2e   :  { %11911 = vmatprep.mubr.msk.bf16.mxu0 %vm736_vm2, %v13438_v16 }
  0x35   :  { %11912 = vmatmul.mubr.msk.bf16.gmra.mxu0 %vm736_vm2, %v13439_v17  ;;  %v13481_v17 = vld [vmem:[%s18486_s0 + $0x1a8] sm:$0xff]  }
  0x36   :  { %11915 = vmatprep.mubr.msk.bf16.mxu0 %vm736_vm2, %v13440_v18  ;;  %v13482_v18 = vld [vmem:[%s18486_s0 + $0x1b0] sm:$0xff]  }
  0x3d   :  { %11916 = vmatmul.mubr.msk.bf16.gmra.mxu0 %vm736_vm2, %v13441_v19 }
  0x3e   :  { %11919 = vmatprep.mubr.msk.bf16.mxu0 %vm736_vm2, %v13442_v20 }
  0x45   :  { %11920 = vmatmul.mubr.msk.bf16.gmra.mxu0 %vm736_vm2, %v13443_v21 }
  0x46   :  { %11923 = vmatprep.mubr.msk.bf16.mxu0 %vm736_vm2, %v13444_v22 }
  0x4d   :  { %11924 = vmatmul.mubr.msk.bf16.gmra.mxu0 %vm736_vm2, %v13445_v23 }
  0x4e   :  { %11927 = vmatprep.mubr.msk.bf16.mxu0 %vm736_vm2, %v13446_v24 }
  0x55   :  { %11928 = vmatmul.mubr.msk.bf16.gmra.mxu0 %vm736_vm2, %v13447_v25 }
  0x56   :  { %11931 = vmatprep.mubr.msk.bf16.mxu0 %vm736_vm2, %v13448_v26 }
  0x5d   :  { %11932 = vmatmul.mubr.msk.bf16.gmra.mxu0 %vm736_vm2, %v13449_v27 }
  0x5e   :  { %11935 = vmatprep.mubr.msk.bf16.mxu0 %vm736_vm2, %v13450_v28 }
  0x65   :  { %11936 = vmatmul.mubr.msk.bf16.gmra.mxu0 %vm736_vm2, %v13451_v29  ;;  %v13483_v29 = vld [vmem:[%s18486_s0 + $0x1b8] sm:$0xff]  }
  0x66   :  { %11939 = vmatprep.mubr.msk.bf16.mxu0 %vm736_vm2, %v13452_v30 }
  0x6d   :  { %11940 = vmatmul.mubr.msk.bf16.gmra.mxu0 %vm736_vm2, %v13453_v31  ;;  %v13484_v31 = vld [vmem:[%s18486_s0 + $0x1c0] sm:$0xff]  }
  0x6e   :  { %11943 = vmatprep.mubr.msk.bf16.mxu0 %vm736_vm2, %v13454_v32 }
  0x75   :  { %11944 = vmatmul.mubr.msk.bf16.gmra.mxu0 %vm736_vm2, %v13455_v33 }
  0x76   :  { %11947 = vmatprep.mubr.msk.bf16.mxu0 %vm736_vm2, %v13456_v34 }
  0x7d   :  { %11948 = vmatmul.mubr.msk.bf16.gmra.mxu0 %vm736_vm2, %v13457_v35 }
  0x7e   :  { %11951 = vmatprep.mubr.msk.bf16.mxu0 %vm736_vm2, %v13458_v36 }
  0x85   :  { %11952 = vmatmul.mubr.msk.bf16.gmra.mxu0 %vm736_vm2, %v13459_v37 }
  0x86   :  { %11955 = vmatprep.mubr.msk.bf16.mxu0 %vm736_vm2, %v13460_v38 }
  0x8d   :  { %11956 = vmatmul.mubr.msk.bf16.gmra.mxu0 %vm736_vm2, %v13461_v39 }
  0x8e   :  { %11959 = vmatprep.mubr.msk.bf16.mxu0 %vm736_vm2, %v13462_v40 }
  0x95   :  { %11960 = vmatmul.mubr.msk.bf16.gmra.mxu0 %vm736_vm2, %v13463_v42 }
  0x96   :  { %11963 = vmatprep.mubr.msk.bf16.mxu0 %vm736_vm2, %v13464_v44 }
  0x9d   :  { %11964 = vmatmul.mubr.msk.bf16.gmra.mxu0 %vm736_vm2, %v13465_v45  ;;  %v13486_v45 = vld [vmem:[%s18486_s0 + $0x1d0] sm:$0xff]  }
  0x9e   :  { %11967 = vmatprep.mubr.msk.bf16.mxu0 %vm736_vm2, %v13466_v46 }
  0xa5   :  { %11968 = vmatmul.mubr.msk.bf16.gmra.mxu0 %vm736_vm2, %v13467_v47 }
  0xa6   :  { %11971 = vmatprep.mubr.msk.bf16.mxu0 %vm736_vm2, %v13468_v48 }
  0xad   :  { %11972 = vmatmul.mubr.msk.bf16.gmra.mxu0 %vm736_vm2, %v13469_v49 }
  0xae   :  { %11975 = vmatprep.mubr.msk.bf16.mxu0 %vm736_vm2, %v13470_v50 }
  0xb5   :  { %11976 = vmatmul.mubr.msk.bf16.gmra.mxu0 %vm736_vm2, %v13471_v51 }
  0xb6   :  { %11979 = vmatprep.mubr.msk.bf16.mxu0 %vm736_vm2, %v13472_v52 }
  0xbd   :  { %11980 = vmatmul.mubr.msk.bf16.gmra.mxu0 %vm736_vm2, %v13473_v54 }
  0xbe   :  { %11983 = vmatprep.mubr.msk.bf16.mxu0 %vm736_vm2, %v13474_v56 }
  0xc5   :  { %11984 = vmatmul.mubr.msk.bf16.gmra.mxu0 %vm736_vm2, %v13475_v58 }
  0xc6   :  { %11987 = vmatprep.mubr.msk.bf16.mxu0 %vm736_vm2, %v13476_v60 }
  0xcd   :  { %v11893_v5 = vpop.f32.mrf.mxu0  ;;  %11988 = vmatmul.mubr.msk.bf16.gmra.mxu0 %vm736_vm2, %v13477_v63 }
  0xce   :  { %1858 = vst.msk [vmem:[#allocation2 + $0x10] sm:$0xff] %vm1855_vm3, %v11893_v5  ;;  %11991 = vmatprep.mubr.msk.bf16.mxu0 %vm736_vm2, %v13478_v1 }
  0xcf   :  { %v1072_v8 = vpop.f32.mrf.mxu0 }
  0xd0   :  { %1856 = vst.msk [vmem:[#allocation2] sm:$0xff] %vm1855_vm3, %v1072_v8 }
  0xd1   :  { %v11894_v9 = vpop.f32.mrf.mxu0 }
  0xd2   :  { %1859 = vst.msk [vmem:[#allocation2 + $0x18] sm:$0xff] %vm1855_vm3, %v11894_v9  ;;  %v13490_v9 = vld [vmem:[%s18486_s0 + $0x1f0] sm:$0xff]  }
  0xd3   :  { %v1075_v13 = vpop.f32.mrf.mxu0 }
  0xd4   :  { %1857 = vst.msk [vmem:[#allocation2 + $0x8] sm:$0xff] %vm1855_vm3, %v1075_v13 }
  0xd5   :  { %v11897_v14 = vpop.f32.mrf.mxu0  ;;  %11992 = vmatmul.mubr.msk.bf16.gmra.mxu0 %vm736_vm2, %v13479_v10  ;;  %v14025_v30 = vld [vmem:[#allocation2 + $0x10] sm:$0xff] }
  0xd6   :  { %1862 = vst.msk [vmem:[#allocation2 + $0x30] sm:$0xff] %vm1855_vm3, %v11897_v14  ;;  %11995 = vmatprep.mubr.msk.bf16.mxu0 %vm736_vm2, %v13480_v11 }
  0xd7   :  { %v1088_v15 = vpop.f32.mrf.mxu0  ;;  %v14017_v24 = vld [vmem:[#allocation2] sm:$0xff] }
  0xd8   :  { %1860 = vst.msk [vmem:[#allocation2 + $0x20] sm:$0xff] %vm1855_vm3, %v1088_v15 }
  0xd9   :  { %v11898_v16 = vpop.f32.mrf.mxu0  ;;  %v3066_v20 = vld [vmem:[#allocation2 + $0x18] sm:$0xf] }
  0xda   :  { %1863 = vst.msk [vmem:[#allocation2 + $0x38] sm:$0xff] %vm1855_vm3, %v11898_v16 }
  0xdb   :  { %v1091_v19 = vpop.f32.mrf.mxu0  ;;  %v14032_v32 = vld [vmem:[#allocation2 + $0x8] sm:$0xff] }
  0xdc   :  { %1861 = vst.msk [vmem:[#allocation2 + $0x28] sm:$0xff] %vm1855_vm3, %v1091_v19 }
  0xdd   :  { %v3070_v21 = vld [vmem:[#allocation2 + $0x34] sm:$0xf]  ;;  %v11901_v22 = vpop.f32.mrf.mxu0  ;;  %11996 = vmatmul.mubr.msk.bf16.gmra.mxu0 %vm736_vm2, %v13481_v17 }
  0xde   :  { %v3074_v23 = vmax.f32 %v3066_v20, %v3070_v21  ;;  %1866 = vst.msk [vmem:[#allocation2 + $0x50] sm:$0xff] %vm1855_vm3, %v11901_v22  ;;  %11999 = vmatprep.mubr.msk.bf16.mxu0 %vm736_vm2, %v13482_v18 }
  0xdf   :  { %v3067_v25 = vld [vmem:[#allocation2 + $0x1c] sm:$0xff]  ;;  %v1104_v26 = vpop.f32.mrf.mxu0 }
  0xe0   :  { %3079 = vst.msk [vmem:[#allocation3 + $0x18] sm:$0xf] %vm3078_vm7, %v3074_v23  ;;  %v3071_v27 = vmax.f32 %v14017_v24, %v3067_v25  ;;  %v13491_v25 = vld [vmem:[%s18486_s0 + $0x1f8] sm:$0xff]  }
  0xe1   :  { %1864 = vst.msk [vmem:[#allocation2 + $0x40] sm:$0xff] %vm1855_vm3, %v1104_v26  ;;  %v11902_v28 = vpop.f32.mrf.mxu0  ;;  %v14043_v40 = vld [vmem:[#allocation2 + $0x38] sm:$0xff]  ;;  %v13492_v26 = vld [vmem:[%s18486_s0 + $0x200] sm:$0xff]  }
  0xe2   :  { %3075 = vst.msk [vmem:[#allocation3] sm:$0xff] %vm1855_vm3, %v3071_v27  ;;  %1867 = vst.msk [vmem:[#allocation2 + $0x58] sm:$0xff] %vm1855_vm3, %v11902_v28 }
  0xe3   :  { %v3068_v33 = vld [vmem:[#allocation2 + $0x24] sm:$0xff]  ;;  %v3069_v34 = vld [vmem:[#allocation2 + $0x2c] sm:$0xff]  ;;  %v1107_v35 = vpop.f32.mrf.mxu0 }
  0xe4   :  { %v3072_v36 = vmax.f32 %v14032_v32, %v3068_v33  ;;  %v3073_v37 = vmax.f32 %v14025_v30, %v3069_v34  ;;  %1865 = vst.msk [vmem:[#allocation2 + $0x48] sm:$0xff] %vm1855_vm3, %v1107_v35  ;;  %v13493_v33 = vld [vmem:[%s18486_s0 + $0x208] sm:$0xff]  }
  0xe5   :  { %v11905_v38 = vpop.f32.mrf.mxu0  ;;  %12000 = vmatmul.mubr.msk.bf16.gmra.mxu0 %vm736_vm2, %v13483_v29  ;;  %v3083_v54 = vld [vmem:[#allocation2 + $0x50] sm:$0xf] }
  0xe6   :  { %3076 = vst.msk [vmem:[#allocation3 + $0x8] sm:$0xff] %vm1855_vm3, %v3072_v36  ;;  %3077 = vst.msk [vmem:[#allocation3 + $0x10] sm:$0xff] %vm1855_vm3, %v3073_v37  ;;  %12003 = vmatprep.mubr.msk.bf16.mxu0 %vm736_vm2, %v13484_v31 }
  0xe7   :  { %1870 = vst.msk [vmem:[#allocation2 + $0x70] sm:$0xff] %vm1855_vm3, %v11905_v38  ;;  %v1120_v39 = vpop.f32.mrf.mxu0 }
  0xe8   :  { %1868 = vst.msk [vmem:[#allocation2 + $0x60] sm:$0xff] %vm1855_vm3, %v1120_v39  ;;  %v14058_v48 = vld [vmem:[#allocation2 + $0x40] sm:$0xff] }
  0xe9   :  { %v3084_v41 = vld [vmem:[#allocation2 + $0x54] sm:$0xff]  ;;  %v11906_v42 = vpop.f32.mrf.mxu0 }
  0xea   :  { %v3088_v44 = vmax.f32 %v14043_v40, %v3084_v41  ;;  %1871 = vst.msk [vmem:[#allocation2 + $0x78] sm:$0xff] %vm1855_vm3, %v11906_v42  ;;  %v13496_v42 = vld [vmem:[%s18486_s0 + $0x210] sm:$0xff]  }
  0xeb   :  { %v1123_v46 = vpop.f32.mrf.mxu0  ;;  %v14070_v56 = vld [vmem:[#allocation2 + $0x48] sm:$0xff] }
  0xec   :  { %3092 = vst.msk [vmem:[#allocation3 + $0x1c] sm:$0xff] %vm1855_vm3, %v3088_v44  ;;  %1869 = vst.msk [vmem:[#allocation2 + $0x68] sm:$0xff] %vm1855_vm3, %v1123_v46 }
  0xed   :  { %v11909_v47 = vpop.f32.mrf.mxu0  ;;  %12004 = vmatmul.mubr.msk.bf16.gmra.mxu0 %vm736_vm2, %v13485_v43 }
  0xee   :  { %1874 = vst.msk [vmem:[#allocation2 + $0x90] sm:$0xff] %vm1855_vm3, %v11909_v47  ;;  %12007 = vmatprep.mubr.msk.bf16.mxu0 %vm736_vm2, %v13486_v45  ;;  %v14090_v10 = vld [vmem:[#allocation2 + $0x70] sm:$0xff] }
  0xef   :  { %v3085_v49 = vld [vmem:[#allocation2 + $0x5c] sm:$0xff]  ;;  %v1136_v50 = vpop.f32.mrf.mxu0 }
  0xf0   :  { %v3089_v51 = vmax.f32 %v14058_v48, %v3085_v49  ;;  %1872 = vst.msk [vmem:[#allocation2 + $0x80] sm:$0xff] %vm1855_vm3, %v1136_v50 }
  0xf1   :  { %v11910_v52 = vpop.f32.mrf.mxu0  ;;  %v14080_v0 = vld [vmem:[#allocation2 + $0x78] sm:$0xff] }
  0xf2   :  { %3093 = vst.msk [vmem:[#allocation3 + $0x24] sm:$0xff] %vm1855_vm3, %v3089_v51  ;;  %1875 = vst.msk [vmem:[#allocation2 + $0x98] sm:$0xff] %vm1855_vm3, %v11910_v52 }
  0xf3   :  { %v3086_v57 = vld [vmem:[#allocation2 + $0x64] sm:$0xff]  ;;  %v3087_v58 = vld [vmem:[#allocation2 + $0x6c] sm:$0xf]  ;;  %v1139_v59 = vpop.f32.mrf.mxu0 }
  0xf4   :  { %v3090_v60 = vmax.f32 %v14070_v56, %v3086_v57  ;;  %v3091_v61 = vmax.f32 %v3083_v54, %v3087_v58  ;;  %1873 = vst.msk [vmem:[#allocation2 + $0x88] sm:$0xff] %vm1855_vm3, %v1139_v59  ;;  %v13497_v54 = vld [vmem:[%s18486_s0 + $0x218] sm:$0xff]  }
  0xf5   :  { %v11913_v62 = vpop.f32.mrf.mxu0  ;;  %12008 = vmatmul.mubr.msk.bf16.gmra.mxu0 %vm736_vm2, %v13487_v53 }
  0xf6   :  { %3094 = vst.msk [vmem:[#allocation3 + $0x2c] sm:$0xff] %vm1855_vm3, %v3090_v60  ;;  %1878 = vst.msk [vmem:[#allocation2 + $0xb0] sm:$0xff] %vm1855_vm3, %v11913_v62  ;;  %12011 = vmatprep.mubr.msk.bf16.mxu0 %vm736_vm2, %v13488_v55  ;;  %v13498_v55 = vld [vmem:[%s18486_s0 + $0x220] sm:$0xff]  }
  0xf7   :  { %3095 = vst.msk [vmem:[#allocation3 + $0x34] sm:$0xf] %vm3078_vm7, %v3091_v61  ;;  %v1152_v63 = vpop.f32.mrf.mxu0  ;;  %v14096_v16 = vld [vmem:[#allocation2 + $0x80] sm:$0xff] }
  0xf8   :  { %1876 = vst.msk [vmem:[#allocation2 + $0xa0] sm:$0xff] %vm1855_vm3, %v1152_v63 }
  0xf9   :  { %v3101_v1 = vld [vmem:[#allocation2 + $0x94] sm:$0xff]  ;;  %v11914_v5 = vpop.f32.mrf.mxu0 }
  0xfa   :  { %v3105_v8 = vmax.f32 %v14080_v0, %v3101_v1  ;;  %1879 = vst.msk [vmem:[#allocation2 + $0xb8] sm:$0xff] %vm1855_vm3, %v11914_v5  ;;  %v2135_v1 = vld [vmem:[#allocation2 + $0x68] sm:$0xff] }
  0xfb   :  { %v3100_v11 = vld [vmem:[#allocation2 + $0x8c] sm:$0xff]  ;;  %v1155_v13 = vpop.f32.mrf.mxu0  ;;  %v3099_v17 = vld [vmem:[#allocation2 + $0x88] sm:$0xf] }
  0xfc   :  { %3109 = vst.msk [vmem:[#allocation3 + $0x40] sm:$0xff] %vm1855_vm3, %v3105_v8  ;;  %v3104_v14 = vmax.f32 %v14090_v10, %v3100_v11  ;;  %1877 = vst.msk [vmem:[#allocation2 + $0xa8] sm:$0xff] %vm1855_vm3, %v1155_v13  ;;  %v13499_v13 = vld [vmem:[%s18486_s0 + $0x228] sm:$0xff]  }
  0xfd   :  { %v11917_v15 = vpop.f32.mrf.mxu0  ;;  %12012 = vmatmul.mubr.msk.bf16.gmra.mxu0 %vm736_vm2, %v13489_v6  ;;  %v14122_v38 = vld [vmem:[#allocation2 + $0xb0] sm:$0xff] }
  0xfe   :  { %3108 = vst.msk [vmem:[#allocation3 + $0x38] sm:$0xff] %vm1855_vm3, %v3104_v14  ;;  %1882 = vst.msk [vmem:[#allocation2 + $0xd0] sm:$0xff] %vm1855_vm3, %v11917_v15  ;;  %12015 = vmatprep.mubr.msk.bf16.mxu0 %vm736_vm2, %v13490_v9  ;;  %v2134_v9 = vld [vmem:[#allocation2 + $0x60] sm:$0xff]  ;;  %v2133_v14 = vld [vmem:[#allocation2 + $0x58] sm:$0xff] }
  0xff   :  { %v3102_v18 = vld [vmem:[#allocation2 + $0x9c] sm:$0xff]  ;;  %v3103_v19 = vld [vmem:[#allocation2 + $0xa4] sm:$0xf]  ;;  %v1168_v20 = vpop.f32.mrf.mxu0  ;;  %v13500_v15 = vld [vmem:[%s18486_s0 + $0x230] sm:$0xff]  }
 0x100   :  { %v3106_v21 = vmax.f32 %v14096_v16, %v3102_v18  ;;  %v3107_v22 = vmax.f32 %v3099_v17, %v3103_v19  ;;  %1880 = vst.msk [vmem:[#allocation2 + $0xc0] sm:$0xff] %vm1855_vm3, %v1168_v20 }
 0x101   :  { %v11918_v23 = vpop.f32.mrf.mxu0  ;;  %v14116_v31 = vld [vmem:[#allocation2 + $0xb8] sm:$0xff] }
 0x102   :  { %3110 = vst.msk [vmem:[#allocation3 + $0x48] sm:$0xff] %vm1855_vm3, %v3106_v21  ;;  %1883 = vst.msk [vmem:[#allocation2 + $0xd8] sm:$0xff] %vm1855_vm3, %v11918_v23  ;;  %v2132_v23 = vld [vmem:[#allocation2 + $0x50] sm:$0xff] }
 0x103   :  { %3111 = vst.msk [vmem:[#allocation3 + $0x50] sm:$0xf] %vm3078_vm7, %v3107_v22  ;;  %v1171_v27 = vpop.f32.mrf.mxu0  ;;  %v14129_v43 = vld [vmem:[#allocation2 + $0xa8] sm:$0xff] }
 0x104   :  { %1881 = vst.msk [vmem:[#allocation2 + $0xc8] sm:$0xff] %vm1855_vm3, %v1171_v27 }
 0x105   :  { %v11921_v28 = vpop.f32.mrf.mxu0  ;;  %12016 = vmatmul.mubr.msk.bf16.gmra.mxu0 %vm736_vm2, %v13491_v25  ;;  %v2148_v20 = vld [vmem:[#allocation2 + $0xd0] sm:$0xff] }
 0x106   :  { %1886 = vst.msk [vmem:[#allocation2 + $0xf0] sm:$0xff] %vm1855_vm3, %v11921_v28  ;;  %12019 = vmatprep.mubr.msk.bf16.mxu0 %vm736_vm2, %v13492_v26 }
 0x107   :  { %v1184_v29 = vpop.f32.mrf.mxu0  ;;  %v3115_v34 = vld [vmem:[#allocation2 + $0xc0] sm:$0xf] }
 0x108   :  { %1884 = vst.msk [vmem:[#allocation2 + $0xe0] sm:$0xff] %vm1855_vm3, %v1184_v29  ;;  %v2146_v28 = vld [vmem:[#allocation2 + $0xc0] sm:$0xff] }
 0x109   :  { %v3118_v35 = vld [vmem:[#allocation2 + $0xd4] sm:$0xff]  ;;  %v3119_v36 = vld [vmem:[#allocation2 + $0xdc] sm:$0xf]  ;;  %v11922_v37 = vpop.f32.mrf.mxu0 }
 0x10a   :  { %v3122_v39 = vmax.f32 %v14116_v31, %v3118_v35  ;;  %v3123_v41 = vmax.f32 %v3115_v34, %v3119_v36  ;;  %1887 = vst.msk [vmem:[#allocation2 + $0xf8] sm:$0xff] %vm1855_vm3, %v11922_v37  ;;  %v13501_v35 = vld [vmem:[%s18486_s0 + $0x238] sm:$0xff]  }
 0x10b   :  { %v3116_v44 = vld [vmem:[#allocation2 + $0xc4] sm:$0xff]  ;;  %v3117_v45 = vld [vmem:[#allocation2 + $0xcc] sm:$0xff]  ;;  %v1187_v46 = vpop.f32.mrf.mxu0 }
 0x10c   :  { %3126 = vst.msk [vmem:[#allocation3 + $0x64] sm:$0xff] %vm1855_vm3, %v3122_v39  ;;  %v3120_v47 = vmax.f32 %v14129_v43, %v3116_v44  ;;  %v3121_v49 = vmax.f32 %v14122_v38, %v3117_v45  ;;  %1885 = vst.msk [vmem:[#allocation2 + $0xe8] sm:$0xff] %vm1855_vm3, %v1187_v46  ;;  %v2147_v26 = vld [vmem:[#allocation2 + $0xc8] sm:$0xff]  ;;  %v2142_v44 = vld [vmem:[#allocation2 + $0xa0] sm:$0xff] }
 0x10d   :  { %3127 = vst.msk [vmem:[#allocation3 + $0x6c] sm:$0xf] %vm3078_vm7, %v3123_v41  ;;  %v11925_v50 = vpop.f32.mrf.mxu0  ;;  %12020 = vmatmul.mubr.msk.bf16.gmra.mxu0 %vm736_vm2, %v13493_v33  ;;  %v3130_v57 = vld [vmem:[#allocation2 + $0xf0] sm:$0xff]  ;;  %v2126_v45 = vld [vmem:[#allocation2 + $0x20] sm:$0xff] }
 0x10e   :  { %3124 = vst.msk [vmem:[#allocation3 + $0x54] sm:$0xff] %vm1855_vm3, %v3120_v47  ;;  %3125 = vst.msk [vmem:[#allocation3 + $0x5c] sm:$0xff] %vm1855_vm3, %v3121_v49  ;;  %12023 = vmatprep.mubr.msk.bf16.mxu0 %vm736_vm2, %v13496_v42  ;;  %v2141_v47 = vld [vmem:[#allocation2 + $0x98] sm:$0xff]  ;;  %v13504_v49 = vld [vmem:[%s18486_s0 + $0x250] sm:$0xff]  }
 0x10f   :  { %1890 = vst.msk [vmem:[#allocation2 + $0x110] sm:$0xff] %vm1855_vm3, %v11925_v50  ;;  %v1200_v51 = vpop.f32.mrf.mxu0  ;;  %v3128_v5 = vld [vmem:[#allocation2 + $0xe0] sm:$0xff]  ;;  %v2058_v50 = vadd.s32 384, %v13978_v3 }
 0x110   :  { %1888 = vst.msk [vmem:[#allocation2 + $0x100] sm:$0xff] %vm1855_vm3, %v1200_v51 }
 0x111   :  { %v11926_v52 = vpop.f32.mrf.mxu0  ;;  %v2153_v53 = vld [vmem:[#allocation2 + $0xf8] sm:$0xff]  ;;  %vm2072_vm10 = vcmp.ge.s32.totalorder %v2058_v50, %v13981_v4  ;;  %vm2086_vm11 = vcmp.lt.s32.totalorder %v2058_v50, %v13988_v7  ;;  %v13518_v50 = vld [vmem:[%s18486_s0 + $0x290] sm:$0xff]  }
 0x112   :  { %1891 = vst.msk [vmem:[#allocation2 + $0x118] sm:$0xff] %vm1855_vm3, %v11926_v52  ;;  %11265 = vmatprep.subr.mxu1 %v2153_v53  ;;  %v3131_v59 = vld [vmem:[#allocation2 + $0xf8] sm:$0xf]  ;;  %v2140_v53 = vld [vmem:[#allocation2 + $0x90] sm:$0xff]  ;;  %vm2099_vm13 = vmand %vm2072_vm10, %vm2086_vm11 }
 0x113   :  { %v1203_v58 = vpop.f32.mrf.mxu0  ;;  %11266 = vmatpush3.msra.mxu1 %v14080_v0  ;;  %v3129_v60 = vld [vmem:[#allocation2 + $0xe8] sm:$0xff]  ;;  %v2125_v52 = vld [vmem:[#allocation2 + $0x18] sm:$0xff] }
 0x114   :  { %1889 = vst.msk [vmem:[#allocation2 + $0x108] sm:$0xff] %vm1855_vm3, %v1203_v58  ;;  %11267 = vmatprep.subr.mxu1 %v3130_v57 }
 0x115   :  { %v11929_v62 = vpop.f32.mrf.mxu0  ;;  %12024 = vmatmul.mubr.msk.bf16.gmra.mxu0 %vm736_vm2, %v13497_v54  ;;  %11268 = vmatpush3.msra.mxu1 %v14090_v10  ;;  %v2149_v10 = vld [vmem:[#allocation2 + $0xd8] sm:$0xff] }
 0x116   :  { %v3135_v61 = vld [vmem:[#allocation2 + $0x114] sm:$0xf]  ;;  %1894 = vst.msk [vmem:[#allocation2 + $0x130] sm:$0xff] %vm1855_vm3, %v11929_v62  ;;  %11269 = vmatprep.subr.mxu1 %v3129_v60  ;;  %12027 = vmatprep.mubr.msk.bf16.mxu0 %vm736_vm2, %v13498_v55  ;;  %v2139_v62 = vld [vmem:[#allocation2 + $0x88] sm:$0xff] }
 0x117   :  { %v3139_v63 = vmax.f32 %v3131_v59, %v3135_v61  ;;  %v3132_v0 = vld [vmem:[#allocation2 + $0xfc] sm:$0xff]  ;;  %v1216_v6 = vpop.f32.mrf.mxu0  ;;  %11270 = vmatpush3.msra.mxu1 %v2135_v1 }
 0x118   :  { %v3136_v8 = vmax.f32 %v3128_v5, %v3132_v0  ;;  %1892 = vst.msk [vmem:[#allocation2 + $0x120] sm:$0xff] %vm1855_vm3, %v1216_v6  ;;  %11271 = vmatprep.subr.mxu1 %v3128_v5  ;;  %v13505_v0 = vld [vmem:[%s18486_s0 + $0x258] sm:$0xff]   ;;  %v13508_v6 = vld [vmem:[%s18486_s0 + $0x260] sm:$0xff]  }
 0x119   :  { %3143 = vst.msk [vmem:[#allocation3 + $0x88] sm:$0xf] %vm3078_vm7, %v3139_v63  ;;  %v11930_v11 = vpop.f32.mrf.mxu0  ;;  %11272 = vmatpush3.msra.mxu1 %v2134_v9  ;;  %v14173_v29 = vld [vmem:[#allocation2 + $0x118] sm:$0xff] }
 0x11a   :  { %3140 = vst.msk [vmem:[#allocation3 + $0x70] sm:$0xff] %vm1855_vm3, %v3136_v8  ;;  %1895 = vst.msk [vmem:[#allocation2 + $0x138] sm:$0xff] %vm1855_vm3, %v11930_v11  ;;  %11273 = vmatprep.subr.mxu1 %v2149_v10 }
 0x11b   :  { %v3133_v17 = vld [vmem:[#allocation2 + $0x104] sm:$0xff]  ;;  %v3134_v18 = vld [vmem:[#allocation2 + $0x10c] sm:$0xff]  ;;  %v1219_v19 = vpop.f32.mrf.mxu0  ;;  %11274 = vmatpush3.msra.mxu1 %v2133_v14 }
 0x11c   :  { %v3137_v21 = vmax.f32 %v3129_v60, %v3133_v17  ;;  %v3138_v22 = vmax.f32 %v3130_v57, %v3134_v18  ;;  %1893 = vst.msk [vmem:[#allocation2 + $0x128] sm:$0xff] %vm1855_vm3, %v1219_v19  ;;  %11275 = vmatprep.subr.mxu1 %v2148_v20 }
 0x11d   :  { %v11933_v25 = vpop.f32.mrf.mxu0  ;;  %12028 = vmatmul.mubr.msk.bf16.gmra.mxu0 %vm736_vm2, %v13499_v13  ;;  %11276 = vmatpush3.msra.mxu1 %v2132_v23  ;;  %v3147_v51 = vld [vmem:[#allocation2 + $0x130] sm:$0xf] }
 0x11e   :  { %3141 = vst.msk [vmem:[#allocation3 + $0x78] sm:$0xff] %vm1855_vm3, %v3137_v21  ;;  %3142 = vst.msk [vmem:[#allocation3 + $0x80] sm:$0xff] %vm1855_vm3, %v3138_v22  ;;  %11277 = vmatprep.subr.mxu1 %v2147_v26  ;;  %12031 = vmatprep.mubr.msk.bf16.mxu0 %vm736_vm2, %v13500_v15  ;;  %v13509_v21 = vld [vmem:[%s18486_s0 + $0x268] sm:$0xff]   ;;  %v13512_v22 = vld [vmem:[%s18486_s0 + $0x270] sm:$0xff]  }
 0x11f   :  { %1898 = vst.msk [vmem:[#allocation2 + $0x150] sm:$0xff] %vm1855_vm3, %v11933_v25  ;;  %v1232_v27 = vpop.f32.mrf.mxu0  ;;  %11278 = vmatpush3.msra.mxu1 %v14070_v56  ;;  %v13502_v56 = vld [vmem:[%s18486_s0 + $0x240] sm:$0xff]  }
 0x120   :  { %1896 = vst.msk [vmem:[#allocation2 + $0x140] sm:$0xff] %vm1855_vm3, %v1232_v27  ;;  %11279 = vmatprep.subr.mxu1 %v2146_v28  ;;  %v14193_v41 = vld [vmem:[#allocation2 + $0x120] sm:$0xff]  ;;  %v13513_v28 = vld [vmem:[%s18486_s0 + $0x278] sm:$0xff]  }
 0x121   :  { %v3148_v33 = vld [vmem:[#allocation2 + $0x134] sm:$0xff]  ;;  %v11934_v34 = vpop.f32.mrf.mxu0  ;;  %11280 = vmatpush3.msra.mxu1 %v14058_v48 }
 0x122   :  { %v3152_v36 = vmax.f32 %v14173_v29, %v3148_v33  ;;  %1899 = vst.msk [vmem:[#allocation2 + $0x158] sm:$0xff] %vm1855_vm3, %v11934_v34  ;;  %11281 = vmatprep.subr.mxu1 %v14116_v31  ;;  %v2128_v48 = vld [vmem:[#allocation2 + $0x30] sm:$0xff]  ;;  %v2127_v31 = vld [vmem:[#allocation2 + $0x28] sm:$0xff] }
 0x123   :  { %v1235_v37 = vpop.f32.mrf.mxu0  ;;  %11282 = vmatpush3.msra.mxu1 %v14043_v40  ;;  %v14206_v54 = vld [vmem:[#allocation2 + $0x128] sm:$0xff] }
 0x124   :  { %3156 = vst.msk [vmem:[#allocation3 + $0x8c] sm:$0xff] %vm1855_vm3, %v3152_v36  ;;  %1897 = vst.msk [vmem:[#allocation2 + $0x148] sm:$0xff] %vm1855_vm3, %v1235_v37  ;;  %11283 = vmatprep.subr.mxu1 %v14122_v38 }
 0x125   :  { %v11937_v39 = vpop.f32.mrf.mxu0  ;;  %12032 = vmatmul.mubr.msk.bf16.gmra.mxu0 %vm736_vm2, %v13501_v35  ;;  %11284 = vmatpush3.msra.mxu1 %v2128_v48 }
 0x126   :  { %1902 = vst.msk [vmem:[#allocation2 + $0x170] sm:$0xff] %vm1855_vm3, %v11937_v39  ;;  %11285 = vmatprep.subr.mxu1 %v14129_v43  ;;  %12035 = vmatprep.mubr.msk.bf16.mxu0 %vm736_vm2, %v13502_v56  ;;  %v13503_v43 = vld [vmem:[%s18486_s0 + $0x248] sm:$0xff]   ;;  %v13516_v39 = vld [vmem:[%s18486_s0 + $0x280] sm:$0xff]  }
 0x127   :  { %v3149_v40 = vld [vmem:[#allocation2 + $0x13c] sm:$0xff]  ;;  %v1248_v42 = vpop.f32.mrf.mxu0  ;;  %11286 = vmatpush3.msra.mxu1 %v2127_v31 }
 0x128   :  { %v3153_v38 = vmax.f32 %v14193_v41, %v3149_v40  ;;  %1900 = vst.msk [vmem:[#allocation2 + $0x160] sm:$0xff] %vm1855_vm3, %v1248_v42  ;;  %11287 = vmatprep.subr.mxu1 %v2142_v44 }
 0x129   :  { %v11938_v46 = vpop.f32.mrf.mxu0  ;;  %11288 = vmatpush3.msra.mxu1 %v2126_v45 }
 0x12a   :  { %3157 = vst.msk [vmem:[#allocation3 + $0x94] sm:$0xff] %vm1855_vm3, %v3153_v38  ;;  %1903 = vst.msk [vmem:[#allocation2 + $0x178] sm:$0xff] %vm1855_vm3, %v11938_v46  ;;  %11289 = vmatprep.subr.mxu1 %v2141_v47 }
 0x12b   :  { %v3150_v55 = vld [vmem:[#allocation2 + $0x144] sm:$0xff]  ;;  %v3151_v57 = vld [vmem:[#allocation2 + $0x14c] sm:$0xf]  ;;  %v1251_v58 = vpop.f32.mrf.mxu0  ;;  %11290 = vmatpush3.msra.mxu1 %v2125_v52 }
 0x12c   :  { %v3154_v59 = vmax.f32 %v14206_v54, %v3150_v55  ;;  %v3155_v60 = vmax.f32 %v3147_v51, %v3151_v57  ;;  %1901 = vst.msk [vmem:[#allocation2 + $0x168] sm:$0xff] %vm1855_vm3, %v1251_v58  ;;  %11291 = vmatprep.subr.mxu1 %v2140_v53 }
 0x12d   :  { %v11941_v61 = vpop.f32.mrf.mxu0  ;;  %12036 = vmatmul.mubr.msk.bf16.gmra.mxu0 %vm736_vm2, %v13503_v43  ;;  %11292 = vmatpush3.msra.mxu1 %v14025_v30  ;;  %v14228_v30 = vld [vmem:[#allocation2 + $0x158] sm:$0xff] }
 0x12e   :  { %3158 = vst.msk [vmem:[#allocation3 + $0x9c] sm:$0xff] %vm1855_vm3, %v3154_v59  ;;  %1906 = vst.msk [vmem:[#allocation2 + $0x190] sm:$0xff] %vm1855_vm3, %v11941_v61  ;;  %11293 = vmatprep.subr.mxu1 %v2139_v62  ;;  %12039 = vmatprep.mubr.msk.bf16.mxu0 %vm736_vm2, %v13504_v49  ;;  %v13517_v49 = vld [vmem:[%s18486_s0 + $0x288] sm:$0xff]  }
 0x12f   :  { %3159 = vst.msk [vmem:[#allocation3 + $0xa4] sm:$0xf] %vm3078_vm7, %v3155_v60  ;;  %v1264_v63 = vpop.f32.mrf.mxu0  ;;  %11294 = vmatpush3.msra.mxu1 %v14032_v32  ;;  %v14247_v10 = vld [vmem:[#allocation2 + $0x160] sm:$0xff] }
 0x130   :  { %1904 = vst.msk [vmem:[#allocation2 + $0x180] sm:$0xff] %vm1855_vm3, %v1264_v63  ;;  %11295 = vmatprep.subr.mxu1 %v14096_v16  ;;  %v14240_v16 = vld [vmem:[#allocation2 + $0x150] sm:$0xff] }
 0x131   :  { %v3165_v1 = vld [vmem:[#allocation2 + $0x174] sm:$0xff]  ;;  %v11942_v5 = vpop.f32.mrf.mxu0  ;;  %11296 = vmatpush3.msra.mxu1 %v14017_v24 }
 0x132   :  { %v3169_v32 = vmax.f32 %v14228_v30, %v3165_v1  ;;  %1907 = vst.msk [vmem:[#allocation2 + $0x198] sm:$0xff] %vm1855_vm3, %v11942_v5  ;;  %10744 = vmatmul.mubr.msk.f32.vlgmr.msra.gmra.mxu1 %vm2096_vm12, %v13683_v12  ;;  %v13519_v1 = vld [vmem:[%s18486_s0 + $0x298] sm:$0xff]   ;;  %v13520_v5 = vld [vmem:[%s18486_s0 + $0x2a0] sm:$0xff]   ;;  %vm13685_vm12 = vmmov 0  }
 0x133   :  { %v3164_v8 = vld [vmem:[#allocation2 + $0x16c] sm:$0xff]  ;;  %v1267_v9 = vpop.f32.mrf.mxu0  ;;  %10745 = vmatprep.mubr.msk.f32.mxu1 %vm2099_vm13, %v13683_v12  ;;  %v3163_v13 = vld [vmem:[#allocation2 + $0x168] sm:$0xf] }
 0x134   :  { %3173 = vst.msk [vmem:[#allocation3 + $0xb0] sm:$0xff] %vm1855_vm3, %v3169_v32  ;;  %v3168_v24 = vmax.f32 %v14240_v16, %v3164_v8  ;;  %1905 = vst.msk [vmem:[#allocation2 + $0x188] sm:$0xff] %vm1855_vm3, %v1267_v9 }
 0x135   :  { %v11945_v11 = vpop.f32.mrf.mxu0  ;;  %12040 = vmatmul.mubr.msk.bf16.gmra.mxu0 %vm736_vm2, %v13505_v0  ;;  %v14273_v56 = vld [vmem:[#allocation2 + $0x190] sm:$0xff] }
 0x136   :  { %3172 = vst.msk [vmem:[#allocation3 + $0xa8] sm:$0xff] %vm1855_vm3, %v3168_v24  ;;  %1910 = vst.msk [vmem:[#allocation2 + $0x1b0] sm:$0xff] %vm1855_vm3, %v11945_v11  ;;  %12043 = vmatprep.mubr.msk.bf16.mxu0 %vm736_vm2, %v13508_v6  ;;  %v2169_v6 = vld [vmem:[#allocation2 + $0x178] sm:$0xff] }
 0x137   :  { %v3166_v14 = vld [vmem:[#allocation2 + $0x17c] sm:$0xff]  ;;  %v3167_v15 = vld [vmem:[#allocation2 + $0x184] sm:$0xf]  ;;  %v1280_v17 = vpop.f32.mrf.mxu0 }
 0x138   :  { %v3170_v18 = vmax.f32 %v14247_v10, %v3166_v14  ;;  %v3171_v19 = vmax.f32 %v3163_v13, %v3167_v15  ;;  %1908 = vst.msk [vmem:[#allocation2 + $0x1a0] sm:$0xff] %vm1855_vm3, %v1280_v17  ;;  %v2168_v15 = vld [vmem:[#allocation2 + $0x170] sm:$0xff] }
 0x139   :  { %v11946_v20 = vpop.f32.mrf.mxu0  ;;  %v14267_v27 = vld [vmem:[#allocation2 + $0x198] sm:$0xff] }
 0x13a   :  { %3174 = vst.msk [vmem:[#allocation3 + $0xb8] sm:$0xff] %vm1855_vm3, %v3170_v18  ;;  %1911 = vst.msk [vmem:[#allocation2 + $0x1b8] sm:$0xff] %vm1855_vm3, %v11946_v20 }
 0x13b   :  { %3175 = vst.msk [vmem:[#allocation3 + $0xc0] sm:$0xf] %vm3078_vm7, %v3171_v19  ;;  %v1283_v23 = vpop.f32.mrf.mxu0  ;;  %v14280_v31 = vld [vmem:[#allocation2 + $0x188] sm:$0xff] }
 0x13c   :  { %1909 = vst.msk [vmem:[#allocation2 + $0x1a8] sm:$0xff] %vm1855_vm3, %v1283_v23  ;;  %v2167_v19 = vld [vmem:[#allocation2 + $0x168] sm:$0xff] }
 0x13d   :  { %v11949_v25 = vpop.f32.mrf.mxu0  ;;  %12044 = vmatmul.mubr.msk.bf16.gmra.mxu0 %vm736_vm2, %v13509_v21 }
 0x13e   :  { %1914 = vst.msk [vmem:[#allocation2 + $0x1d0] sm:$0xff] %vm1855_vm3, %v11949_v25  ;;  %12047 = vmatprep.mubr.msk.bf16.mxu0 %vm736_vm2, %v13512_v22 }
 0x13f   :  { %v1296_v26 = vpop.f32.mrf.mxu0  ;;  %v3179_v33 = vld [vmem:[#allocation2 + $0x1a0] sm:$0xf] }
 0x140   :  { %1912 = vst.msk [vmem:[#allocation2 + $0x1c0] sm:$0xff] %vm1855_vm3, %v1296_v26  ;;  %v13521_v26 = vld [vmem:[%s18486_s0 + $0x2a8] sm:$0xff]  }
 0x141   :  { %v3182_v34 = vld [vmem:[#allocation2 + $0x1b4] sm:$0xff]  ;;  %v3183_v35 = vld [vmem:[#allocation2 + $0x1bc] sm:$0xf]  ;;  %v11950_v36 = vpop.f32.mrf.mxu0 }
 0x142   :  { %v3186_v37 = vmax.f32 %v14267_v27, %v3182_v34  ;;  %v3187_v48 = vmax.f32 %v3179_v33, %v3183_v35  ;;  %1915 = vst.msk [vmem:[#allocation2 + $0x1d8] sm:$0xff] %vm1855_vm3, %v11950_v36  ;;  %v13522_v33 = vld [vmem:[%s18486_s0 + $0x2b0] sm:$0xff]   ;;  %v2163_v35 = vld [vmem:[#allocation2 + $0x148] sm:$0xff] }
 0x143   :  { %v3180_v40 = vld [vmem:[#allocation2 + $0x1a4] sm:$0xff]  ;;  %v3181_v42 = vld [vmem:[#allocation2 + $0x1ac] sm:$0xff]  ;;  %v1299_v44 = vpop.f32.mrf.mxu0 }
 0x144   :  { %3190 = vst.msk [vmem:[#allocation3 + $0xd4] sm:$0xff] %vm1855_vm3, %v3186_v37  ;;  %v3184_v38 = vmax.f32 %v14280_v31, %v3180_v40  ;;  %v3185_v45 = vmax.f32 %v14273_v56, %v3181_v42  ;;  %1913 = vst.msk [vmem:[#allocation2 + $0x1c8] sm:$0xff] %vm1855_vm3, %v1299_v44  ;;  %v13523_v42 = vld [vmem:[%s18486_s0 + $0x2b8] sm:$0xff]   ;;  %v13524_v44 = vld [vmem:[%s18486_s0 + $0x2c0] sm:$0xff]  }
 0x145   :  { %3191 = vst.msk [vmem:[#allocation3 + $0xdc] sm:$0xf] %vm3078_vm7, %v3187_v48  ;;  %v11953_v46 = vpop.f32.mrf.mxu0  ;;  %12048 = vmatmul.mubr.msk.bf16.gmra.mxu0 %vm736_vm2, %v13513_v28  ;;  %v3194_v0 = vld [vmem:[#allocation2 + $0x1d0] sm:$0xff] }
 0x146   :  { %3188 = vst.msk [vmem:[#allocation3 + $0xc4] sm:$0xff] %vm1855_vm3, %v3184_v38  ;;  %3189 = vst.msk [vmem:[#allocation3 + $0xcc] sm:$0xff] %vm1855_vm3, %v3185_v45  ;;  %12051 = vmatprep.mubr.msk.bf16.mxu0 %vm736_vm2, %v13516_v39  ;;  %v2162_v39 = vld [vmem:[#allocation2 + $0x140] sm:$0xff]  ;;  %v2161_v45 = vld [vmem:[#allocation2 + $0x138] sm:$0xff] }
 0x147   :  { %1918 = vst.msk [vmem:[#allocation2 + $0x1f0] sm:$0xff] %vm1855_vm3, %v11953_v46  ;;  %v1312_v47 = vpop.f32.mrf.mxu0  ;;  %v14304_v58 = vld [vmem:[#allocation2 + $0x1c0] sm:$0xff]  ;;  %v2176_v46 = vld [vmem:[#allocation2 + $0x1b0] sm:$0xff] }
 0x148   :  { %1916 = vst.msk [vmem:[#allocation2 + $0x1e0] sm:$0xff] %vm1855_vm3, %v1312_v47 }
 0x149   :  { %v11954_v43 = vpop.f32.mrf.mxu0  ;;  %v3195_v52 = vld [vmem:[#allocation2 + $0x1d8] sm:$0xf] }
 0x14a   :  { %1919 = vst.msk [vmem:[#allocation2 + $0x1f8] sm:$0xff] %vm1855_vm3, %v11954_v43  ;;  %v2181_v25 = vld [vmem:[#allocation2 + $0x1d8] sm:$0xff] }
 0x14b   :  { %v1315_v51 = vpop.f32.mrf.mxu0  ;;  %v3193_v32 = vld [vmem:[#allocation2 + $0x1c8] sm:$0xff] }
 0x14c   :  { %1917 = vst.msk [vmem:[#allocation2 + $0x1e8] sm:$0xff] %vm1855_vm3, %v1315_v51 }
 0x14d   :  { %v11957_v55 = vpop.f32.mrf.mxu0  ;;  %12052 = vmatmul.mubr.msk.bf16.gmra.mxu0 %vm736_vm2, %v13517_v49 }
 0x14e   :  { %v3199_v53 = vld [vmem:[#allocation2 + $0x1f4] sm:$0xf]  ;;  %1922 = vst.msk [vmem:[#allocation2 + $0x210] sm:$0xff] %vm1855_vm3, %v11957_v55  ;;  %12055 = vmatprep.mubr.msk.bf16.mxu0 %vm736_vm2, %v13518_v50 }
 0x14f   :  { %v3203_v57 = vmax.f32 %v3195_v52, %v3199_v53  ;;  %v3196_v59 = vld [vmem:[#allocation2 + $0x1dc] sm:$0xff]  ;;  %v1328_v60 = vpop.f32.mrf.mxu0  ;;  %v2184_v11 = vld [vmem:[#allocation2 + $0x1f0] sm:$0xff] }
 0x150   :  { %v3200_v61 = vmax.f32 %v14304_v58, %v3196_v59  ;;  %1920 = vst.msk [vmem:[#allocation2 + $0x200] sm:$0xff] %vm1855_vm3, %v1328_v60  ;;  %v2182_v21 = vld [vmem:[#allocation2 + $0x1e0] sm:$0xff]  ;;  %v2160_v53 = vld [vmem:[#allocation2 + $0x130] sm:$0xff] }
 0x151   :  { %3207 = vst.msk [vmem:[#allocation3 + $0xf8] sm:$0xf] %vm3078_vm7, %v3203_v57  ;;  %v3208_v62 = vld [vmem:[#allocation2 + $0x1f8] sm:$0xff]  ;;  %v11958_v63 = vpop.f32.mrf.mxu0  ;;  %v2175_v57 = vld [vmem:[#allocation2 + $0x1a8] sm:$0xff]  ;;  %v2174_v60 = vld [vmem:[#allocation2 + $0x1a0] sm:$0xff] }
 0x152   :  { %3204 = vst.msk [vmem:[#allocation3 + $0xe0] sm:$0xff] %vm1855_vm3, %v3200_v61  ;;  %1923 = vst.msk [vmem:[#allocation2 + $0x218] sm:$0xff] %vm1855_vm3, %v11958_v63  ;;  %11300 = vmatprep.subr.mxu1 %v3208_v62 }
 0x153   :  { %v3197_v8 = vld [vmem:[#allocation2 + $0x1e4] sm:$0xff]  ;;  %v3198_v9 = vld [vmem:[#allocation2 + $0x1ec] sm:$0xff]  ;;  %v1331_v24 = vpop.f32.mrf.mxu0  ;;  %11301 = vmatpush3.msra.mxu1 %v2169_v6 }
 0x154   :  { %v3201_v13 = vmax.f32 %v3193_v32, %v3197_v8  ;;  %v3202_v14 = vmax.f32 %v3194_v0, %v3198_v9  ;;  %1921 = vst.msk [vmem:[#allocation2 + $0x208] sm:$0xff] %vm1855_vm3, %v1331_v24  ;;  %11302 = vmatprep.subr.mxu1 %v2184_v11  ;;  %v2183_v18 = vld [vmem:[#allocation2 + $0x1e8] sm:$0xff]  ;;  %v2156_v8 = vld [vmem:[#allocation2 + $0x110] sm:$0xff]  ;;  %v2170_v24 = vld [vmem:[#allocation2 + $0x180] sm:$0xff] }
 0x155   :  { %v11961_v17 = vpop.f32.mrf.mxu0  ;;  %12056 = vmatmul.mubr.msk.bf16.gmra.mxu0 %vm736_vm2, %v13519_v1  ;;  %11303 = vmatpush3.msra.mxu1 %v2168_v15  ;;  %v3211_v38 = vld [vmem:[#allocation2 + $0x210] sm:$0xf]  ;;  %v13525_v1 = vld [vmem:[%s18486_s0 + $0x2c8] sm:$0xff]  }
 0x156   :  { %3205 = vst.msk [vmem:[#allocation3 + $0xe8] sm:$0xff] %vm1855_vm3, %v3201_v13  ;;  %3206 = vst.msk [vmem:[#allocation3 + $0xf0] sm:$0xff] %vm1855_vm3, %v3202_v14  ;;  %11304 = vmatprep.subr.mxu1 %v2183_v18  ;;  %12059 = vmatprep.mubr.msk.bf16.mxu0 %vm736_vm2, %v13520_v5  ;;  %v2060_v5 = vadd.s32 640, %v13978_v3 }
 0x157   :  { %1926 = vst.msk [vmem:[#allocation2 + $0x230] sm:$0xff] %vm1855_vm3, %v11961_v17  ;;  %v1344_v20 = vpop.f32.mrf.mxu0  ;;  %11305 = vmatpush3.msra.mxu1 %v2167_v19  ;;  %v14339_v36 = vld [vmem:[#allocation2 + $0x200] sm:$0xff] }
 0x158   :  { %1924 = vst.msk [vmem:[#allocation2 + $0x220] sm:$0xff] %vm1855_vm3, %v1344_v20  ;;  %11306 = vmatprep.subr.mxu1 %v2182_v21  ;;  %vm2074_vm1 = vcmp.ge.s32.totalorder %v2060_v5, %v13981_v4  ;;  %vm2088_vm4 = vcmp.lt.s32.totalorder %v2060_v5, %v13988_v7  ;;  %v2154_v19 = vld [vmem:[#allocation2 + $0x100] sm:$0xff] }
 0x159   :  { %v3212_v22 = vld [vmem:[#allocation2 + $0x214] sm:$0xff]  ;;  %v11962_v23 = vpop.f32.mrf.mxu0  ;;  %11307 = vmatpush3.msra.mxu1 %v14247_v10 }
 0x15a   :  { %v3216_v28 = vmax.f32 %v3208_v62, %v3212_v22  ;;  %1927 = vst.msk [vmem:[#allocation2 + $0x238] sm:$0xff] %vm1855_vm3, %v11962_v23  ;;  %11308 = vmatprep.subr.mxu1 %v2181_v25 }
 0x15b   :  { %v1347_v34 = vpop.f32.mrf.mxu0  ;;  %11309 = vmatpush3.msra.mxu1 %v14228_v30  ;;  %v14352_v47 = vld [vmem:[#allocation2 + $0x208] sm:$0xff] }
 0x15c   :  { %3220 = vst.msk [vmem:[#allocation3 + $0xfc] sm:$0xff] %vm1855_vm3, %v3216_v28  ;;  %1925 = vst.msk [vmem:[#allocation2 + $0x228] sm:$0xff] %vm1855_vm3, %v1347_v34  ;;  %11310 = vmatprep.subr.mxu1 %v3194_v0 }
 0x15d   :  { %v11965_v10 = vpop.f32.mrf.mxu0  ;;  %12060 = vmatmul.mubr.msk.bf16.gmra.mxu0 %vm736_vm2, %v13521_v26  ;;  %11311 = vmatpush3.msra.mxu1 %v14240_v16  ;;  %v2177_v16 = vld [vmem:[#allocation2 + $0x1b8] sm:$0xff] }
 0x15e   :  { %1930 = vst.msk [vmem:[#allocation2 + $0x250] sm:$0xff] %vm1855_vm3, %v11965_v10  ;;  %11312 = vmatprep.subr.mxu1 %v3193_v32  ;;  %12063 = vmatprep.mubr.msk.bf16.mxu0 %vm736_vm2, %v13522_v33 }
 0x15f   :  { %v3213_v37 = vld [vmem:[#allocation2 + $0x21c] sm:$0xff]  ;;  %v1360_v30 = vpop.f32.mrf.mxu0  ;;  %11313 = vmatpush3.msra.mxu1 %v2163_v35 }
 0x160   :  { %v3217_v48 = vmax.f32 %v14339_v36, %v3213_v37  ;;  %1928 = vst.msk [vmem:[#allocation2 + $0x240] sm:$0xff] %vm1855_vm3, %v1360_v30  ;;  %11314 = vmatprep.subr.mxu1 %v14304_v58  ;;  %v2057_v58 = vadd.s32 256, %v13978_v3 }
 0x161   :  { %v11966_v40 = vpop.f32.mrf.mxu0  ;;  %11315 = vmatpush3.msra.mxu1 %v2162_v39  ;;  %v14364_v61 = vld [vmem:[#allocation2 + $0x238] sm:$0xff] }
 0x162   :  { %3221 = vst.msk [vmem:[#allocation3 + $0x104] sm:$0xff] %vm1855_vm3, %v3217_v48  ;;  %1931 = vst.msk [vmem:[#allocation2 + $0x258] sm:$0xff] %vm1855_vm3, %v11966_v40  ;;  %11316 = vmatprep.subr.mxu1 %v2177_v16  ;;  %vm2071_vm14 = vcmp.ge.s32.totalorder %v2057_v58, %v13981_v4  ;;  %vm2085_vm15 = vcmp.lt.s32.totalorder %v2057_v58, %v13988_v7 }
 0x163   :  { %v3214_v43 = vld [vmem:[#allocation2 + $0x224] sm:$0xff]  ;;  %v3215_v49 = vld [vmem:[#allocation2 + $0x22c] sm:$0xf]  ;;  %v1363_v50 = vpop.f32.mrf.mxu0  ;;  %11317 = vmatpush3.msra.mxu1 %v2161_v45  ;;  %vm14384_vm0 = vmand %vm2071_vm14, %vm2085_vm15 }
 0x164   :  { %v3218_v51 = vmax.f32 %v14352_v47, %v3214_v43  ;;  %v3219_v52 = vmax.f32 %v3211_v38, %v3215_v49  ;;  %1929 = vst.msk [vmem:[#allocation2 + $0x248] sm:$0xff] %vm1855_vm3, %v1363_v50  ;;  %11318 = vmatprep.subr.mxu1 %v2176_v46  ;;  %v12073_v38 = vpop.f32.mrf.mxu1 }
 0x165   :  { %v11969_v55 = vpop.f32.mrf.mxu0  ;;  %12064 = vmatmul.mubr.msk.bf16.gmra.mxu0 %vm736_vm2, %v13523_v42  ;;  %11319 = vmatpush3.msra.mxu1 %v2160_v53  ;;  %2038 = vst.msk [vmem:[#allocation2 + $0x5b0] sm:$0xff] %vm1855_vm3, %v12073_v38 }
 0x166   :  { %3222 = vst.msk [vmem:[#allocation3 + $0x10c] sm:$0xff] %vm1855_vm3, %v3218_v51  ;;  %1934 = vst.msk [vmem:[#allocation2 + $0x270] sm:$0xff] %vm1855_vm3, %v11969_v55  ;;  %11320 = vmatprep.subr.mxu1 %v2175_v57  ;;  %12067 = vmatprep.mubr.msk.bf16.mxu0 %vm736_vm2, %v13524_v44  ;;  %v1792_v46 = vpop.f32.mrf.mxu1 }
 0x167   :  { %3223 = vst.msk [vmem:[#allocation3 + $0x114] sm:$0xf] %vm3078_vm7, %v3219_v52  ;;  %v1376_v59 = vpop.f32.mrf.mxu0  ;;  %11321 = vmatpush3.msra.mxu1 %v14206_v54  ;;  %v14376_v54 = vld [vmem:[#allocation2 + $0x230] sm:$0xff] }
 0x168   :  { %1932 = vst.msk [vmem:[#allocation2 + $0x260] sm:$0xff] %vm1855_vm3, %v1376_v59  ;;  %11322 = vmatprep.subr.mxu1 %v2174_v60  ;;  %2036 = vst.msk [vmem:[#allocation2 + $0x5a0] sm:$0xff] %vm1855_vm3, %v1792_v46  ;;  %v12074_v49 = vpop.f32.mrf.mxu1 }
 0x169   :  { %v3229_v62 = vld [vmem:[#allocation2 + $0x254] sm:$0xff]  ;;  %v11970_v63 = vpop.f32.mrf.mxu0  ;;  %11323 = vmatpush3.msra.mxu1 %v14193_v41  ;;  %2039 = vst.msk [vmem:[#allocation2 + $0x5b8] sm:$0xff] %vm1855_vm3, %v12074_v49 }
 0x16a   :  { %v3233_v0 = vmax.f32 %v14364_v61, %v3229_v62  ;;  %1935 = vst.msk [vmem:[#allocation2 + $0x278] sm:$0xff] %vm1855_vm3, %v11970_v63  ;;  %11324 = vmatprep.subr.mxu1 %v14267_v27  ;;  %v1795_v53 = vpop.f32.mrf.mxu1 }
 0x16b   :  { %v3228_v32 = vld [vmem:[#allocation2 + $0x24c] sm:$0xff]  ;;  %v1379_v41 = vpop.f32.mrf.mxu0  ;;  %11325 = vmatpush3.msra.mxu1 %v14173_v29  ;;  %v14390_v29 = vld [vmem:[#allocation2 + $0x240] sm:$0xff]  ;;  %v3227_v11 = vld [vmem:[#allocation2 + $0x248] sm:$0xf]  ;;  %2037 = vst.msk [vmem:[#allocation2 + $0x5a8] sm:$0xff] %vm1855_vm3, %v1795_v53 }
 0x16c   :  { %3237 = vst.msk [vmem:[#allocation3 + $0x120] sm:$0xff] %vm1855_vm3, %v3233_v0  ;;  %v3232_v6 = vmax.f32 %v14376_v54, %v3228_v32  ;;  %1933 = vst.msk [vmem:[#allocation2 + $0x268] sm:$0xff] %vm1855_vm3, %v1379_v41  ;;  %11326 = vmatprep.subr.mxu1 %v14273_v56  ;;  %v2155_v56 = vld [vmem:[#allocation2 + $0x108] sm:$0xff]  ;;  %v12077_v60 = vpop.f32.mrf.mxu1 }
 0x16d   :  { %v11973_v27 = vpop.f32.mrf.mxu0  ;;  %12068 = vmatmul.mubr.msk.bf16.gmra.mxu0 %vm736_vm2, %v13525_v1  ;;  %11327 = vmatpush3.msra.mxu1 %v2156_v8  ;;  %vm2101_vm2 = vmand %vm2074_vm1, %vm2088_vm4  ;;  %v14413_v34 = vld [vmem:[#allocation2 + $0x270] sm:$0xff]  ;;  %2042 = vst.msk [vmem:[#allocation2 + $0x5d0] sm:$0xff] %vm1855_vm3, %v12077_v60 }
 0x16e   :  { %3236 = vst.msk [vmem:[#allocation3 + $0x118] sm:$0xff] %vm1855_vm3, %v3232_v6  ;;  %1938 = vst.msk [vmem:[#allocation2 + $0x290] sm:$0xff] %vm1855_vm3, %v11973_v27  ;;  %11328 = vmatprep.subr.mxu1 %v14280_v31  ;;  %v1808_v1 = vpop.f32.mrf.mxu1 }
 0x16f   :  { %v3230_v13 = vld [vmem:[#allocation2 + $0x25c] sm:$0xff]  ;;  %v3231_v14 = vld [vmem:[#allocation2 + $0x264] sm:$0xf]  ;;  %v1392_v15 = vpop.f32.mrf.mxu0  ;;  %11329 = vmatpush3.msra.mxu1 %v2155_v56  ;;  %2040 = vst.msk [vmem:[#allocation2 + $0x5c0] sm:$0xff] %vm1855_vm3, %v1808_v1 }
 0x170   :  { %v3234_v17 = vmax.f32 %v14390_v29, %v3230_v13  ;;  %v3235_v18 = vmax.f32 %v3227_v11, %v3231_v14  ;;  %1936 = vst.msk [vmem:[#allocation2 + $0x280] sm:$0xff] %vm1855_vm3, %v1392_v15  ;;  %11330 = vmatprep.subr.mxu1 %v2170_v24  ;;  %v12078_v8 = vpop.f32.mrf.mxu1 }
 0x171   :  { %v11974_v31 = vpop.f32.mrf.mxu0  ;;  %11331 = vmatpush3.msra.mxu1 %v2154_v19  ;;  %v14410_v23 = vld [vmem:[#allocation2 + $0x278] sm:$0xff]  ;;  %2043 = vst.msk [vmem:[#allocation2 + $0x5d8] sm:$0xff] %vm1855_vm3, %v12078_v8 }
 0x172   :  { %3238 = vst.msk [vmem:[#allocation3 + $0x128] sm:$0xff] %vm1855_vm3, %v3234_v17  ;;  %1939 = vst.msk [vmem:[#allocation2 + $0x298] sm:$0xff] %vm1855_vm3, %v11974_v31  ;;  %10746 = vmatmul.mubr.msk.f32.vlgmr.msra.gmra.mxu1 %vm14384_vm0, %v13683_v12  ;;  %v1811_v24 = vpop.f32.mrf.mxu1 }
 0x173   :  { %3239 = vst.msk [vmem:[#allocation3 + $0x130] sm:$0xf] %vm3078_vm7, %v3235_v18  ;;  %v1395_v20 = vpop.f32.mrf.mxu0  ;;  %10747 = vmatprep.mubr.msk.f32.mxu1 %vm2101_vm2, %v13683_v12  ;;  %v14417_v37 = vld [vmem:[#allocation2 + $0x268] sm:$0xff] }
 0x174   :  { %1937 = vst.msk [vmem:[#allocation2 + $0x288] sm:$0xff] %vm1855_vm3, %v1395_v20  ;;  %2041 = vst.msk [vmem:[#allocation2 + $0x5c8] sm:$0xff] %vm1855_vm3, %v1811_v24  ;;  %v12081_v13 = vpop.f32.mrf.mxu1 }
 0x175   :  { %v11977_v21 = vpop.f32.mrf.mxu0  ;;  %2046 = vst.msk [vmem:[#allocation2 + $0x5f0] sm:$0xff] %vm1855_vm3, %v12081_v13 }
 0x176   :  { %1942 = vst.msk [vmem:[#allocation2 + $0x2b0] sm:$0xff] %vm1855_vm3, %v11977_v21  ;;  %v1824_v19 = vpop.f32.mrf.mxu1  ;;  %v7000_v38 = vld [vmem:[#allocation2 + $0x5c0] sm:$0xff] }
 0x177   :  { %v1408_v22 = vpop.f32.mrf.mxu0  ;;  %v3243_v25 = vld [vmem:[#allocation2 + $0x280] sm:$0xf]  ;;  %2044 = vst.msk [vmem:[#allocation2 + $0x5e0] sm:$0xff] %vm1855_vm3, %v1824_v19 }
 0x178   :  { %1940 = vst.msk [vmem:[#allocation2 + $0x2a0] sm:$0xff] %vm1855_vm3, %v1408_v22  ;;  %v12082_v22 = vpop.f32.mrf.mxu1 }
 0x179   :  { %v3246_v26 = vld [vmem:[#allocation2 + $0x294] sm:$0xff]  ;;  %v3247_v28 = vld [vmem:[#allocation2 + $0x29c] sm:$0xf]  ;;  %v11978_v33 = vpop.f32.mrf.mxu0  ;;  %2047 = vst.msk [vmem:[#allocation2 + $0x5f8] sm:$0xff] %vm1855_vm3, %v12082_v22 }
 0x17a   :  { %v3250_v10 = vmax.f32 %v14410_v23, %v3246_v26  ;;  %v3251_v35 = vmax.f32 %v3243_v25, %v3247_v28  ;;  %1943 = vst.msk [vmem:[#allocation2 + $0x2b8] sm:$0xff] %vm1855_vm3, %v11978_v33  ;;  %v6998_v25 = vld [vmem:[#allocation2 + $0x5b0] sm:$0xff]  ;;  %v6999_v26 = vld [vmem:[#allocation2 + $0x5b8] sm:$0xff] }
 0x17b   :  { %v3244_v30 = vld [vmem:[#allocation2 + $0x284] sm:$0xff]  ;;  %v3245_v48 = vld [vmem:[#allocation2 + $0x28c] sm:$0xff]  ;;  %v1411_v39 = vpop.f32.mrf.mxu0 }
 0x17c   :  { %3254 = vst.msk [vmem:[#allocation3 + $0x144] sm:$0xff] %vm1855_vm3, %v3250_v10  ;;  %v3248_v40 = vmax.f32 %v14417_v37, %v3244_v30  ;;  %v3249_v16 = vmax.f32 %v14413_v34, %v3245_v48  ;;  %1941 = vst.msk [vmem:[#allocation2 + $0x2a8] sm:$0xff] %vm1855_vm3, %v1411_v39  ;;  %v1827_v10 = vpop.f32.mrf.mxu1 }
 0x17d   :  { %3255 = vst.msk [vmem:[#allocation3 + $0x14c] sm:$0xf] %vm3078_vm7, %v3251_v35  ;;  %v11981_v42 = vpop.f32.mrf.mxu0  ;;  %v14441_v5 = vld [vmem:[#allocation2 + $0x2b0] sm:$0xff] }
 0x17e   :  { %3252 = vst.msk [vmem:[#allocation3 + $0x134] sm:$0xff] %vm1855_vm3, %v3248_v40  ;;  %3253 = vst.msk [vmem:[#allocation3 + $0x13c] sm:$0xff] %vm1855_vm3, %v3249_v16  ;;  %v7002_v35 = vld [vmem:[#allocation2 + $0x5cc] sm:$0xff] }
 0x17f   :  { %1946 = vst.msk [vmem:[#allocation2 + $0x2d0] sm:$0xff] %vm1855_vm3, %v11981_v42  ;;  %v1424_v44 = vpop.f32.mrf.mxu0  ;;  %v14435_v57 = vld [vmem:[#allocation2 + $0x2a0] sm:$0xff]  ;;  %2045 = vst.msk [vmem:[#allocation2 + $0x5e8] sm:$0xff] %vm1855_vm3, %v1827_v10  ;;  %v7006_v16 = vmax.f32 %v6998_v25, %v7002_v35  ;;  %v12085_v42 = vpop.f32.mrf.mxu1 }
 0x180   :  { %1944 = vst.msk [vmem:[#allocation2 + $0x2c0] sm:$0xff] %vm1855_vm3, %v1424_v44  ;;  %2050 = vst.msk [vmem:[#allocation2 + $0x610] sm:$0xff] %vm1855_vm3, %v12085_v42 }
 0x181   :  { %v11982_v45 = vpop.f32.mrf.mxu0  ;;  %v3259_v50 = vld [vmem:[#allocation2 + $0x2b8] sm:$0xf]  ;;  %7010 = vst.msk [vmem:[#allocation3 + $0x2d8] sm:$0xff] %vm1855_vm3, %v7006_v16 }
 0x182   :  { %1947 = vst.msk [vmem:[#allocation2 + $0x2d8] sm:$0xff] %vm1855_vm3, %v11982_v45  ;;  %v7001_v45 = vld [vmem:[#allocation2 + $0x5c8] sm:$0xf] }
 0x183   :  { %v1427_v43 = vpop.f32.mrf.mxu0  ;;  %v14446_v0 = vld [vmem:[#allocation2 + $0x2a8] sm:$0xff] }
 0x184   :  { %1945 = vst.msk [vmem:[#allocation2 + $0x2c8] sm:$0xff] %vm1855_vm3, %v1427_v43  ;;  %v2197_v43 = vld [vmem:[#allocation2 + $0x258] sm:$0xff] }
 0x185   :  { %v11985_v52 = vpop.f32.mrf.mxu0 }
 0x186   :  { %v3263_v51 = vld [vmem:[#allocation2 + $0x2d4] sm:$0xf]  ;;  %1950 = vst.msk [vmem:[#allocation2 + $0x2f0] sm:$0xff] %vm1855_vm3, %v11985_v52 }
 0x187   :  { %v3267_v55 = vmax.f32 %v3259_v50, %v3263_v51  ;;  %v3260_v58 = vld [vmem:[#allocation2 + $0x2bc] sm:$0xff]  ;;  %v1440_v59 = vpop.f32.mrf.mxu0  ;;  %v2212_v49 = vld [vmem:[#allocation2 + $0x2d0] sm:$0xff]  ;;  %v7005_v51 = vld [vmem:[#allocation2 + $0x5e4] sm:$0xf] }
 0x188   :  { %v3264_v62 = vmax.f32 %v14435_v57, %v3260_v58  ;;  %1948 = vst.msk [vmem:[#allocation2 + $0x2e0] sm:$0xff] %vm1855_vm3, %v1440_v59  ;;  %v7004_v50 = vld [vmem:[#allocation2 + $0x5dc] sm:$0xff]  ;;  %v7009_v60 = vmax.f32 %v7001_v45, %v7005_v51  ;;  %v2203_v51 = vld [vmem:[#allocation2 + $0x288] sm:$0xff] }
 0x189   :  { %3271 = vst.msk [vmem:[#allocation3 + $0x168] sm:$0xf] %vm3078_vm7, %v3267_v55  ;;  %v11986_v63 = vpop.f32.mrf.mxu0  ;;  %v3272_v14 = vld [vmem:[#allocation2 + $0x2d8] sm:$0xff]  ;;  %v7008_v59 = vmax.f32 %v7000_v38, %v7004_v50 }
 0x18a   :  { %3268 = vst.msk [vmem:[#allocation3 + $0x150] sm:$0xff] %vm1855_vm3, %v3264_v62  ;;  %1951 = vst.msk [vmem:[#allocation2 + $0x2f8] sm:$0xff] %vm1855_vm3, %v11986_v63  ;;  %v2205_v45 = vld [vmem:[#allocation2 + $0x298] sm:$0xff] }
 0x18b   :  { %v3261_v32 = vld [vmem:[#allocation2 + $0x2c4] sm:$0xff]  ;;  %v3262_v41 = vld [vmem:[#allocation2 + $0x2cc] sm:$0xff]  ;;  %v1443_v6 = vpop.f32.mrf.mxu0  ;;  %7012 = vst.msk [vmem:[#allocation3 + $0x2e8] sm:$0xff] %vm1855_vm3, %v7008_v59 }
 0x18c   :  { %v3265_v27 = vmax.f32 %v14446_v0, %v3261_v32  ;;  %v3266_v9 = vmax.f32 %v14441_v5, %v3262_v41  ;;  %1949 = vst.msk [vmem:[#allocation2 + $0x2e8] sm:$0xff] %vm1855_vm3, %v1443_v6  ;;  %v2196_v32 = vld [vmem:[#allocation2 + $0x250] sm:$0xff]  ;;  %v2211_v6 = vld [vmem:[#allocation2 + $0x2c8] sm:$0xff] }
 0x18d   :  { %v11989_v56 = vpop.f32.mrf.mxu0  ;;  %v2216_v21 = vld [vmem:[#allocation2 + $0x2f0] sm:$0xff]  ;;  %7013 = vst.msk [vmem:[#allocation3 + $0x2f0] sm:$0xf] %vm3078_vm7, %v7009_v60 }
 0x18e   :  { %3269 = vst.msk [vmem:[#allocation3 + $0x158] sm:$0xff] %vm1855_vm3, %v3265_v27  ;;  %3270 = vst.msk [vmem:[#allocation3 + $0x160] sm:$0xff] %vm1855_vm3, %v3266_v9  ;;  %v3275_v52 = vld [vmem:[#allocation2 + $0x2f0] sm:$0xf]  ;;  %v2195_v27 = vld [vmem:[#allocation2 + $0x248] sm:$0xff] }
 0x18f   :  { %1954 = vst.msk [vmem:[#allocation2 + $0x310] sm:$0xff] %vm1855_vm3, %v11989_v56  ;;  %v1456_v11 = vpop.f32.mrf.mxu0  ;;  %v3273_v30 = vld [vmem:[#allocation2 + $0x2e0] sm:$0xff] }
 0x190   :  { %1952 = vst.msk [vmem:[#allocation2 + $0x300] sm:$0xff] %vm1855_vm3, %v1456_v11  ;;  %v2210_v56 = vld [vmem:[#allocation2 + $0x2c0] sm:$0xff] }
 0x191   :  { %v3276_v15 = vld [vmem:[#allocation2 + $0x2f4] sm:$0xff]  ;;  %v11990_v17 = vpop.f32.mrf.mxu0 }
 0x192   :  { %v2217_v18 = vld [vmem:[#allocation2 + $0x2f8] sm:$0xff]  ;;  %v3280_v31 = vmax.f32 %v3272_v14, %v3276_v15  ;;  %1955 = vst.msk [vmem:[#allocation2 + $0x318] sm:$0xff] %vm1855_vm3, %v11990_v17 }
 0x193   :  { %11335 = vmatprep.subr.mxu1 %v2217_v18  ;;  %v1459_v20 = vpop.f32.mrf.mxu0  ;;  %v3274_v28 = vld [vmem:[#allocation2 + $0x2e8] sm:$0xff] }
 0x194   :  { %11336 = vmatpush3.msra.mxu1 %v14410_v23  ;;  %3284 = vst.msk [vmem:[#allocation3 + $0x16c] sm:$0xff] %vm1855_vm3, %v3280_v31  ;;  %1953 = vst.msk [vmem:[#allocation2 + $0x308] sm:$0xff] %vm1855_vm3, %v1459_v20  ;;  %v7003_v23 = vld [vmem:[#allocation2 + $0x5d4] sm:$0xff]  ;;  %v7014_v31 = vld [vmem:[#allocation2 + $0x5e8] sm:$0xff] }
 0x195   :  { %11337 = vmatprep.subr.mxu1 %v2216_v21  ;;  %v11993_v33 = vpop.f32.mrf.mxu0  ;;  %v7007_v40 = vmax.f32 %v6999_v26, %v7003_v23  ;;  %v7016_v21 = vld [vmem:[#allocation2 + $0x5f8] sm:$0xff] }
 0x196   :  { %11338 = vmatpush3.msra.mxu1 %v14413_v34  ;;  %1958 = vst.msk [vmem:[#allocation2 + $0x330] sm:$0xff] %vm1855_vm3, %v11993_v33  ;;  %v2198_v34 = vld [vmem:[#allocation2 + $0x260] sm:$0xff]  ;;  %v14489_v17 = vld [vmem:[#allocation2 + $0x310] sm:$0xff] }
 0x197   :  { %11339 = vmatprep.subr.mxu1 %v3274_v28  ;;  %v3277_v48 = vld [vmem:[#allocation2 + $0x2fc] sm:$0xff]  ;;  %v1472_v39 = vpop.f32.mrf.mxu0  ;;  %7011 = vst.msk [vmem:[#allocation3 + $0x2e0] sm:$0xff] %vm1855_vm3, %v7007_v40 }
 0x198   :  { %11340 = vmatpush3.msra.mxu1 %v14417_v37  ;;  %v3281_v44 = vmax.f32 %v3273_v30, %v3277_v48  ;;  %1956 = vst.msk [vmem:[#allocation2 + $0x320] sm:$0xff] %vm1855_vm3, %v1472_v39  ;;  %v1840_v37 = vpop.f32.mrf.mxu1 }
 0x199   :  { %11341 = vmatprep.subr.mxu1 %v3273_v30  ;;  %v11994_v46 = vpop.f32.mrf.mxu0  ;;  %2048 = vst.msk [vmem:[#allocation2 + $0x600] sm:$0xff] %vm1855_vm3, %v1840_v37  ;;  %v14484_v24 = vld [vmem:[#allocation2 + $0x318] sm:$0xff]  ;;  %v2204_v37 = vld [vmem:[#allocation2 + $0x290] sm:$0xff] }
 0x19a   :  { %11342 = vmatpush3.msra.mxu1 %v2198_v34  ;;  %3285 = vst.msk [vmem:[#allocation3 + $0x174] sm:$0xff] %vm1855_vm3, %v3281_v44  ;;  %1959 = vst.msk [vmem:[#allocation2 + $0x338] sm:$0xff] %vm1855_vm3, %v11994_v46  ;;  %v12086_v62 = vpop.f32.mrf.mxu1  ;;  %v2059_v34 = vadd.s32 512, %v13978_v3  ;;  %v2062_v46 = vadd.s32 896, %v13978_v3 }
 0x19b   :  { %11343 = vmatprep.subr.mxu1 %v3272_v14  ;;  %v3278_v53 = vld [vmem:[#allocation2 + $0x304] sm:$0xff]  ;;  %v3279_v55 = vld [vmem:[#allocation2 + $0x30c] sm:$0xf]  ;;  %v1475_v58 = vpop.f32.mrf.mxu0  ;;  %2051 = vst.msk [vmem:[#allocation2 + $0x618] sm:$0xff] %vm1855_vm3, %v12086_v62  ;;  %v2209_v14 = vld [vmem:[#allocation2 + $0x2b8] sm:$0xff] }
 0x19c   :  { %11344 = vmatpush3.msra.mxu1 %v2197_v43  ;;  %v3282_v63 = vmax.f32 %v3274_v28, %v3278_v53  ;;  %v3283_v1 = vmax.f32 %v3275_v52, %v3279_v55  ;;  %1957 = vst.msk [vmem:[#allocation2 + $0x328] sm:$0xff] %vm1855_vm3, %v1475_v58  ;;  %v1843_v8 = vpop.f32.mrf.mxu1  ;;  %v2191_v28 = vld [vmem:[#allocation2 + $0x228] sm:$0xff]  ;;  %vm2073_vm5 = vcmp.ge.s32.totalorder %v2059_v34, %v13981_v4  ;;  %v2202_v53 = vld [vmem:[#allocation2 + $0x280] sm:$0xff] }
 0x19d   :  { %11345 = vmatprep.subr.mxu1 %v2212_v49  ;;  %v11997_v41 = vpop.f32.mrf.mxu0  ;;  %2049 = vst.msk [vmem:[#allocation2 + $0x608] sm:$0xff] %vm1855_vm3, %v1843_v8  ;;  %v2188_v49 = vld [vmem:[#allocation2 + $0x210] sm:$0xff]  ;;  %vm2087_vm6 = vcmp.lt.s32.totalorder %v2059_v34, %v13988_v7  ;;  %vm2076_vm8 = vcmp.ge.s32.totalorder %v2062_v46, %v13981_v4  ;;  %vm2090_vm9 = vcmp.lt.s32.totalorder %v2062_v46, %v13988_v7 }
 0x19e   :  { %11346 = vmatpush3.msra.mxu1 %v2196_v32  ;;  %3286 = vst.msk [vmem:[#allocation3 + $0x17c] sm:$0xff] %vm1855_vm3, %v3282_v63  ;;  %1962 = vst.msk [vmem:[#allocation2 + $0x350] sm:$0xff] %vm1855_vm3, %v11997_v41 }
 0x19f   :  { %3287 = vst.msk [vmem:[#allocation3 + $0x184] sm:$0xf] %vm3078_vm7, %v3283_v1  ;;  %11347 = vmatprep.subr.mxu1 %v2211_v6  ;;  %v1488_v9 = vpop.f32.mrf.mxu0  ;;  %v14496_v25 = vld [vmem:[#allocation2 + $0x320] sm:$0xff]  ;;  %vm2100_vm10 = vmand %vm2073_vm5, %vm2087_vm6 }
 0x1a0   :  { %11348 = vmatpush3.msra.mxu1 %v2195_v27  ;;  %1960 = vst.msk [vmem:[#allocation2 + $0x340] sm:$0xff] %vm1855_vm3, %v1488_v9  ;;  %v7017_v22 = vld [vmem:[#allocation2 + $0x600] sm:$0xf]  ;;  %vm2103_vm11 = vmand %vm2076_vm8, %vm2090_vm9 }
 0x1a1   :  { %11349 = vmatprep.subr.mxu1 %v2210_v56  ;;  %v6811_v11 = vld [vmem:[#allocation2 + $0x334] sm:$0xff]  ;;  %v11998_v13 = vpop.f32.mrf.mxu0 }
 0x1a2   :  { %11350 = vmatpush3.msra.mxu1 %v14390_v29  ;;  %v6815_v15 = vmax.f32 %v14484_v24, %v6811_v11  ;;  %1963 = vst.msk [vmem:[#allocation2 + $0x358] sm:$0xff] %vm1855_vm3, %v11998_v13  ;;  %v7015_v29 = vld [vmem:[#allocation2 + $0x5f0] sm:$0xff]  ;;  %v7021_v10 = vld [vmem:[#allocation2 + $0x61c] sm:$0xf] }
 0x1a3   :  { %11351 = vmatprep.subr.mxu1 %v2209_v14  ;;  %v6810_v18 = vld [vmem:[#allocation2 + $0x32c] sm:$0xff]  ;;  %v1491_v19 = vpop.f32.mrf.mxu0  ;;  %v6809_v35 = vld [vmem:[#allocation2 + $0x328] sm:$0xf]  ;;  %v7025_v16 = vmax.f32 %v7017_v22, %v7021_v10 }
 0x1a4   :  { %11352 = vmatpush3.msra.mxu1 %v14364_v61  ;;  %6819 = vst.msk [vmem:[#allocation3 + $0x190] sm:$0xff] %vm1855_vm3, %v6815_v15  ;;  %v6814_v20 = vmax.f32 %v14489_v17, %v6810_v18  ;;  %1961 = vst.msk [vmem:[#allocation2 + $0x348] sm:$0xff] %vm1855_vm3, %v1491_v19  ;;  %v7018_v33 = vld [vmem:[#allocation2 + $0x604] sm:$0xff]  ;;  %v7020_v61 = vld [vmem:[#allocation2 + $0x614] sm:$0xff] }
 0x1a5   :  { %11353 = vmatprep.subr.mxu1 %v14441_v5  ;;  %v12001_v26 = vpop.f32.mrf.mxu0  ;;  %v7019_v23 = vld [vmem:[#allocation2 + $0x60c] sm:$0xff]  ;;  %v7022_v5 = vmax.f32 %v7014_v31, %v7018_v33  ;;  %v7024_v40 = vmax.f32 %v7016_v21, %v7020_v61  ;;  %7029 = vst.msk [vmem:[#allocation3 + $0x30c] sm:$0xf] %vm3078_vm7, %v7025_v16 }
 0x1a6   :  { %11354 = vmatpush3.msra.mxu1 %v14376_v54  ;;  %6818 = vst.msk [vmem:[#allocation3 + $0x188] sm:$0xff] %vm1855_vm3, %v6814_v20  ;;  %1966 = vst.msk [vmem:[#allocation2 + $0x370] sm:$0xff] %vm1855_vm3, %v12001_v26  ;;  %v7023_v54 = vmax.f32 %v7015_v29, %v7019_v23  ;;  %v14525_v63 = vld [vmem:[#allocation2 + $0x350] sm:$0xff] }
 0x1a7   :  { %11355 = vmatprep.subr.mxu1 %v14446_v0  ;;  %v6812_v30 = vld [vmem:[#allocation2 + $0x33c] sm:$0xff]  ;;  %v6813_v48 = vld [vmem:[#allocation2 + $0x344] sm:$0xf]  ;;  %v1504_v39 = vpop.f32.mrf.mxu0  ;;  %7026 = vst.msk [vmem:[#allocation3 + $0x2f4] sm:$0xff] %vm1855_vm3, %v7022_v5  ;;  %7028 = vst.msk [vmem:[#allocation3 + $0x304] sm:$0xff] %vm1855_vm3, %v7024_v40 }
 0x1a8   :  { %11356 = vmatpush3.msra.mxu1 %v2191_v28  ;;  %v6816_v42 = vmax.f32 %v14496_v25, %v6812_v30  ;;  %v6817_v44 = vmax.f32 %v6809_v35, %v6813_v48  ;;  %1964 = vst.msk [vmem:[#allocation2 + $0x360] sm:$0xff] %vm1855_vm3, %v1504_v39  ;;  %v2190_v0 = vld [vmem:[#allocation2 + $0x220] sm:$0xff]  ;;  %7027 = vst.msk [vmem:[#allocation3 + $0x2fc] sm:$0xff] %vm1855_vm3, %v7023_v54 }
 0x1a9   :  { %11357 = vmatprep.subr.mxu1 %v14435_v57  ;;  %v12002_v38 = vpop.f32.mrf.mxu0  ;;  %v2189_v57 = vld [vmem:[#allocation2 + $0x218] sm:$0xff] }
 0x1aa   :  { %11358 = vmatpush3.msra.mxu1 %v2190_v0  ;;  %6820 = vst.msk [vmem:[#allocation3 + $0x198] sm:$0xff] %vm1855_vm3, %v6816_v42  ;;  %1967 = vst.msk [vmem:[#allocation2 + $0x378] sm:$0xff] %vm1855_vm3, %v12002_v38  ;;  %v14521_v55 = vld [vmem:[#allocation2 + $0x358] sm:$0xff] }
 0x1ab   :  { %6821 = vst.msk [vmem:[#allocation3 + $0x1a0] sm:$0xf] %vm3078_vm7, %v6817_v44  ;;  %11359 = vmatprep.subr.mxu1 %v2205_v45  ;;  %v1507_v43 = vpop.f32.mrf.mxu0 }
 0x1ac   :  { %11360 = vmatpush3.msra.mxu1 %v2189_v57  ;;  %1965 = vst.msk [vmem:[#allocation2 + $0x368] sm:$0xff] %vm1855_vm3, %v1507_v43 }
 0x1ad   :  { %11361 = vmatprep.subr.mxu1 %v2204_v37  ;;  %v12005_v50 = vpop.f32.mrf.mxu0 }
 0x1ae   :  { %11362 = vmatpush3.msra.mxu1 %v2188_v49  ;;  %1970 = vst.msk [vmem:[#allocation2 + $0x390] sm:$0xff] %vm1855_vm3, %v12005_v50  ;;  %v18495_v49 = vmov 0.0  }
 0x1af   :  { %11363 = vmatprep.subr.mxu1 %v2203_v51  ;;  %v1520_v52 = vpop.f32.mrf.mxu0  ;;  %v6825_v58 = vld [vmem:[#allocation2 + $0x360] sm:$0xf]  ;;  %2999 = vst.msk [vmem:[#allocation4] sm:$0xff] %vm1855_vm3, %v18495_v49  ;;  %3000 = vst.msk [vmem:[#allocation4 + $0x8] sm:$0xff] %vm1855_vm3, %v18495_v49  ;;  %12230 = vmatprep.subr.bf16.mxu0 %v18495_v49 }
 0x1b0   :  { %11364 = vmatpush3.msra.mxu1 %v14352_v47  ;;  %1968 = vst.msk [vmem:[#allocation2 + $0x380] sm:$0xff] %vm1855_vm3, %v1520_v52  ;;  %v14530_v47 = vld [vmem:[#allocation2 + $0x348] sm:$0xff]  ;;  %3001 = vst.msk [vmem:[#allocation4 + $0x10] sm:$0xff] %vm1855_vm3, %v18495_v49  ;;  %12238 = vmatprep.mubr.msk.bf16.mxu0 %vm13685_vm12, %v18495_v49 }
 0x1b1   :  { %11365 = vmatprep.subr.mxu1 %v2202_v53  ;;  %v6828_v59 = vld [vmem:[#allocation2 + $0x374] sm:$0xff]  ;;  %v6829_v60 = vld [vmem:[#allocation2 + $0x37c] sm:$0xf]  ;;  %v12006_v62 = vpop.f32.mrf.mxu0  ;;  %3002 = vst.msk [vmem:[#allocation4 + $0x18] sm:$0xff] %vm1855_vm3, %v18495_v49  ;;  %3003 = vst.msk [vmem:[#allocation4 + $0x20] sm:$0xff] %vm1855_vm3, %v18495_v49 }
 0x1b2   :  { %11366 = vmatpush3.msra.mxu1 %v14339_v36  ;;  %v6832_v1 = vmax.f32 %v14521_v55, %v6828_v59  ;;  %v6833_v32 = vmax.f32 %v6825_v58, %v6829_v60  ;;  %1971 = vst.msk [vmem:[#allocation2 + $0x398] sm:$0xff] %vm1855_vm3, %v12006_v62  ;;  %v14583_v37 = vld [vmem:[#allocation2 + $0x378] sm:$0xff]  ;;  %3004 = vst.msk [vmem:[#allocation4 + $0x28] sm:$0xff] %vm1855_vm3, %v18495_v49  ;;  %v2232_v60 = vld [vmem:[#allocation2 + $0x370] sm:$0xff] }
 0x1b3   :  { %10748 = vmatmul.mubr.msk.f32.vlgmr.msra.gmra.mxu1 %vm2100_vm10, %v13683_v12  ;;  %v6826_v41 = vld [vmem:[#allocation2 + $0x364] sm:$0xff]  ;;  %v6827_v6 = vld [vmem:[#allocation2 + $0x36c] sm:$0xff]  ;;  %v1523_v8 = vpop.f32.mrf.mxu0  ;;  %3005 = vst.msk [vmem:[#allocation4 + $0x30] sm:$0xff] %vm1855_vm3, %v18495_v49  ;;  %3006 = vst.msk [vmem:[#allocation4 + $0x38] sm:$0xff] %vm1855_vm3, %v18495_v49 }
 0x1b4   :  { %10749 = vmatprep.mubr.msk.f32.mxu1 %vm2103_vm11, %v13683_v12  ;;  %6836 = vst.msk [vmem:[#allocation3 + $0x1b4] sm:$0xff] %vm1855_vm3, %v6832_v1  ;;  %v6830_v36 = vmax.f32 %v14530_v47, %v6826_v41  ;;  %v6831_v27 = vmax.f32 %v14525_v63, %v6827_v6  ;;  %1969 = vst.msk [vmem:[#allocation2 + $0x388] sm:$0xff] %vm1855_vm3, %v1523_v8  ;;  %v2230_v8 = vld [vmem:[#allocation2 + $0x360] sm:$0xff] }
 0x1b5   :  { %6837 = vst.msk [vmem:[#allocation3 + $0x1bc] sm:$0xf] %vm3078_vm7, %v6833_v32  ;;  %v12009_v9 = vpop.f32.mrf.mxu0  ;;  %v14550_v26 = vld [vmem:[#allocation2 + $0x390] sm:$0xff]  ;;  %v2231_v32 = vld [vmem:[#allocation2 + $0x368] sm:$0xff] }
 0x1b6   :  { %6834 = vst.msk [vmem:[#allocation3 + $0x1a4] sm:$0xff] %vm1855_vm3, %v6830_v36  ;;  %6835 = vst.msk [vmem:[#allocation3 + $0x1ac] sm:$0xff] %vm1855_vm3, %v6831_v27 }
 0x1b7   :  { %1974 = vst.msk [vmem:[#allocation2 + $0x3b0] sm:$0xff] %vm1855_vm3, %v12009_v9  ;;  %v1536_v56 = vpop.f32.mrf.mxu0  ;;  %v14545_v31 = vld [vmem:[#allocation2 + $0x380] sm:$0xff]  ;;  %3007 = vst.msk [vmem:[#allocation4 + $0x40] sm:$0xff] %vm1855_vm3, %v18495_v49 }
 0x1b8   :  { %1972 = vst.msk [vmem:[#allocation2 + $0x3a0] sm:$0xff] %vm1855_vm3, %v1536_v56  ;;  %3008 = vst.msk [vmem:[#allocation4 + $0x48] sm:$0xff] %vm1855_vm3, %v18495_v49 }
 0x1b9   :  { %v12010_v11 = vpop.f32.mrf.mxu0  ;;  %v6841_v14 = vld [vmem:[#allocation2 + $0x398] sm:$0xf]  ;;  %3009 = vst.msk [vmem:[#allocation4 + $0x50] sm:$0xff] %vm1855_vm3, %v18495_v49  ;;  %3010 = vst.msk [vmem:[#allocation4 + $0x58] sm:$0xff] %vm1855_vm3, %v18495_v49 }
 0x1ba   :  { %1975 = vst.msk [vmem:[#allocation2 + $0x3b8] sm:$0xff] %vm1855_vm3, %v12010_v11  ;;  %3011 = vst.msk [vmem:[#allocation4 + $0x60] sm:$0xff] %vm1855_vm3, %v18495_v49 }
 0x1bb   :  { %v1539_v13 = vpop.f32.mrf.mxu0  ;;  %v14554_v28 = vld [vmem:[#allocation2 + $0x388] sm:$0xff]  ;;  %3012 = vst.msk [vmem:[#allocation4 + $0x68] sm:$0xff] %vm1855_vm3, %v18495_v49  ;;  %3013 = vst.msk [vmem:[#allocation4 + $0x70] sm:$0xff] %vm1855_vm3, %v18495_v49 }
 0x1bc   :  { %1973 = vst.msk [vmem:[#allocation2 + $0x3a8] sm:$0xff] %vm1855_vm3, %v1539_v13  ;;  %3014 = vst.msk [vmem:[#allocation4 + $0x78] sm:$0xff] %vm1855_vm3, %v18495_v49 }
 0x1bd   :  { %v12013_v18 = vpop.f32.mrf.mxu0  ;;  %3015 = vst.msk [vmem:[#allocation4 + $0x80] sm:$0xff] %vm1855_vm3, %v18495_v49  ;;  %3016 = vst.msk [vmem:[#allocation4 + $0x88] sm:$0xff] %vm1855_vm3, %v18495_v49 }
 0x1be   :  { %v6845_v15 = vld [vmem:[#allocation2 + $0x3b4] sm:$0xf]  ;;  %1978 = vst.msk [vmem:[#allocation2 + $0x3d0] sm:$0xff] %vm1855_vm3, %v12013_v18  ;;  %3017 = vst.msk [vmem:[#allocation4 + $0x90] sm:$0xff] %vm1855_vm3, %v18495_v49 }
 0x1bf   :  { %v6849_v19 = vmax.f32 %v6841_v14, %v6845_v15  ;;  %v6842_v20 = vld [vmem:[#allocation2 + $0x39c] sm:$0xff]  ;;  %v1552_v29 = vpop.f32.mrf.mxu0  ;;  %3018 = vst.msk [vmem:[#allocation4 + $0x98] sm:$0xff] %vm1855_vm3, %v18495_v49  ;;  %3019 = vst.msk [vmem:[#allocation4 + $0xa0] sm:$0xff] %vm1855_vm3, %v18495_v49 }
 0x1c0   :  { %v6846_v21 = vmax.f32 %v14545_v31, %v6842_v20  ;;  %1976 = vst.msk [vmem:[#allocation2 + $0x3c0] sm:$0xff] %vm1855_vm3, %v1552_v29  ;;  %3020 = vst.msk [vmem:[#allocation4 + $0xa8] sm:$0xff] %vm1855_vm3, %v18495_v49 }
 0x1c1   :  { %6853 = vst.msk [vmem:[#allocation3 + $0x1d8] sm:$0xf] %vm3078_vm7, %v6849_v19  ;;  %v12014_v22 = vpop.f32.mrf.mxu0  ;;  %v14563_v48 = vld [vmem:[#allocation2 + $0x3b8] sm:$0xff] }
 0x1c2   :  { %6850 = vst.msk [vmem:[#allocation3 + $0x1c0] sm:$0xff] %vm1855_vm3, %v6846_v21  ;;  %1979 = vst.msk [vmem:[#allocation2 + $0x3d8] sm:$0xff] %vm1855_vm3, %v12014_v22 }
 0x1c3   :  { %v6843_v33 = vld [vmem:[#allocation2 + $0x3a4] sm:$0xff]  ;;  %v6844_v61 = vld [vmem:[#allocation2 + $0x3ac] sm:$0xff]  ;;  %v1555_v10 = vpop.f32.mrf.mxu0  ;;  %3021 = vst.msk [vmem:[#allocation4 + $0xb0] sm:$0xff] %vm1855_vm3, %v18495_v49  ;;  %3022 = vst.msk [vmem:[#allocation4 + $0xb8] sm:$0xff] %vm1855_vm3, %v18495_v49 }
 0x1c4   :  { %v6847_v23 = vmax.f32 %v14554_v28, %v6843_v33  ;;  %v6848_v5 = vmax.f32 %v14550_v26, %v6844_v61  ;;  %1977 = vst.msk [vmem:[#allocation2 + $0x3c8] sm:$0xff] %vm1855_vm3, %v1555_v10  ;;  %3023 = vst.msk [vmem:[#allocation4 + $0xc0] sm:$0xff] %vm1855_vm3, %v18495_v49  ;;  %v2225_v10 = vld [vmem:[#allocation2 + $0x338] sm:$0xff] }
 0x1c5   :  { %v12017_v35 = vpop.f32.mrf.mxu0  ;;  %v14576_v57 = vld [vmem:[#allocation2 + $0x3d0] sm:$0xf]  ;;  %3024 = vst.msk [vmem:[#allocation4 + $0xc8] sm:$0xff] %vm1855_vm3, %v18495_v49  ;;  %3025 = vst.msk [vmem:[#allocation4 + $0xd0] sm:$0xff] %vm1855_vm3, %v18495_v49 }
 0x1c6   :  { %6851 = vst.msk [vmem:[#allocation3 + $0x1c8] sm:$0xff] %vm1855_vm3, %v6847_v23  ;;  %6852 = vst.msk [vmem:[#allocation3 + $0x1d0] sm:$0xff] %vm1855_vm3, %v6848_v5  ;;  %v2244_v14 = vld [vmem:[#allocation2 + $0x3d0] sm:$0xff] }
 0x1c7   :  { %1982 = vst.msk [vmem:[#allocation2 + $0x3f0] sm:$0xff] %vm1855_vm3, %v12017_v35  ;;  %v1568_v30 = vpop.f32.mrf.mxu0  ;;  %v14570_v44 = vld [vmem:[#allocation2 + $0x3c0] sm:$0xff]  ;;  %3026 = vst.msk [vmem:[#allocation4 + $0xd8] sm:$0xff] %vm1855_vm3, %v18495_v49  ;;  %v2240_v23 = vld [vmem:[#allocation2 + $0x3b0] sm:$0xff] }
 0x1c8   :  { %1980 = vst.msk [vmem:[#allocation2 + $0x3e0] sm:$0xff] %vm1855_vm3, %v1568_v30  ;;  %3027 = vst.msk [vmem:[#allocation4 + $0xe0] sm:$0xff] %vm1855_vm3, %v18495_v49  ;;  %v2224_v5 = vld [vmem:[#allocation2 + $0x330] sm:$0xff]  ;;  %v2239_v30 = vld [vmem:[#allocation2 + $0x3a8] sm:$0xff] }
 0x1c9   :  { %v6858_v39 = vld [vmem:[#allocation2 + $0x3d4] sm:$0xff]  ;;  %v12018_v40 = vpop.f32.mrf.mxu0  ;;  %3028 = vst.msk [vmem:[#allocation4 + $0xe8] sm:$0xff] %vm1855_vm3, %v18495_v49  ;;  %3029 = vst.msk [vmem:[#allocation4 + $0xf0] sm:$0xff] %vm1855_vm3, %v18495_v49 }
 0x1ca   :  { %v6862_v16 = vmax.f32 %v14563_v48, %v6858_v39  ;;  %1983 = vst.msk [vmem:[#allocation2 + $0x3f8] sm:$0xff] %vm1855_vm3, %v12018_v40  ;;  %3030 = vst.msk [vmem:[#allocation4 + $0xf8] sm:$0xff] %vm1855_vm3, %v18495_v49  ;;  %v2245_v9 = vld [vmem:[#allocation2 + $0x3d8] sm:$0xff]  ;;  %v2223_v39 = vld [vmem:[#allocation2 + $0x328] sm:$0xff] }
 0x1cb   :  { %v1571_v54 = vpop.f32.mrf.mxu0  ;;  %v14578_v43 = vld [vmem:[#allocation2 + $0x3c8] sm:$0xff]  ;;  %3031 = vst.msk [vmem:[#allocation4 + $0x100] sm:$0xff] %vm1855_vm3, %v18495_v49  ;;  %3032 = vst.msk [vmem:[#allocation4 + $0x108] sm:$0xff] %vm1855_vm3, %v18495_v49 }
 0x1cc   :  { %6866 = vst.msk [vmem:[#allocation3 + $0x1dc] sm:$0xff] %vm1855_vm3, %v6862_v16  ;;  %1981 = vst.msk [vmem:[#allocation2 + $0x3e8] sm:$0xff] %vm1855_vm3, %v1571_v54  ;;  %v2238_v16 = vld [vmem:[#allocation2 + $0x3a0] sm:$0xff] }
 0x1cd   :  { %v12021_v42 = vpop.f32.mrf.mxu0  ;;  %3033 = vst.msk [vmem:[#allocation4 + $0x110] sm:$0xff] %vm1855_vm3, %v18495_v49  ;;  %3034 = vst.msk [vmem:[#allocation4 + $0x118] sm:$0xff] %vm1855_vm3, %v18495_v49 }
 0x1ce   :  { %1986 = vst.msk [vmem:[#allocation2 + $0x410] sm:$0xff] %vm1855_vm3, %v12021_v42  ;;  %3035 = vst.msk [vmem:[#allocation4 + $0x120] sm:$0xff] %vm1855_vm3, %v18495_v49  ;;  %v6870_v50 = vld [vmem:[#allocation2 + $0x3f0] sm:$0xff]  ;;  %v2061_v42 = vadd.s32 768, %v13978_v3 }
 0x1cf   :  { %v6859_v0 = vld [vmem:[#allocation2 + $0x3dc] sm:$0xff]  ;;  %v1584_v34 = vpop.f32.mrf.mxu0  ;;  %3036 = vst.msk [vmem:[#allocation4 + $0x128] sm:$0xff] %vm1855_vm3, %v18495_v49  ;;  %3037 = vst.msk [vmem:[#allocation4 + $0x130] sm:$0xff] %vm1855_vm3, %v18495_v49 }
 0x1d0   :  { %v6863_v38 = vmax.f32 %v14570_v44, %v6859_v0  ;;  %1984 = vst.msk [vmem:[#allocation2 + $0x400] sm:$0xff] %vm1855_vm3, %v1584_v34  ;;  %3038 = vst.msk [vmem:[#allocation4 + $0x138] sm:$0xff] %vm1855_vm3, %v18495_v49  ;;  %v2246_v6 = vld [vmem:[#allocation2 + $0x3e0] sm:$0xff]  ;;  %vm2075_vm13 = vcmp.ge.s32.totalorder %v2061_v42, %v13981_v4  ;;  %vm2089_vm14 = vcmp.lt.s32.totalorder %v2061_v42, %v13988_v7 }
 0x1d1   :  { %v14574_v45 = vld [vmem:[#allocation2 + $0x3f8] sm:$0xff]  ;;  %v12022_v46 = vpop.f32.mrf.mxu0  ;;  %3039 = vst.msk [vmem:[#allocation4 + $0x140] sm:$0xff] %vm1855_vm3, %v18495_v49  ;;  %3040 = vst.msk [vmem:[#allocation4 + $0x148] sm:$0xff] %vm1855_vm3, %v18495_v49 }
 0x1d2   :  { %6867 = vst.msk [vmem:[#allocation3 + $0x1e4] sm:$0xff] %vm1855_vm3, %v6863_v38  ;;  %1987 = vst.msk [vmem:[#allocation2 + $0x418] sm:$0xff] %vm1855_vm3, %v12022_v46  ;;  %11370 = vmatprep.subr.mxu1 %v14574_v45 }
 0x1d3   :  { %3041 = vst.msk [vmem:[#allocation4 + $0x150] sm:$0xff] %vm1855_vm3, %v18495_v49  ;;  %3042 = vst.msk [vmem:[#allocation4 + $0x158] sm:$0xff] %vm1855_vm3, %v18495_v49  ;;  %v6860_v51 = vld [vmem:[#allocation2 + $0x3e4] sm:$0xff]  ;;  %v6861_v52 = vld [vmem:[#allocation2 + $0x3ec] sm:$0xf]  ;;  %v1587_v53 = vpop.f32.mrf.mxu0  ;;  %11371 = vmatpush3.msra.mxu1 %v14583_v37 }
 0x1d4   :  { %3043 = vst.msk [vmem:[#allocation4 + $0x160] sm:$0xff] %vm1855_vm3, %v18495_v49  ;;  %3044 = vst.msk [vmem:[#allocation4 + $0x168] sm:$0xff] %vm1855_vm3, %v18495_v49  ;;  %v6864_v58 = vmax.f32 %v14578_v43, %v6860_v51  ;;  %v6865_v59 = vmax.f32 %v14576_v57, %v6861_v52  ;;  %11372 = vmatprep.subr.mxu1 %v6870_v50  ;;  %v2247_v1 = vld [vmem:[#allocation2 + $0x3e8] sm:$0xff] }
 0x1d5   :  { %3045 = vst.msk [vmem:[#allocation4 + $0x170] sm:$0xff] %vm1855_vm3, %v18495_v49  ;;  %3046 = vst.msk [vmem:[#allocation4 + $0x178] sm:$0xff] %vm1855_vm3, %v18495_v49  ;;  %v12025_v62 = vpop.f32.mrf.mxu0  ;;  %11373 = vmatpush3.msra.mxu1 %v2232_v60 }
 0x1d6   :  { %3047 = vst.msk [vmem:[#allocation4 + $0x180] sm:$0xff] %vm1855_vm3, %v18495_v49  ;;  %3048 = vst.msk [vmem:[#allocation4 + $0x188] sm:$0xff] %vm1855_vm3, %v18495_v49  ;;  %11374 = vmatprep.subr.mxu1 %v2247_v1 }
 0x1d7   :  { %3049 = vst.msk [vmem:[#allocation4 + $0x190] sm:$0xff] %vm1855_vm3, %v18495_v49  ;;  %3050 = vst.msk [vmem:[#allocation4 + $0x198] sm:$0xff] %vm1855_vm3, %v18495_v49  ;;  %v1600_v41 = vpop.f32.mrf.mxu0  ;;  %11375 = vmatpush3.msra.mxu1 %v2231_v32  ;;  %v14730_v19 = vld [vmem:[#allocation2 + $0x400] sm:$0xff] }
 0x1d8   :  { %3051 = vst.msk [vmem:[#allocation4 + $0x1a0] sm:$0xff] %vm1855_vm3, %v18495_v49  ;;  %3052 = vst.msk [vmem:[#allocation4 + $0x1a8] sm:$0xff] %vm1855_vm3, %v18495_v49  ;;  %11376 = vmatprep.subr.mxu1 %v2246_v6 }
 0x1d9   :  { %3053 = vst.msk [vmem:[#allocation4 + $0x1b0] sm:$0xff] %vm1855_vm3, %v18495_v49  ;;  %3054 = vst.msk [vmem:[#allocation4 + $0x1b8] sm:$0xff] %vm1855_vm3, %v18495_v49  ;;  %v6875_v36 = vld [vmem:[#allocation2 + $0x414] sm:$0xff]  ;;  %v12026_v27 = vpop.f32.mrf.mxu0  ;;  %11377 = vmatpush3.msra.mxu1 %v2230_v8 }
 0x1da   :  { %3055 = vst.msk [vmem:[#allocation4 + $0x1c0] sm:$0xff] %vm1855_vm3, %v18495_v49  ;;  %3056 = vst.msk [vmem:[#allocation4 + $0x1c8] sm:$0xff] %vm1855_vm3, %v18495_v49  ;;  %v6879_v56 = vmax.f32 %v14574_v45, %v6875_v36  ;;  %11378 = vmatprep.subr.mxu1 %v2245_v9  ;;  %v2064_v45 = vadd.s32 1152, %v13978_v3 }
 0x1db   :  { %3057 = vst.msk [vmem:[#allocation4 + $0x1d0] sm:$0xff] %vm1855_vm3, %v18495_v49  ;;  %3058 = vst.msk [vmem:[#allocation4 + $0x1d8] sm:$0xff] %vm1855_vm3, %v18495_v49  ;;  %v1603_v13 = vpop.f32.mrf.mxu0  ;;  %11379 = vmatpush3.msra.mxu1 %v14521_v55 }
 0x1dc   :  { %3059 = vst.msk [vmem:[#allocation4 + $0x1e0] sm:$0xff] %vm1855_vm3, %v18495_v49  ;;  %3060 = vst.msk [vmem:[#allocation4 + $0x1e8] sm:$0xff] %vm1855_vm3, %v18495_v49  ;;  %11380 = vmatprep.subr.mxu1 %v2244_v14  ;;  %vm2078_vm15 = vcmp.ge.s32.totalorder %v2064_v45, %v13981_v4  ;;  %vm2092_vm0 = vcmp.lt.s32.totalorder %v2064_v45, %v13988_v7 }
 0x1dd   :  { %3061 = vst.msk [vmem:[#allocation4 + $0x1f0] sm:$0xff] %vm1855_vm3, %v18495_v49  ;;  %3062 = vst.msk [vmem:[#allocation4 + $0x1f8] sm:$0xff] %vm1855_vm3, %v18495_v49  ;;  %v12029_v18 = vpop.f32.mrf.mxu0  ;;  %11381 = vmatpush3.msra.mxu1 %v14525_v63  ;;  %v2226_v63 = vld [vmem:[#allocation2 + $0x340] sm:$0xff] }
 0x1de   :  { %1985 = vst.msk [vmem:[#allocation2 + $0x408] sm:$0xff] %vm1855_vm3, %v1587_v53  ;;  %6868 = vst.msk [vmem:[#allocation3 + $0x1ec] sm:$0xff] %vm1855_vm3, %v6864_v58  ;;  %11382 = vmatprep.subr.mxu1 %v14578_v43 }
 0x1df   :  { %6869 = vst.msk [vmem:[#allocation3 + $0x1f4] sm:$0xf] %vm3078_vm7, %v6865_v59  ;;  %v1616_v21 = vpop.f32.mrf.mxu0  ;;  %11383 = vmatpush3.msra.mxu1 %v14530_v47  ;;  %vm2102_vm1 = vmand %vm2075_vm13, %vm2089_vm14 }
 0x1e0   :  { %1990 = vst.msk [vmem:[#allocation2 + $0x430] sm:$0xff] %vm1855_vm3, %v12025_v62  ;;  %1988 = vst.msk [vmem:[#allocation2 + $0x420] sm:$0xff] %vm1855_vm3, %v1600_v41  ;;  %11384 = vmatprep.subr.mxu1 %v14570_v44 }
 0x1e1   :  { %1991 = vst.msk [vmem:[#allocation2 + $0x438] sm:$0xff] %vm1855_vm3, %v12026_v27  ;;  %6883 = vst.msk [vmem:[#allocation3 + $0x200] sm:$0xff] %vm1855_vm3, %v6879_v56  ;;  %v12030_v61 = vpop.f32.mrf.mxu0  ;;  %11385 = vmatpush3.msra.mxu1 %v2226_v63 }
 0x1e2   :  { %1989 = vst.msk [vmem:[#allocation2 + $0x428] sm:$0xff] %vm1855_vm3, %v1603_v13  ;;  %1994 = vst.msk [vmem:[#allocation2 + $0x450] sm:$0xff] %vm1855_vm3, %v12029_v18  ;;  %11386 = vmatprep.subr.mxu1 %v14563_v48  ;;  %v2237_v48 = vld [vmem:[#allocation2 + $0x398] sm:$0xff] }
 0x1e3   :  { %1992 = vst.msk [vmem:[#allocation2 + $0x440] sm:$0xff] %vm1855_vm3, %v1616_v21  ;;  %1995 = vst.msk [vmem:[#allocation2 + $0x458] sm:$0xff] %vm1855_vm3, %v12030_v61  ;;  %v1619_v47 = vpop.f32.mrf.mxu0  ;;  %11387 = vmatpush3.msra.mxu1 %v2225_v10 }
 0x1e4   :  { %1993 = vst.msk [vmem:[#allocation2 + $0x448] sm:$0xff] %vm1855_vm3, %v1619_v47  ;;  %11388 = vmatprep.subr.mxu1 %v2240_v23  ;;  %vm2105_vm4 = vmand %vm2078_vm15, %vm2092_vm0 }
 0x1e5   :  { %v6874_v11 = vld [vmem:[#allocation2 + $0x40c] sm:$0xff]  ;;  %v6873_v20 = vld [vmem:[#allocation2 + $0x408] sm:$0xf]  ;;  %v12033_v35 = vpop.f32.mrf.mxu0  ;;  %11389 = vmatpush3.msra.mxu1 %v2224_v5 }
 0x1e6   :  { %v6878_v15 = vmax.f32 %v6870_v50, %v6874_v11  ;;  %1998 = vst.msk [vmem:[#allocation2 + $0x470] sm:$0xff] %vm1855_vm3, %v12033_v35  ;;  %11390 = vmatprep.subr.mxu1 %v2239_v30 }
 0x1e7   :  { %v6876_v55 = vld [vmem:[#allocation2 + $0x41c] sm:$0xff]  ;;  %v6877_v29 = vld [vmem:[#allocation2 + $0x424] sm:$0xf]  ;;  %v1632_v40 = vpop.f32.mrf.mxu0  ;;  %11391 = vmatpush3.msra.mxu1 %v2223_v39  ;;  %v14751_v46 = vld [vmem:[#allocation2 + $0x430] sm:$0xff] }
 0x1e8   :  { %6882 = vst.msk [vmem:[#allocation3 + $0x1f8] sm:$0xff] %vm1855_vm3, %v6878_v15  ;;  %v6880_v22 = vmax.f32 %v14730_v19, %v6876_v55  ;;  %v6881_v33 = vmax.f32 %v6873_v20, %v6877_v29  ;;  %v14745_v54 = vld [vmem:[#allocation2 + $0x438] sm:$0xff]  ;;  %1996 = vst.msk [vmem:[#allocation2 + $0x460] sm:$0xff] %vm1855_vm3, %v1632_v40  ;;  %11392 = vmatprep.subr.mxu1 %v2238_v16 }
 0x1e9   :  { %v12034_v38 = vpop.f32.mrf.mxu0  ;;  %11393 = vmatpush3.msra.mxu1 %v14496_v25  ;;  %v14755_v37 = vld [vmem:[#allocation2 + $0x428] sm:$0xff] }
 0x1ea   :  { %6884 = vst.msk [vmem:[#allocation3 + $0x208] sm:$0xff] %vm1855_vm3, %v6880_v22  ;;  %v6889_v44 = vld [vmem:[#allocation2 + $0x440] sm:$0xf]  ;;  %v6892_v0 = vld [vmem:[#allocation2 + $0x454] sm:$0xff]  ;;  %v6893_v34 = vld [vmem:[#allocation2 + $0x45c] sm:$0xf]  ;;  %11394 = vmatprep.subr.mxu1 %v2237_v48 }
 0x1eb   :  { %6885 = vst.msk [vmem:[#allocation3 + $0x210] sm:$0xf] %vm3078_vm7, %v6881_v33  ;;  %v6896_v57 = vmax.f32 %v14745_v54, %v6892_v0  ;;  %v6897_v43 = vmax.f32 %v6889_v44, %v6893_v34  ;;  %v6890_v50 = vld [vmem:[#allocation2 + $0x444] sm:$0xff]  ;;  %v6891_v51 = vld [vmem:[#allocation2 + $0x44c] sm:$0xff]  ;;  %v1635_v52 = vpop.f32.mrf.mxu0  ;;  %11395 = vmatpush3.msra.mxu1 %v14484_v24 }
 0x1ec   :  { %1999 = vst.msk [vmem:[#allocation2 + $0x478] sm:$0xff] %vm1855_vm3, %v12034_v38  ;;  %v6894_v25 = vmax.f32 %v14755_v37, %v6890_v50  ;;  %v6895_v53 = vmax.f32 %v14751_v46, %v6891_v51  ;;  %1997 = vst.msk [vmem:[#allocation2 + $0x468] sm:$0xff] %vm1855_vm3, %v1635_v52  ;;  %11396 = vmatprep.subr.mxu1 %v14550_v26  ;;  %v2219_v24 = vld [vmem:[#allocation2 + $0x308] sm:$0xff] }
 0x1ed   :  { %6900 = vst.msk [vmem:[#allocation3 + $0x224] sm:$0xff] %vm1855_vm3, %v6896_v57  ;;  %v12037_v58 = vpop.f32.mrf.mxu0  ;;  %11397 = vmatpush3.msra.mxu1 %v14489_v17  ;;  %v2218_v17 = vld [vmem:[#allocation2 + $0x300] sm:$0xff]  ;;  %v14785_v27 = vld [vmem:[#allocation2 + $0x470] sm:$0xff] }
 0x1ee   :  { %6901 = vst.msk [vmem:[#allocation3 + $0x22c] sm:$0xf] %vm3078_vm7, %v6897_v43  ;;  %11398 = vmatprep.subr.mxu1 %v14554_v28 }
 0x1ef   :  { %6898 = vst.msk [vmem:[#allocation3 + $0x214] sm:$0xff] %vm1855_vm3, %v6894_v25  ;;  %6899 = vst.msk [vmem:[#allocation3 + $0x21c] sm:$0xff] %vm1855_vm3, %v6895_v53  ;;  %v1648_v26 = vpop.f32.mrf.mxu0  ;;  %11399 = vmatpush3.msra.mxu1 %v2219_v24 }
 0x1f0   :  { %2002 = vst.msk [vmem:[#allocation2 + $0x490] sm:$0xff] %vm1855_vm3, %v12037_v58  ;;  %2000 = vst.msk [vmem:[#allocation2 + $0x480] sm:$0xff] %vm1855_vm3, %v1648_v26  ;;  %11400 = vmatprep.subr.mxu1 %v14545_v31  ;;  %v14780_v31 = vld [vmem:[#allocation2 + $0x460] sm:$0xff] }
 0x1f1   :  { %v12038_v59 = vpop.f32.mrf.mxu0  ;;  %11401 = vmatpush3.msra.mxu1 %v2218_v17 }
 0x1f2   :  { %2003 = vst.msk [vmem:[#allocation2 + $0x498] sm:$0xff] %vm1855_vm3, %v12038_v59  ;;  %10750 = vmatmul.mubr.msk.f32.vlgmr.msra.gmra.mxu1 %vm2102_vm1, %v13683_v12 }
 0x1f3   :  { %v1651_v60 = vpop.f32.mrf.mxu0  ;;  %10751 = vmatprep.mubr.msk.f32.mxu1 %vm2105_vm4, %v13683_v12  ;;  %v6905_v28 = vld [vmem:[#allocation2 + $0x478] sm:$0xf]  ;;  %v14789_v9 = vld [vmem:[#allocation2 + $0x468] sm:$0xff]  ;;  %vm2324_vm4 = vcmask 261120  }
 0x1f4   :  { %2001 = vst.msk [vmem:[#allocation2 + $0x488] sm:$0xff] %vm1855_vm3, %v1651_v60  ;;  %v2265_v50 = vld [vmem:[#allocation2 + $0x478] sm:$0xff] }
 0x1f5   :  { %v12041_v1 = vpop.f32.mrf.mxu0 }
 0x1f6   :  { %2006 = vst.msk [vmem:[#allocation2 + $0x4b0] sm:$0xff] %vm1855_vm3, %v12041_v1 }
 0x1f7   :  { %v6909_v62 = vld [vmem:[#allocation2 + $0x494] sm:$0xf]  ;;  %v6906_v41 = vld [vmem:[#allocation2 + $0x47c] sm:$0xff]  ;;  %v1664_v6 = vpop.f32.mrf.mxu0 }
 0x1f8   :  { %v6913_v32 = vmax.f32 %v6905_v28, %v6909_v62  ;;  %v6910_v8 = vmax.f32 %v14780_v31, %v6906_v41  ;;  %2004 = vst.msk [vmem:[#allocation2 + $0x4a0] sm:$0xff] %vm1855_vm3, %v1664_v6  ;;  %v2261_v6 = vld [vmem:[#allocation2 + $0x458] sm:$0xff] }
 0x1f9   :  { %v12042_v36 = vpop.f32.mrf.mxu0  ;;  %v14798_v55 = vld [vmem:[#allocation2 + $0x498] sm:$0xff] }
 0x1fa   :  { %6917 = vst.msk [vmem:[#allocation3 + $0x248] sm:$0xf] %vm3078_vm7, %v6913_v32 }
 0x1fb   :  { %6914 = vst.msk [vmem:[#allocation3 + $0x230] sm:$0xff] %vm1855_vm3, %v6910_v8  ;;  %2007 = vst.msk [vmem:[#allocation2 + $0x4b8] sm:$0xff] %vm1855_vm3, %v12042_v36  ;;  %v6907_v56 = vld [vmem:[#allocation2 + $0x484] sm:$0xff]  ;;  %v6908_v11 = vld [vmem:[#allocation2 + $0x48c] sm:$0xff]  ;;  %v1667_v13 = vpop.f32.mrf.mxu0 }
 0x1fc   :  { %v6911_v14 = vmax.f32 %v14789_v9, %v6907_v56  ;;  %v6912_v15 = vmax.f32 %v14785_v27, %v6908_v11  ;;  %2005 = vst.msk [vmem:[#allocation2 + $0x4a8] sm:$0xff] %vm1855_vm3, %v1667_v13  ;;  %v2260_v36 = vld [vmem:[#allocation2 + $0x450] sm:$0xff] }
 0x1fd   :  { %v12045_v18 = vpop.f32.mrf.mxu0  ;;  %v6921_v35 = vld [vmem:[#allocation2 + $0x4b0] sm:$0xf] }
 0x1fe   :  { %6915 = vst.msk [vmem:[#allocation3 + $0x238] sm:$0xff] %vm1855_vm3, %v6911_v14  ;;  %6916 = vst.msk [vmem:[#allocation3 + $0x240] sm:$0xff] %vm1855_vm3, %v6912_v15  ;;  %v2258_v14 = vld [vmem:[#allocation2 + $0x440] sm:$0xff] }
 0x1ff   :  { %2010 = vst.msk [vmem:[#allocation2 + $0x4d0] sm:$0xff] %vm1855_vm3, %v12045_v18  ;;  %v1680_v20 = vpop.f32.mrf.mxu0  ;;  %v14805_v61 = vld [vmem:[#allocation2 + $0x4a0] sm:$0xff] }
 0x200   :  { %2008 = vst.msk [vmem:[#allocation2 + $0x4c0] sm:$0xff] %vm1855_vm3, %v1680_v20 }
 0x201   :  { %v12046_v21 = vpop.f32.mrf.mxu0 }
 0x202   :  { %v6922_v29 = vld [vmem:[#allocation2 + $0x4b4] sm:$0xff]  ;;  %2011 = vst.msk [vmem:[#allocation2 + $0x4d8] sm:$0xff] %vm1855_vm3, %v12046_v21 }
 0x203   :  { %v6926_v22 = vmax.f32 %v14798_v55, %v6922_v29  ;;  %v1683_v33 = vpop.f32.mrf.mxu0  ;;  %v14811_v30 = vld [vmem:[#allocation2 + $0x4a8] sm:$0xff]  ;;  %v2273_v15 = vld [vmem:[#allocation2 + $0x4b8] sm:$0xff] }
 0x204   :  { %2009 = vst.msk [vmem:[#allocation2 + $0x4c8] sm:$0xff] %vm1855_vm3, %v1683_v33 }
 0x205   :  { %6930 = vst.msk [vmem:[#allocation3 + $0x24c] sm:$0xff] %vm1855_vm3, %v6926_v22  ;;  %v12049_v63 = vpop.f32.mrf.mxu0 }
 0x206   :  { %2014 = vst.msk [vmem:[#allocation2 + $0x4f0] sm:$0xff] %vm1855_vm3, %v12049_v63  ;;  %v6934_v51 = vld [vmem:[#allocation2 + $0x4d0] sm:$0xff] }
 0x207   :  { %v6923_v10 = vld [vmem:[#allocation2 + $0x4bc] sm:$0xff]  ;;  %v1696_v47 = vpop.f32.mrf.mxu0 }
 0x208   :  { %v6927_v23 = vmax.f32 %v14805_v61, %v6923_v10  ;;  %2012 = vst.msk [vmem:[#allocation2 + $0x4e0] sm:$0xff] %vm1855_vm3, %v1696_v47  ;;  %v2274_v11 = vld [vmem:[#allocation2 + $0x4c0] sm:$0xff]  ;;  %v2272_v10 = vld [vmem:[#allocation2 + $0x4b0] sm:$0xff] }
 0x209   :  { %v12050_v5 = vpop.f32.mrf.mxu0  ;;  %v6935_v34 = vld [vmem:[#allocation2 + $0x4d8] sm:$0xff] }
 0x20a   :  { %6931 = vst.msk [vmem:[#allocation3 + $0x254] sm:$0xff] %vm1855_vm3, %v6927_v23  ;;  %2015 = vst.msk [vmem:[#allocation2 + $0x4f8] sm:$0xff] %vm1855_vm3, %v12050_v5 }
 0x20b   :  { %v6924_v39 = vld [vmem:[#allocation2 + $0x4c4] sm:$0xff]  ;;  %v6925_v40 = vld [vmem:[#allocation2 + $0x4cc] sm:$0xf]  ;;  %v1699_v16 = vpop.f32.mrf.mxu0 }
 0x20c   :  { %v6928_v48 = vmax.f32 %v14811_v30, %v6924_v39  ;;  %v6929_v42 = vmax.f32 %v6921_v35, %v6925_v40  ;;  %2013 = vst.msk [vmem:[#allocation2 + $0x4e8] sm:$0xff] %vm1855_vm3, %v1699_v16 }
 0x20d   :  { %v12053_v44 = vpop.f32.mrf.mxu0  ;;  %v2280_v53 = vld [vmem:[#allocation2 + $0x4f0] sm:$0xff] }
 0x20e   :  { %6932 = vst.msk [vmem:[#allocation3 + $0x25c] sm:$0xff] %vm1855_vm3, %v6928_v48  ;;  %2018 = vst.msk [vmem:[#allocation2 + $0x510] sm:$0xff] %vm1855_vm3, %v12053_v44  ;;  %v2063_v48 = vadd.s32 1024, %v13978_v3 }
 0x20f   :  { %6933 = vst.msk [vmem:[#allocation3 + $0x264] sm:$0xf] %vm3078_vm7, %v6929_v42  ;;  %v1712_v0 = vpop.f32.mrf.mxu0  ;;  %v6936_v17 = vld [vmem:[#allocation2 + $0x4e0] sm:$0xff] }
 0x210   :  { %2016 = vst.msk [vmem:[#allocation2 + $0x500] sm:$0xff] %vm1855_vm3, %v1712_v0  ;;  %v2254_v42 = vld [vmem:[#allocation2 + $0x420] sm:$0xff]  ;;  %v2253_v0 = vld [vmem:[#allocation2 + $0x418] sm:$0xff]  ;;  %vm2077_vm2 = vcmp.ge.s32.totalorder %v2063_v48, %v13981_v4  ;;  %vm2091_vm5 = vcmp.lt.s32.totalorder %v2063_v48, %v13988_v7 }
 0x211   :  { %v6939_v38 = vld [vmem:[#allocation2 + $0x4f4] sm:$0xff]  ;;  %v12054_v45 = vpop.f32.mrf.mxu0  ;;  %vm14870_vm9 = vmand %vm2077_vm2, %vm2091_vm5  ;;  %vm2919_vm2 = vcmask 1043456   ;;  %vm2915_vm5 = vcmask 31744  }
 0x212   :  { %v2281_v57 = vld [vmem:[#allocation2 + $0x4f8] sm:$0xff]  ;;  %v6943_v43 = vmax.f32 %v6935_v34, %v6939_v38  ;;  %2019 = vst.msk [vmem:[#allocation2 + $0x518] sm:$0xff] %vm1855_vm3, %v12054_v45 }
 0x213   :  { %11405 = vmatprep.subr.mxu1 %v2281_v57  ;;  %v6938_v52 = vld [vmem:[#allocation2 + $0x4ec] sm:$0xff]  ;;  %v1715_v25 = vpop.f32.mrf.mxu0  ;;  %v6937_v59 = vld [vmem:[#allocation2 + $0x4e8] sm:$0xf] }
 0x214   :  { %11406 = vmatpush3.msra.mxu1 %v2265_v50  ;;  %6947 = vst.msk [vmem:[#allocation3 + $0x270] sm:$0xff] %vm1855_vm3, %v6943_v43  ;;  %v6942_v58 = vmax.f32 %v6934_v51, %v6938_v52  ;;  %2017 = vst.msk [vmem:[#allocation2 + $0x508] sm:$0xff] %vm1855_vm3, %v1715_v25  ;;  %v2279_v26 = vld [vmem:[#allocation2 + $0x4e8] sm:$0xff] }
 0x215   :  { %11407 = vmatprep.subr.mxu1 %v2280_v53  ;;  %v12057_v24 = vpop.f32.mrf.mxu0  ;;  %v14836_v22 = vld [vmem:[#allocation2 + $0x510] sm:$0xff]  ;;  %v2267_v57 = vld [vmem:[#allocation2 + $0x488] sm:$0xff]  ;;  %v2266_v53 = vld [vmem:[#allocation2 + $0x480] sm:$0xff] }
 0x216   :  { %11408 = vmatpush3.msra.mxu1 %v14785_v27  ;;  %6946 = vst.msk [vmem:[#allocation3 + $0x268] sm:$0xff] %vm1855_vm3, %v6942_v58  ;;  %2022 = vst.msk [vmem:[#allocation2 + $0x530] sm:$0xff] %vm1855_vm3, %v12057_v24  ;;  %v2251_v43 = vld [vmem:[#allocation2 + $0x408] sm:$0xff] }
 0x217   :  { %11409 = vmatprep.subr.mxu1 %v2279_v26  ;;  %v6940_v60 = vld [vmem:[#allocation2 + $0x4fc] sm:$0xff]  ;;  %v6941_v28 = vld [vmem:[#allocation2 + $0x504] sm:$0xf]  ;;  %v1728_v62 = vpop.f32.mrf.mxu0  ;;  %v2819_v50 = vld [vmem:[%s18487_s3 + $0x8] sm:$0xff] }
 0x218   :  { %11410 = vmatpush3.msra.mxu1 %v14789_v9  ;;  %v6944_v1 = vmax.f32 %v6936_v17, %v6940_v60  ;;  %v6945_v32 = vmax.f32 %v6937_v59, %v6941_v28  ;;  %2020 = vst.msk [vmem:[#allocation2 + $0x520] sm:$0xff] %vm1855_vm3, %v1728_v62  ;;  %v2275_v9 = vld [vmem:[#allocation2 + $0x4c8] sm:$0xff]  ;;  %v13674_v59 = vld [vmem:[#allocation2 + $0x5f8] sm:$0xff] }
 0x219   :  { %11411 = vmatprep.subr.mxu1 %v6936_v17  ;;  %v12058_v41 = vpop.f32.mrf.mxu0  ;;  %v14833_v13 = vld [vmem:[#allocation2 + $0x518] sm:$0xff] }
 0x21a   :  { %11412 = vmatpush3.msra.mxu1 %v14780_v31  ;;  %6948 = vst.msk [vmem:[#allocation3 + $0x278] sm:$0xff] %vm1855_vm3, %v6944_v1  ;;  %2023 = vst.msk [vmem:[#allocation2 + $0x538] sm:$0xff] %vm1855_vm3, %v12058_v41  ;;  %v2259_v31 = vld [vmem:[#allocation2 + $0x448] sm:$0xff]  ;;  %v13675_v41 = vld [vmem:[#allocation2 + $0x5f0] sm:$0xff] }
 0x21b   :  { %6949 = vst.msk [vmem:[#allocation3 + $0x280] sm:$0xf] %vm3078_vm7, %v6945_v32  ;;  %11413 = vmatprep.subr.mxu1 %v6935_v34  ;;  %v1731_v8 = vpop.f32.mrf.mxu0  ;;  %v14840_v47 = vld [vmem:[#allocation2 + $0x508] sm:$0xff]  ;;  %v2268_v34 = vld [vmem:[#allocation2 + $0x490] sm:$0xff] }
 0x21c   :  { %11414 = vmatpush3.msra.mxu1 %v2261_v6  ;;  %2021 = vst.msk [vmem:[#allocation2 + $0x528] sm:$0xff] %vm1855_vm3, %v1731_v8  ;;  %v6989_v8 = vld [vmem:[#allocation2 + $0x5ac] sm:$0xf] }
 0x21d   :  { %11415 = vmatprep.subr.mxu1 %v6934_v51  ;;  %v12061_v27 = vpop.f32.mrf.mxu0  ;;  %v2288_v48 = vld [vmem:[#allocation2 + $0x530] sm:$0xff] }
 0x21e   :  { %11416 = vmatpush3.msra.mxu1 %v2260_v36  ;;  %2026 = vst.msk [vmem:[#allocation2 + $0x550] sm:$0xff] %vm1855_vm3, %v12061_v27 }
 0x21f   :  { %11417 = vmatprep.subr.mxu1 %v2275_v9  ;;  %v1744_v56 = vpop.f32.mrf.mxu0  ;;  %v6953_v18 = vld [vmem:[#allocation2 + $0x520] sm:$0xf]  ;;  %v13676_v9 = vld [vmem:[#allocation2 + $0x5e8] sm:$0xff] }
 0x220   :  { %11418 = vmatpush3.msra.mxu1 %v2259_v31  ;;  %2024 = vst.msk [vmem:[#allocation2 + $0x540] sm:$0xff] %vm1855_vm3, %v1744_v56 }
 0x221   :  { %11419 = vmatprep.subr.mxu1 %v2274_v11  ;;  %v6956_v20 = vld [vmem:[#allocation2 + $0x534] sm:$0xff]  ;;  %v6957_v29 = vld [vmem:[#allocation2 + $0x53c] sm:$0xf]  ;;  %v12062_v21 = vpop.f32.mrf.mxu0  ;;  %v2310_v11 = vld [vmem:[#allocation2 + $0x5e0] sm:$0xff] }
 0x222   :  { %11420 = vmatpush3.msra.mxu1 %v2258_v14  ;;  %v6960_v33 = vmax.f32 %v14833_v13, %v6956_v20  ;;  %v6961_v63 = vmax.f32 %v6953_v18, %v6957_v29  ;;  %2027 = vst.msk [vmem:[#allocation2 + $0x558] sm:$0xff] %vm1855_vm3, %v12062_v21  ;;  %v2309_v20 = vld [vmem:[#allocation2 + $0x5d8] sm:$0xff] }
 0x223   :  { %11421 = vmatprep.subr.mxu1 %v2273_v15  ;;  %v6954_v23 = vld [vmem:[#allocation2 + $0x524] sm:$0xff]  ;;  %v6955_v5 = vld [vmem:[#allocation2 + $0x52c] sm:$0xff]  ;;  %v1747_v35 = vpop.f32.mrf.mxu0 }
 0x224   :  { %11422 = vmatpush3.msra.mxu1 %v14745_v54  ;;  %6964 = vst.msk [vmem:[#allocation3 + $0x294] sm:$0xff] %vm1855_vm3, %v6960_v33  ;;  %v6958_v39 = vmax.f32 %v14840_v47, %v6954_v23  ;;  %v6959_v40 = vmax.f32 %v14836_v22, %v6955_v5  ;;  %2025 = vst.msk [vmem:[#allocation2 + $0x548] sm:$0xff] %vm1855_vm3, %v1747_v35  ;;  %v2308_v23 = vld [vmem:[#allocation2 + $0x5d0] sm:$0xff]  ;;  %v2307_v35 = vld [vmem:[#allocation2 + $0x5c8] sm:$0xff] }
 0x225   :  { %6965 = vst.msk [vmem:[#allocation3 + $0x29c] sm:$0xf] %vm3078_vm7, %v6961_v63  ;;  %11423 = vmatprep.subr.mxu1 %v2272_v10  ;;  %v12065_v16 = vpop.f32.mrf.mxu0  ;;  %v6968_v17 = vld [vmem:[#allocation2 + $0x550] sm:$0xff]  ;;  %v6988_v63 = vld [vmem:[#allocation2 + $0x5a4] sm:$0xff] }
 0x226   :  { %11424 = vmatpush3.msra.mxu1 %v14751_v46  ;;  %6962 = vst.msk [vmem:[#allocation3 + $0x284] sm:$0xff] %vm1855_vm3, %v6958_v39  ;;  %6963 = vst.msk [vmem:[#allocation3 + $0x28c] sm:$0xff] %vm1855_vm3, %v6959_v40  ;;  %v2066_v46 = vadd.s32 1408, %v13978_v3  ;;  %v13677_v39 = vld [vmem:[#allocation2 + $0x5c0] sm:$0xff]  ;;  %v13678_v40 = vld [vmem:[#allocation2 + $0x5b8] sm:$0xff] }
 0x227   :  { %2030 = vst.msk [vmem:[#allocation2 + $0x570] sm:$0xff] %vm1855_vm3, %v12065_v16  ;;  %11425 = vmatprep.subr.mxu1 %v14811_v30  ;;  %v1760_v54 = vpop.f32.mrf.mxu0  ;;  %v14874_v51 = vld [vmem:[#allocation2 + $0x540] sm:$0xff]  ;;  %v2289_v16 = vld [vmem:[#allocation2 + $0x538] sm:$0xff] }
 0x228   :  { %11426 = vmatpush3.msra.mxu1 %v14755_v37  ;;  %2028 = vst.msk [vmem:[#allocation2 + $0x560] sm:$0xff] %vm1855_vm3, %v1760_v54  ;;  %v2252_v37 = vld [vmem:[#allocation2 + $0x410] sm:$0xff]  ;;  %vm2080_vm6 = vcmp.ge.s32.totalorder %v2066_v46, %v13981_v4  ;;  %vm2094_vm8 = vcmp.lt.s32.totalorder %v2066_v46, %v13988_v7  ;;  %v2302_v46 = vld [vmem:[#allocation2 + $0x5a0] sm:$0xff] }
 0x229   :  { %11427 = vmatprep.subr.mxu1 %v14805_v61  ;;  %v12066_v44 = vpop.f32.mrf.mxu0  ;;  %v6969_v61 = vld [vmem:[#allocation2 + $0x558] sm:$0xf]  ;;  %vm2107_vm10 = vmand %vm2080_vm6, %vm2094_vm8  ;;  %v13679_v54 = vld [vmem:[#allocation2 + $0x5b0] sm:$0xff]  ;;  %vm3492_vm6 = vcmask 521216   ;;  %vm3494_vm8 = vcmask 523270  }
 0x22a   :  { %11428 = vmatpush3.msra.mxu1 %v2254_v42  ;;  %2031 = vst.msk [vmem:[#allocation2 + $0x578] sm:$0xff] %vm1855_vm3, %v12066_v44  ;;  %v2293_v33 = vld [vmem:[#allocation2 + $0x558] sm:$0xff]  ;;  %v2303_v42 = vld [vmem:[#allocation2 + $0x5a8] sm:$0xff] }
 0x22b   :  { %11429 = vmatprep.subr.mxu1 %v14798_v55  ;;  %v1763_v30 = vpop.f32.mrf.mxu0  ;;  %v6967_v60 = vld [vmem:[#allocation2 + $0x548] sm:$0xff] }
 0x22c   :  { %11430 = vmatpush3.msra.mxu1 %v2253_v0  ;;  %2029 = vst.msk [vmem:[#allocation2 + $0x568] sm:$0xff] %vm1855_vm3, %v1763_v30  ;;  %v2287_v44 = vld [vmem:[#allocation2 + $0x528] sm:$0xff]  ;;  %v2286_v0 = vld [vmem:[#allocation2 + $0x520] sm:$0xff]  ;;  %v2065_v30 = vadd.s32 1280, %v13978_v3 }
 0x22d   :  { %11431 = vmatprep.subr.mxu1 %v2268_v34  ;;  %v12069_v45 = vpop.f32.mrf.mxu0 }
 0x22e   :  { %v6973_v38 = vld [vmem:[#allocation2 + $0x574] sm:$0xf]  ;;  %11432 = vmatpush3.msra.mxu1 %v2252_v37  ;;  %2034 = vst.msk [vmem:[#allocation2 + $0x590] sm:$0xff] %vm1855_vm3, %v12069_v45  ;;  %vm2079_vm11 = vcmp.ge.s32.totalorder %v2065_v30, %v13981_v4  ;;  %vm2093_vm13 = vcmp.lt.s32.totalorder %v2065_v30, %v13988_v7  ;;  %v2823_v45 = vld [vmem:[%s18487_s3 + $0x28] sm:$0xff]  ;;  %v13533_v30 = vld [vmem:[%s18488_s7 + $0x18] sm:$0xff]  }
 0x22f   :  { %v6977_v55 = vmax.f32 %v6969_v61, %v6973_v38  ;;  %11433 = vmatprep.subr.mxu1 %v2267_v57  ;;  %v6970_v52 = vld [vmem:[#allocation2 + $0x55c] sm:$0xff]  ;;  %v1776_v25 = vpop.f32.mrf.mxu0  ;;  %v2296_v6 = vld [vmem:[#allocation2 + $0x570] sm:$0xff]  ;;  %v2067_v61 = vadd.s32 1536, %v13978_v3  ;;  %vm2106_vm14 = vmand %vm2079_vm11, %vm2093_vm13  ;;  %vm3503_vm11 = vcmask 523266  }
 0x230   :  { %11434 = vmatpush3.msra.mxu1 %v2251_v43  ;;  %v6974_v58 = vmax.f32 %v14874_v51, %v6970_v52  ;;  %2032 = vst.msk [vmem:[#allocation2 + $0x580] sm:$0xff] %vm1855_vm3, %v1776_v25  ;;  %v2294_v14 = vld [vmem:[#allocation2 + $0x560] sm:$0xff]  ;;  %v2316_v3 = vld [vmem:[#allocation2 + $0x610] sm:$0xff]  ;;  %v13526_v52 = vld [vmem:[%s18488_s7 + $0x78] sm:$0xff]   ;;  %v11297_v25 = vpop.f32.mrf.mxu1 }
 0x231   :  { %6981 = vst.msk [vmem:[#allocation3 + $0x2b8] sm:$0xf] %vm3078_vm7, %v6977_v55  ;;  %11435 = vmatprep.subr.mxu1 %v2266_v53  ;;  %v6982_v24 = vld [vmem:[#allocation2 + $0x578] sm:$0xff]  ;;  %v12070_v26 = vpop.f32.mrf.mxu0  ;;  %v2282_v38 = vld [vmem:[#allocation2 + $0x500] sm:$0xff]  ;;  %vm2081_vm15 = vcmp.ge.s32.totalorder %v2067_v61, %v13981_v4  ;;  %vm2095_vm0 = vcmp.lt.s32.totalorder %v2067_v61, %v13988_v7  ;;  %v2820_v43 = vld [vmem:[%s18487_s3 + $0x10] sm:$0xff]  ;;  %12231 = vmatpush3.bf16.msra.mxu0 %v13526_v52 }
 0x232   :  { %11436 = vmatpush3.msra.mxu1 %v14730_v19  ;;  %6978 = vst.msk [vmem:[#allocation3 + $0x2a0] sm:$0xff] %vm1855_vm3, %v6974_v58  ;;  %2035 = vst.msk [vmem:[#allocation2 + $0x598] sm:$0xff] %vm1855_vm3, %v12070_v26  ;;  %v2314_v7 = vld [vmem:[#allocation2 + $0x600] sm:$0xff]  ;;  %v2821_v55 = vld [vmem:[%s18487_s3 + $0x18] sm:$0xff]  ;;  %12232 = vmatprep.subr.bf16.mxu0 %v18495_v49  ;;  %v11298_v53 = vpop.f32.mrf.mxu1 }
 0x233   :  { %10752 = vmatmul.mubr.msk.f32.vlgmr.msra.gmra.mxu1 %vm14870_vm9, %v13683_v12  ;;  %11440 = vmatprep.subr.mxu1 %v13674_v59  ;;  %v6971_v28 = vld [vmem:[#allocation2 + $0x564] sm:$0xff]  ;;  %v6972_v62 = vld [vmem:[#allocation2 + $0x56c] sm:$0xff]  ;;  %v1779_v1 = vpop.f32.mrf.mxu0  ;;  %vm2108_vm1 = vmand %vm2081_vm15, %vm2095_vm0  ;;  %vm3498_vm9 = vcmask 523268  }
 0x234   :  { %11441 = vmatpush3.msra.mxu1 %v6982_v24  ;;  %10753 = vmatprep.mubr.msk.f32.mxu1 %vm2107_vm10, %v13683_v12  ;;  %v6975_v32 = vmax.f32 %v6967_v60, %v6971_v28  ;;  %v6976_v19 = vmax.f32 %v6968_v17, %v6972_v62  ;;  %2033 = vst.msk [vmem:[#allocation2 + $0x588] sm:$0xff] %vm1855_vm3, %v1779_v1  ;;  %v2295_v31 = vld [vmem:[#allocation2 + $0x568] sm:$0xff]  ;;  %v2121_v4 = vsel %vm2108_vm1, 0.0012755102, %v18495_v49  ;;  %v2822_v57 = vld [vmem:[%s18487_s3 + $0x20] sm:$0xff]  ;;  %v11332_v58 = vpop.f32.mrf.mxu1  ;;  %vm3501_vm10 = vcmask 517120  }
 0x235   :  { %11442 = vmatprep.subr.mxu1 %v13675_v41  ;;  %v6985_v36 = vld [vmem:[#allocation2 + $0x590] sm:$0xf]  ;;  %v14957_v28 = vld [vmem:[%s18489_s2] ss:$0 sm:$0xff]  ;;  %v13536_v61 = vld [vmem:[%s18488_s7 + $0x8] sm:$0xff]  }
 0x236   :  { %11443 = vmatpush3.msra.mxu1 %v2296_v6  ;;  %6979 = vst.msk [vmem:[#allocation3 + $0x2a8] sm:$0xff] %vm1855_vm3, %v6975_v32  ;;  %6980 = vst.msk [vmem:[#allocation3 + $0x2b0] sm:$0xff] %vm1855_vm3, %v6976_v19  ;;  %v6993_v27 = vmax.f32 %v6985_v36, %v6989_v8  ;;  %v2300_v37 = vld [vmem:[#allocation2 + $0x590] sm:$0xff] }
 0x237   :  { %11444 = vmatprep.subr.mxu1 %v13676_v9  ;;  %v6983_v56 = vld [vmem:[#allocation2 + $0x580] sm:$0xff]  ;;  %v3344_v52 = vld [vmem:[#allocation3 + $0x31] ss:$2 sm:$0xff] }
 0x238   :  { %11445 = vmatpush3.msra.mxu1 %v2295_v31  ;;  %6997 = vst.msk [vmem:[#allocation3 + $0x2d4] sm:$0xf] %vm3078_vm7, %v6993_v27 }
 0x239   :  { %11446 = vmatprep.subr.mxu1 %v2310_v11  ;;  %v6986_v15 = vld [vmem:[#allocation2 + $0x594] sm:$0xff]  ;;  %v6987_v18 = vld [vmem:[#allocation2 + $0x59c] sm:$0xff] }
 0x23a   :  { %11447 = vmatpush3.msra.mxu1 %v2294_v14  ;;  %v6990_v29 = vmax.f32 %v6982_v24, %v6986_v15  ;;  %v6991_v21 = vmax.f32 %v6983_v56, %v6987_v18  ;;  %v2301_v34 = vld [vmem:[#allocation2 + $0x598] sm:$0xff]  ;;  %v11333_v24 = vpop.f32.mrf.mxu1 }
 0x23b   :  { %11448 = vmatprep.subr.mxu1 %v2309_v20  ;;  %v6984_v10 = vld [vmem:[#allocation2 + $0x588] sm:$0xff]  ;;  %v11334_v32 = vadd.f32 %v11333_v24, %v11332_v58  ;;  %v3298_v58 = vld [vmem:[#allocation3 + $0x50] ss:$2 sm:$0xff]  ;;  %v3348_v24 = vld [vmem:[#allocation3 + $0x51] ss:$2 sm:$0xff] }
 0x23c   :  { %11449 = vmatpush3.msra.mxu1 %v2293_v33  ;;  %6994 = vst.msk [vmem:[#allocation3 + $0x2bc] sm:$0xff] %vm1855_vm3, %v6990_v29  ;;  %6995 = vst.msk [vmem:[#allocation3 + $0x2c4] sm:$0xff] %vm1855_vm3, %v6991_v21  ;;  %v6992_v5 = vmax.f32 %v6984_v10, %v6988_v63  ;;  %v2907_v33 = vld [vmem:[%s18490_s5] sm:$0xf]  ;;  %v13527_v63 = vld [vmem:[%s18488_s7 + $0x70] sm:$0xff]  }
 0x23d   :  { %11450 = vmatprep.subr.mxu1 %v2308_v23  ;;  %12233 = vmatpush3.bf16.msra.mxu0 %v13527_v63  ;;  %v10756_v23 = vld [vmem:[%s18491_s4] ss:$0 sm:$0xff] }
 0x23e   :  { %11451 = vmatpush3.msra.mxu1 %v6968_v17  ;;  %6996 = vst.msk [vmem:[#allocation3 + $0x2cc] sm:$0xff] %vm1855_vm3, %v6992_v5  ;;  %12234 = vmatprep.subr.bf16.mxu0 %v18495_v49  ;;  %v15038_v63 = vld [vmem:[#allocation3 + $0xe0] ss:$2 sm:$0xff] }
 0x23f   :  { %11452 = vmatprep.subr.mxu1 %v2307_v35 }
 0x240   :  { %11453 = vmatpush3.msra.mxu1 %v6967_v60  ;;  %v11299_v60 = vadd.f32 %v11298_v53, %v11297_v25  ;;  %v3296_v25 = vld [vmem:[#allocation3 + $0x40] ss:$2 sm:$0xff]  ;;  %v3346_v53 = vld [vmem:[#allocation3 + $0x41] ss:$2 sm:$0xff] }
 0x241   :  { %11454 = vmatprep.subr.mxu1 %v13677_v39 }
 0x242   :  { %11455 = vmatpush3.msra.mxu1 %v14874_v51  ;;  %v2818_v51 = vld [vmem:[%s18487_s3] sm:$0xff]  ;;  %v2395_v1 = vadd.f32 %v11299_v60, %v14957_v28  ;;  %v3352_v60 = vld [vmem:[#allocation3 + $0x71] ss:$2 sm:$0xff] }
 0x243   :  { %11456 = vmatprep.subr.mxu1 %v13678_v40 }
 0x244   :  { %11457 = vmatpush3.msra.mxu1 %v2289_v16  ;;  %v2465_v41 = vadd.f32 %v11334_v32, %v2395_v1  ;;  %v13529_v16 = vld [vmem:[%s18488_s7 + $0x38] sm:$0xff]   ;;  %v3304_v32 = vld [vmem:[#allocation3 + $0x80] ss:$2 sm:$0xff] }
 0x245   :  { %11458 = vmatprep.subr.mxu1 %v13679_v54  ;;  %v13530_v54 = vld [vmem:[%s18488_s7 + $0x30] sm:$0xff]  }
 0x246   :  { %11459 = vmatpush3.msra.mxu1 %v2288_v48  ;;  %v13531_v48 = vld [vmem:[%s18488_s7 + $0x28] sm:$0xff]  }
 0x247   :  { %11460 = vmatprep.subr.mxu1 %v2303_v42  ;;  %v13532_v42 = vld [vmem:[%s18488_s7 + $0x20] sm:$0xff]  }
 0x248   :  { %11461 = vmatpush3.msra.mxu1 %v2287_v44  ;;  %v3560_v44 = vld [vmem:[#allocation4 + $0x1] sm:$0xff] }
 0x249   :  { %11462 = vmatprep.subr.mxu1 %v2302_v46  ;;  %v3561_v46 = vld [vmem:[#allocation4 + $0x9] sm:$0xff] }
 0x24a   :  { %11463 = vmatpush3.msra.mxu1 %v2286_v0  ;;  %v3574_v0 = vpack.c.bf16 %v3561_v46, %v3560_v44  ;;  %v15060_v44 = vld [vmem:[#allocation3 + $0x120] ss:$2 sm:$0xff]  ;;  %v15062_v46 = vld [vmem:[#allocation3 + $0x130] ss:$2 sm:$0xff] }
 0x24b   :  { %11464 = vmatprep.subr.mxu1 %v2301_v34  ;;  %v13534_v34 = vld [vmem:[%s18488_s7 + $0x60] sm:$0xff]  }
 0x24c   :  { %11465 = vmatpush3.msra.mxu1 %v14833_v13  ;;  %v2317_v13 = vld [vmem:[#allocation2 + $0x618] sm:$0xff] }
 0x24d   :  { %11466 = vmatprep.subr.mxu1 %v2300_v37  ;;  %v13535_v37 = vld [vmem:[%s18488_s7 + $0x10] sm:$0xff]  }
 0x24e   :  { %11467 = vmatpush3.msra.mxu1 %v14836_v22  ;;  %v2315_v22 = vld [vmem:[#allocation2 + $0x608] sm:$0xff] }
 0x24f   :  { %11468 = vmatprep.subr.mxu1 %v6984_v10  ;;  %v13528_v10 = vld [vmem:[%s18488_s7 + $0x68] sm:$0xff]  }
 0x250   :  { %11469 = vmatpush3.msra.mxu1 %v14840_v47  ;;  %v2824_v47 = vld [vmem:[%s18487_s3 + $0x30] sm:$0xff]  ;;  %12235 = vmatpush3.bf16.msra.mxu0 %v13528_v10 }
 0x251   :  { %11470 = vmatprep.subr.mxu1 %v6983_v56  ;;  %12236 = vmatprep.subr.bf16.mxu0 %v18495_v49  ;;  %v15040_v10 = vld [vmem:[#allocation3 + $0xf0] ss:$2 sm:$0xff] }
 0x252   :  { %11471 = vmatpush3.msra.mxu1 %v2282_v38  ;;  %v13537_v38 = vld [vmem:[%s18488_s7] sm:$0xff]  }
 0x253   :  { %10754 = vmatmul.mubr.msk.f32.vlgmr.msra.gmra.mxu1 %vm2106_vm14, %v13683_v12  ;;  %12087 = vmatprep.subr.mxu1 %v18495_v49  ;;  %v2825_v12 = vld [vmem:[%s18487_s3 + $0x38] sm:$0xff] }
 0x254   :  { %12088 = vmatpush3.msra.mxu1 %v2317_v13  ;;  %12095 = vmatprep.mubr.msk.f32.mxu1 %vm13685_vm12, %v18495_v49  ;;  %v10758_v13 = vld [vmem:[%s18492_s6] ss:$0 sm:$0xff] }
 0x255   :  { %12089 = vmatprep.subr.mxu1 %v18495_v49  ;;  %12237 = vmatpush3.bf16.msra.mxu0 %v13534_v34 }
 0x256   :  { %12090 = vmatpush3.msra.mxu1 %v2316_v3  ;;  %12302 = vmatprep.subr.bf16.mxu0 %v18495_v49 }
 0x257   :  { %12091 = vmatprep.subr.mxu1 %v18495_v49 }
 0x258   :  { %12092 = vmatpush3.msra.mxu1 %v2315_v22 }
 0x259   :  { %12093 = vmatprep.subr.mxu1 %v18495_v49 }
 0x25a   :  { %12094 = vmatpush3.msra.mxu1 %v2314_v7 }
 0x25b   :  { %12096 = vmatmul.mubr.msk.f32.vlgmr.msra.gmra.mxu1 %vm2324_vm4, %v2121_v4  ;;  %12098 = vmatprep.subr.mxu1 %v18495_v49 }
 0x25c   :  { %12114 = vmatprep.mubr.msk.f32.mxu1 %vm13685_vm12, %v18495_v49  ;;  %12099 = vmatpush3.msra.mxu1 %v2825_v12 }
 0x25d   :  { %12100 = vmatprep.subr.mxu1 %v18495_v49 }
 0x25e   :  { %12101 = vmatpush3.msra.mxu1 %v2824_v47  ;;  %v3288_v47 = vld [vmem:[#allocation3] ss:$2 sm:$0xff] }
 0x25f   :  { %12102 = vmatprep.subr.mxu1 %v18495_v49 }
 0x260   :  { %12103 = vmatpush3.msra.mxu1 %v2823_v45  ;;  %v3290_v45 = vld [vmem:[#allocation3 + $0x10] ss:$2 sm:$0xff] }
 0x261   :  { %12104 = vmatprep.subr.mxu1 %v18495_v49 }
 0x262   :  { %12105 = vmatpush3.msra.mxu1 %v2822_v57  ;;  %v3338_v57 = vld [vmem:[#allocation3 + $0x1] ss:$2 sm:$0xff] }
 0x263   :  { %12106 = vmatprep.subr.mxu1 %v18495_v49 }
 0x264   :  { %12107 = vmatpush3.msra.mxu1 %v2821_v55  ;;  %v3340_v55 = vld [vmem:[#allocation3 + $0x11] ss:$2 sm:$0xff] }
 0x265   :  { %12108 = vmatprep.subr.mxu1 %v18495_v49  ;;  %v3388_v1 = vmax.f32 %v3290_v45, %v3340_v55  ;;  %v3330_v45 = vld [vmem:[#allocation3 + $0x150] ss:$2 sm:$0xff]  ;;  %v3380_v55 = vld [vmem:[#allocation3 + $0x151] ss:$2 sm:$0xff] }
 0x266   :  { %12109 = vmatpush3.msra.mxu1 %v2820_v43  ;;  %v3292_v43 = vld [vmem:[#allocation3 + $0x20] ss:$2 sm:$0xff] }
 0x267   :  { %12110 = vmatprep.subr.mxu1 %v18495_v49 }
 0x268   :  { %12111 = vmatpush3.msra.mxu1 %v2819_v50  ;;  %v3294_v50 = vld [vmem:[#allocation3 + $0x30] ss:$2 sm:$0xff] }
 0x269   :  { %12112 = vmatprep.subr.mxu1 %v18495_v49 }
 0x26a   :  { %12113 = vmatpush3.msra.mxu1 %v2818_v51  ;;  %v3342_v51 = vld [vmem:[#allocation3 + $0x21] ss:$2 sm:$0xff] }
 0x26b   :  { %12117 = vmatprep.subr.mxu1 %v18495_v49 }
 0x273   :  { %v11367_v26 = vpop.f32.mrf.mxu1 }
 0x275   :  { %v11368_v17 = vpop.f32.mrf.mxu1 }
 0x276   :  { %v11369_v6 = vadd.f32 %v11368_v17, %v11367_v26  ;;  %v3300_v26 = vld [vmem:[#allocation3 + $0x60] ss:$2 sm:$0xff]  ;;  %v3350_v17 = vld [vmem:[#allocation3 + $0x61] ss:$2 sm:$0xff] }
 0x278   :  { %v2535_v9 = vadd.f32 %v11369_v6, %v2465_v41  ;;  %v3389_v41 = vmax.f32 %v3292_v43, %v3342_v51  ;;  %v3390_v6 = vmax.f32 %v3294_v50, %v3344_v52 }
 0x27a   :  { %v15070_v34 = vadd.f32 %v14957_v28, %v3390_v6  ;;  %v7033_v6 = vld [vmem:[#allocation3 + $0x198] ss:$2 sm:$0xff] }
 0x2b2   :  { %v11402_v59 = vpop.f32.mrf.mxu1 }
 0x2b4   :  { %v11403_v62 = vpop.f32.mrf.mxu1 }
 0x2b5   :  { %v11404_v36 = vadd.f32 %v11403_v62, %v11402_v59  ;;  %v3302_v59 = vld [vmem:[#allocation3 + $0x70] ss:$2 sm:$0xff]  ;;  %v3387_v62 = vmax.f32 %v3288_v47, %v3338_v57  ;;  %v15090_v57 = vld [vmem:[#allocation3 + $0x160] ss:$2 sm:$0xff] }
 0x2b7   :  { %v2605_v11 = vadd.f32 %v11404_v36, %v2535_v9  ;;  %v3392_v36 = vmax.f32 %v3298_v58, %v3348_v24  ;;  %v15024_v9 = vld [vmem:[#allocation3 + $0xa0] ss:$2 sm:$0xff] }
 0x2f3   :  { %v11437_v19 = vpop.f32.mrf.mxu1 }
 0x2f5   :  { %v11438_v8 = vpop.f32.mrf.mxu1 }
 0x2f6   :  { %v11439_v31 = vadd.f32 %v11438_v8, %v11437_v19  ;;  %v3354_v19 = vld [vmem:[#allocation3 + $0x81] ss:$2 sm:$0xff]  ;;  %v3391_v8 = vmax.f32 %v3296_v25, %v3346_v53  ;;  %v15098_v53 = vld [vmem:[#allocation3 + $0x170] ss:$2 sm:$0xff] }
 0x2f7   :  { %v3382_v25 = vld [vmem:[#allocation3 + $0x161] ss:$2 sm:$0xff] }
 0x2f8   :  { %v2675_v15 = vadd.f32 %v11439_v31, %v2605_v11  ;;  %v3356_v31 = vld [vmem:[#allocation3 + $0x91] ss:$2 sm:$0xff]  ;;  %v3393_v11 = vmax.f32 %v3300_v26, %v3350_v17 }
 0x313   :  { %v11472_v27 = vpop.f32.mrf.mxu1 }
 0x315   :  { %v11473_v56 = vpop.f32.mrf.mxu1 }
 0x316   :  { %v11474_v14 = vadd.f32 %v11473_v56, %v11472_v27  ;;  %v15022_v27 = vld [vmem:[#allocation3 + $0x90] ss:$2 sm:$0xff]  ;;  %v3358_v56 = vld [vmem:[#allocation3 + $0xa1] ss:$2 sm:$0xff] }
 0x317   :  { %v3397_v47 = vmax.f32 %v15024_v9, %v3358_v56  ;;  %v3408_v56 = vmax.f32 %v3330_v45, %v3380_v55  ;;  %v7097_v45 = vld [vmem:[#allocation3 + $0x209] ss:$2 sm:$0xff] }
 0x318   :  { %v2745_v18 = vadd.f32 %v11474_v14, %v2675_v15  ;;  %v3394_v14 = vmax.f32 %v3302_v59, %v3352_v60  ;;  %v15026_v15 = vld [vmem:[#allocation3 + $0xb0] ss:$2 sm:$0xff]  ;;  %v3336_v59 = vld [vmem:[#allocation3 + $0x180] ss:$2 sm:$0xf] }
 0x319   :  { %v3384_v60 = vld [vmem:[#allocation3 + $0x171] ss:$2 sm:$0xff]  ;;  %v15118_v9 = vadd.f32 %v14957_v28, %v3397_v47  ;;  %v7047_v47 = vld [vmem:[#allocation3 + $0x208] ss:$2 sm:$0xff] }
 0x31b   :  { %v2814_v20 = vpop.f32.mrf.mxu1 }
 0x31c   :  { %v2815_v29 = vadd.f32 %v2814_v20, %v2745_v18  ;;  %v15028_v18 = vld [vmem:[#allocation3 + $0xc0] ss:$2 sm:$0xff]  ;;  %v15030_v20 = vld [vmem:[#allocation3 + $0xb1] ss:$2 sm:$0xff] }
 0x31d   :  { %v12097_v21 = vpop.f32.mrf.mxu1  ;;  %v3398_v50 = vmax.f32 %v15026_v15, %v15030_v20  ;;  %v7085_v15 = vld [vmem:[#allocation3 + $0x1a9] ss:$2 sm:$0xff]  ;;  %v7039_v20 = vld [vmem:[#allocation3 + $0x1c8] ss:$2 sm:$0xff] }
 0x31e   :  { %12115 = vmatmul.mubr.msk.f32.vlgmr.msra.gmra.mxu1 %vm1855_vm3, %v2815_v29  ;;  %v15032_v29 = vld [vmem:[#allocation3 + $0xc1] ss:$2 sm:$0xff]  ;;  %v15034_v21 = vld [vmem:[#allocation3 + $0xd0] ss:$2 sm:$0xff] }
 0x31f   :  { %12119 = vmatprep.mubr.msk.f32.mxu1 %vm13685_vm12, %v18495_v49  ;;  %12118 = vmatpush3.msk.msra.mxu1 %vm2919_vm2, %v2907_v33  ;;  %v15036_v33 = vld [vmem:[#allocation3 + $0xd1] ss:$2 sm:$0xff]  ;;  %v3399_v51 = vmax.f32 %v15028_v18, %v15032_v29 }
 0x320   :  { %12122 = vmatprep.subr.bf16.mxu1 %v18495_v49  ;;  %v3400_v52 = vmax.f32 %v15034_v21, %v15036_v33  ;;  %v7087_v18 = vld [vmem:[#allocation3 + $0x1b9] ss:$2 sm:$0xff]  ;;  %v7089_v29 = vld [vmem:[#allocation3 + $0x1c9] ss:$2 sm:$0xff]  ;;  %v15123_v21 = vadd.f32 %v14957_v28, %v3398_v50 }
 0x321   :  { %v15126_v33 = vadd.f32 %v14957_v28, %v3399_v51 }
 0x3de   :  { %v2902_v5 = vpop.f32.mrf.mxu1 }
 0x3df   :  { %v2903_v35 = vadd.f32 %v10756_v23, %v2902_v5  ;;  %v15042_v23 = vld [vmem:[#allocation3 + $0xe1] ss:$2 sm:$0xff]  ;;  %v15044_v5 = vld [vmem:[#allocation3 + $0xf1] ss:$2 sm:$0xff] }
 0x3e0   :  { %v12116_v39 = vpop.f32.mrf.mxu1  ;;  %v3401_v24 = vmax.f32 %v15038_v63, %v15042_v23  ;;  %v3402_v26 = vmax.f32 %v15040_v10, %v15044_v5  ;;  %v15129_v63 = vadd.f32 %v14957_v28, %v3400_v52  ;;  %v3409_v10 = vmax.f32 %v15090_v57, %v3382_v25  ;;  %v7041_v23 = vld [vmem:[#allocation3 + $0x1d8] ss:$2 sm:$0xff]  ;;  %v7091_v5 = vld [vmem:[#allocation3 + $0x1d9] ss:$2 sm:$0xff]  ;;  %v7051_v25 = vld [vmem:[#allocation3 + $0x228] ss:$2 sm:$0xff] }
 0x3e1   :  { %v2906_v40 = vmax.f32 %v2903_v35, 0.0  ;;  %v15046_v35 = vld [vmem:[#allocation3 + $0x100] ss:$2 sm:$0xff]  ;;  %v15048_v39 = vld [vmem:[#allocation3 + $0x101] ss:$2 sm:$0xff] }
 0x3e2   :  { %v3403_v17 = vmax.f32 %v15046_v35, %v15048_v39  ;;  %v7043_v35 = vld [vmem:[#allocation3 + $0x1e8] ss:$2 sm:$0xff]  ;;  %v7093_v39 = vld [vmem:[#allocation3 + $0x1e9] ss:$2 sm:$0xff]  ;;  %v7123_v57 = vld [vmem:[#allocation3 + $0x2d9] ss:$2 sm:$0xff] }
 0x3e3   :  { %12120 = vmatmul.mubr.msk.f32.vlgmr.msra.gmra.mxu1 %vm2915_vm5, %v2906_v40  ;;  %v15051_v40 = vadd.f32 %v14957_v28, %v3387_v62  ;;  %v3386_v62 = vld [vmem:[#allocation3 + $0x181] ss:$2 sm:$0xf]  ;;  %v7049_v52 = vld [vmem:[#allocation3 + $0x218] ss:$2 sm:$0xff] }
 0x3e4   :  { %12130 = vmatprep.mubr.msk.bf16.mxu1 %vm13685_vm12, %v18495_v49  ;;  %12123 = vmatpush3.bf16.msra.mxu1 %v13529_v16  ;;  %v15054_v16 = vadd.f32 %v14957_v28, %v3388_v1 }
 0x3e5   :  { %12124 = vmatprep.subr.bf16.mxu1 %v18495_v49 }
 0x3e8   :  { %12125 = vmatpush3.bf16.msra.mxu1 %v13530_v54  ;;  %v3395_v54 = vmax.f32 %v3304_v32, %v3354_v19 }
 0x3e9   :  { %12126 = vmatprep.subr.bf16.mxu1 %v18495_v49 }
 0x3ea   :  { %v15101_v58 = vadd.f32 %v14957_v28, %v3395_v54  ;;  %v15133_v54 = vadd.f32 %v14957_v28, %v3401_v24  ;;  %v15158_v24 = vadd.f32 %v14957_v28, %v3409_v10 }
 0x3ec   :  { %12127 = vmatpush3.bf16.msra.mxu1 %v13531_v48  ;;  %v15056_v48 = vld [vmem:[#allocation3 + $0x110] ss:$2 sm:$0xff] }
 0x3ed   :  { %12128 = vmatprep.subr.bf16.mxu1 %v18495_v49 }
 0x3f0   :  { %12129 = vmatpush3.bf16.msra.mxu1 %v13532_v42  ;;  %v15058_v42 = vld [vmem:[#allocation3 + $0x111] ss:$2 sm:$0xff] }
 0x3f1   :  { %12158 = vmatprep.subr.bf16.mxu1 %v18495_v49  ;;  %v3404_v1 = vmax.f32 %v15056_v48, %v15058_v42  ;;  %v15136_v48 = vadd.f32 %v14957_v28, %v3402_v26  ;;  %v15139_v42 = vadd.f32 %v14957_v28, %v3403_v17 }
 0x3f3   :  { %12131 = vmatmul.mubr.msk.bf16.vlgmr.msra.gmra.mxu1 %vm1855_vm3, %v3574_v0  ;;  %v15064_v0 = vld [vmem:[#allocation3 + $0x121] ss:$2 sm:$0xff] }
 0x3f4   :  { %12159 = vmatpush3.bf16.msra.mxu1 %v13533_v30  ;;  %12134 = vmatprep.mubr.msk.bf16.mxu1 %vm13685_vm12, %v18495_v49  ;;  %v15067_v30 = vadd.f32 %v14957_v28, %v3389_v41  ;;  %v3405_v32 = vmax.f32 %v15060_v44, %v15064_v0  ;;  %v7031_v41 = vld [vmem:[#allocation3 + $0x188] ss:$2 sm:$0xff]  ;;  %v3410_v44 = vmax.f32 %v15098_v53, %v3384_v60  ;;  %v7095_v0 = vld [vmem:[#allocation3 + $0x1f9] ss:$2 sm:$0xff]  ;;  %v7101_v60 = vld [vmem:[#allocation3 + $0x229] ss:$2 sm:$0xff] }
 0x3f5   :  { %12160 = vmatprep.subr.bf16.mxu1 %v18495_v49  ;;  %v7099_v53 = vld [vmem:[#allocation3 + $0x219] ss:$2 sm:$0xff] }
 0x3f8   :  { %12161 = vmatpush3.bf16.msra.mxu1 %v13535_v37  ;;  %v15073_v37 = vadd.f32 %v14957_v28, %v3391_v8  ;;  %v7081_v8 = vld [vmem:[#allocation3 + $0x189] ss:$2 sm:$0xff] }
 0x3f9   :  { %12162 = vmatprep.subr.bf16.mxu1 %v18495_v49  ;;  %v7130_v50 = vmax.f32 %v7031_v41, %v7081_v8  ;;  %v7139_v8 = vmax.f32 %v7049_v52, %v7099_v53 }
 0x3fb   :  { %v15212_v52 = vadd.f32 %v14957_v28, %v7139_v8 }
 0x3fc   :  { %12163 = vmatpush3.bf16.msra.mxu1 %v13536_v61  ;;  %v15076_v61 = vadd.f32 %v14957_v28, %v3392_v36  ;;  %v7083_v36 = vld [vmem:[#allocation3 + $0x199] ss:$2 sm:$0xff] }
 0x3fd   :  { %12164 = vmatprep.subr.bf16.mxu1 %v18495_v49  ;;  %v7131_v51 = vmax.f32 %v7033_v6, %v7083_v36  ;;  %v7138_v6 = vmax.f32 %v7047_v47, %v7097_v45  ;;  %v15166_v36 = vld [vmem:[#allocation3 + $0x2e8] ss:$2 sm:$0xff] }
 0x400   :  { %12165 = vmatpush3.bf16.msra.mxu1 %v13537_v38  ;;  %v3376_v38 = vld [vmem:[#allocation3 + $0x131] ss:$2 sm:$0xff] }
 0x401   :  { %12194 = vmatprep.subr.bf16.mxu1 %v18495_v49  ;;  %v3406_v19 = vmax.f32 %v15062_v46, %v3376_v38  ;;  %v7045_v46 = vld [vmem:[#allocation3 + $0x1f8] ss:$2 sm:$0xff] }
 0x402   :  { %v7073_v38 = vld [vmem:[#allocation3 + $0x2d8] ss:$2 sm:$0xff] }
 0x403   :  { %v7151_v10 = vmax.f32 %v7073_v38, %v7123_v57  ;;  %v7182_v38 = vsub.s32 1, %v13975_v2  ;;  %v15204_v57 = vld [vmem:[#allocation3 + $0x268] ss:$2 sm:$0xff] }
 0x4a3   :  { %v2989_v3 = vpop.f32.mrf.mxu1 }
 0x4a4   :  { %v2990_v22 = vadd.f32 %v10758_v13, %v2989_v3  ;;  %v15078_v13 = vld [vmem:[#allocation3 + $0x140] ss:$2 sm:$0xff]  ;;  %v15080_v3 = vld [vmem:[#allocation3 + $0x141] ss:$2 sm:$0xff] }
 0x4a5   :  { %v12121_v4 = vpop.f32.mrf.mxu1 }
 0x4a6   :  { %v2993_v7 = vsub.f32 0.0, %v2990_v22  ;;  %v15083_v4 = vadd.f32 %v14957_v28, %v3393_v11  ;;  %v7035_v11 = vld [vmem:[#allocation3 + $0x1a8] ss:$2 sm:$0xff] }
 0x4a7   :  { %v7132_v26 = vmax.f32 %v7035_v11, %v7085_v15  ;;  %v15169_v11 = vadd.f32 %v14957_v28, %v7130_v50  ;;  %v7140_v15 = vmax.f32 %v7051_v25, %v7101_v60  ;;  %v15206_v50 = vld [vmem:[#allocation3 + $0x269] ss:$2 sm:$0xff]  ;;  %v15217_v25 = vadd.f32 %v14957_v28, %v7151_v10 }
 0x4a8   :  { %v2994_v12 = vmul.f32 1.442695, %v2993_v7  ;;  %v15086_v7 = vadd.f32 %v14957_v28, %v3394_v14  ;;  %v7037_v14 = vld [vmem:[#allocation3 + $0x1b8] ss:$2 sm:$0xff] }
 0x4a9   :  { %v7133_v17 = vmax.f32 %v7037_v14, %v7087_v18  ;;  %v15172_v14 = vadd.f32 %v14957_v28, %v7131_v51  ;;  %v15174_v18 = vld [vmem:[#allocation3 + $0x248] ss:$2 sm:$0xff]  ;;  %v15209_v51 = vadd.f32 %v14957_v28, %v7138_v6 }
 0x4aa   :  { %13670 = vpow2.f32 %v2994_v12  ;;  %v3396_v12 = vmax.f32 %v15022_v27, %v3356_v31  ;;  %v3407_v31 = vmax.f32 %v15078_v13, %v15080_v3  ;;  %v15143_v13 = vadd.f32 %v14957_v28, %v3404_v1  ;;  %v7103_v1 = vld [vmem:[#allocation3 + $0x239] ss:$2 sm:$0xff] }
 0x4ab   :  { %v15146_v3 = vadd.f32 %v14957_v28, %v3405_v32  ;;  %v15161_v32 = vadd.f32 %v14957_v28, %v3410_v44 }
 0x4ac   :  { %v15115_v27 = vadd.f32 %v14957_v28, %v3396_v12  ;;  %v3411_v12 = vmax.f32 %v3336_v59, %v3386_v62  ;;  %v15152_v55 = vadd.f32 %v14957_v28, %v3407_v31  ;;  %v7134_v59 = vmax.f32 %v7039_v20, %v7089_v29  ;;  %v7053_v62 = vld [vmem:[#allocation3 + $0x238] ss:$2 sm:$0xff]  ;;  %v15176_v20 = vld [vmem:[#allocation3 + $0x249] ss:$2 sm:$0xff] }
 0x4ad   :  { %v7136_v31 = vmax.f32 %v7043_v35, %v7093_v39  ;;  %v7141_v29 = vmax.f32 %v7053_v62, %v7103_v1  ;;  %v15182_v35 = vadd.f32 %v14957_v28, %v7132_v26  ;;  %v15185_v39 = vadd.f32 %v14957_v28, %v7133_v17 }
 0x4ae   :  { %v15164_v41 = vadd.f32 %v14957_v28, %v3411_v12  ;;  %v15188_v44 = vadd.f32 %v14957_v28, %v7134_v59  ;;  %v15220_v26 = vadd.f32 %v14957_v28, %v7140_v15  ;;  %v7142_v17 = vmax.f32 %v15174_v18, %v15176_v20 }
 0x4af   :  { %v15199_v47 = vadd.f32 %v14957_v28, %v7136_v31  ;;  %v15225_v59 = vadd.f32 %v14957_v28, %v7141_v29 }
 0x4b7   :  { %v13671_v22 = vpop.eup %13670 }
 0x4b8   :  { %v2996_v43 = vadd.f32 1.0, %v13671_v22  ;;  %v15149_v22 = vadd.f32 %v14957_v28, %v3406_v19  ;;  %v7135_v19 = vmax.f32 %v7041_v23, %v7091_v5  ;;  %v15178_v23 = vld [vmem:[#allocation3 + $0x2e9] ss:$2 sm:$0xff]  ;;  %v3439_v5 = vsub.s32 0, %v13975_v2 }
 0x4ba   :  { %13672 = vrcp.f32 %v2996_v43  ;;  %v15155_v43 = vadd.f32 %v14957_v28, %v3408_v56  ;;  %v7137_v56 = vmax.f32 %v7045_v46, %v7095_v0  ;;  %v15190_v46 = vld [vmem:[#allocation3 + $0x258] ss:$2 sm:$0xff]  ;;  %v15192_v0 = vld [vmem:[#allocation3 + $0x259] ss:$2 sm:$0xff]  ;;  %v15196_v12 = vadd.f32 %v14957_v28, %v7135_v19 }
 0x4bb   :  { %v7143_v60 = vmax.f32 %v15190_v46, %v15192_v0  ;;  %v18501_v0 = vmax.f32 %v15204_v57, %v15206_v50 }
 0x4bc   :  { %v15202_v45 = vadd.f32 %v14957_v28, %v7137_v56 }
 0x4c7   :  { %v13673_v53 = vpop.eup %13672 }
 0x4c8   :  { %v15229_v62 = vrot.slane %v13673_v53, %v3439_v5  ;;  %v15233_v19 = vrot.slane %v13673_v53, %v7182_v38 }
 0x4ca   :  { %v3441_v31 = vmul.f32 %v15229_v62, %v15051_v40  ;;  %v3442_v56 = vmul.f32 %v15229_v62, %v15054_v16  ;;  %v3443_v6 = vmul.f32 %v15229_v62, %v15067_v30  ;;  %v3444_v8 = vmul.f32 %v15229_v62, %v15070_v34 }
 0x4cb   :  { %v3445_v10 = vmul.f32 %v15229_v62, %v15073_v37  ;;  %v3446_v15 = vmul.f32 %v15229_v62, %v15076_v61  ;;  %v3447_v29 = vmul.f32 %v15229_v62, %v15083_v4  ;;  %v3448_v40 = vmul.f32 %v15229_v62, %v15086_v7 }
 0x4cc   :  { %v3466_v5 = vmax.f32 %v3441_v31, 0.0  ;;  %v3467_v16 = vmax.f32 %v3442_v56, 0.0  ;;  %v3468_v38 = vmax.f32 %v3443_v6, 0.0  ;;  %v3469_v53 = vmax.f32 %v3444_v8, 0.0 }
 0x4cd   :  { %v3470_v30 = vmax.f32 %v3445_v10, 0.0  ;;  %v3471_v2 = vmax.f32 %v3446_v15, 0.0  ;;  %v3472_v1 = vmax.f32 %v3447_v29, 0.0  ;;  %v3449_v34 = vmul.f32 %v15229_v62, %v15101_v58  ;;  %v15292_v29 = vld [vmem:[#allocation3 + $0x2f8] ss:$2 sm:$0xff] }
 0x4ce   :  { %3491 = vst.msk [vmem:[#allocation4 + $0x11] sm:$0xff] %vm1855_vm3, %v3466_v5  ;;  %3496 = vst.msk [vmem:[#allocation4 + $0x23] sm:$0xff] %vm1855_vm3, %v3468_v38  ;;  %v3473_v37 = vmax.f32 %v3448_v40, 0.0  ;;  %v3450_v61 = vmul.f32 %v15229_v62, %v15115_v27  ;;  %v3451_v4 = vmul.f32 %v15229_v62, %v15118_v9  ;;  %v3452_v7 = vmul.f32 %v15229_v62, %v15123_v21  ;;  %v15304_v40 = vld [vmem:[#allocation3 + $0x308] ss:$2 sm:$0xf] }
 0x4cf   :  { %3493 = vst.msk [vmem:[#allocation4 + $0x19] sm:$0x3f] %vm3492_vm6, %v3467_v16  ;;  %v3474_v58 = vmax.f32 %v3449_v34, 0.0  ;;  %v3453_v31 = vmul.f32 %v15229_v62, %v15126_v33  ;;  %v3454_v27 = vmul.f32 %v15229_v62, %v15129_v63  ;;  %v3455_v9 = vmul.f32 %v15229_v62, %v15133_v54  ;;  %v15306_v5 = vld [vmem:[#allocation3 + $0x2f9] ss:$2 sm:$0xff] }
 0x4d0   :  { %3495 = vst.msk [vmem:[#allocation4 + $0x1b] sm:$0xc0] %vm3494_vm8, %v3467_v16  ;;  %v3475_v21 = vmax.f32 %v3450_v61, 0.0  ;;  %v3476_v56 = vmax.f32 %v3451_v4, 0.0  ;;  %v3477_v6 = vmax.f32 %v3452_v7, 0.0  ;;  %v3457_v63 = vmul.f32 %v15229_v62, %v15139_v42 }
 0x4d1   :  { %3497 = vst.msk [vmem:[#allocation4 + $0x2b] sm:$0xf] %vm3078_vm7, %v3469_v53  ;;  %v3479_v33 = vmax.f32 %v3454_v27, 0.0  ;;  %v3480_v8 = vmax.f32 %v3455_v9, 0.0  ;;  %v3459_v10 = vmul.f32 %v15229_v62, %v15146_v3  ;;  %v3460_v15 = vmul.f32 %v15229_v62, %v15149_v22  ;;  %v15331_v9 = vld [vmem:[#allocation3 + $0x278] ss:$2 sm:$0xff] }
 0x4d2   :  { %3499 = vst.msk [vmem:[#allocation4 + $0x2d] sm:$0xf0] %vm3498_vm9, %v3469_v53  ;;  %3511 = vst.msk [vmem:[#allocation4 + $0x6d] sm:$0xf0] %vm3498_vm9, %v3476_v56  ;;  %v3482_v42 = vmax.f32 %v3457_v63, 0.0  ;;  %v3462_v3 = vmul.f32 %v15229_v62, %v15155_v43  ;;  %v3463_v22 = vmul.f32 %v15229_v62, %v15158_v24  ;;  %v3465_v7 = vmul.f32 %v15229_v62, %v15164_v41 }
 0x4d3   :  { %3500 = vst.msk [vmem:[#allocation4 + $0x35] sm:$0xff] %vm1855_vm3, %v3470_v30  ;;  %3505 = vst.msk [vmem:[#allocation4 + $0x47] sm:$0xff] %vm1855_vm3, %v3472_v1  ;;  %v3478_v1 = vmax.f32 %v3453_v31, 0.0  ;;  %v3484_v38 = vmax.f32 %v3459_v10, 0.0  ;;  %v3485_v53 = vmax.f32 %v3460_v15, 0.0  ;;  %v7184_v41 = vmul.f32 %v15233_v19, %v15169_v11 }
 0x4d4   :  { %3502 = vst.msk [vmem:[#allocation4 + $0x3d] sm:$0x3] %vm3501_vm10, %v3471_v2  ;;  %v15312_v30 = vld [vmem:[#allocation3 + $0x309] ss:$2 sm:$0xf]  ;;  %v3487_v61 = vmax.f32 %v3462_v3, 0.0  ;;  %v7186_v11 = vmul.f32 %v15233_v19, %v15182_v35  ;;  %v7187_v63 = vmul.f32 %v15233_v19, %v15185_v39  ;;  %v7188_v15 = vmul.f32 %v15233_v19, %v15188_v44 }
 0x4d5   :  { %3504 = vst.msk [vmem:[#allocation4 + $0x3f] sm:$0xfc] %vm3503_vm11, %v3471_v2  ;;  %v3456_v2 = vmul.f32 %v15229_v62, %v15136_v48  ;;  %v3458_v48 = vmul.f32 %v15229_v62, %v15143_v13  ;;  %3514 = vst.msk [vmem:[#allocation4 + $0x7f] sm:$0xfc] %vm3503_vm11, %v3478_v1  ;;  %v3461_v13 = vmul.f32 %v15229_v62, %v15152_v55  ;;  %v3562_v43 = vld [vmem:[#allocation4 + $0x11] sm:$0xff]  ;;  %v3488_v4 = vmax.f32 %v3463_v22, 0.0 }
 0x4d6   :  { %3506 = vst.msk [vmem:[#allocation4 + $0x51] sm:$0xff] %vm1855_vm3, %v3473_v37  ;;  %3509 = vst.msk [vmem:[#allocation4 + $0x63] sm:$0xff] %vm1855_vm3, %v3475_v21  ;;  %v3464_v55 = vmul.f32 %v15229_v62, %v15161_v32  ;;  %v3563_v34 = vld [vmem:[#allocation4 + $0x19] sm:$0xff]  ;;  %v4034_v37 = vld [vmem:[#allocation4 + $0x10] sm:$0xff]  ;;  %v7185_v62 = vmul.f32 %v15233_v19, %v15172_v14  ;;  %v7211_v10 = vmax.f32 %v7186_v11, 0.0  ;;  %v7167_v39 = vadd.f32 %v14957_v28, %v7142_v17 }
 0x4d7   :  { %3507 = vst.msk [vmem:[#allocation4 + $0x59] sm:$0x3f] %vm3492_vm6, %v3474_v58  ;;  %v3481_v54 = vmax.f32 %v3456_v2, 0.0  ;;  %v3483_v16 = vmax.f32 %v3458_v48, 0.0  ;;  %v3486_v24 = vmax.f32 %v3461_v13, 0.0  ;;  %v4035_v31 = vld [vmem:[#allocation4 + $0x18] sm:$0xff]  ;;  %v7154_v48 = vmax.f32 %v15304_v40, %v15312_v30 }
 0x4d8   :  { %3508 = vst.msk [vmem:[#allocation4 + $0x5b] sm:$0xc0] %vm3494_vm8, %v3474_v58  ;;  %v15317_v58 = vpack.c.bf16 %v3563_v34, %v3562_v43  ;;  %v13538_v32 = vld [vmem:[%s18488_s7 + $0xb8] sm:$0xff]   ;;  %v3489_v27 = vmax.f32 %v3464_v55, 0.0  ;;  %3528 = vst.msk [vmem:[#allocation4 + $0xdb] sm:$0xc0] %vm3494_vm8, %v3488_v4  ;;  %v7189_v20 = vmul.f32 %v15233_v19, %v15196_v12  ;;  %v7190_v46 = vmul.f32 %v15233_v19, %v15199_v47 }
 0x4d9   :  { %3510 = vst.msk [vmem:[#allocation4 + $0x6b] sm:$0xf] %vm3078_vm7, %v3476_v56  ;;  %3520 = vst.msk [vmem:[#allocation4 + $0xab] sm:$0xf] %vm3078_vm7, %v3483_v16  ;;  %v15333_v21 = vld [vmem:[#allocation3 + $0x279] ss:$2 sm:$0xff]  ;;  %v15335_v56 = vpack.c.bf16 %v4035_v31, %v4034_v37  ;;  %v7169_v17 = vadd.f32 %v14957_v28, %v18501_v0  ;;  %v7191_v12 = vmul.f32 %v15233_v19, %v15202_v45 }
 0x4da   :  { %3512 = vst.msk [vmem:[#allocation4 + $0x75] sm:$0xff] %vm1855_vm3, %v3477_v6  ;;  %3515 = vst.msk [vmem:[#allocation4 + $0x87] sm:$0xff] %vm1855_vm3, %v3479_v33  ;;  %v3490_v6 = vmax.f32 %v3465_v7, 0.0  ;;  %v15343_v2 = vld [vmem:[#allocation3 + $0x288] ss:$2 sm:$0xff]  ;;  %12135 = vmatmul.mubr.msk.bf16.gmra.mxu1 %vm1855_vm3, %v15317_v58  ;;  %v7209_v33 = vmax.f32 %v7184_v41, 0.0  ;;  %v7145_v47 = vmax.f32 %v15331_v9, %v15333_v21  ;;  %v7192_v37 = vmul.f32 %v15233_v19, %v15209_v51 }
 0x4db   :  { %3513 = vst.msk [vmem:[#allocation4 + $0x7d] sm:$0x3] %vm3501_vm10, %v3478_v1  ;;  %3523 = vst.msk [vmem:[#allocation4 + $0xbd] sm:$0x3] %vm3501_vm10, %v3485_v53  ;;  %v15345_v14 = vld [vmem:[#allocation3 + $0x289] ss:$2 sm:$0xff]  ;;  %v7153_v1 = vmax.f32 %v15292_v29, %v15306_v5  ;;  %12239 = vmatmul.mubr.msk.bf16.vlgmr.msra.gmra.mxu0 %vm1855_vm3, %v15335_v56  ;;  %12138 = vmatprep.mubr.msk.bf16.mxu1 %vm13685_vm12, %v18495_v49  ;;  %v7194_v41 = vmul.f32 %v15233_v19, %v15220_v26 }
 0x4dc   :  { %3516 = vst.msk [vmem:[#allocation4 + $0x91] sm:$0xff] %vm1855_vm3, %v3480_v8  ;;  %3519 = vst.msk [vmem:[#allocation4 + $0xa3] sm:$0xff] %vm1855_vm3, %v3482_v42  ;;  %v7210_v8 = vmax.f32 %v7185_v62, 0.0  ;;  %v15356_v35 = vld [vmem:[#allocation3 + $0x299] ss:$2 sm:$0xff]  ;;  %v7168_v42 = vadd.f32 %v14957_v28, %v7143_v60  ;;  %12242 = vmatprep.mubr.msk.bf16.mxu0 %vm13685_vm12, %v18495_v49  ;;  %12303 = vmatpush3.bf16.msra.mxu0 %v13538_v32  ;;  %v13539_v44 = vld [vmem:[%s18488_s7 + $0xb0] sm:$0xff]   ;;  %v7146_v57 = vmax.f32 %v15343_v2, %v15345_v14 }
 0x4dd   :  { %3517 = vst.msk [vmem:[#allocation4 + $0x99] sm:$0x3f] %vm3492_vm6, %v3481_v54  ;;  %3527 = vst.msk [vmem:[#allocation4 + $0xd9] sm:$0x3f] %vm3492_vm6, %v3488_v4  ;;  %v15375_v13 = vld [vmem:[#allocation3 + $0x2a8] ss:$2 sm:$0xff]  ;;  %12304 = vmatprep.subr.bf16.mxu0 %v18495_v49  ;;  %v7195_v62 = vmul.f32 %v15233_v19, %v15225_v59  ;;  %v7170_v11 = vadd.f32 %v14957_v28, %v7145_v47 }
 0x4de   :  { %3518 = vst.msk [vmem:[#allocation4 + $0x9b] sm:$0xc0] %vm3494_vm8, %v3481_v54  ;;  %v15354_v54 = vld [vmem:[#allocation3 + $0x298] ss:$2 sm:$0xff]  ;;  %v15377_v3 = vld [vmem:[#allocation3 + $0x2a9] ss:$2 sm:$0xff]  ;;  %v7197_v2 = vmul.f32 %v15233_v19, %v7168_v42 }
 0x4df   :  { %3521 = vst.msk [vmem:[#allocation4 + $0xad] sm:$0xf0] %vm3498_vm9, %v3483_v16  ;;  %v7212_v18 = vmax.f32 %v7187_v63, 0.0  ;;  %v15395_v60 = vld [vmem:[#allocation3 + $0x2b8] ss:$2 sm:$0xff]  ;;  %v4036_v50 = vld [vmem:[#allocation4 + $0x20] sm:$0xff]  ;;  %v7147_v45 = vmax.f32 %v15354_v54, %v15356_v35  ;;  %v7148_v4 = vmax.f32 %v15375_v13, %v15377_v3  ;;  %v7171_v63 = vadd.f32 %v14957_v28, %v7146_v57 }
 0x4e0   :  { %3522 = vst.msk [vmem:[#allocation4 + $0xb5] sm:$0xff] %vm1855_vm3, %v3484_v38  ;;  %3525 = vst.msk [vmem:[#allocation4 + $0xc7] sm:$0xff] %vm1855_vm3, %v3486_v24  ;;  %v15397_v22 = vld [vmem:[#allocation3 + $0x2b9] ss:$2 sm:$0xff]  ;;  %v3564_v16 = vld [vmem:[#allocation4 + $0x21] sm:$0xff]  ;;  %v7214_v43 = vmax.f32 %v7189_v20, 0.0  ;;  %12305 = vmatpush3.bf16.msra.mxu0 %v13539_v44 }
 0x4e1   :  { %3524 = vst.msk [vmem:[#allocation4 + $0xbf] sm:$0xfc] %vm3503_vm11, %v3485_v53  ;;  %v3565_v38 = vld [vmem:[#allocation4 + $0x29] sm:$0xff]  ;;  %v7213_v53 = vmax.f32 %v7188_v15, 0.0  ;;  %v7215_v34 = vmax.f32 %v7190_v46, 0.0  ;;  %v7216_v24 = vmax.f32 %v7191_v12, 0.0  ;;  %v7149_v7 = vmax.f32 %v15395_v60, %v15397_v22  ;;  %12306 = vmatprep.subr.bf16.mxu0 %v18495_v49 }
 0x4e2   :  { %3526 = vst.msk [vmem:[#allocation4 + $0xd1] sm:$0xff] %vm1855_vm3, %v3487_v61  ;;  %3529 = vst.msk [vmem:[#allocation4 + $0xe3] sm:$0xff] %vm1855_vm3, %v3489_v27  ;;  %v4037_v55 = vld [vmem:[#allocation4 + $0x28] sm:$0xff]  ;;  %v7193_v61 = vmul.f32 %v15233_v19, %v15212_v52  ;;  %v7071_v31 = vld [vmem:[#allocation3 + $0x2c8] ss:$2 sm:$0xff]  ;;  %v15420_v27 = vpack.c.bf16 %v3565_v38, %v3564_v16  ;;  %v7217_v52 = vmax.f32 %v7192_v37, 0.0  ;;  %v7172_v54 = vadd.f32 %v14957_v28, %v7147_v45 }
 0x4e3   :  { %3530 = vst.msk [vmem:[#allocation4 + $0xeb] sm:$0xf] %vm3078_vm7, %v3490_v6  ;;  %7238 = vst.msk [vmem:[#allocation4 + $0x12b] sm:$0xf] %vm3078_vm7, %v7212_v18  ;;  %v7121_v32 = vld [vmem:[#allocation3 + $0x2c9] ss:$2 sm:$0xff]  ;;  %v15432_v9 = vpack.c.bf16 %v4037_v55, %v4036_v50  ;;  %v7196_v6 = vmul.f32 %v15233_v19, %v7167_v39  ;;  %v7199_v15 = vmul.f32 %v15233_v19, %v7170_v11 }
 0x4e4   :  { %7234 = vst.msk [vmem:[#allocation4 + $0x111] sm:$0xff] %vm1855_vm3, %v7209_v33  ;;  %7237 = vst.msk [vmem:[#allocation4 + $0x123] sm:$0xff] %vm1855_vm3, %v7211_v10  ;;  %v13541_v51 = vld [vmem:[%s18488_s7 + $0xa8] sm:$0xff]   ;;  %v7218_v21 = vmax.f32 %v7193_v61, 0.0  ;;  %12139 = vmatmul.mubr.msk.bf16.gmra.mxu1 %vm1855_vm3, %v15420_v27  ;;  %v7219_v26 = vmax.f32 %v7194_v41, 0.0  ;;  %v7220_v59 = vmax.f32 %v7195_v62, 0.0  ;;  %v7150_v14 = vmax.f32 %v7071_v31, %v7121_v32 }
 0x4e5   :  { %7235 = vst.msk [vmem:[#allocation4 + $0x119] sm:$0x3f] %vm3492_vm6, %v7210_v8  ;;  %7245 = vst.msk [vmem:[#allocation4 + $0x159] sm:$0x3f] %vm3492_vm6, %v7217_v52  ;;  %12243 = vmatmul.mubr.msk.bf16.gmra.mxu0 %vm1855_vm3, %v15432_v9  ;;  %12142 = vmatprep.mubr.msk.bf16.mxu1 %vm13685_vm12, %v18495_v49  ;;  %v7221_v33 = vmax.f32 %v7196_v6, 0.0  ;;  %v13542_v35 = vld [vmem:[%s18488_s7 + $0xa0] sm:$0xff]   ;;  %v7173_v39 = vadd.f32 %v14957_v28, %v7148_v4  ;;  %v7174_v42 = vadd.f32 %v14957_v28, %v7149_v7 }
 0x4e6   :  { %7236 = vst.msk [vmem:[#allocation4 + $0x11b] sm:$0xc0] %vm3494_vm8, %v7210_v8  ;;  %7246 = vst.msk [vmem:[#allocation4 + $0x15b] sm:$0xc0] %vm3494_vm8, %v7217_v52  ;;  %v7198_v8 = vmul.f32 %v15233_v19, %v7169_v17  ;;  %12246 = vmatprep.mubr.msk.bf16.mxu0 %vm13685_vm12, %v18495_v49  ;;  %12307 = vmatpush3.bf16.msra.mxu0 %v13541_v51  ;;  %v7222_v10 = vmax.f32 %v7197_v2, 0.0  ;;  %v3566_v13 = vld [vmem:[#allocation4 + $0x31] sm:$0xff]  ;;  %v7201_v20 = vmul.f32 %v15233_v19, %v7172_v54 }
 0x4e7   :  { %7239 = vst.msk [vmem:[#allocation4 + $0x12d] sm:$0xf0] %vm3498_vm9, %v7212_v18  ;;  %7249 = vst.msk [vmem:[#allocation4 + $0x16d] sm:$0xf0] %vm3498_vm9, %v7219_v26  ;;  %v3567_v3 = vld [vmem:[#allocation4 + $0x39] sm:$0xff]  ;;  %12308 = vmatprep.subr.bf16.mxu0 %v18495_v49  ;;  %v7200_v18 = vmul.f32 %v15233_v19, %v7171_v63  ;;  %v18502_v46 = vmax.f32 %v15166_v36, %v15178_v23  ;;  %v4038_v17 = vld [vmem:[#allocation4 + $0x30] sm:$0xff]  ;;  %v7202_v16 = vmul.f32 %v15233_v19, %v7173_v39  ;;  %v15565_v39 = vpop.f32.mrf.mxu1 }
 0x4e8   :  { %7240 = vst.msk [vmem:[#allocation4 + $0x135] sm:$0xff] %vm1855_vm3, %v7213_v53  ;;  %7243 = vst.msk [vmem:[#allocation4 + $0x147] sm:$0xff] %vm1855_vm3, %v7215_v34  ;;  %v7223_v44 = vmax.f32 %v7198_v8, 0.0  ;;  %v4039_v60 = vld [vmem:[#allocation4 + $0x38] sm:$0xff]  ;;  %v7224_v22 = vmax.f32 %v7199_v15, 0.0  ;;  %v7203_v38 = vmul.f32 %v15233_v19, %v7174_v42  ;;  %v7175_v53 = vadd.f32 %v14957_v28, %v7150_v14  ;;  %v3568_v45 = vld [vmem:[#allocation4 + $0x41] sm:$0xff] }
 0x4e9   :  { %7241 = vst.msk [vmem:[#allocation4 + $0x13d] sm:$0x3] %vm3501_vm10, %v7214_v43  ;;  %7251 = vst.msk [vmem:[#allocation4 + $0x17d] sm:$0x3] %vm3501_vm10, %v7221_v33  ;;  %v7177_v0 = vadd.f32 %v14957_v28, %v18502_v46  ;;  %v7225_v12 = vmax.f32 %v7200_v18, 0.0  ;;  %v7226_v47 = vmax.f32 %v7201_v20, 0.0  ;;  %v7178_v36 = vadd.f32 %v14957_v28, %v7153_v1 }
 0x4ea   :  { %7242 = vst.msk [vmem:[#allocation4 + $0x13f] sm:$0xfc] %vm3503_vm11, %v7214_v43  ;;  %7252 = vst.msk [vmem:[#allocation4 + $0x17f] sm:$0xfc] %vm3503_vm11, %v7221_v33  ;;  %v7179_v23 = vadd.f32 %v14957_v28, %v7154_v48  ;;  %v15484_v57 = vpack.c.bf16 %v3567_v3, %v3566_v13  ;;  %12309 = vmatpush3.bf16.msra.mxu0 %v13542_v35  ;;  %v7227_v50 = vmax.f32 %v7202_v16, 0.0  ;;  %v7228_v55 = vmax.f32 %v7203_v38, 0.0  ;;  %v12132_v3 = vpop.f32.mrf.mxu1 }
 0x4eb   :  { %7244 = vst.msk [vmem:[#allocation4 + $0x151] sm:$0xff] %vm1855_vm3, %v7216_v24  ;;  %7247 = vst.msk [vmem:[#allocation4 + $0x163] sm:$0xff] %vm1855_vm3, %v7218_v21  ;;  %v7204_v43 = vmul.f32 %v15233_v19, %v7175_v53  ;;  %v15489_v34 = vpack.c.bf16 %v4039_v60, %v4038_v17  ;;  %12374 = vmatprep.subr.bf16.mxu0 %v18495_v49  ;;  %v7205_v28 = vmul.f32 %v15233_v19, %v15217_v25  ;;  %v3569_v24 = vld [vmem:[#allocation4 + $0x49] sm:$0xff]  ;;  %v3570_v31 = vld [vmem:[#allocation4 + $0x51] sm:$0xff] }
 0x4ec   :  { %7248 = vst.msk [vmem:[#allocation4 + $0x16b] sm:$0xf] %vm3078_vm7, %v7219_v26  ;;  %7258 = vst.msk [vmem:[#allocation4 + $0x1ab] sm:$0xf] %vm3078_vm7, %v7226_v47  ;;  %v7206_v29 = vmul.f32 %v15233_v19, %v7177_v0  ;;  %12143 = vmatmul.mubr.msk.bf16.gmra.mxu1 %vm1855_vm3, %v15484_v57  ;;  %v7207_v5 = vmul.f32 %v15233_v19, %v7178_v36  ;;  %v7208_v30 = vmul.f32 %v15233_v19, %v7179_v23  ;;  %v4040_v19 = vld [vmem:[#allocation4 + $0x40] sm:$0xff]  ;;  %v4041_v61 = vld [vmem:[#allocation4 + $0x48] sm:$0xff]  ;;  %v15572_v18 = vpop.f32.mrf.mxu1 }
 0x4ed   :  { %7250 = vst.msk [vmem:[#allocation4 + $0x175] sm:$0xff] %vm1855_vm3, %v7220_v59  ;;  %7253 = vst.msk [vmem:[#allocation4 + $0x187] sm:$0xff] %vm1855_vm3, %v7222_v10  ;;  %v7229_v40 = vmax.f32 %v7204_v43, 0.0  ;;  %12247 = vmatmul.mubr.msk.bf16.gmra.mxu0 %vm1855_vm3, %v15489_v34  ;;  %12146 = vmatprep.mubr.msk.bf16.mxu1 %vm13685_vm12, %v18495_v49  ;;  %v7230_v25 = vmax.f32 %v7205_v28, 0.0  ;;  %v15517_v4 = vpack.c.bf16 %v3569_v24, %v3568_v45  ;;  %v3571_v32 = vld [vmem:[#allocation4 + $0x59] sm:$0xff]  ;;  %v4042_v51 = vld [vmem:[#allocation4 + $0x50] sm:$0xff] }
 0x4ee   :  { %7254 = vst.msk [vmem:[#allocation4 + $0x191] sm:$0xff] %vm1855_vm3, %v7223_v44  ;;  %7257 = vst.msk [vmem:[#allocation4 + $0x1a3] sm:$0xff] %vm1855_vm3, %v7225_v12  ;;  %v7231_v1 = vmax.f32 %v7206_v29, 0.0  ;;  %12250 = vmatprep.mubr.msk.bf16.mxu0 %vm13685_vm12, %v18495_v49  ;;  %v7232_v48 = vmax.f32 %v7207_v5, 0.0  ;;  %v7233_v37 = vmax.f32 %v7208_v30, 0.0  ;;  %v15519_v7 = vpack.c.bf16 %v4041_v61, %v4040_v19  ;;  %v4043_v52 = vld [vmem:[#allocation4 + $0x58] sm:$0xff]  ;;  %v12133_v0 = vpop.f32.mrf.mxu1 }
 0x4ef   :  { %7255 = vst.msk [vmem:[#allocation4 + $0x199] sm:$0x3f] %vm3492_vm6, %v7224_v22  ;;  %v15529_v41 = vpack.c.bf16 %v3571_v32, %v3570_v31  ;;  %v15531_v62 = vpack.c.bf16 %v4043_v52, %v4042_v51  ;;  %v3572_v21 = vld [vmem:[#allocation4 + $0x61] sm:$0xff]  ;;  %v3573_v6 = vld [vmem:[#allocation4 + $0x69] sm:$0xff]  ;;  %v4047_v54 = vld [vmem:[#allocation4 + $0x78] sm:$0xff] }
 0x4f0   :  { %7256 = vst.msk [vmem:[#allocation4 + $0x19b] sm:$0xc0] %vm3494_vm8, %v7224_v22  ;;  %7266 = vst.msk [vmem:[#allocation4 + $0x1db] sm:$0xc0] %vm3494_vm8, %v7231_v1  ;;  %v4044_v11 = vld [vmem:[#allocation4 + $0x60] sm:$0xff]  ;;  %v4045_v26 = vld [vmem:[#allocation4 + $0x68] sm:$0xff]  ;;  %v15541_v59 = vpack.c.bf16 %v3573_v6, %v3572_v21 }
 0x4f1   :  { %7259 = vst.msk [vmem:[#allocation4 + $0x1ad] sm:$0xf0] %vm3498_vm9, %v7226_v47  ;;  %v15543_v2 = vpack.c.bf16 %v4045_v26, %v4044_v11  ;;  %v3531_v14 = vld [vmem:[#allocation4] sm:$0xff]  ;;  %v3532_v33 = vld [vmem:[#allocation4 + $0x8] sm:$0xff]  ;;  %v4046_v63 = vld [vmem:[#allocation4 + $0x70] sm:$0xff] }
 0x4f2   :  { %7260 = vst.msk [vmem:[#allocation4 + $0x1b5] sm:$0xff] %vm1855_vm3, %v7227_v50  ;;  %7263 = vst.msk [vmem:[#allocation4 + $0x1c7] sm:$0xff] %vm1855_vm3, %v7229_v40  ;;  %v3545_v8 = vpack.c.bf16 %v3532_v33, %v3531_v14  ;;  %v13540_v35 = vld [vmem:[%s18488_s7 + $0x58] sm:$0xff]   ;;  %v4054_v10 = vpack.c.bf16 %v4047_v54, %v4046_v63  ;;  %v13543_v15 = vld [vmem:[%s18488_s7 + $0x50] sm:$0xff]  }
 0x4f3   :  { %7261 = vst.msk [vmem:[#allocation4 + $0x1bd] sm:$0x3] %vm3501_vm10, %v7228_v55  ;;  %v4388_v42 = vld [vmem:[#allocation4 + $0x12] sm:$0xff]  ;;  %v4389_v13 = vld [vmem:[#allocation4 + $0x1a] sm:$0xff]  ;;  %v13546_v46 = vld [vmem:[%s18488_s7 + $0xf8] sm:$0xff]  }
 0x4f4   :  { %7262 = vst.msk [vmem:[#allocation4 + $0x1bf] sm:$0xfc] %vm3503_vm11, %v7228_v55  ;;  %12147 = vmatmul.mubr.msk.bf16.gmra.mxu1 %vm1855_vm3, %v15517_v4  ;;  %v13544_v44 = vld [vmem:[%s18488_s7 + $0x48] sm:$0xff]   ;;  %v15574_v20 = vpack.c.bf16 %v4389_v13, %v4388_v42  ;;  %v13545_v17 = vld [vmem:[%s18488_s7 + $0x40] sm:$0xff]   ;;  %v4390_v60 = vld [vmem:[#allocation4 + $0x22] sm:$0xff] }
 0x4f5   :  { %7264 = vst.msk [vmem:[#allocation4 + $0x1d1] sm:$0xff] %vm1855_vm3, %v7230_v25  ;;  %7267 = vst.msk [vmem:[#allocation4 + $0x1e3] sm:$0xff] %vm1855_vm3, %v7232_v48  ;;  %12251 = vmatmul.mubr.msk.bf16.gmra.mxu0 %vm1855_vm3, %v15519_v7  ;;  %12150 = vmatprep.mubr.msk.bf16.mxu1 %vm13685_vm12, %v18495_v49  ;;  %v4391_v22 = vld [vmem:[#allocation4 + $0x2a] sm:$0xff]  ;;  %v13549_v38 = vld [vmem:[%s18488_s7 + $0xe8] sm:$0xff]  }
 0x4f6   :  { %7265 = vst.msk [vmem:[#allocation4 + $0x1d9] sm:$0x3f] %vm3492_vm6, %v7231_v1  ;;  %12254 = vmatprep.mubr.msk.bf16.mxu0 %vm13685_vm12, %v18495_v49  ;;  %v15595_v16 = vpack.c.bf16 %v4391_v22, %v4390_v60  ;;  %v13550_v53 = vld [vmem:[%s18488_s7 + $0xe0] sm:$0xff]   ;;  %v4393_v47 = vld [vmem:[#allocation4 + $0x3a] sm:$0xff]  ;;  %v4394_v36 = vld [vmem:[#allocation4 + $0x42] sm:$0xff] }
 0x4f7   :  { %7268 = vst.msk [vmem:[#allocation4 + $0x1eb] sm:$0xf] %vm3078_vm7, %v7233_v37  ;;  %v4392_v12 = vld [vmem:[#allocation4 + $0x32] sm:$0xff]  ;;  %v4395_v23 = vld [vmem:[#allocation4 + $0x4a] sm:$0xff]  ;;  %v4397_v43 = vld [vmem:[#allocation4 + $0x5a] sm:$0xff] }
 0x4f8   :  { %v15625_v50 = vpack.c.bf16 %v4395_v23, %v4394_v36  ;;  %v4396_v55 = vld [vmem:[#allocation4 + $0x52] sm:$0xff]  ;;  %v4398_v28 = vld [vmem:[#allocation4 + $0x62] sm:$0xff]  ;;  %v4399_v29 = vld [vmem:[#allocation4 + $0x6a] sm:$0xff] }
 0x4f9   :  { %v4407_v40 = vpack.c.bf16 %v4399_v29, %v4398_v28  ;;  %v3857_v5 = vld [vmem:[#allocation4 + $0x2] sm:$0xff]  ;;  %v3858_v30 = vld [vmem:[#allocation4 + $0xa] sm:$0xff]  ;;  %v4400_v25 = vld [vmem:[#allocation4 + $0x72] sm:$0xff] }
 0x4fa   :  { %v4401_v1 = vld [vmem:[#allocation4 + $0x7a] sm:$0xff]  ;;  %v13548_v48 = vld [vmem:[%s18488_s7 + $0x98] sm:$0xff]   ;;  %v3871_v37 = vpack.c.bf16 %v3858_v30, %v3857_v5  ;;  %v13558_v51 = vld [vmem:[%s18488_s7 + $0x20] sm:$0xff]  }
 0x4fb   :  { %v15652_v45 = vpack.c.bf16 %v4401_v1, %v4400_v25  ;;  %v13551_v24 = vld [vmem:[%s18488_s7 + $0x90] sm:$0xff]   ;;  %v13552_v19 = vld [vmem:[%s18488_s7 + $0x88] sm:$0xff]   ;;  %v13554_v61 = vld [vmem:[%s18488_s7 + $0x38] sm:$0xff]  }
 0x4fc   :  { %12151 = vmatmul.mubr.msk.bf16.gmra.mxu1 %vm1855_vm3, %v15529_v41  ;;  %v13555_v31 = vld [vmem:[%s18488_s7 + $0x30] sm:$0xff]   ;;  %v13557_v32 = vld [vmem:[%s18488_s7 + $0x28] sm:$0xff]   ;;  %v4755_v11 = vld [vmem:[#allocation4 + $0x89] sm:$0xff] }
 0x4fd   :  { %12255 = vmatmul.mubr.msk.bf16.gmra.mxu0 %vm1855_vm3, %v15531_v62  ;;  %12154 = vmatprep.mubr.msk.bf16.mxu1 %vm13685_vm12, %v18495_v49  ;;  %v4752_v52 = vld [vmem:[#allocation4 + $0x71] sm:$0xff]  ;;  %v4754_v6 = vld [vmem:[#allocation4 + $0x81] sm:$0xff]  ;;  %v5146_v42 = vld [vmem:[#allocation4 + $0xa9] sm:$0xff] }
 0x4fe   :  { %12258 = vmatprep.mubr.msk.bf16.mxu0 %vm13685_vm12, %v18495_v49  ;;  %v13556_v26 = vld [vmem:[%s18488_s7 + $0xd8] sm:$0xff]   ;;  %v13559_v14 = vld [vmem:[%s18488_s7 + $0xd0] sm:$0xff]   ;;  %v13565_v63 = vld [vmem:[%s18488_s7 + $0x48] sm:$0xff]  }
 0x4ff   :  { %v13562_v33 = vld [vmem:[%s18488_s7 + $0x58] sm:$0xff]   ;;  %v13566_v54 = vld [vmem:[%s18488_s7 + $0x40] sm:$0xff]   ;;  %v5152_v1 = vld [vmem:[#allocation4 + $0xd9] sm:$0x3f] }
 0x500   :  { %v5147_v0 = vld [vmem:[#allocation4 + $0xb1] sm:$0xff]  ;;  %v5150_v36 = vld [vmem:[#allocation4 + $0xc9] sm:$0xff] }
 0x501   :  { %v4566_v5 = vld [vmem:[#allocation4 + $0x28] sm:$0xff]  ;;  %v15858_v25 = vld [vmem:[#allocation4 + $0xd1] sm:$0xff] }
 0x504   :  { %12155 = vmatmul.mubr.msk.bf16.gmra.mxu1 %vm1855_vm3, %v15541_v59 }
 0x505   :  { %12259 = vmatmul.mubr.msk.bf16.gmra.mxu0 %vm1855_vm3, %v15543_v2  ;;  %12166 = vmatprep.mubr.msk.bf16.mxu1 %vm13685_vm12, %v18495_v49 }
 0x506   :  { %12262 = vmatprep.mubr.msk.bf16.mxu0 %vm13685_vm12, %v18495_v49 }
 0x50c   :  { %12167 = vmatmul.mubr.msk.bf16.vlgmr.msra.gmra.mxu1 %vm1855_vm3, %v3545_v8  ;;  %v13561_v8 = vld [vmem:[%s18488_s7 + $0xc0] sm:$0xff]  }
 0x50d   :  { %12195 = vmatpush3.bf16.msra.mxu1 %v13540_v35  ;;  %12263 = vmatmul.mubr.msk.bf16.gmra.mxu0 %vm1855_vm3, %v4054_v10  ;;  %v5143_v35 = vld [vmem:[#allocation4 + $0x91] sm:$0xff]  ;;  %v5144_v10 = vld [vmem:[#allocation4 + $0x99] sm:$0xff] }
 0x50e   :  { %12170 = vmatprep.mubr.msk.bf16.mxu1 %vm13685_vm12, %v18495_v49  ;;  %12310 = vmatprep.mubr.msk.bf16.mxu0 %vm13685_vm12, %v18495_v49 }
 0x50f   :  { %12196 = vmatprep.subr.bf16.mxu1 %v18495_v49 }
 0x511   :  { %12197 = vmatpush3.bf16.msra.mxu1 %v13543_v15  ;;  %v5145_v15 = vld [vmem:[#allocation4 + $0xa1] sm:$0xff] }
 0x512   :  { %12198 = vmatprep.subr.bf16.mxu1 %v18495_v49  ;;  %v15806_v13 = vpack.c.bf16 %v5146_v42, %v5145_v15  ;;  %v4569_v42 = vld [vmem:[#allocation4 + $0x40] sm:$0xff] }
 0x514   :  { %12171 = vmatmul.mubr.msk.bf16.gmra.mxu1 %vm1855_vm3, %v15335_v56  ;;  %v13547_v56 = vld [vmem:[%s18488_s7 + $0xf0] sm:$0xff]  }
 0x515   :  { %12311 = vmatmul.mubr.msk.bf16.vlgmr.msra.gmra.mxu0 %vm1855_vm3, %v15574_v20  ;;  %12174 = vmatprep.mubr.msk.bf16.mxu1 %vm13685_vm12, %v18495_v49 }
 0x516   :  { %12314 = vmatprep.mubr.msk.bf16.mxu0 %vm13685_vm12, %v18495_v49  ;;  %12199 = vmatpush3.bf16.msra.mxu1 %v13544_v44 }
 0x517   :  { %12200 = vmatprep.subr.bf16.mxu1 %v18495_v49  ;;  %12375 = vmatpush3.bf16.msra.mxu0 %v13546_v46 }
 0x518   :  { %12376 = vmatprep.subr.bf16.mxu0 %v18495_v49 }
 0x51a   :  { %12201 = vmatpush3.bf16.msra.mxu1 %v13545_v17  ;;  %v5148_v17 = vld [vmem:[#allocation4 + $0xb9] sm:$0xff] }
 0x51b   :  { %12377 = vmatpush3.bf16.msra.mxu0 %v13547_v56  ;;  %12266 = vmatprep.subr.bf16.mxu1 %v18495_v49  ;;  %v15824_v22 = vpack.c.bf16 %v5148_v17, %v5147_v0  ;;  %v5438_v0 = vld [vmem:[#allocation4 + $0x82] sm:$0xff]  ;;  %v5439_v17 = vld [vmem:[#allocation4 + $0x8a] sm:$0xff] }
 0x51c   :  { %12175 = vmatmul.mubr.msk.bf16.gmra.mxu1 %vm1855_vm3, %v15432_v9  ;;  %12378 = vmatprep.subr.bf16.mxu0 %v18495_v49  ;;  %v15614_v9 = vpack.c.bf16 %v4393_v47, %v4392_v12 }
 0x51d   :  { %12315 = vmatmul.mubr.msk.bf16.gmra.mxu0 %vm1855_vm3, %v15595_v16  ;;  %12178 = vmatprep.mubr.msk.bf16.mxu1 %vm13685_vm12, %v18495_v49 }
 0x51e   :  { %12318 = vmatprep.mubr.msk.bf16.mxu0 %vm13685_vm12, %v18495_v49 }
 0x51f   :  { %12379 = vmatpush3.bf16.msra.mxu0 %v13549_v38 }
 0x520   :  { %12380 = vmatprep.subr.bf16.mxu0 %v18495_v49 }
 0x523   :  { %12381 = vmatpush3.bf16.msra.mxu0 %v13550_v53 }
 0x524   :  { %12179 = vmatmul.mubr.msk.bf16.gmra.mxu1 %vm1855_vm3, %v15489_v34  ;;  %12446 = vmatprep.subr.bf16.mxu0 %v18495_v49  ;;  %v4406_v34 = vpack.c.bf16 %v4397_v43, %v4396_v55 }
 0x525   :  { %12319 = vmatmul.mubr.msk.bf16.gmra.mxu0 %vm1855_vm3, %v15614_v9  ;;  %12182 = vmatprep.mubr.msk.bf16.mxu1 %vm13685_vm12, %v18495_v49 }
 0x526   :  { %12322 = vmatprep.mubr.msk.bf16.mxu0 %vm13685_vm12, %v18495_v49 }
 0x52c   :  { %12183 = vmatmul.mubr.msk.bf16.gmra.mxu1 %vm1855_vm3, %v15519_v7  ;;  %v13553_v7 = vld [vmem:[%s18488_s7 + $0x80] sm:$0xff]  }
 0x52d   :  { %12323 = vmatmul.mubr.msk.bf16.gmra.mxu0 %vm1855_vm3, %v15625_v50  ;;  %12186 = vmatprep.mubr.msk.bf16.mxu1 %vm13685_vm12, %v18495_v49 }
 0x52e   :  { %12326 = vmatprep.mubr.msk.bf16.mxu0 %vm13685_vm12, %v18495_v49 }
 0x534   :  { %12187 = vmatmul.mubr.msk.bf16.gmra.mxu1 %vm1855_vm3, %v15531_v62  ;;  %v4753_v62 = vld [vmem:[#allocation4 + $0x79] sm:$0xff] }
 0x535   :  { %12327 = vmatmul.mubr.msk.bf16.gmra.mxu0 %vm1855_vm3, %v4406_v34  ;;  %12190 = vmatprep.mubr.msk.bf16.mxu1 %vm13685_vm12, %v18495_v49  ;;  %v15729_v21 = vpack.c.bf16 %v4753_v62, %v4752_v52 }
 0x536   :  { %12330 = vmatprep.mubr.msk.bf16.mxu0 %vm13685_vm12, %v18495_v49 }
 0x53c   :  { %12191 = vmatmul.mubr.msk.bf16.gmra.mxu1 %vm1855_vm3, %v15543_v2  ;;  %v15741_v2 = vpack.c.bf16 %v4755_v11, %v4754_v6  ;;  %v4568_v6 = vld [vmem:[#allocation4 + $0x38] sm:$0xff] }
 0x53d   :  { %12331 = vmatmul.mubr.msk.bf16.gmra.mxu0 %vm1855_vm3, %v4407_v40  ;;  %12202 = vmatprep.mubr.msk.bf16.mxu1 %vm13685_vm12, %v18495_v49 }
 0x53e   :  { %12334 = vmatprep.mubr.msk.bf16.mxu0 %vm13685_vm12, %v18495_v49 }
 0x544   :  { %12203 = vmatmul.mubr.msk.bf16.vlgmr.msra.gmra.mxu1 %vm1855_vm3, %v3871_v37  ;;  %v13564_v37 = vld [vmem:[%s18488_s7 + $0x118] sm:$0xff]  }
 0x545   :  { %12267 = vmatpush3.bf16.msra.mxu1 %v13548_v48  ;;  %12335 = vmatmul.mubr.msk.bf16.gmra.mxu0 %vm1855_vm3, %v15652_v45 }
 0x546   :  { %12206 = vmatprep.mubr.msk.bf16.mxu1 %vm13685_vm12, %v18495_v49  ;;  %12382 = vmatprep.mubr.msk.bf16.mxu0 %vm13685_vm12, %v18495_v49 }
 0x547   :  { %12268 = vmatprep.subr.bf16.mxu1 %v18495_v49 }
 0x549   :  { %12269 = vmatpush3.bf16.msra.mxu1 %v13551_v24 }
 0x54a   :  { %12270 = vmatprep.subr.bf16.mxu1 %v18495_v49 }
 0x54c   :  { %12207 = vmatmul.mubr.msk.bf16.gmra.mxu1 %vm1855_vm3, %v15574_v20 }
 0x54d   :  { %12383 = vmatmul.mubr.msk.bf16.vlgmr.msra.gmra.mxu0 %vm1855_vm3, %v15420_v27  ;;  %12210 = vmatprep.mubr.msk.bf16.mxu1 %vm13685_vm12, %v18495_v49 }
 0x54e   :  { %12386 = vmatprep.mubr.msk.bf16.mxu0 %vm13685_vm12, %v18495_v49  ;;  %12271 = vmatpush3.bf16.msra.mxu1 %v13552_v19 }
 0x54f   :  { %12272 = vmatprep.subr.bf16.mxu1 %v18495_v49  ;;  %12447 = vmatpush3.bf16.msra.mxu0 %v13554_v61 }
 0x550   :  { %12448 = vmatprep.subr.bf16.mxu0 %v18495_v49 }
 0x552   :  { %12273 = vmatpush3.bf16.msra.mxu1 %v13553_v7  ;;  %v5159_v7 = vpack.c.bf16 %v5152_v1, %v15858_v25  ;;  %v13574_v1 = vld [vmem:[%s18488_s7 + $0x80] sm:$0xff]  }
 0x553   :  { %12449 = vmatpush3.bf16.msra.mxu0 %v13555_v31  ;;  %12338 = vmatprep.subr.bf16.mxu1 %v18495_v49 }
 0x554   :  { %12211 = vmatmul.mubr.msk.bf16.gmra.mxu1 %vm1855_vm3, %v15595_v16  ;;  %12450 = vmatprep.subr.bf16.mxu0 %v18495_v49 }
 0x555   :  { %12387 = vmatmul.mubr.msk.bf16.gmra.mxu0 %vm1855_vm3, %v15484_v57  ;;  %12214 = vmatprep.mubr.msk.bf16.mxu1 %vm13685_vm12, %v18495_v49 }
 0x556   :  { %12390 = vmatprep.mubr.msk.bf16.mxu0 %vm13685_vm12, %v18495_v49 }
 0x557   :  { %12451 = vmatpush3.bf16.msra.mxu0 %v13557_v32 }
 0x558   :  { %12452 = vmatprep.subr.bf16.mxu0 %v18495_v49 }
 0x55b   :  { %12453 = vmatpush3.bf16.msra.mxu0 %v13558_v51  ;;  %v13567_v51 = vld [vmem:[%s18488_s7 + $0x110] sm:$0xff]  }
 0x55c   :  { %12215 = vmatmul.mubr.msk.bf16.gmra.mxu1 %vm1855_vm3, %v15614_v9  ;;  %12518 = vmatprep.subr.bf16.mxu0 %v18495_v49  ;;  %v5149_v9 = vld [vmem:[#allocation4 + $0xc1] sm:$0xff] }
 0x55d   :  { %12391 = vmatmul.mubr.msk.bf16.gmra.mxu0 %vm1855_vm3, %v15517_v4  ;;  %12218 = vmatprep.mubr.msk.bf16.mxu1 %vm13685_vm12, %v18495_v49  ;;  %v15842_v55 = vpack.c.bf16 %v5150_v36, %v5149_v9  ;;  %v15914_v9 = vpack.c.bf16 %v5439_v17, %v5438_v0  ;;  %v13573_v36 = vld [vmem:[%s18488_s7 + $0x88] sm:$0xff]  }
 0x55e   :  { %12394 = vmatprep.mubr.msk.bf16.mxu0 %vm13685_vm12, %v18495_v49 }
 0x564   :  { %12219 = vmatmul.mubr.msk.bf16.gmra.mxu1 %vm1855_vm3, %v15625_v50 }
 0x565   :  { %12395 = vmatmul.mubr.msk.bf16.gmra.mxu0 %vm1855_vm3, %v15529_v41  ;;  %12222 = vmatprep.mubr.msk.bf16.mxu1 %vm13685_vm12, %v18495_v49 }
 0x566   :  { %12398 = vmatprep.mubr.msk.bf16.mxu0 %vm13685_vm12, %v18495_v49 }
 0x56c   :  { %12223 = vmatmul.mubr.msk.bf16.gmra.mxu1 %vm1855_vm3, %v4406_v34 }
 0x56d   :  { %12399 = vmatmul.mubr.msk.bf16.gmra.mxu0 %vm1855_vm3, %v15541_v59  ;;  %12226 = vmatprep.mubr.msk.bf16.mxu1 %vm13685_vm12, %v18495_v49 }
 0x56e   :  { %12402 = vmatprep.mubr.msk.bf16.mxu0 %vm13685_vm12, %v18495_v49 }
 0x574   :  { %12227 = vmatmul.mubr.msk.bf16.gmra.mxu1 %vm1855_vm3, %v4407_v40  ;;  %v4565_v40 = vld [vmem:[#allocation4 + $0x20] sm:$0xff] }
 0x575   :  { %12403 = vmatmul.mubr.msk.bf16.gmra.mxu0 %vm1855_vm3, %v15729_v21  ;;  %12274 = vmatprep.mubr.msk.bf16.mxu1 %vm13685_vm12, %v18495_v49  ;;  %v4579_v19 = vpack.c.bf16 %v4566_v5, %v4565_v40  ;;  %v4571_v40 = vld [vmem:[#allocation4 + $0x50] sm:$0xff]  ;;  %v4572_v5 = vld [vmem:[#allocation4 + $0x58] sm:$0xff] }
 0x576   :  { %12406 = vmatprep.mubr.msk.bf16.mxu0 %vm13685_vm12, %v18495_v49 }
 0x57c   :  { %12275 = vmatmul.mubr.msk.bf16.vlgmr.msra.gmra.mxu1 %vm1855_vm3, %v15317_v58  ;;  %v13560_v58 = vld [vmem:[%s18488_s7 + $0xc8] sm:$0xff]  }
 0x57d   :  { %12339 = vmatpush3.bf16.msra.mxu1 %v13556_v26  ;;  %12407 = vmatmul.mubr.msk.bf16.gmra.mxu0 %vm1855_vm3, %v15741_v2 }
 0x57e   :  { %12278 = vmatprep.mubr.msk.bf16.mxu1 %vm13685_vm12, %v18495_v49  ;;  %12454 = vmatprep.mubr.msk.bf16.mxu0 %vm13685_vm12, %v18495_v49 }
 0x57f   :  { %12340 = vmatprep.subr.bf16.mxu1 %v18495_v49 }
 0x581   :  { %12341 = vmatpush3.bf16.msra.mxu1 %v13559_v14 }
 0x582   :  { %12342 = vmatprep.subr.bf16.mxu1 %v18495_v49 }
 0x584   :  { %12279 = vmatmul.mubr.msk.bf16.gmra.mxu1 %vm1855_vm3, %v15420_v27  ;;  %v13563_v27 = vld [vmem:[%s18488_s7 + $0x50] sm:$0xff]  }
 0x585   :  { %12455 = vmatmul.mubr.msk.bf16.vlgmr.msra.gmra.mxu0 %vm1855_vm3, %v15729_v21  ;;  %12282 = vmatprep.mubr.msk.bf16.mxu1 %vm13685_vm12, %v18495_v49 }
 0x586   :  { %12458 = vmatprep.mubr.msk.bf16.mxu0 %vm13685_vm12, %v18495_v49  ;;  %12343 = vmatpush3.bf16.msra.mxu1 %v13560_v58 }
 0x587   :  { %12344 = vmatprep.subr.bf16.mxu1 %v18495_v49  ;;  %12519 = vmatpush3.bf16.msra.mxu0 %v13562_v33  ;;  %v13568_v33 = vld [vmem:[%s18488_s7 + $0x108] sm:$0xff]  }
 0x588   :  { %12520 = vmatprep.subr.bf16.mxu0 %v18495_v49 }
 0x58a   :  { %12345 = vmatpush3.bf16.msra.mxu1 %v13561_v8 }
 0x58b   :  { %12521 = vmatpush3.bf16.msra.mxu0 %v13563_v27  ;;  %12410 = vmatprep.subr.bf16.mxu1 %v18495_v49  ;;  %v13570_v27 = vld [vmem:[%s18488_s7 + $0x98] sm:$0xff]  }
 0x58c   :  { %12283 = vmatmul.mubr.msk.bf16.gmra.mxu1 %vm1855_vm3, %v15484_v57  ;;  %12522 = vmatprep.subr.bf16.mxu0 %v18495_v49  ;;  %v15795_v57 = vpack.c.bf16 %v5144_v10, %v5143_v35  ;;  %v13569_v10 = vld [vmem:[%s18488_s7 + $0x100] sm:$0xff]  }
 0x58d   :  { %12459 = vmatmul.mubr.msk.bf16.gmra.mxu0 %vm1855_vm3, %v15741_v2  ;;  %12286 = vmatprep.mubr.msk.bf16.mxu1 %vm13685_vm12, %v18495_v49 }
 0x58e   :  { %12462 = vmatprep.mubr.msk.bf16.mxu0 %vm13685_vm12, %v18495_v49 }
 0x58f   :  { %12523 = vmatpush3.bf16.msra.mxu0 %v13565_v63 }
 0x590   :  { %12524 = vmatprep.subr.bf16.mxu0 %v18495_v49 }
 0x593   :  { %12525 = vmatpush3.bf16.msra.mxu0 %v13566_v54 }
 0x594   :  { %12287 = vmatmul.mubr.msk.bf16.gmra.mxu1 %vm1855_vm3, %v15517_v4  ;;  %12590 = vmatprep.subr.bf16.mxu0 %v18495_v49 }
 0x595   :  { %12463 = vmatmul.mubr.msk.bf16.gmra.mxu0 %vm1855_vm3, %v15795_v57  ;;  %12290 = vmatprep.mubr.msk.bf16.mxu1 %vm13685_vm12, %v18495_v49 }
 0x596   :  { %12466 = vmatprep.mubr.msk.bf16.mxu0 %vm13685_vm12, %v18495_v49 }
 0x59a   :  { %v15808_v3 = vpop.f32.mrf.mxu1 }
 0x59b   :  { %v15812_v4 = vpop.f32.mrf.mxu0 }
 0x59c   :  { %12291 = vmatmul.mubr.msk.bf16.gmra.mxu1 %vm1855_vm3, %v15529_v41  ;;  %v12136_v44 = vpop.f32.mrf.mxu1 }
 0x59d   :  { %12467 = vmatmul.mubr.msk.bf16.gmra.mxu0 %vm1855_vm3, %v15806_v13  ;;  %12294 = vmatprep.mubr.msk.bf16.mxu1 %vm13685_vm12, %v18495_v49  ;;  %v12240_v20 = vpop.f32.mrf.mxu0  ;;  %v4570_v44 = vld [vmem:[#allocation4 + $0x48] sm:$0xff] }
 0x59e   :  { %12470 = vmatprep.mubr.msk.bf16.mxu0 %vm13685_vm12, %v18495_v49  ;;  %v15820_v46 = vpop.f32.mrf.mxu1 }
 0x59f   :  { %v15822_v56 = vpop.f32.mrf.mxu0 }
 0x5a0   :  { %v12137_v41 = vpop.f32.mrf.mxu1 }
 0x5a1   :  { %v12241_v60 = vpop.f32.mrf.mxu0 }
 0x5a4   :  { %v15826_v16 = vpop.f32.mrf.mxu1  ;;  %12295 = vmatmul.mubr.msk.bf16.gmra.mxu1 %vm1855_vm3, %v15541_v59 }
 0x5a5   :  { %v15830_v38 = vpop.f32.mrf.mxu0  ;;  %12471 = vmatmul.mubr.msk.bf16.gmra.mxu0 %vm1855_vm3, %v15824_v22  ;;  %12298 = vmatprep.mubr.msk.bf16.mxu1 %vm13685_vm12, %v18495_v49 }
 0x5a6   :  { %v12140_v53 = vpop.f32.mrf.mxu1  ;;  %12474 = vmatprep.mubr.msk.bf16.mxu0 %vm13685_vm12, %v18495_v49 }
 0x5a7   :  { %v12244_v12 = vpop.f32.mrf.mxu0  ;;  %v4581_v53 = vpack.c.bf16 %v4570_v44, %v4569_v42 }
 0x5a8   :  { %v15838_v47 = vpop.f32.mrf.mxu1 }
 0x5a9   :  { %v15840_v23 = vpop.f32.mrf.mxu0 }
 0x5aa   :  { %v12141_v59 = vpop.f32.mrf.mxu1 }
 0x5ab   :  { %v12245_v50 = vpop.f32.mrf.mxu0 }
 0x5ac   :  { %v15844_v43 = vpop.f32.mrf.mxu1  ;;  %12299 = vmatmul.mubr.msk.bf16.gmra.mxu1 %vm1855_vm3, %v15729_v21  ;;  %v4567_v21 = vld [vmem:[#allocation4 + $0x30] sm:$0xff] }
 0x5ad   :  { %v15848_v34 = vpop.f32.mrf.mxu0  ;;  %12475 = vmatmul.mubr.msk.bf16.gmra.mxu0 %vm1855_vm3, %v15842_v55  ;;  %12346 = vmatprep.mubr.msk.bf16.mxu1 %vm13685_vm12, %v18495_v49  ;;  %v4580_v58 = vpack.c.bf16 %v4568_v6, %v4567_v21 }
 0x5ae   :  { %v12144_v28 = vpop.f32.mrf.mxu1  ;;  %12478 = vmatprep.mubr.msk.bf16.mxu0 %vm13685_vm12, %v18495_v49 }
 0x5af   :  { %v12248_v29 = vpop.f32.mrf.mxu0 }
 0x5b0   :  { %v15856_v30 = vpop.f32.mrf.mxu1 }
 0x5b1   :  { %v15860_v48 = vpop.f32.mrf.mxu0 }
 0x5b2   :  { %v12145_v24 = vpop.f32.mrf.mxu1 }
 0x5b3   :  { %v12249_v61 = vpop.f32.mrf.mxu0  ;;  %v5440_v24 = vld [vmem:[#allocation4 + $0x92] sm:$0xff] }
 0x5b4   :  { %v15866_v31 = vpop.f32.mrf.mxu1  ;;  %12347 = vmatmul.mubr.msk.bf16.vlgmr.msra.gmra.mxu1 %vm1855_vm3, %v4579_v19  ;;  %v5441_v19 = vld [vmem:[#allocation4 + $0x9a] sm:$0xff] }
 0x5b5   :  { %v15869_v32 = vpop.f32.mrf.mxu0  ;;  %12411 = vmatpush3.bf16.msra.mxu1 %v13564_v37  ;;  %12479 = vmatmul.mubr.msk.bf16.gmra.mxu0 %vm1855_vm3, %v5159_v7 }
 0x5b6   :  { %v12148_v52 = vpop.f32.mrf.mxu1  ;;  %12350 = vmatprep.mubr.msk.bf16.mxu1 %vm13685_vm12, %v18495_v49  ;;  %12526 = vmatprep.mubr.msk.bf16.mxu0 %vm13685_vm12, %v18495_v49 }
 0x5b7   :  { %v12252_v62 = vpop.f32.mrf.mxu0  ;;  %12412 = vmatprep.subr.bf16.mxu1 %v18495_v49 }
 0x5b8   :  { %v15880_v11 = vpop.f32.mrf.mxu1  ;;  %v5452_v62 = vpack.c.bf16 %v5441_v19, %v5440_v24 }
 0x5b9   :  { %v15882_v26 = vpop.f32.mrf.mxu0  ;;  %12413 = vmatpush3.bf16.msra.mxu1 %v13567_v51  ;;  %v4582_v51 = vpack.c.bf16 %v4572_v5, %v4571_v40  ;;  %v5444_v5 = vld [vmem:[#allocation4 + $0xb2] sm:$0xff] }
 0x5ba   :  { %v12149_v14 = vpop.f32.mrf.mxu1  ;;  %12414 = vmatprep.subr.bf16.mxu1 %v18495_v49 }
 0x5bb   :  { %v12253_v8 = vpop.f32.mrf.mxu0 }
 0x5bc   :  { %v15891_v63 = vpop.f32.mrf.mxu1  ;;  %12351 = vmatmul.mubr.msk.bf16.gmra.mxu1 %vm1855_vm3, %v4580_v58  ;;  %v4574_v8 = vld [vmem:[#allocation4 + $0x68] sm:$0xff] }
 0x5bd   :  { %v15894_v54 = vpop.f32.mrf.mxu0  ;;  %12527 = vmatmul.mubr.msk.bf16.vlgmr.msra.gmra.mxu0 %vm1855_vm3, %v15652_v45  ;;  %12354 = vmatprep.mubr.msk.bf16.mxu1 %vm13685_vm12, %v18495_v49  ;;  %v13571_v45 = vld [vmem:[%s18488_s7 + $0x90] sm:$0xff]  }
 0x5be   :  { %v12152_v35 = vpop.f32.mrf.mxu1  ;;  %12530 = vmatprep.mubr.msk.bf16.mxu0 %vm13685_vm12, %v18495_v49  ;;  %12415 = vmatpush3.bf16.msra.mxu1 %v13568_v33  ;;  %v4573_v33 = vld [vmem:[#allocation4 + $0x60] sm:$0xff] }
 0x5bf   :  { %v12256_v15 = vpop.f32.mrf.mxu0  ;;  %12416 = vmatprep.subr.bf16.mxu1 %v18495_v49  ;;  %12591 = vmatpush3.bf16.msra.mxu0 %v13570_v27  ;;  %v5442_v35 = vld [vmem:[#allocation4 + $0xa2] sm:$0xff]  ;;  %v4583_v44 = vpack.c.bf16 %v4574_v8, %v4573_v33 }
 0x5c0   :  { %v15909_v20 = vpop.f32.mrf.mxu1  ;;  %12592 = vmatprep.subr.bf16.mxu0 %v18495_v49  ;;  %v4577_v8 = vld [vmem:[#allocation4 + $0x80] sm:$0xff] }
 0x5c1   :  { %v15912_v41 = vpop.f32.mrf.mxu0 }
 0x5c2   :  { %v12153_v60 = vpop.f32.mrf.mxu1  ;;  %12417 = vmatpush3.bf16.msra.mxu1 %v13569_v10  ;;  %v5443_v10 = vld [vmem:[#allocation4 + $0xaa] sm:$0xff] }
 0x5c3   :  { %v12257_v12 = vpop.f32.mrf.mxu0  ;;  %12593 = vmatpush3.bf16.msra.mxu0 %v13571_v45  ;;  %12482 = vmatprep.subr.bf16.mxu1 %v18495_v49  ;;  %v5453_v0 = vpack.c.bf16 %v5443_v10, %v5442_v35  ;;  %v4578_v35 = vld [vmem:[#allocation4 + $0x88] sm:$0xff] }
 0x5c4   :  { %v15920_v59 = vpop.f32.mrf.mxu1  ;;  %12355 = vmatmul.mubr.msk.bf16.gmra.mxu1 %vm1855_vm3, %v4581_v53  ;;  %12594 = vmatprep.subr.bf16.mxu0 %v18495_v49 }
 0x5c5   :  { %v15924_v50 = vpop.f32.mrf.mxu0  ;;  %12531 = vmatmul.mubr.msk.bf16.gmra.mxu0 %vm1855_vm3, %v15914_v9  ;;  %12358 = vmatprep.mubr.msk.bf16.mxu1 %vm13685_vm12, %v18495_v49 }
 0x5c6   :  { %v12156_v28 = vpop.f32.mrf.mxu1  ;;  %12534 = vmatprep.mubr.msk.bf16.mxu0 %vm13685_vm12, %v18495_v49 }
 0x5c7   :  { %v12260_v29 = vpop.f32.mrf.mxu0  ;;  %12595 = vmatpush3.bf16.msra.mxu0 %v13573_v36  ;;  %v4575_v28 = vld [vmem:[#allocation4 + $0x70] sm:$0xff] }
 0x5c8   :  { %v15935_v37 = vpop.f32.mrf.mxu1  ;;  %12596 = vmatprep.subr.bf16.mxu0 %v18495_v49  ;;  %v4576_v29 = vld [vmem:[#allocation4 + $0x78] sm:$0xff] }
 0x5c9   :  { %v15938_v61 = vpop.f32.mrf.mxu0 }
 0x5ca   :  { %v12157_v7 = vpop.f32.mrf.mxu1 }
 0x5cb   :  { %v12261_v52 = vpop.f32.mrf.mxu0  ;;  %12597 = vmatpush3.bf16.msra.mxu0 %v13574_v1  ;;  %v5445_v1 = vld [vmem:[#allocation4 + $0xba] sm:$0xff]  ;;  %v15971_v7 = vpack.c.bf16 %v4576_v29, %v4575_v28 }
 0x5cc   :  { %v15940_v21 = vpop.f32.mrf.mxu1  ;;  %12359 = vmatmul.mubr.msk.bf16.gmra.mxu1 %vm1855_vm3, %v4582_v51  ;;  %12662 = vmatprep.subr.bf16.mxu0 %v18495_v49  ;;  %v5454_v52 = vpack.c.bf16 %v5445_v1, %v5444_v5  ;;  %v4919_v1 = vld [vmem:[#allocation4 + $0x22] sm:$0xff] }
 0x5cd   :  { %v15944_v6 = vpop.f32.mrf.mxu0  ;;  %12535 = vmatmul.mubr.msk.bf16.gmra.mxu0 %vm1855_vm3, %v5452_v62  ;;  %12362 = vmatprep.mubr.msk.bf16.mxu1 %vm13685_vm12, %v18495_v49 }
 0x5ce   :  { %v12168_v14 = vpop.f32.mrf.mxu1  ;;  %12538 = vmatprep.mubr.msk.bf16.mxu0 %vm13685_vm12, %v18495_v49 }
 0x5cf   :  { %v12264_v58 = vpop.f32.mrf.mxu0 }
 0x5d0   :  { %v15951_v27 = vpop.f32.mrf.mxu1 }
 0x5d1   :  { %v15953_v15 = vpop.f32.mrf.mxu0 }
 0x5d2   :  { %v12169_v42 = vpop.f32.mrf.mxu1 }
 0x5d3   :  { %v12265_v45 = vpop.f32.mrf.mxu0  ;;  %v5446_v42 = vld [vmem:[#allocation4 + $0xc2] sm:$0xff] }
 0x5d4   :  { %v3810_v17 = vpop.f32.mrf.mxu1  ;;  %12363 = vmatmul.mubr.msk.bf16.gmra.mxu1 %vm1855_vm3, %v4583_v44  ;;  %v5447_v44 = vld [vmem:[#allocation4 + $0xca] sm:$0xff] }
 0x5d5   :  { %v15957_v60 = vadd.f32 %v3810_v17, %v15808_v3  ;;  %v15959_v53 = vpop.f32.mrf.mxu0  ;;  %12539 = vmatmul.mubr.msk.bf16.gmra.mxu0 %vm1855_vm3, %v5453_v0  ;;  %12366 = vmatprep.mubr.msk.bf16.mxu1 %vm13685_vm12, %v18495_v49  ;;  %v15990_v17 = vpack.c.bf16 %v4578_v35, %v4577_v8 }
 0x5d6   :  { %v12172_v12 = vpop.f32.mrf.mxu1  ;;  %12542 = vmatprep.mubr.msk.bf16.mxu0 %vm13685_vm12, %v18495_v49 }
 0x5d7   :  { %v12312_v36 = vpop.f32.mrf.mxu0 }
 0x5d8   :  { %v3813_v40 = vpop.f32.mrf.mxu1  ;;  %v5455_v36 = vpack.c.bf16 %v5447_v44, %v5446_v42 }
 0x5d9   :  { %v15967_v3 = vadd.f32 %v3813_v40, %v15820_v46  ;;  %v15969_v24 = vpop.f32.mrf.mxu0 }
 0x5da   :  { %v12173_v19 = vpop.f32.mrf.mxu1 }
 0x5db   :  { %v12313_v51 = vpop.f32.mrf.mxu0  ;;  %v4920_v19 = vld [vmem:[#allocation4 + $0x2a] sm:$0xff] }
 0x5dc   :  { %v3818_v62 = vpop.f32.mrf.mxu1  ;;  %12367 = vmatmul.mubr.msk.bf16.gmra.mxu1 %vm1855_vm3, %v15971_v7  ;;  %v4933_v35 = vpack.c.bf16 %v4920_v19, %v4919_v1 }
 0x5dd   :  { %v15976_v14 = vadd.f32 %v3818_v62, %v15826_v16  ;;  %v15978_v58 = vpop.f32.mrf.mxu0  ;;  %12543 = vmatmul.mubr.msk.bf16.gmra.mxu0 %vm1855_vm3, %v5454_v52  ;;  %12370 = vmatprep.mubr.msk.bf16.mxu1 %vm13685_vm12, %v18495_v49  ;;  %v5448_v52 = vld [vmem:[#allocation4 + $0xd2] sm:$0xff]  ;;  %v5449_v62 = vld [vmem:[#allocation4 + $0xda] sm:$0x3f] }
 0x5de   :  { %v12176_v46 = vpop.f32.mrf.mxu1  ;;  %12546 = vmatprep.mubr.msk.bf16.mxu0 %vm13685_vm12, %v18495_v49  ;;  %v5456_v42 = vpack.c.bf16 %v5449_v62, %v5448_v52  ;;  %v13576_v62 = vld [vmem:[%s18488_s7 + $0x8] sm:$0xff]  }
 0x5df   :  { %v12316_v33 = vpop.f32.mrf.mxu0 }
 0x5e0   :  { %v3821_v10 = vpop.f32.mrf.mxu1  ;;  %v13572_v33 = vld [vmem:[%s18488_s7 + $0x18] sm:$0xff]  }
 0x5e1   :  { %v15986_v16 = vadd.f32 %v3821_v10, %v15838_v47  ;;  %v15988_v45 = vpop.f32.mrf.mxu0 }
 0x5e2   :  { %v12177_v0 = vpop.f32.mrf.mxu1 }
 0x5e3   :  { %v12317_v12 = vpop.f32.mrf.mxu0 }
 0x5e4   :  { %v3826_v28 = vpop.f32.mrf.mxu1  ;;  %12371 = vmatmul.mubr.msk.bf16.gmra.mxu1 %vm1855_vm3, %v15990_v17 }
 0x5e5   :  { %v15995_v29 = vadd.f32 %v3826_v28, %v15844_v43  ;;  %v15997_v40 = vpop.f32.mrf.mxu0  ;;  %12547 = vmatmul.mubr.msk.bf16.gmra.mxu0 %vm1855_vm3, %v5455_v36  ;;  %12418 = vmatprep.mubr.msk.bf16.mxu1 %vm13685_vm12, %v18495_v49 }
 0x5e6   :  { %v12180_v47 = vpop.f32.mrf.mxu1  ;;  %12550 = vmatprep.mubr.msk.bf16.mxu0 %vm13685_vm12, %v18495_v49 }
 0x5e7   :  { %v12320_v5 = vpop.f32.mrf.mxu0  ;;  %v4921_v47 = vld [vmem:[#allocation4 + $0x32] sm:$0xff] }
 0x5e8   :  { %v3829_v51 = vpop.f32.mrf.mxu1 }
 0x5e9   :  { %v16005_v43 = vadd.f32 %v3829_v51, %v15856_v30  ;;  %v16007_v46 = vpop.f32.mrf.mxu0  ;;  %v13575_v30 = vld [vmem:[%s18488_s7 + $0x10] sm:$0xff]  }
 0x5ea   :  { %v12181_v8 = vpop.f32.mrf.mxu1 }
 0x5eb   :  { %v12321_v10 = vpop.f32.mrf.mxu0  ;;  %v13578_v8 = vld [vmem:[%s18488_s7 + $0xd8] sm:$0xff]  }
 0x5ec   :  { %v3834_v44 = vpop.f32.mrf.mxu1  ;;  %12419 = vmatmul.mubr.msk.bf16.vlgmr.msra.gmra.mxu1 %vm1855_vm3, %v4933_v35 }
 0x5ed   :  { %v16014_v0 = vadd.f32 %v3834_v44, %v15866_v31  ;;  %v16016_v12 = vpop.f32.mrf.mxu0  ;;  %12483 = vmatpush3.bf16.msra.mxu1 %v13572_v33  ;;  %12551 = vmatmul.mubr.msk.bf16.gmra.mxu0 %vm1855_vm3, %v5456_v42  ;;  %v4922_v31 = vld [vmem:[#allocation4 + $0x3a] sm:$0xff]  ;;  %v13577_v44 = vld [vmem:[%s18488_s7] sm:$0xff]  }
 0x5ee   :  { %v12184_v36 = vpop.f32.mrf.mxu1  ;;  %12422 = vmatprep.mubr.msk.bf16.mxu1 %vm13685_vm12, %v18495_v49  ;;  %12598 = vmatprep.mubr.msk.bf16.mxu0 %vm13685_vm12, %v18495_v49  ;;  %v4934_v52 = vpack.c.bf16 %v4922_v31, %v4921_v47 }
 0x5ef   :  { %v12324_v28 = vpop.f32.mrf.mxu0  ;;  %12484 = vmatprep.subr.bf16.mxu1 %v18495_v49  ;;  %v4924_v36 = vld [vmem:[#allocation4 + $0x4a] sm:$0xff] }
 0x5f0   :  { %v3837_v5 = vpop.f32.mrf.mxu1 }
 0x5f1   :  { %v16028_v1 = vadd.f32 %v3837_v5, %v15880_v11  ;;  %v16030_v19 = vpop.f32.mrf.mxu0  ;;  %12485 = vmatpush3.bf16.msra.mxu1 %v13575_v30 }
 0x5f2   :  { %v12185_v51 = vpop.f32.mrf.mxu1  ;;  %12486 = vmatprep.subr.bf16.mxu1 %v18495_v49 }
 0x5f3   :  { %v12325_v33 = vpop.f32.mrf.mxu0 }
 0x5f4   :  { %v3842_v35 = vpop.f32.mrf.mxu1  ;;  %12423 = vmatmul.mubr.msk.bf16.gmra.mxu1 %vm1855_vm3, %v4934_v52 }
 0x5f5   :  { %v16041_v11 = vadd.f32 %v3842_v35, %v15891_v63  ;;  %v16043_v10 = vpop.f32.mrf.mxu0  ;;  %12599 = vmatmul.mubr.msk.bf16.vlgmr.msra.gmra.mxu0 %vm1855_vm3, %v15741_v2  ;;  %12426 = vmatprep.mubr.msk.bf16.mxu1 %vm13685_vm12, %v18495_v49  ;;  %v4923_v63 = vld [vmem:[#allocation4 + $0x42] sm:$0xff] }
 0x5f6   :  { %v12188_v42 = vpop.f32.mrf.mxu1  ;;  %12602 = vmatprep.mubr.msk.bf16.mxu0 %vm13685_vm12, %v18495_v49  ;;  %12487 = vmatpush3.bf16.msra.mxu1 %v13576_v62  ;;  %v13579_v2 = vld [vmem:[%s18488_s7 + $0xd0] sm:$0xff]   ;;  %v4935_v51 = vpack.c.bf16 %v4924_v36, %v4923_v63  ;;  %v13581_v62 = vld [vmem:[%s18488_s7 + $0xc8] sm:$0xff]  }
 0x5f7   :  { %v12328_v30 = vpop.f32.mrf.mxu0  ;;  %12488 = vmatprep.subr.bf16.mxu1 %v18495_v49  ;;  %12663 = vmatpush3.bf16.msra.mxu0 %v13578_v8 }
 0x5f8   :  { %v3845_v28 = vpop.f32.mrf.mxu1  ;;  %12664 = vmatprep.subr.bf16.mxu0 %v18495_v49  ;;  %v4926_v30 = vld [vmem:[#allocation4 + $0x5a] sm:$0xff] }
 0x5f9   :  { %v16060_v47 = vadd.f32 %v3845_v28, %v15909_v20  ;;  %v16062_v31 = vpop.f32.mrf.mxu0 }
 0x5fa   :  { %v12189_v5 = vpop.f32.mrf.mxu1  ;;  %12489 = vmatpush3.bf16.msra.mxu1 %v13577_v44  ;;  %v4925_v44 = vld [vmem:[#allocation4 + $0x52] sm:$0xff] }
 0x5fb   :  { %v12329_v52 = vpop.f32.mrf.mxu0  ;;  %12665 = vmatpush3.bf16.msra.mxu0 %v13579_v2  ;;  %12554 = vmatprep.subr.bf16.mxu1 %v18495_v49  ;;  %v4936_v28 = vpack.c.bf16 %v4926_v30, %v4925_v44  ;;  %v3803_v5 = vadd.f32 %v15940_v21, %v15565_v39  ;;  %v3806_v39 = vadd.f32 %v15951_v27, %v15572_v18 }
 0x5fc   :  { %v3850_v33 = vpop.f32.mrf.mxu1  ;;  %12427 = vmatmul.mubr.msk.bf16.gmra.mxu1 %vm1855_vm3, %v4935_v51  ;;  %12666 = vmatprep.subr.bf16.mxu0 %v18495_v49 }
 0x5fd   :  { %v16071_v20 = vadd.f32 %v3850_v33, %v15920_v59  ;;  %v16073_v8 = vpop.f32.mrf.mxu0  ;;  %12603 = vmatmul.mubr.msk.bf16.gmra.mxu0 %vm1855_vm3, %v15795_v57  ;;  %12430 = vmatprep.mubr.msk.bf16.mxu1 %vm13685_vm12, %v18495_v49  ;;  %v13582_v59 = vld [vmem:[%s18488_s7 + $0xc0] sm:$0xff]  }
 0x5fe   :  { %v12192_v35 = vpop.f32.mrf.mxu1  ;;  %12606 = vmatprep.mubr.msk.bf16.mxu0 %vm13685_vm12, %v18495_v49 }
 0x5ff   :  { %v12332_v42 = vpop.f32.mrf.mxu0  ;;  %12667 = vmatpush3.bf16.msra.mxu0 %v13581_v62  ;;  %v4927_v35 = vld [vmem:[#allocation4 + $0x62] sm:$0xff] }
 0x600   :  { %v3853_v63 = vpop.f32.mrf.mxu1  ;;  %12668 = vmatprep.subr.bf16.mxu0 %v18495_v49  ;;  %v4928_v42 = vld [vmem:[#allocation4 + $0x6a] sm:$0xff] }
 0x601   :  { %v16086_v57 = vadd.f32 %v3853_v63, %v15935_v37  ;;  %v16088_v36 = vpop.f32.mrf.mxu0 }
 0x602   :  { %18503 = vst [vmem:[#allocation7_spill] sm:$0xff] %v16088_v36  ;;  %v12193_v2 = vpop.f32.mrf.mxu1 }
 0x603   :  { %v12333_v51 = vpop.f32.mrf.mxu0  ;;  %12669 = vmatpush3.bf16.msra.mxu0 %v13582_v59 }
 0x604   :  { %v3965_v52 = vpop.f32.mrf.mxu1  ;;  %12431 = vmatmul.mubr.msk.bf16.gmra.mxu1 %vm1855_vm3, %v4936_v28  ;;  %12734 = vmatprep.subr.bf16.mxu0 %v18495_v49 }
 0x605   :  { %v16094_v62 = vadd.f32 %v3965_v52, %v3803_v5  ;;  %v16096_v33 = vpop.f32.mrf.mxu0  ;;  %12607 = vmatmul.mubr.msk.bf16.gmra.mxu0 %vm1855_vm3, %v15806_v13  ;;  %12434 = vmatprep.mubr.msk.bf16.mxu1 %vm13685_vm12, %v18495_v49  ;;  %v4937_v13 = vpack.c.bf16 %v4928_v42, %v4927_v35  ;;  %v4929_v52 = vld [vmem:[#allocation4 + $0x72] sm:$0xff] }
 0x606   :  { %18504 = vst [vmem:[#allocation8_spill] sm:$0xff] %v16096_v33  ;;  %v12204_v37 = vpop.f32.mrf.mxu1  ;;  %12610 = vmatprep.mubr.msk.bf16.mxu0 %vm13685_vm12, %v18495_v49 }
 0x607   :  { %v12336_v21 = vpop.f32.mrf.mxu0  ;;  %v4930_v37 = vld [vmem:[#allocation4 + $0x7a] sm:$0xff] }
 0x608   :  { %v3968_v44 = vpop.f32.mrf.mxu1  ;;  %v4938_v42 = vpack.c.bf16 %v4930_v37, %v4929_v52 }
 0x609   :  { %v16106_v30 = vadd.f32 %v3968_v44, %v3806_v39  ;;  %v16108_v59 = vpop.f32.mrf.mxu0 }
 0x60a   :  { %18505 = vst [vmem:[#allocation9_spill] sm:$0xff] %v16108_v59  ;;  %v12205_v63 = vpop.f32.mrf.mxu1 }
 0x60b   :  { %v12337_v2 = vpop.f32.mrf.mxu0 }
 0x60c   :  { %v3973_v28 = vpop.f32.mrf.mxu1  ;;  %12435 = vmatmul.mubr.msk.bf16.gmra.mxu1 %vm1855_vm3, %v4937_v13 }
 0x60d   :  { %v16112_v5 = vadd.f32 %v3973_v28, %v15957_v60  ;;  %v16114_v51 = vpop.f32.mrf.mxu0  ;;  %12611 = vmatmul.mubr.msk.bf16.gmra.mxu0 %vm1855_vm3, %v15824_v22  ;;  %12438 = vmatprep.mubr.msk.bf16.mxu1 %vm13685_vm12, %v18495_v49 }
 0x60e   :  { %v12208_v18 = vpop.f32.mrf.mxu1  ;;  %12614 = vmatprep.mubr.msk.bf16.mxu0 %vm13685_vm12, %v18495_v49 }
 0x60f   :  { %v12384_v27 = vpop.f32.mrf.mxu0  ;;  %v5801_v18 = vld [vmem:[#allocation4 + $0xd9] sm:$0xff] }
 0x610   :  { %v3976_v39 = vpop.f32.mrf.mxu1 }
 0x611   :  { %v16123_v21 = vadd.f32 %v3976_v39, %v15967_v3  ;;  %v16125_v60 = vpop.f32.mrf.mxu0  ;;  %v5809_v39 = vpack.c.bf16 %v5801_v18, %v15858_v25 }
 0x612   :  { %v12209_v35 = vpop.f32.mrf.mxu1 }
 0x613   :  { %v12385_v44 = vpop.f32.mrf.mxu0 }
 0x614   :  { %v3981_v22 = vpop.f32.mrf.mxu1  ;;  %12439 = vmatmul.mubr.msk.bf16.gmra.mxu1 %vm1855_vm3, %v4938_v42 }
 0x615   :  { %v16129_v63 = vadd.f32 %v3981_v22, %v15976_v14  ;;  %v16131_v13 = vpop.f32.mrf.mxu0  ;;  %12615 = vmatmul.mubr.msk.bf16.gmra.mxu0 %vm1855_vm3, %v15842_v55  ;;  %12442 = vmatprep.mubr.msk.bf16.mxu1 %vm13685_vm12, %v18495_v49  ;;  %v5802_v22 = vld [vmem:[#allocation4 + $0xe1] sm:$0xff] }
 0x616   :  { %v12212_v3 = vpop.f32.mrf.mxu1  ;;  %12618 = vmatprep.mubr.msk.bf16.mxu0 %vm13685_vm12, %v18495_v49 }
 0x617   :  { %v12388_v2 = vpop.f32.mrf.mxu0  ;;  %v5803_v3 = vld [vmem:[#allocation4 + $0xe9] sm:$0x3f] }
 0x618   :  { %v3984_v28 = vpop.f32.mrf.mxu1  ;;  %v13580_v2 = vld [vmem:[%s18488_s7 + $0x78] sm:$0xff]  }
 0x619   :  { %v16140_v27 = vadd.f32 %v3984_v28, %v15986_v16  ;;  %v16142_v14 = vpop.f32.mrf.mxu0 }
 0x61a   :  { %v12213_v52 = vpop.f32.mrf.mxu1 }
 0x61b   :  { %v12389_v37 = vpop.f32.mrf.mxu0  ;;  %v5810_v52 = vpack.c.bf16 %v5803_v3, %v5802_v22 }
 0x61c   :  { %v3989_v55 = vpop.f32.mrf.mxu1  ;;  %12443 = vmatmul.mubr.msk.bf16.gmra.mxu1 %vm1855_vm3, %v15914_v9 }
 0x61d   :  { %v16148_v35 = vadd.f32 %v3989_v55, %v15995_v29  ;;  %v16150_v42 = vpop.f32.mrf.mxu0  ;;  %12619 = vmatmul.mubr.msk.bf16.gmra.mxu0 %vm1855_vm3, %v5809_v39  ;;  %12490 = vmatprep.mubr.msk.bf16.mxu1 %vm13685_vm12, %v18495_v49 }
 0x61e   :  { %v12216_v16 = vpop.f32.mrf.mxu1  ;;  %12622 = vmatprep.mubr.msk.bf16.mxu0 %vm13685_vm12, %v18495_v49 }
 0x61f   :  { %v12392_v44 = vpop.f32.mrf.mxu0 }
 0x620   :  { %v3992_v25 = vpop.f32.mrf.mxu1  ;;  %v6144_v44 = vld [vmem:[#allocation4 + $0x90] sm:$0xff] }
 0x621   :  { %v16158_v9 = vadd.f32 %v3992_v25, %v16005_v43  ;;  %v16160_v29 = vpop.f32.mrf.mxu0  ;;  %v13583_v43 = vld [vmem:[%s18488_s7 + $0x70] sm:$0xff]   ;;  %v6145_v25 = vld [vmem:[#allocation4 + $0x98] sm:$0xff] }
 0x622   :  { %v12217_v28 = vpop.f32.mrf.mxu1 }
 0x623   :  { %v12393_v18 = vpop.f32.mrf.mxu0  ;;  %v13584_v28 = vld [vmem:[%s18488_s7 + $0x68] sm:$0xff]  }
 0x624   :  { %v3997_v37 = vpop.f32.mrf.mxu1  ;;  %12491 = vmatmul.mubr.msk.bf16.vlgmr.msra.gmra.mxu1 %vm1855_vm3, %v15971_v7 }
 0x625   :  { %v16168_v39 = vadd.f32 %v3997_v37, %v16014_v0  ;;  %v16170_v55 = vpop.f32.mrf.mxu0  ;;  %12555 = vmatpush3.bf16.msra.mxu1 %v13580_v2  ;;  %12623 = vmatmul.mubr.msk.bf16.gmra.mxu0 %vm1855_vm3, %v5810_v52  ;;  %v16190_v52 = vpack.c.bf16 %v6145_v25, %v6144_v44  ;;  %v13586_v37 = vld [vmem:[%s18488_s7 + $0x118] sm:$0xff]  }
 0x626   :  { %v12220_v16 = vpop.f32.mrf.mxu1  ;;  %12494 = vmatprep.mubr.msk.bf16.mxu1 %vm13685_vm12, %v18495_v49  ;;  %12670 = vmatprep.mubr.msk.bf16.mxu0 %vm13685_vm12, %v18495_v49 }
 0x627   :  { %v12396_v7 = vpop.f32.mrf.mxu0  ;;  %12556 = vmatprep.subr.bf16.mxu1 %v18495_v49 }
 0x628   :  { %v4000_v0 = vpop.f32.mrf.mxu1 }
 0x629   :  { %v16182_v22 = vadd.f32 %v4000_v0, %v16028_v1  ;;  %v16184_v3 = vpop.f32.mrf.mxu0  ;;  %12557 = vmatpush3.bf16.msra.mxu1 %v13583_v43  ;;  %v13585_v0 = vld [vmem:[%s18488_s7 + $0x60] sm:$0xff]  }
 0x62a   :  { %v12221_v2 = vpop.f32.mrf.mxu1  ;;  %12558 = vmatprep.subr.bf16.mxu1 %v18495_v49 }
 0x62b   :  { %v12397_v18 = vpop.f32.mrf.mxu0  ;;  %v6146_v2 = vld [vmem:[#allocation4 + $0xa0] sm:$0xff] }
 0x62c   :  { %v4005_v16 = vpop.f32.mrf.mxu1  ;;  %12495 = vmatmul.mubr.msk.bf16.gmra.mxu1 %vm1855_vm3, %v15990_v17  ;;  %v6147_v18 = vld [vmem:[#allocation4 + $0xa8] sm:$0xff] }
 0x62d   :  { %v16198_v1 = vadd.f32 %v4005_v16, %v16041_v11  ;;  %v16200_v43 = vpop.f32.mrf.mxu0  ;;  %12671 = vmatmul.mubr.msk.bf16.vlgmr.msra.gmra.mxu0 %vm1855_vm3, %v16190_v52  ;;  %12498 = vmatprep.mubr.msk.bf16.mxu1 %vm13685_vm12, %v18495_v49  ;;  %v13587_v11 = vld [vmem:[%s18488_s7 + $0x110] sm:$0xff]   ;;  %v16221_v59 = vpack.c.bf16 %v6147_v18, %v6146_v2  ;;  %v13590_v2 = vld [vmem:[%s18488_s7 + $0x100] sm:$0xff]   ;;  %v6149_v18 = vld [vmem:[#allocation4 + $0xb8] sm:$0xff] }
 0x62e   :  { %v12224_v7 = vpop.f32.mrf.mxu1  ;;  %12674 = vmatprep.mubr.msk.bf16.mxu0 %vm13685_vm12, %v18495_v49  ;;  %12559 = vmatpush3.bf16.msra.mxu1 %v13584_v28 }
 0x62f   :  { %v12400_v44 = vpop.f32.mrf.mxu0  ;;  %12560 = vmatprep.subr.bf16.mxu1 %v18495_v49  ;;  %12735 = vmatpush3.bf16.msra.mxu0 %v13586_v37  ;;  %v13589_v37 = vld [vmem:[%s18488_s7 + $0x108] sm:$0xff]  }
 0x630   :  { %v4008_v25 = vpop.f32.mrf.mxu1  ;;  %12736 = vmatprep.subr.bf16.mxu0 %v18495_v49 }
 0x631   :  { %v16217_v16 = vadd.f32 %v4008_v25, %v16060_v47  ;;  %v16219_v28 = vpop.f32.mrf.mxu0 }
 0x632   :  { %18506 = vst [vmem:[#allocation10_spill] sm:$0xff] %v16219_v28  ;;  %v12225_v7 = vpop.f32.mrf.mxu1  ;;  %12561 = vmatpush3.bf16.msra.mxu1 %v13585_v0 }
 0x633   :  { %v12401_v44 = vpop.f32.mrf.mxu0  ;;  %12737 = vmatpush3.bf16.msra.mxu0 %v13587_v11  ;;  %12626 = vmatprep.subr.bf16.mxu1 %v18495_v49 }
 0x634   :  { %v4013_v33 = vpop.f32.mrf.mxu1  ;;  %12499 = vmatmul.mubr.msk.bf16.gmra.mxu1 %vm1855_vm3, %v16190_v52  ;;  %12738 = vmatprep.subr.bf16.mxu0 %v18495_v49 }
 0x635   :  { %v16231_v47 = vadd.f32 %v4013_v33, %v16071_v20  ;;  %v16233_v0 = vpop.f32.mrf.mxu0  ;;  %12675 = vmatmul.mubr.msk.bf16.gmra.mxu0 %vm1855_vm3, %v16221_v59  ;;  %12502 = vmatprep.mubr.msk.bf16.mxu1 %vm13685_vm12, %v18495_v49  ;;  %v6148_v33 = vld [vmem:[#allocation4 + $0xb0] sm:$0xff] }
 0x636   :  { %18507 = vst [vmem:[#allocation11_spill] sm:$0xff] %v16233_v0  ;;  %v12228_v11 = vpop.f32.mrf.mxu1  ;;  %12678 = vmatprep.mubr.msk.bf16.mxu0 %vm13685_vm12, %v18495_v49 }
 0x637   :  { %v12404_v25 = vpop.f32.mrf.mxu0  ;;  %12739 = vmatpush3.bf16.msra.mxu0 %v13589_v37  ;;  %v16252_v37 = vpack.c.bf16 %v6149_v18, %v6148_v33 }
 0x638   :  { %v4016_v20 = vpop.f32.mrf.mxu1  ;;  %12740 = vmatprep.subr.bf16.mxu0 %v18495_v49  ;;  %v4197_v25 = vadd.f32 %v15812_v4, %v16094_v62 }
 0x639   :  { %v16246_v7 = vadd.f32 %v4016_v20, %v16086_v57  ;;  %v16248_v44 = vpop.f32.mrf.mxu0  ;;  %v6150_v20 = vld [vmem:[#allocation4 + $0xc0] sm:$0xff] }
 0x63a   :  { %18508 = vst [vmem:[#allocation12_spill] sm:$0xff] %v16248_v44  ;;  %v12229_v11 = vpop.f32.mrf.mxu1 }
 0x63b   :  { %v12405_v0 = vpop.f32.mrf.mxu0  ;;  %12741 = vmatpush3.bf16.msra.mxu0 %v13590_v2 }
 0x63c   :  { %v4319_v36 = vpop.f32.mrf.mxu1  ;;  %12503 = vmatmul.mubr.msk.bf16.gmra.mxu1 %vm1855_vm3, %v16221_v59  ;;  %12806 = vmatprep.subr.bf16.mxu0 %v18495_v49  ;;  %v4198_v0 = vadd.f32 %v15822_v56, %v16106_v30 }
 0x63d   :  { %v16257_v28 = vadd.f32 %v4319_v36, %v4197_v25  ;;  %v16259_v57 = vpop.f32.mrf.mxu0  ;;  %12679 = vmatmul.mubr.msk.bf16.gmra.mxu0 %vm1855_vm3, %v16252_v37  ;;  %12506 = vmatprep.mubr.msk.bf16.mxu1 %vm13685_vm12, %v18495_v49  ;;  %v6151_v36 = vld [vmem:[#allocation4 + $0xc8] sm:$0xff] }
 0x63e   :  { %18509 = vst [vmem:[#allocation13_spill] sm:$0xff] %v16259_v57  ;;  %v12276_v4 = vpop.f32.mrf.mxu1  ;;  %12682 = vmatprep.mubr.msk.bf16.mxu0 %vm13685_vm12, %v18495_v49  ;;  %v4199_v57 = vadd.f32 %v15830_v38, %v16112_v5  ;;  %v4200_v5 = vadd.f32 %v15840_v23, %v16123_v21 }
 0x63f   :  { %v12408_v62 = vpop.f32.mrf.mxu0  ;;  %v16275_v4 = vpack.c.bf16 %v6151_v36, %v6150_v20 }
 0x640   :  { %v4322_v2 = vpop.f32.mrf.mxu1 }
 0x641   :  { %v16269_v33 = vadd.f32 %v4322_v2, %v4198_v0  ;;  %v16271_v18 = vpop.f32.mrf.mxu0  ;;  %v6152_v2 = vld [vmem:[#allocation4 + $0xd0] sm:$0xff] }
 0x642   :  { %v12277_v11 = vpop.f32.mrf.mxu1 }
 0x643   :  { %v12409_v25 = vpop.f32.mrf.mxu0 }
 0x644   :  { %v4327_v44 = vpop.f32.mrf.mxu1  ;;  %12507 = vmatmul.mubr.msk.bf16.gmra.mxu1 %vm1855_vm3, %v16252_v37  ;;  %v4201_v25 = vadd.f32 %v15848_v34, %v16129_v63  ;;  %v4202_v63 = vadd.f32 %v15860_v48, %v16140_v27 }
 0x645   :  { %v16279_v62 = vadd.f32 %v4327_v44, %v4199_v57  ;;  %v16281_v56 = vpop.f32.mrf.mxu0  ;;  %12683 = vmatmul.mubr.msk.bf16.gmra.mxu0 %vm1855_vm3, %v16275_v4  ;;  %12510 = vmatprep.mubr.msk.bf16.mxu1 %vm13685_vm12, %v18495_v49  ;;  %v6153_v44 = vld [vmem:[#allocation4 + $0xd8] sm:$0xff] }
 0x646   :  { %18510 = vst [vmem:[#allocation14_spill] sm:$0xff] %v16281_v56  ;;  %v12280_v30 = vpop.f32.mrf.mxu1  ;;  %12686 = vmatprep.mubr.msk.bf16.mxu0 %vm13685_vm12, %v18495_v49 }
 0x647   :  { %v12456_v38 = vpop.f32.mrf.mxu0  ;;  %v16297_v30 = vpack.c.bf16 %v6153_v44, %v6152_v2  ;;  %v6155_v44 = vld [vmem:[#allocation4 + $0xe8] sm:$0xff] }
 0x648   :  { %v4330_v0 = vpop.f32.mrf.mxu1 }
 0x649   :  { %v16291_v57 = vadd.f32 %v4330_v0, %v4200_v5  ;;  %v16293_v20 = vpop.f32.mrf.mxu0  ;;  %v5123_v5 = vld [vmem:[#allocation4 + $0xd8] sm:$0x3f] }
 0x64a   :  { %18511 = vst [vmem:[#allocation15_spill] sm:$0xff] %v16293_v20  ;;  %v12281_v36 = vpop.f32.mrf.mxu1 }
 0x64b   :  { %v12457_v11 = vpop.f32.mrf.mxu0 }
 0x64c   :  { %v4335_v56 = vpop.f32.mrf.mxu1  ;;  %12511 = vmatmul.mubr.msk.bf16.gmra.mxu1 %vm1855_vm3, %v16275_v4 }
 0x64d   :  { %v16301_v38 = vadd.f32 %v4335_v56, %v4201_v25  ;;  %v16303_v23 = vpop.f32.mrf.mxu0  ;;  %12687 = vmatmul.mubr.msk.bf16.gmra.mxu0 %vm1855_vm3, %v16297_v30  ;;  %12514 = vmatprep.mubr.msk.bf16.mxu1 %vm13685_vm12, %v18495_v49  ;;  %v16313_v56 = vld [vmem:[#allocation4 + $0xe0] sm:$0xff] }
 0x64e   :  { %18512 = vst [vmem:[#allocation16_spill] sm:$0xff] %v16303_v23  ;;  %v12284_v21 = vpop.f32.mrf.mxu1  ;;  %12690 = vmatprep.mubr.msk.bf16.mxu0 %vm13685_vm12, %v18495_v49  ;;  %v5130_v23 = vpack.c.bf16 %v5123_v5, %v6152_v2  ;;  %v6156_v2 = vld [vmem:[#allocation4 + $0xf0] sm:$0xff] }
 0x64f   :  { %v12460_v34 = vpop.f32.mrf.mxu0  ;;  %v4203_v21 = vadd.f32 %v15869_v32, %v16148_v35  ;;  %v6157_v32 = vld [vmem:[#allocation4 + $0xf8] sm:$0x3f] }
 0x650   :  { %v4338_v0 = vpop.f32.mrf.mxu1  ;;  %v6163_v34 = vpack.c.bf16 %v6155_v44, %v16313_v56  ;;  %v13588_v44 = vld [vmem:[%s18488_s7 + $0xb8] sm:$0xff]  }
 0x651   :  { %v16315_v36 = vadd.f32 %v4338_v0, %v4202_v63  ;;  %v16317_v11 = vpop.f32.mrf.mxu0  ;;  %v18515_v63 = vmov 0.0  }
 0x652   :  { %18513 = vst [vmem:[#allocation17_spill] sm:$0xff] %v16317_v11  ;;  %v12285_v25 = vpop.f32.mrf.mxu1 }
 0x653   :  { %v12461_v20 = vpop.f32.mrf.mxu0  ;;  %v6164_v25 = vpack.c.bf16 %v6157_v32, %v6156_v2  ;;  %v13591_v2 = vld [vmem:[%s18488_s7 + $0xb0] sm:$0xff]  }
 0x654   :  { %v4343_v49 = vpop.f32.mrf.mxu1  ;;  %12515 = vmatmul.mubr.msk.bf16.gmra.mxu1 %vm1855_vm3, %v5130_v23  ;;  %v4204_v20 = vadd.f32 %v15882_v26, %v16158_v9 }
 0x655   :  { %v16323_v48 = vadd.f32 %v4343_v49, %v4203_v21  ;;  %v16325_v27 = vpop.f32.mrf.mxu0  ;;  %12691 = vmatmul.mubr.msk.bf16.gmra.mxu0 %vm1855_vm3, %v6163_v34  ;;  %12562 = vmatprep.mubr.msk.bf16.mxu1 %vm13685_vm12, %v18515_v63 }
 0x656   :  { %18514 = vst [vmem:[#allocation18_spill] sm:$0xff] %v16325_v27  ;;  %v12288_v0 = vpop.f32.mrf.mxu1  ;;  %12694 = vmatprep.mubr.msk.bf16.mxu0 %vm13685_vm12, %v18515_v63 }
 0x657   :  { %v12464_v35 = vpop.f32.mrf.mxu0  ;;  %v4205_v0 = vadd.f32 %v15894_v54, %v16168_v39 }
 0x658   :  { %v4346_v23 = vpop.f32.mrf.mxu1  ;;  %v6499_v35 = vld [vmem:[#allocation4 + $0x9a] sm:$0xff] }
 0x659   :  { %v16334_v49 = vadd.f32 %v4346_v23, %v4204_v20  ;;  %v16336_v5 = vpop.f32.mrf.mxu0 }
 0x65a   :  { %18516 = vst [vmem:[#allocation19_spill] sm:$0xff] %v16336_v5  ;;  %v12289_v21 = vpop.f32.mrf.mxu1 }
 0x65b   :  { %v12465_v34 = vpop.f32.mrf.mxu0 }
 0x65c   :  { %v4351_v27 = vpop.f32.mrf.mxu1  ;;  %12563 = vmatmul.mubr.msk.bf16.vlgmr.msra.gmra.mxu1 %vm1855_vm3, %v15990_v17  ;;  %v4206_v17 = vadd.f32 %v15912_v41, %v16182_v22  ;;  %v4207_v41 = vadd.f32 %v15924_v50, %v16198_v1  ;;  %v13594_v34 = vld [vmem:[%s18488_s7 + $0x18] sm:$0xff]   ;;  %v13593_v1 = vld [vmem:[%s18488_s7 + $0xa0] sm:$0xff]  }
 0x65d   :  { %v16345_v26 = vadd.f32 %v4351_v27, %v4205_v0  ;;  %v16347_v9 = vpop.f32.mrf.mxu0  ;;  %12627 = vmatpush3.bf16.msra.mxu1 %v13588_v44  ;;  %12695 = vmatmul.mubr.msk.bf16.gmra.mxu0 %vm1855_vm3, %v6164_v25  ;;  %v6498_v27 = vld [vmem:[#allocation4 + $0x92] sm:$0xff] }
 0x65e   :  { %18517 = vst [vmem:[#allocation20_spill] sm:$0xff] %v16347_v9  ;;  %v12292_v32 = vpop.f32.mrf.mxu1  ;;  %12566 = vmatprep.mubr.msk.bf16.mxu1 %vm13685_vm12, %v18515_v63  ;;  %12742 = vmatprep.mubr.msk.bf16.mxu0 %vm13685_vm12, %v18515_v63  ;;  %v13592_v25 = vld [vmem:[%s18488_s7 + $0xa8] sm:$0xff]   ;;  %v16370_v22 = vpack.c.bf16 %v6499_v35, %v6498_v27  ;;  %v6500_v27 = vld [vmem:[#allocation4 + $0xa2] sm:$0xff]  ;;  %v6501_v35 = vld [vmem:[#allocation4 + $0xaa] sm:$0xff] }
 0x65f   :  { %v12468_v54 = vpop.f32.mrf.mxu0  ;;  %12628 = vmatprep.subr.bf16.mxu1 %v18515_v63 }
 0x660   :  { %v4354_v39 = vpop.f32.mrf.mxu1  ;;  %v4208_v54 = vadd.f32 %v15938_v61, %v16217_v16  ;;  %v4209_v61 = vadd.f32 %v15944_v6, %v16231_v47  ;;  %v16403_v16 = vpack.c.bf16 %v6501_v35, %v6500_v27 }
 0x661   :  { %v16360_v20 = vadd.f32 %v4354_v39, %v4206_v17  ;;  %v16362_v23 = vpop.f32.mrf.mxu0  ;;  %12629 = vmatpush3.bf16.msra.mxu1 %v13591_v2  ;;  %v13595_v17 = vld [vmem:[%s18488_s7 + $0x10] sm:$0xff]  }
 0x662   :  { %18518 = vst [vmem:[#allocation21_spill] sm:$0xff] %v16362_v23  ;;  %v12293_v44 = vpop.f32.mrf.mxu1  ;;  %12630 = vmatprep.subr.bf16.mxu1 %v18515_v63 }
 0x663   :  { %v12469_v21 = vpop.f32.mrf.mxu0 }
 0x664   :  { %v4359_v0 = vpop.f32.mrf.mxu1  ;;  %12567 = vmatmul.mubr.msk.bf16.gmra.mxu1 %vm1855_vm3, %v16190_v52 }
 0x665   :  { %v16377_v2 = vadd.f32 %v4359_v0, %v4207_v41  ;;  %v16379_v32 = vpop.f32.mrf.mxu0  ;;  %12743 = vmatmul.mubr.msk.bf16.vlgmr.msra.gmra.mxu0 %vm1855_vm3, %v16370_v22  ;;  %12570 = vmatprep.mubr.msk.bf16.mxu1 %vm13685_vm12, %v18515_v63 }
 0x666   :  { %18519 = vst [vmem:[#allocation22_spill] sm:$0xff] %v16379_v32  ;;  %v12296_v50 = vpop.f32.mrf.mxu1  ;;  %12746 = vmatprep.mubr.msk.bf16.mxu0 %vm13685_vm12, %v18515_v63  ;;  %12631 = vmatpush3.bf16.msra.mxu1 %v13592_v25 }
 0x667   :  { %v12472_v52 = vpop.f32.mrf.mxu0  ;;  %12632 = vmatprep.subr.bf16.mxu1 %v18515_v63  ;;  %12807 = vmatpush3.bf16.msra.mxu0 %v13594_v34  ;;  %v13597_v34 = vld [vmem:[%s18488_s7 + $0x8] sm:$0xff]  }
 0x668   :  { %v4362_v39 = vpop.f32.mrf.mxu1  ;;  %12808 = vmatprep.subr.bf16.mxu0 %v18515_v63  ;;  %v13598_v52 = vld [vmem:[%s18488_s7] sm:$0xff]  }
 0x669   :  { %v16397_v44 = vadd.f32 %v4362_v39, %v4208_v54  ;;  %v16399_v25 = vpop.f32.mrf.mxu0  ;;  %v6503_v39 = vld [vmem:[#allocation4 + $0xba] sm:$0xff] }
 0x66a   :  { %18520 = vst [vmem:[#allocation23_spill] sm:$0xff] %v16399_v25  ;;  %v12297_v21 = vpop.f32.mrf.mxu1  ;;  %12633 = vmatpush3.bf16.msra.mxu1 %v13593_v1 }
 0x66b   :  { %v12473_v41 = vpop.f32.mrf.mxu0  ;;  %12809 = vmatpush3.bf16.msra.mxu0 %v13595_v17  ;;  %12698 = vmatprep.subr.bf16.mxu1 %v18515_v63  ;;  %v6502_v17 = vld [vmem:[#allocation4 + $0xb2] sm:$0xff] }
 0x66c   :  { %v4367_v0 = vpop.f32.mrf.mxu1  ;;  %12571 = vmatmul.mubr.msk.bf16.gmra.mxu1 %vm1855_vm3, %v16221_v59  ;;  %12810 = vmatprep.subr.bf16.mxu0 %v18515_v63  ;;  %v4210_v59 = vadd.f32 %v15953_v15, %v16246_v7 }
 0x66d   :  { %v16412_v50 = vadd.f32 %v4367_v0, %v4209_v61  ;;  %v16414_v1 = vpop.f32.mrf.mxu0  ;;  %12747 = vmatmul.mubr.msk.bf16.gmra.mxu0 %vm1855_vm3, %v16403_v16  ;;  %12574 = vmatprep.mubr.msk.bf16.mxu1 %vm13685_vm12, %v18515_v63  ;;  %v16432_v61 = vpack.c.bf16 %v6503_v39, %v6502_v17 }
 0x66e   :  { %18521 = vst [vmem:[#allocation24_spill] sm:$0xff] %v16414_v1  ;;  %v12300_v6 = vpop.f32.mrf.mxu1  ;;  %12750 = vmatprep.mubr.msk.bf16.mxu0 %vm13685_vm12, %v18515_v63 }
 0x66f   :  { %v12476_v47 = vpop.f32.mrf.mxu0  ;;  %12811 = vmatpush3.bf16.msra.mxu0 %v13597_v34 }
 0x670   :  { %v4370_v54 = vpop.f32.mrf.mxu1  ;;  %12812 = vmatprep.subr.bf16.mxu0 %v18515_v63  ;;  %v6504_v47 = vld [vmem:[#allocation4 + $0xc2] sm:$0xff] }
 0x671   :  { %v16428_v27 = vadd.f32 %v4370_v54, %v4210_v59  ;;  %v16430_v35 = vpop.f32.mrf.mxu0  ;;  %v6505_v59 = vld [vmem:[#allocation4 + $0xca] sm:$0xff] }
 0x672   :  { %18522 = vst [vmem:[#allocation25_spill] sm:$0xff] %v16430_v35  ;;  %v12301_v21 = vpop.f32.mrf.mxu1  ;;  %v16451_v17 = vpack.c.bf16 %v6505_v59, %v6504_v47  ;;  %v6506_v47 = vld [vmem:[#allocation4 + $0xd2] sm:$0xff]  ;;  %v6507_v59 = vld [vmem:[#allocation4 + $0xda] sm:$0xff]  ;;  %v6509_v35 = vld [vmem:[#allocation4 + $0xea] sm:$0xff] }
 0x673   :  { %v12477_v41 = vpop.f32.mrf.mxu0  ;;  %12813 = vmatpush3.bf16.msra.mxu0 %v13598_v52 }
 0x674   :  { %v16434_v15 = vpop.f32.mrf.mxu1  ;;  %12575 = vmatmul.mubr.msk.bf16.gmra.mxu1 %vm1855_vm3, %v16252_v37  ;;  %12878 = vmatprep.subr.bf16.mxu0 %v18515_v63 }
 0x675   :  { %v16439_v7 = vpop.f32.mrf.mxu0  ;;  %12751 = vmatmul.mubr.msk.bf16.gmra.mxu0 %vm1855_vm3, %v16432_v61  ;;  %12578 = vmatprep.mubr.msk.bf16.mxu1 %vm13685_vm12, %v18515_v63 }
 0x676   :  { %18523 = vst [vmem:[#allocation26_spill] sm:$0xff] %v16439_v7  ;;  %v12348_v34 = vpop.f32.mrf.mxu1  ;;  %12754 = vmatprep.mubr.msk.bf16.mxu0 %vm13685_vm12, %v18515_v63 }
 0x677   :  { %v12480_v0 = vpop.f32.mrf.mxu0 }
 0x678   :  { %v16447_v6 = vpop.f32.mrf.mxu1 }
 0x679   :  { %v16449_v37 = vpop.f32.mrf.mxu0 }
 0x67a   :  { %18524 = vst [vmem:[#allocation27_spill] sm:$0xff] %v16449_v37  ;;  %v12349_v52 = vpop.f32.mrf.mxu1  ;;  %v16469_v37 = vpack.c.bf16 %v6507_v59, %v6506_v47  ;;  %v5626_v47 = vld [vmem:[#allocation4 + $0xe8] sm:$0x3f] }
 0x67b   :  { %v12481_v54 = vpop.f32.mrf.mxu0  ;;  %v5633_v25 = vpack.c.bf16 %v5626_v47, %v16313_v56  ;;  %v6511_v56 = vld [vmem:[#allocation4 + $0xfa] sm:$0x3f]  ;;  %v5967_v47 = vld [vmem:[#allocation4 + $0x82] sm:$0xff] }
 0x67c   :  { %v16453_v39 = vpop.f32.mrf.mxu1  ;;  %12579 = vmatmul.mubr.msk.bf16.gmra.mxu1 %vm1855_vm3, %v16275_v4 }
 0x67d   :  { %v16457_v21 = vpop.f32.mrf.mxu0  ;;  %12755 = vmatmul.mubr.msk.bf16.gmra.mxu0 %vm1855_vm3, %v16451_v17  ;;  %12582 = vmatprep.mubr.msk.bf16.mxu1 %vm13685_vm12, %v18515_v63 }
 0x67e   :  { %18525 = vst [vmem:[#allocation28_spill] sm:$0xff] %v16457_v21  ;;  %v12352_v41 = vpop.f32.mrf.mxu1  ;;  %12758 = vmatprep.mubr.msk.bf16.mxu0 %vm13685_vm12, %v18515_v63 }
 0x67f   :  { %v12528_v34 = vpop.f32.mrf.mxu0 }
 0x680   :  { %v16465_v0 = vpop.f32.mrf.mxu1 }
 0x681   :  { %v16467_v52 = vpop.f32.mrf.mxu0 }
 0x682   :  { %18526 = vst [vmem:[#allocation29_spill] sm:$0xff] %v16467_v52  ;;  %v12353_v4 = vpop.f32.mrf.mxu1 }
 0x683   :  { %v12529_v54 = vpop.f32.mrf.mxu0 }
 0x684   :  { %v16471_v7 = vpop.f32.mrf.mxu1  ;;  %12583 = vmatmul.mubr.msk.bf16.gmra.mxu1 %vm1855_vm3, %v16297_v30  ;;  %v16485_v54 = vld [vmem:[#allocation4 + $0xe2] sm:$0xff] }
 0x685   :  { %v16475_v41 = vpop.f32.mrf.mxu0  ;;  %12759 = vmatmul.mubr.msk.bf16.gmra.mxu0 %vm1855_vm3, %v16469_v37  ;;  %12586 = vmatprep.mubr.msk.bf16.mxu1 %vm13685_vm12, %v18515_v63  ;;  %v6517_v23 = vpack.c.bf16 %v6509_v35, %v16485_v54  ;;  %v5968_v35 = vld [vmem:[#allocation4 + $0x8a] sm:$0xff] }
 0x686   :  { %18527 = vst [vmem:[#allocation30_spill] sm:$0xff] %v16475_v41  ;;  %v12356_v34 = vpop.f32.mrf.mxu1  ;;  %12762 = vmatprep.mubr.msk.bf16.mxu0 %vm13685_vm12, %v18515_v63  ;;  %v5981_v41 = vpack.c.bf16 %v5968_v35, %v5967_v47 }
 0x687   :  { %v12532_v4 = vpop.f32.mrf.mxu0 }
 0x688   :  { %v16483_v59 = vpop.f32.mrf.mxu1 }
 0x689   :  { %v16487_v30 = vpop.f32.mrf.mxu0 }
 0x68a   :  { %18528 = vst [vmem:[#allocation31_spill] sm:$0xff] %v16487_v30  ;;  %v12357_v1 = vpop.f32.mrf.mxu1 }
 0x68b   :  { %v12533_v32 = vpop.f32.mrf.mxu0  ;;  %v6510_v1 = vld [vmem:[#allocation4 + $0xf2] sm:$0xff] }
 0x68c   :  { %v16491_v9 = vpop.f32.mrf.mxu1  ;;  %12587 = vmatmul.mubr.msk.bf16.gmra.mxu1 %vm1855_vm3, %v5633_v25  ;;  %v6518_v25 = vpack.c.bf16 %v6511_v56, %v6510_v1  ;;  %v7270_v1 = vld [vmem:[#allocation4 + $0x108] sm:$0xff] }
 0x68d   :  { %v16494_v34 = vpop.f32.mrf.mxu0  ;;  %12763 = vmatmul.mubr.msk.bf16.gmra.mxu0 %vm1855_vm3, %v6517_v23  ;;  %12634 = vmatprep.mubr.msk.bf16.mxu1 %vm13685_vm12, %v18515_v63  ;;  %v13596_v23 = vld [vmem:[%s18488_s7 + $0xf8] sm:$0xff]  }
 0x68e   :  { %18529 = vst [vmem:[#allocation32_spill] sm:$0xff] %v16494_v34  ;;  %v12360_v4 = vpop.f32.mrf.mxu1  ;;  %12766 = vmatprep.mubr.msk.bf16.mxu0 %vm13685_vm12, %v18515_v63 }
 0x68f   :  { %v12536_v32 = vpop.f32.mrf.mxu0 }
 0x690   :  { %v16501_v5 = vpop.f32.mrf.mxu1  ;;  %v13599_v32 = vld [vmem:[%s18488_s7 + $0xf0] sm:$0xff]  }
 0x691   :  { %v16503_v30 = vpop.f32.mrf.mxu0 }
 0x692   :  { %18530 = vst [vmem:[#allocation33_spill] sm:$0xff] %v16503_v30  ;;  %v12361_v34 = vpop.f32.mrf.mxu1 }
 0x693   :  { %v12537_v4 = vpop.f32.mrf.mxu0  ;;  %v7269_v34 = vld [vmem:[#allocation4 + $0x100] sm:$0xff] }
 0x694   :  { %v16508_v11 = vpop.f32.mrf.mxu1  ;;  %12635 = vmatmul.mubr.msk.bf16.vlgmr.msra.gmra.mxu1 %vm1855_vm3, %v5981_v41  ;;  %v7283_v35 = vpack.c.bf16 %v7270_v1, %v7269_v34  ;;  %v13602_v4 = vld [vmem:[%s18488_s7 + $0x78] sm:$0xff]   ;;  %v13601_v34 = vld [vmem:[%s18488_s7 + $0xe0] sm:$0xff]  }
 0x695   :  { %v16511_v52 = vpop.f32.mrf.mxu0  ;;  %12699 = vmatpush3.bf16.msra.mxu1 %v13596_v23  ;;  %12767 = vmatmul.mubr.msk.bf16.gmra.mxu0 %vm1855_vm3, %v6518_v25 }
 0x696   :  { %18531 = vst [vmem:[#allocation34_spill] sm:$0xff] %v16511_v52  ;;  %v12364_v30 = vpop.f32.mrf.mxu1  ;;  %12638 = vmatprep.mubr.msk.bf16.mxu1 %vm13685_vm12, %v18515_v63  ;;  %12814 = vmatprep.mubr.msk.bf16.mxu0 %vm13685_vm12, %v18515_v63 }
 0x697   :  { %v12540_v56 = vpop.f32.mrf.mxu0  ;;  %12700 = vmatprep.subr.bf16.mxu1 %v18515_v63  ;;  %v13600_v30 = vld [vmem:[%s18488_s7 + $0xe8] sm:$0xff]  }
 0x698   :  { %v16522_v41 = vpop.f32.mrf.mxu1 }
 0x699   :  { %v16524_v47 = vpop.f32.mrf.mxu0  ;;  %12701 = vmatpush3.bf16.msra.mxu1 %v13599_v32 }
 0x69a   :  { %18532 = vst [vmem:[#allocation35_spill] sm:$0xff] %v16524_v47  ;;  %v12365_v23 = vpop.f32.mrf.mxu1  ;;  %12702 = vmatprep.subr.bf16.mxu1 %v18515_v63 }
 0x69b   :  { %v12541_v25 = vpop.f32.mrf.mxu0  ;;  %v7271_v23 = vld [vmem:[#allocation4 + $0x110] sm:$0xff] }
 0x69c   :  { %v16533_v56 = vpop.f32.mrf.mxu1  ;;  %12639 = vmatmul.mubr.msk.bf16.gmra.mxu1 %vm1855_vm3, %v16370_v22  ;;  %v13603_v22 = vld [vmem:[%s18488_s7 + $0x70] sm:$0xff]   ;;  %v7272_v25 = vld [vmem:[#allocation4 + $0x118] sm:$0xff] }
 0x69d   :  { %v16537_v47 = vpop.f32.mrf.mxu0  ;;  %12815 = vmatmul.mubr.msk.bf16.vlgmr.msra.gmra.mxu0 %vm1855_vm3, %v7283_v35  ;;  %12642 = vmatprep.mubr.msk.bf16.mxu1 %vm13685_vm12, %v18515_v63  ;;  %v16556_v52 = vpack.c.bf16 %v7272_v25, %v7271_v23  ;;  %v7273_v25 = vld [vmem:[#allocation4 + $0x120] sm:$0xff] }
 0x69e   :  { %18533 = vst [vmem:[#allocation36_spill] sm:$0xff] %v16537_v47  ;;  %v12368_v32 = vpop.f32.mrf.mxu1  ;;  %12818 = vmatprep.mubr.msk.bf16.mxu0 %vm13685_vm12, %v18515_v63  ;;  %12703 = vmatpush3.bf16.msra.mxu1 %v13600_v30 }
 0x69f   :  { %v12544_v1 = vpop.f32.mrf.mxu0  ;;  %12704 = vmatprep.subr.bf16.mxu1 %v18515_v63  ;;  %12879 = vmatpush3.bf16.msra.mxu0 %v13602_v4  ;;  %v13605_v4 = vld [vmem:[%s18488_s7 + $0x68] sm:$0xff]  }
 0x6a0   :  { %v16551_v35 = vpop.f32.mrf.mxu1  ;;  %12880 = vmatprep.subr.bf16.mxu0 %v18515_v63 }
 0x6a1   :  { %v16554_v32 = vpop.f32.mrf.mxu0 }
 0x6a2   :  { %18534 = vst [vmem:[#allocation37_spill] sm:$0xff] %v16554_v32  ;;  %v12369_v30 = vpop.f32.mrf.mxu1  ;;  %12705 = vmatpush3.bf16.msra.mxu1 %v13601_v34  ;;  %v4551_v34 = vadd.f32 %v15959_v53, %v16257_v28  ;;  %v13606_v53 = vld [vmem:[%s18488_s7 + $0x60] sm:$0xff]  }
 0x6a3   :  { %v12545_v47 = vpop.f32.mrf.mxu0  ;;  %12881 = vmatpush3.bf16.msra.mxu0 %v13603_v22  ;;  %12770 = vmatprep.subr.bf16.mxu1 %v18515_v63  ;;  %v7274_v30 = vld [vmem:[#allocation4 + $0x128] sm:$0xff] }
 0x6a4   :  { %v16562_v1 = vpop.f32.mrf.mxu1  ;;  %12643 = vmatmul.mubr.msk.bf16.gmra.mxu1 %vm1855_vm3, %v16403_v16  ;;  %12882 = vmatprep.subr.bf16.mxu0 %v18515_v63  ;;  %v4728_v23 = vadd.f32 %v16434_v15, %v4551_v34 }
 0x6a5   :  { %v16569_v47 = vpop.f32.mrf.mxu0  ;;  %12819 = vmatmul.mubr.msk.bf16.gmra.mxu0 %vm1855_vm3, %v16556_v52  ;;  %12646 = vmatprep.mubr.msk.bf16.mxu1 %vm13685_vm12, %v18515_v63 }
 0x6a6   :  { %18535 = vst [vmem:[#allocation38_spill] sm:$0xff] %v16569_v47  ;;  %v12372_v22 = vpop.f32.mrf.mxu1  ;;  %12822 = vmatprep.mubr.msk.bf16.mxu0 %vm13685_vm12, %v18515_v63 }
 0x6a7   :  { %v12548_v16 = vpop.f32.mrf.mxu0  ;;  %12883 = vmatpush3.bf16.msra.mxu0 %v13605_v4  ;;  %v4552_v22 = vadd.f32 %v15969_v24, %v16269_v33  ;;  %v4905_v4 = vadd.f32 %v16114_v51, %v4728_v23  ;;  %v4553_v24 = vadd.f32 %v15978_v58, %v16279_v62  ;;  %v7275_v58 = vld [vmem:[#allocation4 + $0x130] sm:$0xff]  ;;  %v7276_v62 = vld [vmem:[#allocation4 + $0x138] sm:$0xff] }
 0x6a8   :  { %v16581_v28 = vpop.f32.mrf.mxu1  ;;  %12884 = vmatprep.subr.bf16.mxu0 %v18515_v63  ;;  %v16590_v16 = vpack.c.bf16 %v7274_v30, %v7273_v25 }
 0x6a9   :  { %v16586_v47 = vpop.f32.mrf.mxu0  ;;  %v4729_v15 = vadd.f32 %v16447_v6, %v4552_v22 }
 0x6aa   :  { %18536 = vst [vmem:[#allocation39_spill] sm:$0xff] %v16586_v47  ;;  %v12373_v32 = vpop.f32.mrf.mxu1 }
 0x6ab   :  { %v12549_v34 = vpop.f32.mrf.mxu0  ;;  %12885 = vmatpush3.bf16.msra.mxu0 %v13606_v53  ;;  %v4906_v32 = vadd.f32 %v16125_v60, %v4729_v15  ;;  %v4555_v60 = vadd.f32 %v15997_v40, %v16301_v38  ;;  %v7277_v38 = vld [vmem:[#allocation4 + $0x140] sm:$0xff] }
 0x6ac   :  { %v5027_v21 = vpop.f32.mrf.mxu1  ;;  %12647 = vmatmul.mubr.msk.bf16.gmra.mxu1 %vm1855_vm3, %v16432_v61  ;;  %12950 = vmatprep.subr.bf16.mxu0 %v18515_v63  ;;  %v4730_v61 = vadd.f32 %v16453_v39, %v4553_v24  ;;  %v16613_v39 = vpack.c.bf16 %v7276_v62, %v7275_v58 }
 0x6ad   :  { %v5082_v33 = vadd.f32 %v5027_v21, %v4905_v4  ;;  %v16597_v47 = vpop.f32.mrf.mxu0  ;;  %12823 = vmatmul.mubr.msk.bf16.gmra.mxu0 %vm1855_vm3, %v16590_v16  ;;  %12650 = vmatprep.mubr.msk.bf16.mxu1 %vm13685_vm12, %v18515_v63  ;;  %v4554_v21 = vadd.f32 %v15988_v45, %v16291_v57 }
 0x6ae   :  { %v12420_v51 = vpop.f32.mrf.mxu1  ;;  %12826 = vmatprep.mubr.msk.bf16.mxu0 %vm13685_vm12, %v18515_v63  ;;  %v4907_v4 = vadd.f32 %v16131_v13, %v4730_v61  ;;  %v4732_v13 = vadd.f32 %v16471_v7, %v4555_v60  ;;  %v7278_v61 = vld [vmem:[#allocation4 + $0x148] sm:$0xff] }
 0x6af   :  { %v12552_v6 = vpop.f32.mrf.mxu0  ;;  %v4731_v22 = vadd.f32 %v16465_v0, %v4554_v21 }
 0x6b0   :  { %v5030_v23 = vpop.f32.mrf.mxu1  ;;  %v4556_v6 = vadd.f32 %v16007_v46, %v16315_v36  ;;  %v4909_v7 = vadd.f32 %v16150_v42, %v4732_v13  ;;  %v4557_v46 = vadd.f32 %v16016_v12, %v16323_v48  ;;  %v7279_v48 = vld [vmem:[#allocation4 + $0x150] sm:$0xff] }
 0x6b1   :  { %v5083_v53 = vadd.f32 %v5030_v23, %v4906_v32  ;;  %v16609_v25 = vpop.f32.mrf.mxu0  ;;  %v4908_v51 = vadd.f32 %v16142_v14, %v4731_v22  ;;  %v5980_v22 = vld [vmem:[#allocation4 + $0xea] sm:$0x3f] }
 0x6b2   :  { %v12421_v30 = vpop.f32.mrf.mxu1  ;;  %v4733_v62 = vadd.f32 %v16483_v59, %v4556_v6  ;;  %v4734_v42 = vadd.f32 %v16491_v9, %v4557_v46 }
 0x6b3   :  { %5097 = vst [vmem:[#allocation5 + $0x1b0] sm:$0xff] %v5083_v53  ;;  %v12553_v34 = vpop.f32.mrf.mxu0 }
 0x6b4   :  { %v5035_v24 = vpop.f32.mrf.mxu1  ;;  %12651 = vmatmul.mubr.msk.bf16.gmra.mxu1 %vm1855_vm3, %v16451_v17  ;;  %v7280_v34 = vld [vmem:[#allocation4 + $0x158] sm:$0xff] }
 0x6b5   :  { %v5084_v45 = vadd.f32 %v5035_v24, %v4907_v4  ;;  %v16619_v57 = vpop.f32.mrf.mxu0  ;;  %12827 = vmatmul.mubr.msk.bf16.gmra.mxu0 %vm1855_vm3, %v16613_v39  ;;  %12654 = vmatprep.mubr.msk.bf16.mxu1 %vm13685_vm12, %v18515_v63  ;;  %v4558_v4 = vadd.f32 %v16030_v19, %v16334_v49  ;;  %v4559_v19 = vadd.f32 %v16043_v10, %v16345_v26  ;;  %v6321_v26 = vld [vmem:[#allocation4 + $0x91] sm:$0xff] }
 0x6b6   :  { %v12424_v0 = vpop.f32.mrf.mxu1  ;;  %12830 = vmatprep.mubr.msk.bf16.mxu0 %vm13685_vm12, %v18515_v63 }
 0x6b7   :  { %v6693_v15 = vmax.f32 %v5082_v33, %v5084_v45  ;;  %v12600_v17 = vpop.f32.mrf.mxu0  ;;  %v16635_v33 = vpack.c.bf16 %v7278_v61, %v7277_v38  ;;  %v4735_v9 = vadd.f32 %v16501_v5, %v4558_v4  ;;  %v6323_v4 = vld [vmem:[#allocation4 + $0xa1] sm:$0xff] }
 0x6b8   :  { %v5038_v40 = vpop.f32.mrf.mxu1 }
 0x6b9   :  { %6695 = vst [vmem:[#allocation6] sm:$0xff] %v6693_v15  ;;  %v5085_v32 = vadd.f32 %v5038_v40, %v4908_v51  ;;  %v16631_v23 = vpop.f32.mrf.mxu0  ;;  %v5987_v15 = vpack.c.bf16 %v5980_v22, %v16485_v54  ;;  %v4911_v51 = vadd.f32 %v16170_v55, %v4734_v42  ;;  %v16658_v40 = vpack.c.bf16 %v7280_v34, %v7279_v48  ;;  %v18537_v48 = vld [vmem:[#allocation10_spill] sm:$0xff] }
 0x6ba   :  { %v12425_v58 = vpop.f32.mrf.mxu1  ;;  %v6690_v45 = vld [vmem:[#allocation5 + $0x1b0] sm:$0x3f]  ;;  %v4736_v55 = vadd.f32 %v16508_v11, %v4559_v19  ;;  %v4912_v10 = vadd.f32 %v16184_v3, %v4735_v9  ;;  %v13604_v11 = vld [vmem:[%s18488_s7 + $0x38] sm:$0xff]   ;;  %v18538_v9 = vld [vmem:[#allocation7_spill] sm:$0xff] }
 0x6bb   :  { %5099 = vst [vmem:[#allocation5 + $0x18] sm:$0xff] %v5085_v32  ;;  %v12601_v21 = vpop.f32.mrf.mxu0  ;;  %v6322_v32 = vld [vmem:[#allocation4 + $0x99] sm:$0xff] }
 0x6bc   :  { %v5043_v14 = vpop.f32.mrf.mxu1  ;;  %12655 = vmatmul.mubr.msk.bf16.gmra.mxu1 %vm1855_vm3, %v16469_v37  ;;  %v4910_v37 = vadd.f32 %v16160_v29, %v4733_v62  ;;  %v7281_v62 = vld [vmem:[#allocation4 + $0x160] sm:$0xff]  ;;  %v7282_v21 = vld [vmem:[#allocation4 + $0x168] sm:$0xff] }
 0x6bd   :  { %v5086_v36 = vadd.f32 %v5043_v14, %v4909_v7  ;;  %v16641_v53 = vpop.f32.mrf.mxu0  ;;  %12831 = vmatmul.mubr.msk.bf16.gmra.mxu0 %vm1855_vm3, %v16635_v33  ;;  %12658 = vmatprep.mubr.msk.bf16.mxu1 %vm13685_vm12, %v18515_v63  ;;  %v4560_v7 = vadd.f32 %v16062_v31, %v16360_v20  ;;  %v4561_v31 = vadd.f32 %v16073_v8, %v16377_v2 }
 0x6be   :  { %v12428_v59 = vpop.f32.mrf.mxu1  ;;  %12834 = vmatprep.mubr.msk.bf16.mxu0 %vm13685_vm12, %v18515_v63 }
 0x6bf   :  { %v12604_v30 = vpop.f32.mrf.mxu0  ;;  %v6335_v59 = vpack.c.bf16 %v6322_v32, %v6321_v26  ;;  %v4737_v3 = vadd.f32 %v16522_v41, %v4560_v7  ;;  %v4738_v8 = vadd.f32 %v16533_v56, %v4561_v31  ;;  %v18540_v26 = vld [vmem:[#allocation11_spill] sm:$0xff] }
 0x6c0   :  { %v5046_v12 = vpop.f32.mrf.mxu1  ;;  %v4913_v30 = vadd.f32 %v16200_v43, %v4736_v55  ;;  %v13607_v43 = vld [vmem:[%s18488_s7 + $0x30] sm:$0xff]   ;;  %v13608_v55 = vld [vmem:[%s18488_s7 + $0x28] sm:$0xff]  }
 0x6c1   :  { %v5087_v24 = vadd.f32 %v5046_v12, %v4910_v37  ;;  %v16653_v60 = vpop.f32.mrf.mxu0  ;;  %v16682_v37 = vpack.c.bf16 %v7282_v21, %v7281_v62  ;;  %v4914_v34 = vadd.f32 %v18537_v48, %v4737_v3  ;;  %v4915_v32 = vadd.f32 %v18540_v26, %v4738_v8  ;;  %v18541_v21 = vld [vmem:[#allocation8_spill] sm:$0xff]  ;;  %v6326_v31 = vld [vmem:[#allocation4 + $0xb9] sm:$0xff] }
 0x6c2   :  { %v6692_v0 = vld [vmem:[#allocation5 + $0x18] sm:$0x3f]  ;;  %v12429_v13 = vpop.f32.mrf.mxu1  ;;  %v4563_v7 = vadd.f32 %v18541_v21, %v16412_v50  ;;  %v13609_v50 = vld [vmem:[%s18488_s7 + $0x20] sm:$0xff]  }
 0x6c3   :  { %v6694_v17 = vmax.f32 %v6690_v45, %v6692_v0  ;;  %5101 = vst [vmem:[#allocation5 + $0x168] sm:$0xff] %v5087_v24  ;;  %v12605_v29 = vpop.f32.mrf.mxu0  ;;  %v6324_v24 = vld [vmem:[#allocation4 + $0xa9] sm:$0xff] }
 0x6c4   :  { %v5051_v38 = vpop.f32.mrf.mxu1  ;;  %12659 = vmatmul.mubr.msk.bf16.gmra.mxu1 %vm1855_vm3, %v5987_v15  ;;  %v16706_v45 = vld [vmem:[%s18493_s8] ss:$0 sm:$0xff] }
 0x6c5   :  { %6696 = vst [vmem:[#allocation6 + $0x8] sm:$0x3f] %v6694_v17  ;;  %v5088_v49 = vadd.f32 %v5051_v38, %v4911_v51  ;;  %v16663_v61 = vpop.f32.mrf.mxu0  ;;  %12835 = vmatmul.mubr.msk.bf16.gmra.mxu0 %vm1855_vm3, %v16658_v40  ;;  %12706 = vmatprep.mubr.msk.bf16.mxu1 %vm13685_vm12, %v18515_v63  ;;  %v4562_v17 = vadd.f32 %v18538_v9, %v16397_v44 }
 0x6c6   :  { %v12432_v5 = vpop.f32.mrf.mxu1  ;;  %12838 = vmatprep.mubr.msk.bf16.mxu0 %vm13685_vm12, %v18515_v63 }
 0x6c7   :  { %v6701_v54 = vmax.f32 %v5086_v36, %v5088_v49  ;;  %v12608_v6 = vpop.f32.mrf.mxu0  ;;  %v6336_v5 = vpack.c.bf16 %v6324_v24, %v6323_v4 }
 0x6c8   :  { %v5054_v58 = vpop.f32.mrf.mxu1 }
 0x6c9   :  { %6703 = vst [vmem:[#allocation6 + $0xe] sm:$0xff] %v6701_v54  ;;  %v5089_v14 = vadd.f32 %v5054_v58, %v4912_v10  ;;  %v16675_v46 = vpop.f32.mrf.mxu0  ;;  %v4739_v54 = vadd.f32 %v16551_v35, %v4562_v17  ;;  %v13610_v58 = vld [vmem:[%s18488_s7 + $0xb8] sm:$0xff]  }
 0x6ca   :  { %v12433_v36 = vpop.f32.mrf.mxu1  ;;  %v6698_v38 = vld [vmem:[#allocation5 + $0x168] sm:$0x3f] }
 0x6cb   :  { %5103 = vst [vmem:[#allocation5 + $0x48] sm:$0xff] %v5089_v14  ;;  %v12609_v42 = vpop.f32.mrf.mxu0 }
 0x6cc   :  { %v5059_v22 = vpop.f32.mrf.mxu1  ;;  %12707 = vmatmul.mubr.msk.bf16.vlgmr.msra.gmra.mxu1 %vm1855_vm3, %v6335_v59  ;;  %v4740_v59 = vadd.f32 %v16562_v1, %v4563_v7  ;;  %v18543_v42 = vld [vmem:[#allocation12_spill] sm:$0xff]  ;;  %v18544_v1 = vld [vmem:[#allocation9_spill] sm:$0xff] }
 0x6cd   :  { %v16687_v20 = vadd.f32 %v5059_v22, %v4913_v30  ;;  %v16689_v12 = vpop.f32.mrf.mxu0  ;;  %12771 = vmatpush3.bf16.msra.mxu1 %v13604_v11  ;;  %12839 = vmatmul.mubr.msk.bf16.gmra.mxu0 %vm1855_vm3, %v16682_v37  ;;  %v4916_v30 = vadd.f32 %v18543_v42, %v4739_v54  ;;  %v6325_v22 = vld [vmem:[#allocation4 + $0xb1] sm:$0xff]  ;;  %v4564_v8 = vadd.f32 %v18544_v1, %v16428_v27  ;;  %v6331_v1 = vld [vmem:[#allocation4 + $0xe1] sm:$0xff] }
 0x6ce   :  { %v12436_v41 = vpop.f32.mrf.mxu1  ;;  %12710 = vmatprep.mubr.msk.bf16.mxu1 %vm13685_vm12, %v18515_v63  ;;  %12886 = vmatprep.mubr.msk.bf16.mxu0 %vm13685_vm12, %v18515_v63  ;;  %v13613_v27 = vld [vmem:[%s18488_s7 + $0xa8] sm:$0xff]  }
 0x6cf   :  { %v12612_v2 = vpop.f32.mrf.mxu0  ;;  %12772 = vmatprep.subr.bf16.mxu1 %v18515_v63  ;;  %v4741_v4 = vadd.f32 %v16581_v28, %v4564_v8  ;;  %v6332_v8 = vld [vmem:[#allocation4 + $0xe9] sm:$0xff] }
 0x6d0   :  { %v6745_v0 = vld [vmem:[#allocation6] ss:$2 sm:$0xff]  ;;  %v6759_v13 = vld [vmem:[#allocation6 + $0x1] ss:$2 sm:$0xff]  ;;  %v5062_v15 = vpop.f32.mrf.mxu1 }
 0x6d1   :  { %v6772_v29 = vmax.f32 %v6745_v0, %v6759_v13  ;;  %v5091_v56 = vadd.f32 %v5062_v15, %v4914_v34  ;;  %v16710_v51 = vpop.f32.mrf.mxu0  ;;  %12773 = vmatpush3.bf16.msra.mxu1 %v13607_v43  ;;  %v13611_v43 = vld [vmem:[%s18488_s7 + $0xb0] sm:$0xff]   ;;  %v6337_v34 = vpack.c.bf16 %v6326_v31, %v6325_v22  ;;  %v18546_v0 = vld [vmem:[#allocation13_spill] sm:$0xff] }
 0x6d2   :  { %18539 = vst [vmem:[#allocation10_spill] sm:$0xff] %v16710_v51  ;;  %v6700_v19 = vld [vmem:[#allocation5 + $0x48] sm:$0x3f]  ;;  %v12437_v49 = vpop.f32.mrf.mxu1  ;;  %12774 = vmatprep.subr.bf16.mxu1 %v18515_v63  ;;  %v4917_v13 = vadd.f32 %v18546_v0, %v4740_v59  ;;  %v6330_v59 = vld [vmem:[#allocation4 + $0xd9] sm:$0xff] }
 0x6d3   :  { %v6785_v6 = vadd.f32 %v16706_v45, %v6772_v29  ;;  %v6702_v44 = vmax.f32 %v6698_v38, %v6700_v19  ;;  %5105 = vst [vmem:[#allocation5 + $0x110] sm:$0xff] %v5091_v56  ;;  %v12613_v10 = vpop.f32.mrf.mxu0  ;;  %v4918_v56 = vadd.f32 %v16271_v18, %v4741_v4  ;;  %v6327_v38 = vld [vmem:[#allocation4 + $0xc1] sm:$0xff]  ;;  %v6328_v19 = vld [vmem:[#allocation4 + $0xc9] sm:$0xff]  ;;  %v6340_v4 = vpack.c.bf16 %v6332_v8, %v6331_v1 }
 0x6d4   :  { %v5067_v62 = vpop.f32.mrf.mxu1  ;;  %12711 = vmatmul.mubr.msk.bf16.gmra.mxu1 %vm1855_vm3, %v6336_v5  ;;  %v13614_v49 = vld [vmem:[%s18488_s7 + $0xa0] sm:$0xff]   ;;  %v6338_v18 = vpack.c.bf16 %v6328_v19, %v6327_v38  ;;  %v8127_v1 = vld [vmem:[#allocation4 + $0x11a] sm:$0xff] }
 0x6d5   :  { %v6792_v14 = vmax.f32 %v6785_v6, 0.0  ;;  %6704 = vst [vmem:[#allocation6 + $0x16] sm:$0x3f] %v6702_v44  ;;  %v5092_v35 = vadd.f32 %v5067_v62, %v4915_v32  ;;  %v16725_v11 = vpop.f32.mrf.mxu0  ;;  %12887 = vmatmul.mubr.msk.bf16.vlgmr.msra.gmra.mxu0 %vm1855_vm3, %v16556_v52  ;;  %12714 = vmatprep.mubr.msk.bf16.mxu1 %vm13685_vm12, %v18515_v63  ;;  %v18577_v51 = vld [vmem:[#allocation23_spill] sm:$0xff] }
 0x6d6   :  { %18542 = vst [vmem:[#allocation7_spill] sm:$0xff] %v16725_v11  ;;  %v12440_v36 = vpop.f32.mrf.mxu1  ;;  %12890 = vmatprep.mubr.msk.bf16.mxu0 %vm13685_vm12, %v18515_v63  ;;  %12775 = vmatpush3.bf16.msra.mxu1 %v13608_v55 }
 0x6d7   :  { %6799 = vst [vmem:[%s18494_s9] sm:$0xff] %v6792_v14  ;;  %v6709_v52 = vmax.f32 %v16687_v20, %v5092_v35  ;;  %v12616_v3 = vpop.f32.mrf.mxu0  ;;  %12776 = vmatprep.subr.bf16.mxu1 %v18515_v63  ;;  %12951 = vmatpush3.bf16.msra.mxu0 %v13610_v58 }
 0x6d8   :  { %v5070_v41 = vpop.f32.mrf.mxu1  ;;  %12952 = vmatprep.subr.bf16.mxu0 %v18515_v63 }
 0x6d9   :  { %6711 = vst [vmem:[#allocation6 + $0x1c] sm:$0xff] %v6709_v52  ;;  %v5093_v20 = vadd.f32 %v5070_v41, %v4916_v30  ;;  %v16749_v2 = vpop.f32.mrf.mxu0 }
 0x6da   :  { %18545 = vst [vmem:[#allocation11_spill] sm:$0xff] %v16749_v2  ;;  %v12441_v48 = vpop.f32.mrf.mxu1  ;;  %12777 = vmatpush3.bf16.msra.mxu1 %v13609_v50  ;;  %v6706_v10 = vld [vmem:[#allocation5 + $0x110] sm:$0x3f] }
 0x6db   :  { %5107 = vst [vmem:[#allocation5 + $0x98] sm:$0xff] %v5093_v20  ;;  %v12617_v24 = vpop.f32.mrf.mxu0  ;;  %12953 = vmatpush3.bf16.msra.mxu0 %v13611_v43  ;;  %12842 = vmatprep.subr.bf16.mxu1 %v18515_v63  ;;  %v6329_v50 = vld [vmem:[#allocation4 + $0xd1] sm:$0xff] }
 0x6dc   :  { %v5075_v15 = vpop.f32.mrf.mxu1  ;;  %12715 = vmatmul.mubr.msk.bf16.gmra.mxu1 %vm1855_vm3, %v6337_v34  ;;  %12954 = vmatprep.subr.bf16.mxu0 %v18515_v63 }
 0x6dd   :  { %v16759_v9 = vadd.f32 %v5075_v15, %v4917_v13  ;;  %v16761_v17 = vpop.f32.mrf.mxu0  ;;  %12891 = vmatmul.mubr.msk.bf16.gmra.mxu0 %vm1855_vm3, %v16590_v16  ;;  %12718 = vmatprep.mubr.msk.bf16.mxu1 %vm13685_vm12, %v18515_v63  ;;  %v6333_v13 = vld [vmem:[#allocation4 + $0xf1] sm:$0xff] }
 0x6de   :  { %18547 = vst [vmem:[#allocation8_spill] sm:$0xff] %v16761_v17  ;;  %v12444_v28 = vpop.f32.mrf.mxu1  ;;  %12894 = vmatprep.mubr.msk.bf16.mxu0 %vm13685_vm12, %v18515_v63 }
 0x6df   :  { %v12620_v29 = vpop.f32.mrf.mxu0  ;;  %12955 = vmatpush3.bf16.msra.mxu0 %v13613_v27  ;;  %v6334_v27 = vld [vmem:[#allocation4 + $0xf9] sm:$0x3f] }
 0x6e0   :  { %v6747_v5 = vld [vmem:[#allocation6 + $0x10] ss:$2 sm:$0xff]  ;;  %v6761_v55 = vld [vmem:[#allocation6 + $0x11] ss:$2 sm:$0xff]  ;;  %v5078_v16 = vpop.f32.mrf.mxu1  ;;  %12956 = vmatprep.subr.bf16.mxu0 %v18515_v63 }
 0x6e1   :  { %v6773_v54 = vmax.f32 %v6747_v5, %v6761_v55  ;;  %v5095_v6 = vadd.f32 %v5078_v16, %v4918_v56  ;;  %v16774_v44 = vpop.f32.mrf.mxu0  ;;  %v6341_v56 = vpack.c.bf16 %v6334_v27, %v6333_v13  ;;  %v7298_v55 = vld [vmem:[#allocation4 + $0x101] sm:$0xff]  ;;  %v7299_v16 = vld [vmem:[#allocation4 + $0x109] sm:$0xff] }
 0x6e2   :  { %18548 = vst [vmem:[#allocation12_spill] sm:$0xff] %v16774_v44  ;;  %v6708_v26 = vld [vmem:[#allocation5 + $0x98] sm:$0x3f]  ;;  %v12445_v32 = vpop.f32.mrf.mxu1 }
 0x6e3   :  { %v6786_v58 = vadd.f32 %v16706_v45, %v6773_v54  ;;  %v6710_v62 = vmax.f32 %v6706_v10, %v6708_v26  ;;  %5109 = vst [vmem:[#allocation5 + $0x150] sm:$0xff] %v5095_v6  ;;  %v12621_v21 = vpop.f32.mrf.mxu0  ;;  %12957 = vmatpush3.bf16.msra.mxu0 %v13614_v49  ;;  %v7312_v26 = vpack.c.bf16 %v7299_v16, %v7298_v55  ;;  %v7784_v32 = vld [vmem:[#allocation4 + $0x170] sm:$0xff]  ;;  %v7302_v16 = vld [vmem:[#allocation4 + $0x121] sm:$0xff] }
 0x6e4   :  { %v16777_v7 = vpop.f32.mrf.mxu1  ;;  %12719 = vmatmul.mubr.msk.bf16.gmra.mxu1 %vm1855_vm3, %v6338_v18  ;;  %13022 = vmatprep.subr.bf16.mxu0 %v18515_v63  ;;  %v7785_v18 = vld [vmem:[#allocation4 + $0x178] sm:$0xff] }
 0x6e5   :  { %v6793_v14 = vmax.f32 %v6786_v58, 0.0  ;;  %6712 = vst [vmem:[#allocation6 + $0x24] sm:$0x3f] %v6710_v62  ;;  %v16781_v35 = vpop.f32.mrf.mxu0  ;;  %12895 = vmatmul.mubr.msk.bf16.gmra.mxu0 %vm1855_vm3, %v16613_v39  ;;  %12722 = vmatprep.mubr.msk.bf16.mxu1 %vm13685_vm12, %v18515_v63  ;;  %v6339_v39 = vpack.c.bf16 %v6330_v59, %v6329_v50  ;;  %v13615_v50 = vld [vmem:[%s18488_s7 + $0x50] sm:$0xff]  }
 0x6e6   :  { %18549 = vst [vmem:[#allocation9_spill] sm:$0xff] %v16781_v35  ;;  %v12492_v45 = vpop.f32.mrf.mxu1  ;;  %12898 = vmatprep.mubr.msk.bf16.mxu0 %vm13685_vm12, %v18515_v63 }
 0x6e7   :  { %6800 = vst [vmem:[%s18494_s9 + $0x8] sm:$0xff] %v6793_v14  ;;  %v12624_v36 = vpop.f32.mrf.mxu0  ;;  %v7792_v14 = vpack.c.bf16 %v7785_v18, %v7784_v32  ;;  %v8128_v32 = vld [vmem:[#allocation4 + $0x122] sm:$0xff]  ;;  %v8129_v18 = vld [vmem:[#allocation4 + $0x12a] sm:$0xff] }
 0x6e8   :  { %v16792_v52 = vpop.f32.mrf.mxu1 }
 0x6e9   :  { %v16794_v3 = vpop.f32.mrf.mxu0 }
 0x6ea   :  { %18550 = vst [vmem:[#allocation13_spill] sm:$0xff] %v16794_v3  ;;  %v12493_v42 = vpop.f32.mrf.mxu1  ;;  %v18565_v3 = vld [vmem:[#allocation17_spill] sm:$0xff] }
 0x6eb   :  { %v12625_v30 = vpop.f32.mrf.mxu0 }
 0x6ec   :  { %v16796_v22 = vpop.f32.mrf.mxu1  ;;  %12723 = vmatmul.mubr.msk.bf16.gmra.mxu1 %vm1855_vm3, %v6339_v39  ;;  %v7300_v39 = vld [vmem:[#allocation4 + $0x111] sm:$0xff]  ;;  %v7301_v30 = vld [vmem:[#allocation4 + $0x119] sm:$0xff] }
 0x6ed   :  { %v16799_v31 = vpop.f32.mrf.mxu0  ;;  %12899 = vmatmul.mubr.msk.bf16.gmra.mxu0 %vm1855_vm3, %v16635_v33  ;;  %12726 = vmatprep.mubr.msk.bf16.mxu1 %vm13685_vm12, %v18515_v63 }
 0x6ee   :  { %v12496_v43 = vpop.f32.mrf.mxu1  ;;  %12902 = vmatprep.mubr.msk.bf16.mxu0 %vm13685_vm12, %v18515_v63 }
 0x6ef   :  { %v12672_v41 = vpop.f32.mrf.mxu0 }
 0x6f0   :  { %v16807_v20 = vpop.f32.mrf.mxu1  ;;  %v8126_v41 = vld [vmem:[#allocation4 + $0x112] sm:$0xff] }
 0x6f1   :  { %v16809_v48 = vpop.f32.mrf.mxu0  ;;  %v16868_v27 = vpack.c.bf16 %v8127_v1, %v8126_v41  ;;  %v18557_v41 = vld [vmem:[#allocation14_spill] sm:$0xff] }
 0x6f2   :  { %v12497_v34 = vpop.f32.mrf.mxu1  ;;  %v5382_v1 = vadd.f32 %v16777_v7, %v18557_v41  ;;  %v18559_v7 = vld [vmem:[#allocation15_spill] sm:$0xff] }
 0x6f3   :  { %v12673_v24 = vpop.f32.mrf.mxu0 }
 0x6f4   :  { %v16811_v0 = vpop.f32.mrf.mxu1  ;;  %12727 = vmatmul.mubr.msk.bf16.gmra.mxu1 %vm1855_vm3, %v6340_v4  ;;  %v16862_v4 = vpack.c.bf16 %v7301_v30, %v7300_v39  ;;  %v13616_v24 = vld [vmem:[%s18488_s7 + $0x48] sm:$0xff]  }
 0x6f5   :  { %v16814_v33 = vpop.f32.mrf.mxu0  ;;  %12903 = vmatmul.mubr.msk.bf16.gmra.mxu0 %vm1855_vm3, %v16658_v40  ;;  %12730 = vmatprep.mubr.msk.bf16.mxu1 %vm13685_vm12, %v18515_v63 }
 0x6f6   :  { %v12500_v15 = vpop.f32.mrf.mxu1  ;;  %12906 = vmatprep.mubr.msk.bf16.mxu0 %vm13685_vm12, %v18515_v63 }
 0x6f7   :  { %v12676_v28 = vpop.f32.mrf.mxu0  ;;  %v13618_v15 = vld [vmem:[%s18488_s7 + $0xf8] sm:$0xff]  }
 0x6f8   :  { %v16822_v29 = vpop.f32.mrf.mxu1 }
 0x6f9   :  { %v16824_v38 = vpop.f32.mrf.mxu0 }
 0x6fa   :  { %v12501_v19 = vpop.f32.mrf.mxu1 }
 0x6fb   :  { %v12677_v49 = vpop.f32.mrf.mxu0 }
 0x6fc   :  { %v16826_v5 = vpop.f32.mrf.mxu1  ;;  %12731 = vmatmul.mubr.msk.bf16.gmra.mxu1 %vm1855_vm3, %v6341_v56  ;;  %v13617_v49 = vld [vmem:[%s18488_s7 + $0x40] sm:$0xff]  }
 0x6fd   :  { %v16829_v40 = vpop.f32.mrf.mxu0  ;;  %12907 = vmatmul.mubr.msk.bf16.gmra.mxu0 %vm1855_vm3, %v16682_v37  ;;  %12778 = vmatprep.mubr.msk.bf16.mxu1 %vm13685_vm12, %v18515_v63  ;;  %v13612_v37 = vld [vmem:[%s18488_s7 + $0x58] sm:$0xff]  }
 0x6fe   :  { %v12504_v54 = vpop.f32.mrf.mxu1  ;;  %12910 = vmatprep.mubr.msk.bf16.mxu0 %vm13685_vm12, %v18515_v63 }
 0x6ff   :  { %v12680_v6 = vpop.f32.mrf.mxu0  ;;  %v7303_v54 = vld [vmem:[#allocation4 + $0x129] sm:$0xff] }
 0x700   :  { %v16837_v10 = vpop.f32.mrf.mxu1  ;;  %v13619_v6 = vld [vmem:[%s18488_s7 + $0xf0] sm:$0xff]  }
 0x701   :  { %v16839_v58 = vpop.f32.mrf.mxu0 }
 0x702   :  { %18551 = vst [vmem:[#allocation40_spill] sm:$0xff] %v16839_v58  ;;  %v12505_v62 = vpop.f32.mrf.mxu1 }
 0x703   :  { %v12681_v21 = vpop.f32.mrf.mxu0 }
 0x704   :  { %v16844_v45 = vpop.f32.mrf.mxu1  ;;  %12779 = vmatmul.mubr.msk.bf16.vlgmr.msra.gmra.mxu1 %vm1855_vm3, %v7312_v26  ;;  %v16897_v21 = vpack.c.bf16 %v7303_v54, %v7302_v16 }
 0x705   :  { %v16847_v36 = vpop.f32.mrf.mxu0  ;;  %12843 = vmatpush3.bf16.msra.mxu1 %v13612_v37  ;;  %12911 = vmatmul.mubr.msk.bf16.gmra.mxu0 %vm1855_vm3, %v7792_v14 }
 0x706   :  { %18552 = vst [vmem:[#allocation41_spill] sm:$0xff] %v16847_v36  ;;  %v12508_v59 = vpop.f32.mrf.mxu1  ;;  %12782 = vmatprep.mubr.msk.bf16.mxu1 %vm13685_vm12, %v18515_v63  ;;  %12958 = vmatprep.mubr.msk.bf16.mxu0 %vm13685_vm12, %v18515_v63 }
 0x707   :  { %v12684_v42 = vpop.f32.mrf.mxu0  ;;  %12844 = vmatprep.subr.bf16.mxu1 %v18515_v63  ;;  %v13621_v59 = vld [vmem:[%s18488_s7 + $0xe8] sm:$0xff]  }
 0x708   :  { %v16858_v43 = vpop.f32.mrf.mxu1 }
 0x709   :  { %v16860_v8 = vpop.f32.mrf.mxu0  ;;  %12845 = vmatpush3.bf16.msra.mxu1 %v13615_v50  ;;  %v16899_v50 = vpack.c.bf16 %v8129_v18, %v8128_v32  ;;  %v5385_v32 = vadd.f32 %v16792_v52, %v18559_v7 }
 0x70a   :  { %18553 = vst [vmem:[#allocation42_spill] sm:$0xff] %v16860_v8  ;;  %v12509_v34 = vpop.f32.mrf.mxu1  ;;  %12846 = vmatprep.subr.bf16.mxu1 %v18515_v63 }
 0x70b   :  { %v12685_v13 = vpop.f32.mrf.mxu0 }
 0x70c   :  { %v16873_v28 = vpop.f32.mrf.mxu1  ;;  %12783 = vmatmul.mubr.msk.bf16.gmra.mxu1 %vm1855_vm3, %v16862_v4  ;;  %v7305_v13 = vld [vmem:[#allocation4 + $0x139] sm:$0xff] }
 0x70d   :  { %v16877_v56 = vpop.f32.mrf.mxu0  ;;  %12959 = vmatmul.mubr.msk.bf16.vlgmr.msra.gmra.mxu0 %vm1855_vm3, %v16868_v27  ;;  %12786 = vmatprep.mubr.msk.bf16.mxu1 %vm13685_vm12, %v18515_v63 }
 0x70e   :  { %18554 = vst [vmem:[#allocation43_spill] sm:$0xff] %v16877_v56  ;;  %v12512_v19 = vpop.f32.mrf.mxu1  ;;  %12962 = vmatprep.mubr.msk.bf16.mxu0 %vm13685_vm12, %v18515_v63  ;;  %12847 = vmatpush3.bf16.msra.mxu1 %v13616_v24  ;;  %v7304_v24 = vld [vmem:[#allocation4 + $0x131] sm:$0xff] }
 0x70f   :  { %v12688_v55 = vpop.f32.mrf.mxu0  ;;  %12848 = vmatprep.subr.bf16.mxu1 %v18515_v63  ;;  %13023 = vmatpush3.bf16.msra.mxu0 %v13618_v15  ;;  %v13622_v15 = vld [vmem:[%s18488_s7 + $0xe0] sm:$0xff]  }
 0x710   :  { %v16892_v26 = vpop.f32.mrf.mxu1  ;;  %13024 = vmatprep.subr.bf16.mxu0 %v18515_v63  ;;  %v8131_v55 = vld [vmem:[#allocation4 + $0x13a] sm:$0xff]  ;;  %v18573_v56 = vld [vmem:[#allocation21_spill] sm:$0xff] }
 0x711   :  { %v16895_v37 = vpop.f32.mrf.mxu0  ;;  %v5409_v2 = vadd.f32 %v16837_v10, %v18573_v56  ;;  %v18575_v10 = vld [vmem:[#allocation22_spill] sm:$0xff] }
 0x712   :  { %18555 = vst [vmem:[#allocation44_spill] sm:$0xff] %v16895_v37  ;;  %v12513_v62 = vpop.f32.mrf.mxu1  ;;  %12849 = vmatpush3.bf16.msra.mxu1 %v13617_v49  ;;  %v8130_v49 = vld [vmem:[#allocation4 + $0x132] sm:$0xff] }
 0x713   :  { %v12689_v14 = vpop.f32.mrf.mxu0  ;;  %13025 = vmatpush3.bf16.msra.mxu0 %v13619_v6  ;;  %12914 = vmatprep.subr.bf16.mxu1 %v18515_v63  ;;  %v16928_v6 = vpack.c.bf16 %v7305_v13, %v7304_v24  ;;  %v18560_v62 = vld [vmem:[#allocation28_spill] sm:$0xff] }
 0x714   :  { %v16905_v42 = vpop.f32.mrf.mxu1  ;;  %12787 = vmatmul.mubr.msk.bf16.gmra.mxu1 %vm1855_vm3, %v16897_v21  ;;  %13026 = vmatprep.subr.bf16.mxu0 %v18515_v63  ;;  %v5599_v14 = vadd.f32 %v18560_v62, %v5382_v1  ;;  %v18562_v1 = vld [vmem:[#allocation16_spill] sm:$0xff] }
 0x715   :  { %v16910_v39 = vpop.f32.mrf.mxu0  ;;  %12963 = vmatmul.mubr.msk.bf16.gmra.mxu0 %vm1855_vm3, %v16899_v50  ;;  %12790 = vmatprep.mubr.msk.bf16.mxu1 %vm13685_vm12, %v18515_v63  ;;  %v5390_v24 = vadd.f32 %v16796_v22, %v18562_v1  ;;  %v8133_v62 = vld [vmem:[#allocation4 + $0x14a] sm:$0xff]  ;;  %v18566_v22 = vld [vmem:[#allocation30_spill] sm:$0xff] }
 0x716   :  { %18556 = vst [vmem:[#allocation45_spill] sm:$0xff] %v16910_v39  ;;  %v12516_v30 = vpop.f32.mrf.mxu1  ;;  %12966 = vmatprep.mubr.msk.bf16.mxu0 %vm13685_vm12, %v18515_v63  ;;  %v18569_v39 = vld [vmem:[#allocation19_spill] sm:$0xff] }
 0x717   :  { %v12692_v34 = vpop.f32.mrf.mxu0  ;;  %13027 = vmatpush3.bf16.msra.mxu0 %v13621_v59  ;;  %v16933_v59 = vpack.c.bf16 %v8131_v55, %v8130_v49  ;;  %v7306_v55 = vld [vmem:[#allocation4 + $0x141] sm:$0xff]  ;;  %v5601_v1 = vadd.f32 %v18566_v22, %v5390_v24  ;;  %v5401_v44 = vadd.f32 %v16822_v29, %v18569_v39 }
 0x718   :  { %v16923_v19 = vpop.f32.mrf.mxu1  ;;  %13028 = vmatprep.subr.bf16.mxu0 %v18515_v63  ;;  %v18568_v24 = vld [vmem:[#allocation31_spill] sm:$0xff] }
 0x719   :  { %v16926_v16 = vpop.f32.mrf.mxu0  ;;  %v8135_v22 = vld [vmem:[#allocation4 + $0x15a] sm:$0xff] }
 0x71a   :  { %18558 = vst [vmem:[#allocation14_spill] sm:$0xff] %v16926_v16  ;;  %v12517_v54 = vpop.f32.mrf.mxu1  ;;  %v5393_v16 = vadd.f32 %v16807_v20, %v18565_v3 }
 0x71b   :  { %v12693_v18 = vpop.f32.mrf.mxu0  ;;  %13029 = vmatpush3.bf16.msra.mxu0 %v13622_v15  ;;  %v18563_v15 = vld [vmem:[#allocation29_spill] sm:$0xff] }
 0x71c   :  { %v5721_v30 = vpop.f32.mrf.mxu1  ;;  %12791 = vmatmul.mubr.msk.bf16.gmra.mxu1 %vm1855_vm3, %v16928_v6  ;;  %13094 = vmatprep.subr.bf16.mxu0 %v18515_v63  ;;  %v5600_v49 = vadd.f32 %v18563_v15, %v5385_v32  ;;  %v7307_v54 = vld [vmem:[#allocation4 + $0x149] sm:$0xff] }
 0x71d   :  { %v16938_v41 = vadd.f32 %v5721_v30, %v5599_v14  ;;  %v16940_v34 = vpop.f32.mrf.mxu0  ;;  %12967 = vmatmul.mubr.msk.bf16.gmra.mxu0 %vm1855_vm3, %v16933_v59  ;;  %12794 = vmatprep.mubr.msk.bf16.mxu1 %vm13685_vm12, %v18515_v63  ;;  %v8132_v18 = vld [vmem:[#allocation4 + $0x142] sm:$0xff] }
 0x71e   :  { %18561 = vst [vmem:[#allocation15_spill] sm:$0xff] %v16940_v34  ;;  %v12564_v52 = vpop.f32.mrf.mxu1  ;;  %12970 = vmatprep.mubr.msk.bf16.mxu0 %vm13685_vm12, %v18515_v63 }
 0x71f   :  { %v12696_v13 = vpop.f32.mrf.mxu0  ;;  %v16955_v52 = vpack.c.bf16 %v7307_v54, %v7306_v55  ;;  %v5602_v55 = vadd.f32 %v18568_v24, %v5393_v16  ;;  %v7308_v54 = vld [vmem:[#allocation4 + $0x151] sm:$0xff] }
 0x720   :  { %v5724_v7 = vpop.f32.mrf.mxu1  ;;  %v16960_v13 = vpack.c.bf16 %v8133_v62, %v8132_v18  ;;  %v8134_v62 = vld [vmem:[#allocation4 + $0x152] sm:$0xff] }
 0x721   :  { %v16951_v14 = vadd.f32 %v5724_v7, %v5600_v49  ;;  %v16953_v30 = vpop.f32.mrf.mxu0  ;;  %v7309_v7 = vld [vmem:[#allocation4 + $0x159] sm:$0xff] }
 0x722   :  { %18564 = vst [vmem:[#allocation28_spill] sm:$0xff] %v16953_v30  ;;  %v12565_v34 = vpop.f32.mrf.mxu1 }
 0x723   :  { %v12697_v35 = vpop.f32.mrf.mxu0 }
 0x724   :  { %v5729_v32 = vpop.f32.mrf.mxu1  ;;  %12795 = vmatmul.mubr.msk.bf16.gmra.mxu1 %vm1855_vm3, %v16955_v52  ;;  %v18567_v35 = vld [vmem:[#allocation18_spill] sm:$0xff] }
 0x725   :  { %v16964_v15 = vadd.f32 %v5729_v32, %v5601_v1  ;;  %v16966_v49 = vpop.f32.mrf.mxu0  ;;  %12971 = vmatmul.mubr.msk.bf16.gmra.mxu0 %vm1855_vm3, %v16960_v13  ;;  %12798 = vmatprep.mubr.msk.bf16.mxu1 %vm13685_vm12, %v18515_v63  ;;  %v5398_v20 = vadd.f32 %v16811_v0, %v18567_v35  ;;  %v18570_v0 = vld [vmem:[#allocation32_spill] sm:$0xff] }
 0x726   :  { %v12568_v3 = vpop.f32.mrf.mxu1  ;;  %12974 = vmatprep.mubr.msk.bf16.mxu0 %vm13685_vm12, %v18515_v63 }
 0x727   :  { %v12744_v34 = vpop.f32.mrf.mxu0  ;;  %v16981_v3 = vpack.c.bf16 %v7309_v7, %v7308_v54  ;;  %v5603_v35 = vadd.f32 %v18570_v0, %v5398_v20  ;;  %v18572_v20 = vld [vmem:[#allocation33_spill] sm:$0xff]  ;;  %v7310_v7 = vld [vmem:[#allocation4 + $0x161] sm:$0xff] }
 0x728   :  { %v5732_v18 = vpop.f32.mrf.mxu1  ;;  %v16986_v34 = vpack.c.bf16 %v8135_v22, %v8134_v62  ;;  %v5604_v54 = vadd.f32 %v18572_v20, %v5401_v44  ;;  %v8136_v22 = vld [vmem:[#allocation4 + $0x162] sm:$0xff]  ;;  %v8137_v0 = vld [vmem:[#allocation4 + $0x16a] sm:$0xff] }
 0x729   :  { %v16977_v1 = vadd.f32 %v5732_v18, %v5602_v55  ;;  %v16979_v32 = vpop.f32.mrf.mxu0  ;;  %v7311_v18 = vld [vmem:[#allocation4 + $0x169] sm:$0xff] }
 0x72a   :  { %v12569_v30 = vpop.f32.mrf.mxu1 }
 0x72b   :  { %v12745_v37 = vpop.f32.mrf.mxu0 }
 0x72c   :  { %v5737_v16 = vpop.f32.mrf.mxu1  ;;  %12799 = vmatmul.mubr.msk.bf16.gmra.mxu1 %vm1855_vm3, %v16981_v3  ;;  %v18571_v37 = vld [vmem:[#allocation20_spill] sm:$0xff] }
 0x72d   :  { %v16990_v24 = vadd.f32 %v5737_v16, %v5603_v35  ;;  %v16992_v55 = vpop.f32.mrf.mxu0  ;;  %12975 = vmatmul.mubr.msk.bf16.gmra.mxu0 %vm1855_vm3, %v16986_v34  ;;  %12802 = vmatprep.mubr.msk.bf16.mxu1 %vm13685_vm12, %v18515_v63  ;;  %v5406_v39 = vadd.f32 %v16826_v5, %v18571_v37  ;;  %v18574_v5 = vld [vmem:[#allocation34_spill] sm:$0xff] }
 0x72e   :  { %v12572_v29 = vpop.f32.mrf.mxu1  ;;  %12978 = vmatprep.mubr.msk.bf16.mxu0 %vm13685_vm12, %v18515_v63 }
 0x72f   :  { %v12748_v30 = vpop.f32.mrf.mxu0  ;;  %v17007_v29 = vpack.c.bf16 %v7311_v18, %v7310_v7  ;;  %v5605_v37 = vadd.f32 %v18574_v5, %v5406_v39  ;;  %v18576_v39 = vld [vmem:[#allocation35_spill] sm:$0xff] }
 0x730   :  { %v5740_v62 = vpop.f32.mrf.mxu1  ;;  %v17012_v30 = vpack.c.bf16 %v8137_v0, %v8136_v22  ;;  %v5606_v7 = vadd.f32 %v18576_v39, %v5409_v2  ;;  %v7595_v18 = vld [vmem:[#allocation4 + $0x102] sm:$0xff]  ;;  %v8138_v0 = vld [vmem:[#allocation4 + $0x172] sm:$0xff]  ;;  %v8139_v5 = vld [vmem:[#allocation4 + $0x17a] sm:$0xff] }
 0x731   :  { %v17003_v35 = vadd.f32 %v5740_v62, %v5604_v54  ;;  %v17005_v16 = vpop.f32.mrf.mxu0  ;;  %v7596_v62 = vld [vmem:[#allocation4 + $0x10a] sm:$0xff]  ;;  %v8146_v39 = vpack.c.bf16 %v8139_v5, %v8138_v0 }
 0x732   :  { %v12573_v17 = vpop.f32.mrf.mxu1  ;;  %v7609_v36 = vpack.c.bf16 %v7596_v62, %v7595_v18  ;;  %v18578_v2 = vld [vmem:[#allocation36_spill] sm:$0xff] }
 0x733   :  { %v12749_v8 = vpop.f32.mrf.mxu0 }
 0x734   :  { %v5745_v44 = vpop.f32.mrf.mxu1  ;;  %12803 = vmatmul.mubr.msk.bf16.gmra.mxu1 %vm1855_vm3, %v17007_v29  ;;  %v5414_v8 = vadd.f32 %v16844_v45, %v18575_v10  ;;  %v5417_v45 = vadd.f32 %v16858_v43, %v18577_v51  ;;  %v18579_v51 = vld [vmem:[#allocation24_spill] sm:$0xff]  ;;  %v18580_v43 = vld [vmem:[#allocation37_spill] sm:$0xff] }
 0x735   :  { %v17016_v20 = vadd.f32 %v5745_v44, %v5605_v37  ;;  %v17018_v54 = vpop.f32.mrf.mxu0  ;;  %12979 = vmatmul.mubr.msk.bf16.gmra.mxu0 %vm1855_vm3, %v17012_v30  ;;  %12850 = vmatprep.mubr.msk.bf16.mxu1 %vm13685_vm12, %v18515_v63 }
 0x736   :  { %v12576_v17 = vpop.f32.mrf.mxu1  ;;  %12982 = vmatprep.mubr.msk.bf16.mxu0 %vm13685_vm12, %v18515_v63 }
 0x737   :  { %v12752_v56 = vpop.f32.mrf.mxu0  ;;  %v13620_v17 = vld [vmem:[%s18488_s7 + $0x98] sm:$0xff]  }
 0x738   :  { %v5748_v22 = vpop.f32.mrf.mxu1  ;;  %v5607_v56 = vadd.f32 %v18578_v2, %v5414_v8  ;;  %v5608_v8 = vadd.f32 %v18580_v43, %v5417_v45  ;;  %v18581_v2 = vld [vmem:[#allocation25_spill] sm:$0xff]  ;;  %v18582_v45 = vld [vmem:[#allocation38_spill] sm:$0xff] }
 0x739   :  { %v17029_v37 = vadd.f32 %v5748_v22, %v5606_v7  ;;  %v17031_v44 = vpop.f32.mrf.mxu0 }
 0x73a   :  { %v12577_v11 = vpop.f32.mrf.mxu1 }
 0x73b   :  { %v12753_v10 = vpop.f32.mrf.mxu0  ;;  %v13623_v11 = vld [vmem:[%s18488_s7 + $0x90] sm:$0xff]  }
 0x73c   :  { %v5753_v58 = vpop.f32.mrf.mxu1  ;;  %12851 = vmatmul.mubr.msk.bf16.vlgmr.msra.gmra.mxu1 %vm1855_vm3, %v7609_v36  ;;  %v13624_v10 = vld [vmem:[%s18488_s7 + $0x88] sm:$0xff]  }
 0x73d   :  { %v17040_v7 = vadd.f32 %v5753_v58, %v5607_v56  ;;  %v17042_v22 = vpop.f32.mrf.mxu0  ;;  %12915 = vmatpush3.bf16.msra.mxu1 %v13620_v17  ;;  %12983 = vmatmul.mubr.msk.bf16.gmra.mxu0 %vm1855_vm3, %v8146_v39  ;;  %v5422_v58 = vadd.f32 %v16873_v28, %v18579_v51  ;;  %v5425_v28 = vadd.f32 %v16892_v26, %v18581_v2  ;;  %v13627_v2 = vld [vmem:[%s18488_s7 + $0x30] sm:$0xff]  }
 0x73e   :  { %v12580_v18 = vpop.f32.mrf.mxu1  ;;  %12854 = vmatprep.mubr.msk.bf16.mxu1 %vm13685_vm12, %v18515_v63  ;;  %13030 = vmatprep.mubr.msk.bf16.mxu0 %vm13685_vm12, %v18515_v63 }
 0x73f   :  { %v12756_v36 = vpop.f32.mrf.mxu0  ;;  %12916 = vmatprep.subr.bf16.mxu1 %v18515_v63  ;;  %v5609_v39 = vadd.f32 %v18582_v45, %v5422_v58  ;;  %v13626_v18 = vld [vmem:[%s18488_s7 + $0x38] sm:$0xff]   ;;  %v13625_v58 = vld [vmem:[%s18488_s7 + $0x80] sm:$0xff]  }
 0x740   :  { %v5756_v62 = vpop.f32.mrf.mxu1 }
 0x741   :  { %v17056_v0 = vadd.f32 %v5756_v62, %v5608_v8  ;;  %v17058_v5 = vpop.f32.mrf.mxu0  ;;  %12917 = vmatpush3.bf16.msra.mxu1 %v13623_v11  ;;  %v18584_v62 = vld [vmem:[#allocation39_spill] sm:$0xff] }
 0x742   :  { %v12581_v17 = vpop.f32.mrf.mxu1  ;;  %12918 = vmatprep.subr.bf16.mxu1 %v18515_v63 }
 0x743   :  { %v12757_v56 = vpop.f32.mrf.mxu0  ;;  %v5610_v17 = vadd.f32 %v18584_v62, %v5425_v28 }
 0x744   :  { %v5761_v51 = vpop.f32.mrf.mxu1  ;;  %12855 = vmatmul.mubr.msk.bf16.gmra.mxu1 %vm1855_vm3, %v16868_v27  ;;  %v18583_v27 = vld [vmem:[#allocation26_spill] sm:$0xff] }
 0x745   :  { %v17072_v11 = vadd.f32 %v5761_v51, %v5609_v39  ;;  %v17074_v36 = vpop.f32.mrf.mxu0  ;;  %13031 = vmatmul.mubr.msk.bf16.vlgmr.msra.gmra.mxu0 %vm1855_vm3, %v16897_v21  ;;  %12858 = vmatprep.mubr.msk.bf16.mxu1 %vm13685_vm12, %v18515_v63  ;;  %v5430_v43 = vadd.f32 %v16905_v42, %v18583_v27  ;;  %v18585_v42 = vld [vmem:[#allocation27_spill] sm:$0xff] }
 0x746   :  { %v12584_v26 = vpop.f32.mrf.mxu1  ;;  %13034 = vmatprep.mubr.msk.bf16.mxu0 %vm13685_vm12, %v18515_v63  ;;  %12919 = vmatpush3.bf16.msra.mxu1 %v13624_v10  ;;  %v5433_v51 = vadd.f32 %v16923_v19, %v18585_v42 }
 0x747   :  { %v12760_v8 = vpop.f32.mrf.mxu0  ;;  %12920 = vmatprep.subr.bf16.mxu1 %v18515_v63  ;;  %13095 = vmatpush3.bf16.msra.mxu0 %v13626_v18  ;;  %v5611_v26 = vadd.f32 %v16597_v47, %v5430_v43  ;;  %v13629_v18 = vld [vmem:[%s18488_s7 + $0x28] sm:$0xff]  }
 0x748   :  { %v5764_v56 = vpop.f32.mrf.mxu1  ;;  %13096 = vmatprep.subr.bf16.mxu0 %v18515_v63  ;;  %v5612_v43 = vadd.f32 %v16609_v25, %v5433_v51 }
 0x749   :  { %v17093_v10 = vadd.f32 %v5764_v56, %v5610_v17  ;;  %v17095_v45 = vpop.f32.mrf.mxu0 }
 0x74a   :  { %v12585_v39 = vpop.f32.mrf.mxu1  ;;  %12921 = vmatpush3.bf16.msra.mxu1 %v13625_v58 }
 0x74b   :  { %v12761_v28 = vpop.f32.mrf.mxu0  ;;  %13097 = vmatpush3.bf16.msra.mxu0 %v13627_v2  ;;  %12986 = vmatprep.subr.bf16.mxu1 %v18515_v63 }
 0x74c   :  { %v5769_v27 = vpop.f32.mrf.mxu1  ;;  %12859 = vmatmul.mubr.msk.bf16.gmra.mxu1 %vm1855_vm3, %v16899_v50  ;;  %13098 = vmatprep.subr.bf16.mxu0 %v18515_v63  ;;  %v13630_v50 = vld [vmem:[%s18488_s7 + $0x20] sm:$0xff]  }
 0x74d   :  { %v17107_v58 = vadd.f32 %v5769_v27, %v5611_v26  ;;  %v17109_v8 = vpop.f32.mrf.mxu0  ;;  %13035 = vmatmul.mubr.msk.bf16.gmra.mxu0 %vm1855_vm3, %v16928_v6  ;;  %12862 = vmatprep.mubr.msk.bf16.mxu1 %vm13685_vm12, %v18515_v63 }
 0x74e   :  { %18586 = vst [vmem:[#allocation16_spill] sm:$0xff] %v17109_v8  ;;  %v12588_v47 = vpop.f32.mrf.mxu1  ;;  %13038 = vmatprep.mubr.msk.bf16.mxu0 %vm13685_vm12, %v18515_v63 }
 0x74f   :  { %v12764_v19 = vpop.f32.mrf.mxu0  ;;  %13099 = vmatpush3.bf16.msra.mxu0 %v13629_v18 }
 0x750   :  { %v5772_v62 = vpop.f32.mrf.mxu1  ;;  %13100 = vmatprep.subr.bf16.mxu0 %v18515_v63 }
 0x751   :  { %v17122_v17 = vadd.f32 %v5772_v62, %v5612_v43  ;;  %v17124_v2 = vpop.f32.mrf.mxu0 }
 0x752   :  { %18588 = vst [vmem:[#allocation17_spill] sm:$0xff] %v17124_v2  ;;  %v12589_v56 = vpop.f32.mrf.mxu1 }
 0x753   :  { %18587 = vst [vmem:[#allocation29_spill] sm:$0xff] %v17122_v17  ;;  %v12765_v39 = vpop.f32.mrf.mxu0  ;;  %13101 = vmatpush3.bf16.msra.mxu0 %v13630_v50 }
 0x754   :  { %v17126_v42 = vpop.f32.mrf.mxu1  ;;  %12863 = vmatmul.mubr.msk.bf16.gmra.mxu1 %vm1855_vm3, %v16933_v59  ;;  %13166 = vmatprep.subr.bf16.mxu0 %v18515_v63 }
 0x755   :  { %v17131_v25 = vpop.f32.mrf.mxu0  ;;  %13039 = vmatmul.mubr.msk.bf16.gmra.mxu0 %vm1855_vm3, %v16955_v52  ;;  %12866 = vmatprep.mubr.msk.bf16.mxu1 %vm13685_vm12, %v18515_v63 }
 0x756   :  { %18589 = vst [vmem:[#allocation30_spill] sm:$0xff] %v17131_v25  ;;  %v12636_v51 = vpop.f32.mrf.mxu1  ;;  %13042 = vmatprep.mubr.msk.bf16.mxu0 %vm13685_vm12, %v18515_v63 }
 0x757   :  { %v12768_v28 = vpop.f32.mrf.mxu0 }
 0x758   :  { %v17139_v26 = vpop.f32.mrf.mxu1 }
 0x759   :  { %v17141_v18 = vpop.f32.mrf.mxu0 }
 0x75a   :  { %18590 = vst [vmem:[#allocation18_spill] sm:$0xff] %v17141_v18  ;;  %v12637_v59 = vpop.f32.mrf.mxu1 }
 0x75b   :  { %v12769_v27 = vpop.f32.mrf.mxu0 }
 0x75c   :  { %v17143_v47 = vpop.f32.mrf.mxu1  ;;  %12867 = vmatmul.mubr.msk.bf16.gmra.mxu1 %vm1855_vm3, %v16960_v13 }
 0x75d   :  { %v17147_v19 = vpop.f32.mrf.mxu0  ;;  %13043 = vmatmul.mubr.msk.bf16.gmra.mxu0 %vm1855_vm3, %v16981_v3  ;;  %12870 = vmatprep.mubr.msk.bf16.mxu1 %vm13685_vm12, %v18515_v63 }
 0x75e   :  { %18591 = vst [vmem:[#allocation31_spill] sm:$0xff] %v17147_v19  ;;  %v12640_v43 = vpop.f32.mrf.mxu1  ;;  %13046 = vmatprep.mubr.msk.bf16.mxu0 %vm13685_vm12, %v18515_v63 }
 0x75f   :  { %v12816_v50 = vpop.f32.mrf.mxu0 }
 0x760   :  { %v17155_v62 = vpop.f32.mrf.mxu1  ;;  %v8490_v50 = vld [vmem:[#allocation4 + $0x171] sm:$0xff] }
 0x761   :  { %v17157_v56 = vpop.f32.mrf.mxu0 }
 0x762   :  { %18592 = vst [vmem:[#allocation19_spill] sm:$0xff] %v17157_v56  ;;  %v12641_v39 = vpop.f32.mrf.mxu1 }
 0x763   :  { %v12817_v51 = vpop.f32.mrf.mxu0  ;;  %v8491_v39 = vld [vmem:[#allocation4 + $0x179] sm:$0xff] }
 0x764   :  { %v17159_v13 = vpop.f32.mrf.mxu1  ;;  %12871 = vmatmul.mubr.msk.bf16.gmra.mxu1 %vm1855_vm3, %v16986_v34 }
 0x765   :  { %v17163_v28 = vpop.f32.mrf.mxu0  ;;  %13047 = vmatmul.mubr.msk.bf16.gmra.mxu0 %vm1855_vm3, %v17007_v29  ;;  %12874 = vmatprep.mubr.msk.bf16.mxu1 %vm13685_vm12, %v18515_v63 }
 0x766   :  { %18593 = vst [vmem:[#allocation32_spill] sm:$0xff] %v17163_v28  ;;  %v12644_v59 = vpop.f32.mrf.mxu1  ;;  %13050 = vmatprep.mubr.msk.bf16.mxu0 %vm13685_vm12, %v18515_v63  ;;  %v17175_v28 = vpack.c.bf16 %v8491_v39, %v8490_v50  ;;  %v8492_v39 = vld [vmem:[#allocation4 + $0x181] sm:$0xff] }
 0x767   :  { %v12820_v27 = vpop.f32.mrf.mxu0 }
 0x768   :  { %v17171_v43 = vpop.f32.mrf.mxu1 }
 0x769   :  { %v17173_v51 = vpop.f32.mrf.mxu0 }
 0x76a   :  { %18594 = vst [vmem:[#allocation20_spill] sm:$0xff] %v17173_v51  ;;  %v12645_v34 = vpop.f32.mrf.mxu1 }
 0x76b   :  { %v12821_v56 = vpop.f32.mrf.mxu0  ;;  %v8493_v34 = vld [vmem:[#allocation4 + $0x189] sm:$0xff] }
 0x76c   :  { %v17177_v19 = vpop.f32.mrf.mxu1  ;;  %12875 = vmatmul.mubr.msk.bf16.gmra.mxu1 %vm1855_vm3, %v17012_v30  ;;  %v13628_v30 = vld [vmem:[%s18488_s7 + $0xd8] sm:$0xff]   ;;  %v8500_v25 = vpack.c.bf16 %v8493_v34, %v8492_v39 }
 0x76d   :  { %v17181_v59 = vpop.f32.mrf.mxu0  ;;  %13051 = vmatmul.mubr.msk.bf16.gmra.mxu0 %vm1855_vm3, %v17175_v28  ;;  %12922 = vmatprep.mubr.msk.bf16.mxu1 %vm13685_vm12, %v18515_v63 }
 0x76e   :  { %18595 = vst [vmem:[#allocation33_spill] sm:$0xff] %v17181_v59  ;;  %v12648_v27 = vpop.f32.mrf.mxu1  ;;  %13054 = vmatprep.mubr.msk.bf16.mxu0 %vm13685_vm12, %v18515_v63 }
 0x76f   :  { %v12824_v56 = vpop.f32.mrf.mxu0 }
 0x770   :  { %v17189_v50 = vpop.f32.mrf.mxu1  ;;  %v13631_v56 = vld [vmem:[%s18488_s7 + $0xd0] sm:$0xff]  }
 0x771   :  { %v17191_v51 = vpop.f32.mrf.mxu0 }
 0x772   :  { %18596 = vst [vmem:[#allocation21_spill] sm:$0xff] %v17191_v51  ;;  %v12649_v59 = vpop.f32.mrf.mxu1 }
 0x773   :  { %v12825_v18 = vpop.f32.mrf.mxu0 }
 0x774   :  { %v17196_v2 = vpop.f32.mrf.mxu1  ;;  %12923 = vmatmul.mubr.msk.bf16.vlgmr.msra.gmra.mxu1 %vm1855_vm3, %v16862_v4 }
 0x775   :  { %v17200_v27 = vpop.f32.mrf.mxu0  ;;  %12987 = vmatpush3.bf16.msra.mxu1 %v13628_v30  ;;  %13055 = vmatmul.mubr.msk.bf16.gmra.mxu0 %vm1855_vm3, %v8500_v25  ;;  %v13634_v30 = vld [vmem:[%s18488_s7 + $0x58] sm:$0xff]  }
 0x776   :  { %18597 = vst [vmem:[#allocation34_spill] sm:$0xff] %v17200_v27  ;;  %v12652_v51 = vpop.f32.mrf.mxu1  ;;  %12926 = vmatprep.mubr.msk.bf16.mxu1 %vm13685_vm12, %v18515_v63  ;;  %13102 = vmatprep.mubr.msk.bf16.mxu0 %vm13685_vm12, %v18515_v63 }
 0x777   :  { %v12828_v18 = vpop.f32.mrf.mxu0  ;;  %12988 = vmatprep.subr.bf16.mxu1 %v18515_v63  ;;  %v13632_v51 = vld [vmem:[%s18488_s7 + $0xc8] sm:$0xff]  }
 0x778   :  { %v17211_v4 = vpop.f32.mrf.mxu1 }
 0x779   :  { %v17213_v59 = vpop.f32.mrf.mxu0  ;;  %12989 = vmatpush3.bf16.msra.mxu1 %v13631_v56 }
 0x77a   :  { %18598 = vst [vmem:[#allocation22_spill] sm:$0xff] %v17213_v59  ;;  %v12653_v39 = vpop.f32.mrf.mxu1  ;;  %12990 = vmatprep.subr.bf16.mxu1 %v18515_v63 }
 0x77b   :  { %v12829_v34 = vpop.f32.mrf.mxu0  ;;  %v13633_v39 = vld [vmem:[%s18488_s7 + $0xc0] sm:$0xff]  }
 0x77c   :  { %v17222_v18 = vpop.f32.mrf.mxu1  ;;  %12927 = vmatmul.mubr.msk.bf16.gmra.mxu1 %vm1855_vm3, %v16897_v21  ;;  %v13635_v21 = vld [vmem:[%s18488_s7 + $0x50] sm:$0xff]  }
 0x77d   :  { %v17226_v27 = vpop.f32.mrf.mxu0  ;;  %13103 = vmatmul.mubr.msk.bf16.vlgmr.msra.gmra.mxu0 %vm1855_vm3, %v17175_v28  ;;  %12930 = vmatprep.mubr.msk.bf16.mxu1 %vm13685_vm12, %v18515_v63 }
 0x77e   :  { %18599 = vst [vmem:[#allocation35_spill] sm:$0xff] %v17226_v27  ;;  %v12656_v56 = vpop.f32.mrf.mxu1  ;;  %13106 = vmatprep.mubr.msk.bf16.mxu0 %vm13685_vm12, %v18515_v63  ;;  %12991 = vmatpush3.bf16.msra.mxu1 %v13632_v51 }
 0x77f   :  { %v12832_v34 = vpop.f32.mrf.mxu0  ;;  %12992 = vmatprep.subr.bf16.mxu1 %v18515_v63  ;;  %13167 = vmatpush3.bf16.msra.mxu0 %v13634_v30  ;;  %v13637_v30 = vld [vmem:[%s18488_s7 + $0x48] sm:$0xff]  }
 0x780   :  { %v17241_v27 = vpop.f32.mrf.mxu1  ;;  %13168 = vmatprep.subr.bf16.mxu0 %v18515_v63 }
 0x781   :  { %v17244_v56 = vpop.f32.mrf.mxu0 }
 0x782   :  { %18600 = vst [vmem:[#allocation23_spill] sm:$0xff] %v17244_v56  ;;  %v12657_v59 = vpop.f32.mrf.mxu1  ;;  %12993 = vmatpush3.bf16.msra.mxu1 %v13633_v39  ;;  %v5953_v56 = vadd.f32 %v16619_v57, %v16938_v41  ;;  %v8881_v41 = vld [vmem:[#allocation4 + $0x191] sm:$0xff] }
 0x783   :  { %v12833_v51 = vpop.f32.mrf.mxu0  ;;  %13169 = vmatpush3.bf16.msra.mxu0 %v13635_v21  ;;  %13058 = vmatprep.subr.bf16.mxu1 %v18515_v63 }
 0x784   :  { %v17250_v34 = vpop.f32.mrf.mxu1  ;;  %12931 = vmatmul.mubr.msk.bf16.gmra.mxu1 %vm1855_vm3, %v16928_v6  ;;  %13170 = vmatprep.subr.bf16.mxu0 %v18515_v63  ;;  %v6130_v21 = vadd.f32 %v17126_v42, %v5953_v56  ;;  %v13638_v6 = vld [vmem:[%s18488_s7 + $0x40] sm:$0xff]  }
 0x785   :  { %v17257_v59 = vpop.f32.mrf.mxu0  ;;  %13107 = vmatmul.mubr.msk.bf16.gmra.mxu0 %vm1855_vm3, %v8500_v25  ;;  %12934 = vmatprep.mubr.msk.bf16.mxu1 %vm13685_vm12, %v18515_v63  ;;  %v5954_v25 = vadd.f32 %v16631_v23, %v16951_v14  ;;  %v5955_v23 = vadd.f32 %v16641_v53, %v16964_v15 }
 0x786   :  { %18601 = vst [vmem:[#allocation36_spill] sm:$0xff] %v17257_v59  ;;  %v12660_v39 = vpop.f32.mrf.mxu1  ;;  %13110 = vmatprep.mubr.msk.bf16.mxu0 %vm13685_vm12, %v18515_v63  ;;  %v8882_v59 = vld [vmem:[#allocation4 + $0x199] sm:$0xff] }
 0x787   :  { %v12836_v51 = vpop.f32.mrf.mxu0  ;;  %13171 = vmatpush3.bf16.msra.mxu0 %v13637_v30  ;;  %v6131_v42 = vadd.f32 %v17139_v26, %v5954_v25  ;;  %v6307_v30 = vadd.f32 %v16799_v31, %v6130_v21  ;;  %v5956_v21 = vadd.f32 %v16653_v60, %v16977_v1  ;;  %v5957_v60 = vadd.f32 %v16663_v61, %v16990_v24  ;;  %v8885_v24 = vld [vmem:[#allocation4 + $0x1b1] sm:$0xff] }
 0x788   :  { %v17268_v57 = vpop.f32.mrf.mxu1  ;;  %13172 = vmatprep.subr.bf16.mxu0 %v18515_v63  ;;  %v17277_v51 = vpack.c.bf16 %v8882_v59, %v8881_v41  ;;  %v8884_v59 = vld [vmem:[#allocation4 + $0x1a9] sm:$0xff] }
 0x789   :  { %v17273_v39 = vpop.f32.mrf.mxu0  ;;  %v6308_v53 = vadd.f32 %v16809_v48, %v6131_v42 }
 0x78a   :  { %18602 = vst [vmem:[#allocation24_spill] sm:$0xff] %v17273_v39  ;;  %v12661_v17 = vpop.f32.mrf.mxu1 }
 0x78b   :  { %v12837_v56 = vpop.f32.mrf.mxu0  ;;  %13173 = vmatpush3.bf16.msra.mxu0 %v13638_v6 }
 0x78c   :  { %v6429_v8 = vpop.f32.mrf.mxu1  ;;  %12935 = vmatmul.mubr.msk.bf16.gmra.mxu1 %vm1855_vm3, %v16955_v52  ;;  %13238 = vmatprep.subr.bf16.mxu0 %v18515_v63  ;;  %v6132_v52 = vadd.f32 %v17143_v47, %v5955_v23 }
 0x78d   :  { %v6484_v14 = vadd.f32 %v6429_v8, %v6307_v30  ;;  %v17284_v39 = vpop.f32.mrf.mxu0  ;;  %13111 = vmatmul.mubr.msk.bf16.gmra.mxu0 %vm1855_vm3, %v17277_v51  ;;  %12938 = vmatprep.mubr.msk.bf16.mxu1 %vm13685_vm12, %v18515_v63  ;;  %v8883_v8 = vld [vmem:[#allocation4 + $0x1a1] sm:$0xff]  ;;  %v6133_v30 = vadd.f32 %v17155_v62, %v5956_v21 }
 0x78e   :  { %v12708_v31 = vpop.f32.mrf.mxu1  ;;  %13114 = vmatprep.mubr.msk.bf16.mxu0 %vm13685_vm12, %v18515_v63  ;;  %v6309_v48 = vadd.f32 %v16814_v33, %v6132_v52  ;;  %v17303_v42 = vpack.c.bf16 %v8884_v59, %v8883_v8  ;;  %v5958_v52 = vadd.f32 %v16675_v46, %v17003_v35  ;;  %v5959_v46 = vadd.f32 %v16689_v12, %v17016_v20 }
 0x78f   :  { %v6661_v17 = vadd.f32 %v16966_v49, %v6484_v14  ;;  %v12840_v26 = vpop.f32.mrf.mxu0  ;;  %v6310_v61 = vadd.f32 %v16824_v38, %v6133_v30  ;;  %v8886_v14 = vld [vmem:[#allocation4 + $0x1b9] sm:$0xff]  ;;  %v17336_v30 = vld [vmem:[%s18493_s8] ss:$0 sm:$0xff] }
 0x790   :  { %v6432_v15 = vpop.f32.mrf.mxu1  ;;  %v17324_v59 = vpack.c.bf16 %v8886_v14, %v8885_v24 }
 0x791   :  { %v6717_v6 = vmax.f32 %v16759_v9, %v6661_v17  ;;  %v6485_v41 = vadd.f32 %v6432_v15, %v6308_v53  ;;  %v17298_v25 = vpop.f32.mrf.mxu0 }
 0x792   :  { %v12709_v56 = vpop.f32.mrf.mxu1 }
 0x793   :  { %6719 = vst [vmem:[#allocation6 + $0x2a] sm:$0xff] %v6717_v6  ;;  %v6662_v49 = vadd.f32 %v16979_v32, %v6485_v41  ;;  %v12841_v47 = vpop.f32.mrf.mxu0  ;;  %v6134_v32 = vadd.f32 %v17159_v13, %v5957_v60  ;;  %v6135_v13 = vadd.f32 %v17171_v43, %v5958_v52  ;;  %v6714_v41 = vld [vmem:[#allocation5 + $0x150] sm:$0x3f] }
 0x794   :  { %v6437_v23 = vpop.f32.mrf.mxu1  ;;  %12939 = vmatmul.mubr.msk.bf16.gmra.mxu1 %vm1855_vm3, %v16981_v3 }
 0x795   :  { %6676 = vst [vmem:[#allocation5 + $0x60] sm:$0xff] %v6662_v49  ;;  %v6486_v9 = vadd.f32 %v6437_v23, %v6309_v48  ;;  %v17309_v1 = vpop.f32.mrf.mxu0  ;;  %13115 = vmatmul.mubr.msk.bf16.gmra.mxu0 %vm1855_vm3, %v17303_v42  ;;  %12942 = vmatprep.mubr.msk.bf16.mxu1 %vm13685_vm12, %v18515_v63  ;;  %v6311_v6 = vadd.f32 %v16829_v40, %v6134_v32  ;;  %v18603_v23 = vld [vmem:[#allocation40_spill] sm:$0xff] }
 0x796   :  { %v12712_v33 = vpop.f32.mrf.mxu1  ;;  %13118 = vmatprep.mubr.msk.bf16.mxu0 %vm13685_vm12, %v18515_v63  ;;  %v6312_v60 = vadd.f32 %v18603_v23, %v6135_v13  ;;  %v8888_v32 = vld [vmem:[#allocation4 + $0x1c9] sm:$0xff] }
 0x797   :  { %v6663_v3 = vadd.f32 %v16992_v55, %v6486_v9  ;;  %v12888_v62 = vpop.f32.mrf.mxu0  ;;  %v8887_v33 = vld [vmem:[#allocation4 + $0x1c1] sm:$0xff] }
 0x798   :  { %v6440_v31 = vpop.f32.mrf.mxu1  ;;  %v18604_v62 = vld [vmem:[#allocation10_spill] sm:$0xff] }
 0x799   :  { %v6487_v17 = vadd.f32 %v6440_v31, %v6310_v61  ;;  %v17322_v26 = vpop.f32.mrf.mxu0  ;;  %v5960_v61 = vadd.f32 %v18604_v62, %v17029_v37 }
 0x79a   :  { %v6749_v53 = vld [vmem:[#allocation6 + $0x20] ss:$2 sm:$0xff]  ;;  %v6763_v15 = vld [vmem:[#allocation6 + $0x21] ss:$2 sm:$0xff]  ;;  %v12713_v8 = vpop.f32.mrf.mxu1 }
 0x79b   :  { %v6774_v55 = vmax.f32 %v6749_v53, %v6763_v15  ;;  %v6664_v21 = vadd.f32 %v17005_v16, %v6487_v17  ;;  %v12889_v38 = vpop.f32.mrf.mxu0  ;;  %v18605_v53 = vld [vmem:[#allocation41_spill] sm:$0xff]  ;;  %v17360_v8 = vpack.c.bf16 %v8888_v32, %v8887_v33 }
 0x79c   :  { %v6716_v35 = vld [vmem:[#allocation5 + $0x60] sm:$0x3f]  ;;  %v6445_v56 = vpop.f32.mrf.mxu1  ;;  %12943 = vmatmul.mubr.msk.bf16.gmra.mxu1 %vm1855_vm3, %v17007_v29  ;;  %v6136_v29 = vadd.f32 %v17177_v19, %v5959_v46  ;;  %v8304_v46 = vld [vmem:[#allocation4 + $0x128] sm:$0xff] }
 0x79d   :  { %v6787_v43 = vadd.f32 %v17336_v30, %v6774_v55  ;;  %v6718_v16 = vmax.f32 %v6714_v41, %v6716_v35  ;;  %6678 = vst [vmem:[#allocation5 + $0x188] sm:$0xff] %v6664_v21  ;;  %v6488_v49 = vadd.f32 %v6445_v56, %v6311_v6  ;;  %v17339_v40 = vpop.f32.mrf.mxu0  ;;  %13119 = vmatmul.mubr.msk.bf16.gmra.mxu0 %vm1855_vm3, %v17324_v59  ;;  %v18607_v6 = vld [vmem:[#allocation42_spill] sm:$0xff] }
 0x79e   :  { %12946 = vmatprep.mubr.msk.bf16.mxu1 %vm13685_vm12, %v18515_v63  ;;  %v12716_v12 = vpop.f32.mrf.mxu1  ;;  %13122 = vmatprep.mubr.msk.bf16.mxu0 %vm13685_vm12, %v18515_v63  ;;  %v6313_v15 = vadd.f32 %v18605_v53, %v6136_v29  ;;  %v17377_v35 = vld [vmem:[#allocation4 + $0x1d1] sm:$0xff]  ;;  %v8890_v56 = vld [vmem:[#allocation4 + $0x1d9] sm:$0x3f] }
 0x79f   :  { %v6794_v20 = vmax.f32 %v6787_v43, 0.0  ;;  %6720 = vst [vmem:[#allocation6 + $0x32] sm:$0x3f] %v6718_v16  ;;  %v6665_v47 = vadd.f32 %v17018_v54, %v6488_v49  ;;  %v12892_v48 = vpop.f32.mrf.mxu0  ;;  %v6137_v54 = vadd.f32 %v17189_v50, %v5960_v61  ;;  %v8303_v50 = vld [vmem:[#allocation4 + $0x120] sm:$0xff]  ;;  %v8897_v23 = vpack.c.bf16 %v8890_v56, %v17377_v35  ;;  %v18610_v61 = vld [vmem:[#allocation8_spill] sm:$0xff] }
 0x7a0   :  { %v6448_v9 = vpop.f32.mrf.mxu1  ;;  %v18608_v16 = vld [vmem:[#allocation11_spill] sm:$0xff]  ;;  %v8317_v48 = vpack.c.bf16 %v8304_v46, %v8303_v50  ;;  %v8305_v50 = vld [vmem:[#allocation4 + $0x130] sm:$0xff]  ;;  %v18612_v46 = vld [vmem:[#allocation12_spill] sm:$0xff] }
 0x7a1   :  { %6801 = vst [vmem:[%s18494_s9 + $0x10] sm:$0xff] %v6794_v20  ;;  %v6725_v24 = vmax.f32 %v6663_v3, %v6665_v47  ;;  %v6489_v14 = vadd.f32 %v6448_v9, %v6312_v60  ;;  %v17355_v19 = vpop.f32.mrf.mxu0  ;;  %v18606_v3 = vld [vmem:[#allocation7_spill] sm:$0xff]  ;;  %v6314_v41 = vadd.f32 %v18607_v6, %v6137_v54  ;;  %v5962_v49 = vadd.f32 %v18608_v16, %v17056_v0  ;;  %v9174_v6 = vld [vmem:[#allocation4 + $0x172] sm:$0xff] }
 0x7a2   :  { %v12717_v31 = vpop.f32.mrf.mxu1  ;;  %v5961_v13 = vadd.f32 %v18606_v3, %v17040_v7  ;;  %v18609_v0 = vld [vmem:[#allocation43_spill] sm:$0xff]  ;;  %v5964_v56 = vadd.f32 %v18612_v46, %v17093_v10 }
 0x7a3   :  { %6727 = vst [vmem:[#allocation6 + $0x38] sm:$0xff] %v6725_v24  ;;  %v6666_v52 = vadd.f32 %v17031_v44, %v6489_v14  ;;  %v12893_v17 = vpop.f32.mrf.mxu0  ;;  %v6139_v60 = vadd.f32 %v17211_v4, %v5962_v49  ;;  %v5963_v24 = vadd.f32 %v18610_v61, %v17072_v11  ;;  %v18615_v61 = vld [vmem:[#allocation16_spill] sm:$0xff] }
 0x7a4   :  { %v6453_v37 = vpop.f32.mrf.mxu1  ;;  %12947 = vmatmul.mubr.msk.bf16.gmra.mxu1 %vm1855_vm3, %v17175_v28  ;;  %v6138_v28 = vadd.f32 %v17196_v2, %v5961_v13  ;;  %v13636_v2 = vld [vmem:[%s18488_s7 + $0x118] sm:$0xff]  }
 0x7a5   :  { %6680 = vst [vmem:[#allocation5 + $0x140] sm:$0xff] %v6666_v52  ;;  %v6490_v55 = vadd.f32 %v6453_v37, %v6313_v15  ;;  %v17366_v21 = vpop.f32.mrf.mxu0  ;;  %13123 = vmatmul.mubr.msk.bf16.gmra.mxu0 %vm1855_vm3, %v17360_v8  ;;  %12994 = vmatprep.mubr.msk.bf16.mxu1 %vm13685_vm12, %v18515_v63  ;;  %v6722_v14 = vld [vmem:[#allocation5 + $0x188] sm:$0x3f]  ;;  %v6140_v15 = vadd.f32 %v17222_v18, %v5963_v24 }
 0x7a6   :  { %v12720_v44 = vpop.f32.mrf.mxu1  ;;  %13126 = vmatprep.mubr.msk.bf16.mxu0 %vm13685_vm12, %v18515_v63  ;;  %v6315_v62 = vadd.f32 %v18609_v0, %v6138_v28  ;;  %v8306_v28 = vld [vmem:[#allocation4 + $0x138] sm:$0xff]  ;;  %v8308_v0 = vld [vmem:[#allocation4 + $0x148] sm:$0xff] }
 0x7a7   :  { %v6667_v38 = vadd.f32 %v17042_v22, %v6490_v55  ;;  %v12896_v7 = vpop.f32.mrf.mxu0  ;;  %v18611_v55 = vld [vmem:[#allocation44_spill] sm:$0xff]  ;;  %v8318_v49 = vpack.c.bf16 %v8306_v28, %v8305_v50  ;;  %v18619_v28 = vld [vmem:[#allocation17_spill] sm:$0xff] }
 0x7a8   :  { %v6456_v43 = vpop.f32.mrf.mxu1  ;;  %v6316_v44 = vadd.f32 %v18611_v55, %v6139_v60  ;;  %v18614_v60 = vld [vmem:[#allocation9_spill] sm:$0xff] }
 0x7a9   :  { %v6491_v12 = vadd.f32 %v6456_v43, %v6314_v41  ;;  %v17381_v29 = vpop.f32.mrf.mxu0  ;;  %v9175_v41 = vld [vmem:[#allocation4 + $0x17a] sm:$0xff] }
 0x7aa   :  { %v6751_v20 = vld [vmem:[#allocation6 + $0x30] ss:$2 sm:$0xff]  ;;  %v6765_v22 = vld [vmem:[#allocation6 + $0x31] ss:$2 sm:$0xff]  ;;  %v12721_v47 = vpop.f32.mrf.mxu1 }
 0x7ab   :  { %v6775_v9 = vmax.f32 %v6751_v20, %v6765_v22  ;;  %v6668_v33 = vadd.f32 %v17058_v5, %v6491_v12  ;;  %v12897_v32 = vpop.f32.mrf.mxu0  ;;  %v13639_v5 = vld [vmem:[%s18488_s7 + $0x110] sm:$0xff]   ;;  %v13640_v12 = vld [vmem:[%s18488_s7 + $0x108] sm:$0xff]   ;;  %v18613_v22 = vld [vmem:[#allocation45_spill] sm:$0xff]  ;;  %v17422_v47 = vpack.c.bf16 %v9175_v41, %v9174_v6 }
 0x7ac   :  { %v6724_v31 = vld [vmem:[#allocation5 + $0x140] sm:$0x3f]  ;;  %v6461_v54 = vpop.f32.mrf.mxu1  ;;  %12995 = vmatmul.mubr.msk.bf16.vlgmr.msra.gmra.mxu1 %vm1855_vm3, %v8317_v48  ;;  %v13642_v48 = vld [vmem:[%s18488_s7 + $0x98] sm:$0xff]  }
 0x7ad   :  { %v6788_v52 = vadd.f32 %v17336_v30, %v6775_v9  ;;  %v6726_v17 = vmax.f32 %v6722_v14, %v6724_v31  ;;  %6682 = vst [vmem:[#allocation5 + $0x1a8] sm:$0xff] %v6668_v33  ;;  %v6492_v53 = vadd.f32 %v6461_v54, %v6315_v62  ;;  %v17394_v4 = vpop.f32.mrf.mxu0  ;;  %13059 = vmatpush3.bf16.msra.mxu1 %v13636_v2  ;;  %v8307_v32 = vld [vmem:[#allocation4 + $0x140] sm:$0xff]  ;;  %v18616_v31 = vld [vmem:[#allocation14_spill] sm:$0xff] }
 0x7ae   :  { %13127 = vmatmul.mubr.msk.bf16.gmra.mxu0 %vm1855_vm3, %v8897_v23  ;;  %v12724_v11 = vpop.f32.mrf.mxu1  ;;  %12998 = vmatprep.mubr.msk.bf16.mxu1 %vm13685_vm12, %v18515_v63  ;;  %v6141_v2 = vadd.f32 %v17241_v27, %v5964_v56  ;;  %v5965_v9 = vadd.f32 %v18614_v60, %v17107_v58  ;;  %v13641_v58 = vld [vmem:[%s18488_s7 + $0x100] sm:$0xff]   ;;  %v8319_v55 = vpack.c.bf16 %v8308_v0, %v8307_v32  ;;  %v18620_v41 = vld [vmem:[#allocation15_spill] sm:$0xff]  ;;  %v13645_v56 = vld [vmem:[%s18488_s7 + $0x88] sm:$0xff]  }
 0x7af   :  { %13174 = vmatprep.mubr.msk.bf16.mxu0 %vm13685_vm12, %v18515_v63  ;;  %v6795_v37 = vmax.f32 %v6788_v52, 0.0  ;;  %6728 = vst [vmem:[#allocation6 + $0x40] sm:$0x3f] %v6726_v17  ;;  %v6669_v3 = vadd.f32 %v17074_v36, %v6492_v53  ;;  %v12900_v13 = vpop.f32.mrf.mxu0  ;;  %13060 = vmatprep.subr.bf16.mxu1 %v18515_v63  ;;  %v9176_v52 = vld [vmem:[#allocation4 + $0x182] sm:$0xff]  ;;  %v9177_v17 = vld [vmem:[#allocation4 + $0x18a] sm:$0xff]  ;;  %v8310_v60 = vld [vmem:[#allocation4 + $0x158] sm:$0xff] }
 0x7b0   :  { %v6464_v7 = vpop.f32.mrf.mxu1  ;;  %v6142_v62 = vadd.f32 %v17250_v34, %v5965_v9  ;;  %v6318_v54 = vadd.f32 %v18616_v31, %v6141_v2  ;;  %v13643_v53 = vld [vmem:[%s18488_s7 + $0x90] sm:$0xff]   ;;  %v18617_v11 = vld [vmem:[#allocation29_spill] sm:$0xff]  ;;  %v18623_v31 = vld [vmem:[#allocation18_spill] sm:$0xff] }
 0x7b1   :  { %6802 = vst [vmem:[%s18494_s9 + $0x18] sm:$0xff] %v6795_v37  ;;  %v6733_v18 = vmax.f32 %v6667_v38, %v6669_v3  ;;  %v6493_v43 = vadd.f32 %v6464_v7, %v6316_v44  ;;  %v17413_v36 = vpop.f32.mrf.mxu0  ;;  %13061 = vmatpush3.bf16.msra.mxu1 %v13639_v5  ;;  %v6317_v38 = vadd.f32 %v18613_v22, %v6140_v15  ;;  %v18618_v15 = vld [vmem:[#allocation13_spill] sm:$0xff]  ;;  %v9179_v32 = vld [vmem:[#allocation4 + $0x19a] sm:$0xff] }
 0x7b2   :  { %v12725_v16 = vpop.f32.mrf.mxu1  ;;  %13062 = vmatprep.subr.bf16.mxu1 %v18515_v63  ;;  %v5966_v34 = vadd.f32 %v18618_v15, %v18617_v11  ;;  %v17453_v44 = vpack.c.bf16 %v9177_v17, %v9176_v52  ;;  %v6319_v46 = vadd.f32 %v18620_v41, %v6142_v62  ;;  %v13646_v9 = vld [vmem:[%s18488_s7 + $0x80] sm:$0xff]  }
 0x7b3   :  { %6735 = vst [vmem:[#allocation6 + $0x46] sm:$0xff] %v6733_v18  ;;  %v6670_v10 = vadd.f32 %v17095_v45, %v6493_v43  ;;  %v12901_v20 = vpop.f32.mrf.mxu0 }
 0x7b4   :  { %v6469_v23 = vpop.f32.mrf.mxu1  ;;  %12999 = vmatmul.mubr.msk.bf16.gmra.mxu1 %vm1855_vm3, %v8318_v49  ;;  %v6143_v50 = vadd.f32 %v17268_v57, %v5966_v34  ;;  %v6730_v18 = vld [vmem:[#allocation5 + $0x1a8] sm:$0x3f] }
 0x7b5   :  { %6684 = vst [vmem:[#allocation5 + $0x28] sm:$0xff] %v6670_v10  ;;  %v6494_v27 = vadd.f32 %v6469_v23, %v6317_v38  ;;  %v17430_v33 = vpop.f32.mrf.mxu0  ;;  %13002 = vmatprep.mubr.msk.bf16.mxu1 %vm13685_vm12, %v18515_v63  ;;  %13063 = vmatpush3.bf16.msra.mxu1 %v13640_v12  ;;  %v18621_v10 = vld [vmem:[#allocation30_spill] sm:$0xff]  ;;  %v18622_v38 = vld [vmem:[#allocation28_spill] sm:$0xff]  ;;  %v8309_v23 = vld [vmem:[#allocation4 + $0x150] sm:$0xff] }
 0x7b6   :  { %13175 = vmatmul.mubr.msk.bf16.vlgmr.msra.gmra.mxu0 %vm1855_vm3, %v17422_v47  ;;  %v12728_v45 = vpop.f32.mrf.mxu1  ;;  %13064 = vmatprep.subr.bf16.mxu1 %v18515_v63 }
 0x7b7   :  { %13178 = vmatprep.mubr.msk.bf16.mxu0 %vm13685_vm12, %v18515_v63  ;;  %v6671_v24 = vadd.f32 %v18615_v61, %v6494_v27  ;;  %v12904_v14 = vpop.f32.mrf.mxu0  ;;  %13239 = vmatpush3.bf16.msra.mxu0 %v13642_v48  ;;  %v6320_v48 = vadd.f32 %v18622_v38, %v6143_v50  ;;  %v9178_v45 = vld [vmem:[#allocation4 + $0x192] sm:$0xff] }
 0x7b8   :  { %v6472_v5 = vpop.f32.mrf.mxu1  ;;  %13240 = vmatprep.subr.bf16.mxu0 %v18515_v63  ;;  %v8320_v14 = vpack.c.bf16 %v8310_v60, %v8309_v23  ;;  %v9190_v17 = vpack.c.bf16 %v9179_v32, %v9178_v45  ;;  %v8314_v23 = vld [vmem:[#allocation4 + $0x178] sm:$0xff] }
 0x7b9   :  { %v6495_v37 = vadd.f32 %v6472_v5, %v6318_v54  ;;  %v17451_v3 = vpop.f32.mrf.mxu0  ;;  %13065 = vmatpush3.bf16.msra.mxu1 %v13641_v58 }
 0x7ba   :  { %v12729_v13 = vpop.f32.mrf.mxu1  ;;  %13130 = vmatprep.subr.bf16.mxu1 %v18515_v63 }
 0x7bb   :  { %v6672_v7 = vadd.f32 %v18619_v28, %v6495_v37  ;;  %v12905_v6 = vpop.f32.mrf.mxu0  ;;  %13241 = vmatpush3.bf16.msra.mxu0 %v13643_v53  ;;  %v8311_v13 = vld [vmem:[#allocation4 + $0x160] sm:$0xff] }
 0x7bc   :  { %v6732_v43 = vld [vmem:[#allocation5 + $0x28] sm:$0x3f]  ;;  %v6477_v16 = vpop.f32.mrf.mxu1  ;;  %13003 = vmatmul.mubr.msk.bf16.gmra.mxu1 %vm1855_vm3, %v8319_v55  ;;  %13242 = vmatprep.subr.bf16.mxu0 %v18515_v63 }
 0x7bd   :  { %v6734_v57 = vmax.f32 %v6730_v18, %v6732_v43  ;;  %6686 = vst [vmem:[#allocation5 + $0xf8] sm:$0xff] %v6672_v7  ;;  %v6496_v49 = vadd.f32 %v6477_v16, %v6319_v46  ;;  %v17464_v12 = vpop.f32.mrf.mxu0  ;;  %13006 = vmatprep.mubr.msk.bf16.mxu1 %vm13685_vm12, %v18515_v63  ;;  %v8312_v55 = vld [vmem:[#allocation4 + $0x168] sm:$0xff] }
 0x7be   :  { %13179 = vmatmul.mubr.msk.bf16.gmra.mxu0 %vm1855_vm3, %v17453_v44  ;;  %v12732_v2 = vpop.f32.mrf.mxu1  ;;  %v9180_v28 = vld [vmem:[#allocation4 + $0x1a2] sm:$0xff]  ;;  %v9181_v7 = vld [vmem:[#allocation4 + $0x1aa] sm:$0xff] }
 0x7bf   :  { %13182 = vmatprep.mubr.msk.bf16.mxu0 %vm13685_vm12, %v18515_v63  ;;  %6736 = vst [vmem:[#allocation6 + $0x4e] sm:$0x3f] %v6734_v57  ;;  %v6673_v20 = vadd.f32 %v18621_v10, %v6496_v49  ;;  %v12908_v22 = vpop.f32.mrf.mxu0  ;;  %13243 = vmatpush3.bf16.msra.mxu0 %v13645_v56  ;;  %v8321_v56 = vpack.c.bf16 %v8312_v55, %v8311_v13 }
 0x7c0   :  { %v6480_v27 = vpop.f32.mrf.mxu1  ;;  %13244 = vmatprep.subr.bf16.mxu0 %v18515_v63  ;;  %v9191_v16 = vpack.c.bf16 %v9181_v7, %v9180_v28  ;;  %v9184_v7 = vld [vmem:[#allocation4 + $0x1c2] sm:$0xff] }
 0x7c1   :  { %v6741_v0 = vmax.f32 %v6671_v24, %v6673_v20  ;;  %v6497_v58 = vadd.f32 %v6480_v27, %v6320_v48  ;;  %v17478_v62 = vpop.f32.mrf.mxu0  ;;  %v8313_v48 = vld [vmem:[#allocation4 + $0x170] sm:$0xff]  ;;  %v9183_v27 = vld [vmem:[#allocation4 + $0x1ba] sm:$0xff] }
 0x7c2   :  { %v12733_v61 = vpop.f32.mrf.mxu1 }
 0x7c3   :  { %6743 = vst [vmem:[#allocation6 + $0x54] sm:$0xff] %v6741_v0  ;;  %v6674_v54 = vadd.f32 %v18623_v31, %v6497_v58  ;;  %v12909_v52 = vpop.f32.mrf.mxu0  ;;  %13245 = vmatpush3.bf16.msra.mxu0 %v13646_v9  ;;  %v9182_v9 = vld [vmem:[#allocation4 + $0x1b2] sm:$0xff]  ;;  %v17514_v0 = vpack.c.bf16 %v8314_v23, %v8313_v48 }
 0x7c4   :  { %v17481_v53 = vpop.f32.mrf.mxu1  ;;  %13007 = vmatmul.mubr.msk.bf16.gmra.mxu1 %vm1855_vm3, %v8320_v14  ;;  %13310 = vmatprep.subr.bf16.mxu0 %v18515_v63  ;;  %v6738_v57 = vld [vmem:[#allocation5 + $0xf8] sm:$0x3f]  ;;  %v9192_v61 = vpack.c.bf16 %v9183_v27, %v9182_v9  ;;  %v8657_v9 = vld [vmem:[#allocation4 + $0x122] sm:$0xff]  ;;  %v8658_v27 = vld [vmem:[#allocation4 + $0x12a] sm:$0xff] }
 0x7c5   :  { %6688 = vst [vmem:[#allocation5 + $0xb8] sm:$0x3f] %v6674_v54  ;;  %v17485_v5 = vpop.f32.mrf.mxu0  ;;  %13010 = vmatprep.mubr.msk.bf16.mxu1 %vm13685_vm12, %v18515_v63 }
 0x7c6   :  { %13183 = vmatmul.mubr.msk.bf16.gmra.mxu0 %vm1855_vm3, %v9190_v17  ;;  %v6753_v24 = vld [vmem:[#allocation6 + $0x40] ss:$2 sm:$0xff]  ;;  %v6767_v11 = vld [vmem:[#allocation6 + $0x41] ss:$2 sm:$0xff]  ;;  %v12780_v15 = vpop.f32.mrf.mxu1 }
 0x7c7   :  { %13186 = vmatprep.mubr.msk.bf16.mxu0 %vm13685_vm12, %v18515_v63  ;;  %v6776_v34 = vmax.f32 %v6753_v24, %v6767_v11  ;;  %v12912_v37 = vpop.f32.mrf.mxu0  ;;  %v8315_v24 = vld [vmem:[#allocation4 + $0x180] sm:$0xff] }
 0x7c8   :  { %v17492_v50 = vpop.f32.mrf.mxu1  ;;  %v8316_v37 = vld [vmem:[#allocation4 + $0x188] sm:$0xff] }
 0x7c9   :  { %v6789_v6 = vadd.f32 %v17336_v30, %v6776_v34  ;;  %v17495_v41 = vpop.f32.mrf.mxu0 }
 0x7ca   :  { %v12781_v46 = vpop.f32.mrf.mxu1 }
 0x7cb   :  { %v6796_v18 = vmax.f32 %v6789_v6, 0.0  ;;  %v12913_v43 = vpop.f32.mrf.mxu0  ;;  %v9185_v6 = vld [vmem:[#allocation4 + $0x1ca] sm:$0xff] }
 0x7cc   :  { %v6740_v49 = vld [vmem:[#allocation5 + $0xb8] sm:$0x3f]  ;;  %v17497_v2 = vpop.f32.mrf.mxu1  ;;  %13011 = vmatmul.mubr.msk.bf16.gmra.mxu1 %vm1855_vm3, %v8321_v56 }
 0x7cd   :  { %6803 = vst [vmem:[%s18494_s9 + $0x20] sm:$0xff] %v6796_v18  ;;  %v6742_v10 = vmax.f32 %v6738_v57, %v6740_v49  ;;  %v17503_v20 = vpop.f32.mrf.mxu0  ;;  %13014 = vmatprep.mubr.msk.bf16.mxu1 %vm13685_vm12, %v18515_v63  ;;  %v9193_v49 = vpack.c.bf16 %v9185_v6, %v9184_v7  ;;  %v8659_v6 = vld [vmem:[#allocation4 + $0x132] sm:$0xff] }
 0x7ce   :  { %13187 = vmatmul.mubr.msk.bf16.gmra.mxu0 %vm1855_vm3, %v9191_v16  ;;  %v12784_v22 = vpop.f32.mrf.mxu1  ;;  %v17533_v16 = vpack.c.bf16 %v8316_v37, %v8315_v24  ;;  %v8671_v24 = vpack.c.bf16 %v8658_v27, %v8657_v9  ;;  %v13650_v27 = vld [vmem:[%s18488_s7 + $0xd8] sm:$0xff]  }
 0x7cf   :  { %13190 = vmatprep.mubr.msk.bf16.mxu0 %vm13685_vm12, %v18515_v63  ;;  %6744 = vst [vmem:[#allocation6 + $0x5c] sm:$0x3f] %v6742_v10  ;;  %v12960_v38 = vpop.f32.mrf.mxu0 }
 0x7d0   :  { %v17510_v60 = vpop.f32.mrf.mxu1 }
 0x7d1   :  { %v17512_v45 = vpop.f32.mrf.mxu0 }
 0x7d2   :  { %v12785_v32 = vpop.f32.mrf.mxu1 }
 0x7d3   :  { %v12961_v58 = vpop.f32.mrf.mxu0 }
 0x7d4   :  { %v17516_v14 = vpop.f32.mrf.mxu1  ;;  %13015 = vmatmul.mubr.msk.bf16.gmra.mxu1 %vm1855_vm3, %v17514_v0  ;;  %v9186_v58 = vld [vmem:[#allocation4 + $0x1d2] sm:$0xff] }
 0x7d5   :  { %v17520_v31 = vpop.f32.mrf.mxu0  ;;  %13018 = vmatprep.mubr.msk.bf16.mxu1 %vm13685_vm12, %v18515_v63 }
 0x7d6   :  { %13191 = vmatmul.mubr.msk.bf16.gmra.mxu0 %vm1855_vm3, %v9192_v61  ;;  %v6755_v54 = vld [vmem:[#allocation6 + $0x50] ss:$2 sm:$0xff]  ;;  %v6757_v52 = vld [vmem:[#allocation6 + $0x60] ss:$2 sm:$0x1]  ;;  %v12788_v17 = vpop.f32.mrf.mxu1 }
 0x7d7   :  { %13194 = vmatprep.mubr.msk.bf16.mxu0 %vm13685_vm12, %v18515_v63  ;;  %v6769_v11 = vld [vmem:[#allocation6 + $0x51] ss:$2 sm:$0xff]  ;;  %v6771_v15 = vld [vmem:[#allocation6 + $0x61] ss:$2 sm:$0x1]  ;;  %v12964_v34 = vpop.f32.mrf.mxu0 }
 0x7d8   :  { %v6777_v13 = vmax.f32 %v6755_v54, %v6769_v11  ;;  %v6778_v55 = vmax.f32 %v6757_v52, %v6771_v15  ;;  %v17527_v28 = vpop.f32.mrf.mxu1  ;;  %v9187_v61 = vld [vmem:[#allocation4 + $0x1da] sm:$0x3f]  ;;  %v13644_v52 = vld [vmem:[%s18488_s7 + $0x18] sm:$0xff]  }
 0x7d9   :  { %v17529_v46 = vpop.f32.mrf.mxu0  ;;  %v9194_v15 = vpack.c.bf16 %v9187_v61, %v9186_v58 }
 0x7da   :  { %v6790_v56 = vadd.f32 %v17336_v30, %v6777_v13  ;;  %v6791_v18 = vadd.f32 %v17336_v30, %v6778_v55  ;;  %v12789_v43 = vpop.f32.mrf.mxu1  ;;  %v13647_v13 = vld [vmem:[%s18488_s7 + $0x10] sm:$0xff]  }
 0x7db   :  { %v12965_v57 = vpop.f32.mrf.mxu0  ;;  %v9528_v43 = vld [vmem:[#allocation4 + $0x181] sm:$0xff] }
 0x7dc   :  { %v6797_v10 = vmax.f32 %v6790_v56, 0.0  ;;  %v6798_v22 = vmax.f32 %v6791_v18, 0.0  ;;  %v17535_v38 = vpop.f32.mrf.mxu1  ;;  %13019 = vmatmul.mubr.msk.bf16.gmra.mxu1 %vm1855_vm3, %v17533_v16  ;;  %v8660_v56 = vld [vmem:[#allocation4 + $0x13a] sm:$0xff]  ;;  %v9529_v57 = vld [vmem:[#allocation4 + $0x189] sm:$0xff] }
 0x7dd   :  { %v17539_v48 = vpop.f32.mrf.mxu0  ;;  %13066 = vmatprep.mubr.msk.bf16.mxu1 %vm13685_vm12, %v18515_v63  ;;  %v9542_v9 = vpack.c.bf16 %v9529_v57, %v9528_v43  ;;  %v13653_v57 = vld [vmem:[%s18488_s7 + $0xc8] sm:$0xff]  }
 0x7de   :  { %13195 = vmatmul.mubr.msk.bf16.gmra.mxu0 %vm1855_vm3, %v9193_v49  ;;  %6804 = vst [vmem:[%s18494_s9 + $0x28] sm:$0xff] %v6797_v10  ;;  %6805 = vst [vmem:[%s18494_s9 + $0x30] sm:$0x1] %v6798_v22  ;;  %v12792_v30 = vpop.f32.mrf.mxu1  ;;  %v8672_v22 = vpack.c.bf16 %v8660_v56, %v8659_v6 }
 0x7df   :  { %13198 = vmatprep.mubr.msk.bf16.mxu0 %vm13685_vm12, %v18515_v63  ;;  %v12968_v23 = vpop.f32.mrf.mxu0  ;;  %v13648_v30 = vld [vmem:[%s18488_s7 + $0x8] sm:$0xff]  }
 0x7e0   :  { %v17552_v32 = vpop.f32.mrf.mxu1 }
 0x7e1   :  { %v17554_v54 = vpop.f32.mrf.mxu0 }
 0x7e2   :  { %v12793_v17 = vpop.f32.mrf.mxu1 }
 0x7e3   :  { %v12969_v11 = vpop.f32.mrf.mxu0  ;;  %v13649_v17 = vld [vmem:[%s18488_s7] sm:$0xff]  }
 0x7e4   :  { %v17559_v34 = vpop.f32.mrf.mxu1  ;;  %13067 = vmatmul.mubr.msk.bf16.vlgmr.msra.gmra.mxu1 %vm1855_vm3, %v8671_v24  ;;  %v8661_v11 = vld [vmem:[#allocation4 + $0x142] sm:$0xff] }
 0x7e5   :  { %v17562_v37 = vpop.f32.mrf.mxu0  ;;  %13131 = vmatpush3.bf16.msra.mxu1 %v13644_v52  ;;  %13070 = vmatprep.mubr.msk.bf16.mxu1 %vm13685_vm12, %v18515_v63 }
 0x7e6   :  { %13199 = vmatmul.mubr.msk.bf16.gmra.mxu0 %vm1855_vm3, %v9194_v15  ;;  %v12796_v55 = vpop.f32.mrf.mxu1  ;;  %13132 = vmatprep.subr.bf16.mxu1 %v18515_v63  ;;  %v8662_v15 = vld [vmem:[#allocation4 + $0x14a] sm:$0xff] }
 0x7e7   :  { %13246 = vmatprep.mubr.msk.bf16.mxu0 %vm13685_vm12, %v18515_v63  ;;  %v12972_v7 = vpop.f32.mrf.mxu0  ;;  %v8673_v56 = vpack.c.bf16 %v8662_v15, %v8661_v11  ;;  %v18626_v15 = vld [vmem:[#allocation31_spill] sm:$0xff] }
 0x7e8   :  { %v17573_v18 = vpop.f32.mrf.mxu1 }
 0x7e9   :  { %v17575_v49 = vpop.f32.mrf.mxu0  ;;  %13133 = vmatpush3.bf16.msra.mxu1 %v13647_v13  ;;  %v13651_v13 = vld [vmem:[%s18488_s7 + $0xd0] sm:$0xff]  }
 0x7ea   :  { %v12797_v10 = vpop.f32.mrf.mxu1  ;;  %13134 = vmatprep.subr.bf16.mxu1 %v18515_v63 }
 0x7eb   :  { %v12973_v23 = vpop.f32.mrf.mxu0 }
 0x7ec   :  { %v17584_v58 = vpop.f32.mrf.mxu1  ;;  %13071 = vmatmul.mubr.msk.bf16.gmra.mxu1 %vm1855_vm3, %v8672_v22 }
 0x7ed   :  { %v17587_v61 = vpop.f32.mrf.mxu0  ;;  %13074 = vmatprep.mubr.msk.bf16.mxu1 %vm13685_vm12, %v18515_v63  ;;  %13135 = vmatpush3.bf16.msra.mxu1 %v13648_v30 }
 0x7ee   :  { %13247 = vmatmul.mubr.msk.bf16.vlgmr.msra.gmra.mxu0 %vm1855_vm3, %v9542_v9  ;;  %v12800_v52 = vpop.f32.mrf.mxu1  ;;  %13136 = vmatprep.subr.bf16.mxu1 %v18515_v63  ;;  %v8663_v9 = vld [vmem:[#allocation4 + $0x152] sm:$0xff] }
 0x7ef   :  { %13250 = vmatprep.mubr.msk.bf16.mxu0 %vm13685_vm12, %v18515_v63  ;;  %v12976_v24 = vpop.f32.mrf.mxu0  ;;  %13311 = vmatpush3.bf16.msra.mxu0 %v13650_v27  ;;  %v8664_v27 = vld [vmem:[#allocation4 + $0x15a] sm:$0xff]  ;;  %v13654_v52 = vld [vmem:[%s18488_s7 + $0xc0] sm:$0xff]  }
 0x7f0   :  { %v17601_v55 = vpop.f32.mrf.mxu1  ;;  %13312 = vmatprep.subr.bf16.mxu0 %v18515_v63  ;;  %v8674_v11 = vpack.c.bf16 %v8664_v27, %v8663_v9  ;;  %v8665_v27 = vld [vmem:[#allocation4 + $0x162] sm:$0xff] }
 0x7f1   :  { %v17604_v7 = vpop.f32.mrf.mxu0  ;;  %13137 = vmatpush3.bf16.msra.mxu1 %v13649_v17 }
 0x7f2   :  { %v12801_v6 = vpop.f32.mrf.mxu1  ;;  %13202 = vmatprep.subr.bf16.mxu1 %v18515_v63 }
 0x7f3   :  { %v12977_v43 = vpop.f32.mrf.mxu0  ;;  %13313 = vmatpush3.bf16.msra.mxu0 %v13651_v13  ;;  %v7541_v13 = vadd.f32 %v18626_v15, %v17481_v53  ;;  %v18628_v53 = vld [vmem:[#allocation19_spill] sm:$0xff] }
 0x7f4   :  { %v17610_v10 = vpop.f32.mrf.mxu1  ;;  %13075 = vmatmul.mubr.msk.bf16.gmra.mxu1 %vm1855_vm3, %v8673_v56  ;;  %13314 = vmatprep.subr.bf16.mxu0 %v18515_v63 }
 0x7f5   :  { %v17614_v22 = vpop.f32.mrf.mxu0  ;;  %13078 = vmatprep.mubr.msk.bf16.mxu1 %vm13685_vm12, %v18515_v63 }
 0x7f6   :  { %18624 = vst [vmem:[#allocation37_spill] sm:$0xff] %v17614_v22  ;;  %13251 = vmatmul.mubr.msk.bf16.gmra.mxu0 %vm1855_vm3, %v17277_v51  ;;  %v12804_v30 = vpop.f32.mrf.mxu1 }
 0x7f7   :  { %13254 = vmatprep.mubr.msk.bf16.mxu0 %vm13685_vm12, %v18515_v63  ;;  %v12980_v23 = vpop.f32.mrf.mxu0  ;;  %13315 = vmatpush3.bf16.msra.mxu0 %v13653_v57 }
 0x7f8   :  { %v17625_v17 = vpop.f32.mrf.mxu1  ;;  %13316 = vmatprep.subr.bf16.mxu0 %v18515_v63  ;;  %v7544_v23 = vadd.f32 %v18628_v53, %v17492_v50 }
 0x7f9   :  { %v17628_v51 = vpop.f32.mrf.mxu0 }
 0x7fa   :  { %18625 = vst [vmem:[#allocation25_spill] sm:$0xff] %v17628_v51  ;;  %v12805_v24 = vpop.f32.mrf.mxu1 }
 0x7fb   :  { %v12981_v6 = vpop.f32.mrf.mxu0  ;;  %13317 = vmatpush3.bf16.msra.mxu0 %v13654_v52  ;;  %v8666_v52 = vld [vmem:[#allocation4 + $0x16a] sm:$0xff] }
 0x7fc   :  { %v7703_v56 = vpop.f32.mrf.mxu1  ;;  %13079 = vmatmul.mubr.msk.bf16.gmra.mxu1 %vm1855_vm3, %v8674_v11  ;;  %13382 = vmatprep.subr.bf16.mxu0 %v18515_v63  ;;  %v18630_v6 = vld [vmem:[#allocation32_spill] sm:$0xff] }
 0x7fd   :  { %v17634_v43 = vadd.f32 %v7703_v56, %v7541_v13  ;;  %v17636_v57 = vpop.f32.mrf.mxu0  ;;  %13082 = vmatprep.mubr.msk.bf16.mxu1 %vm13685_vm12, %v18515_v63  ;;  %v7549_v56 = vadd.f32 %v18630_v6, %v17497_v2  ;;  %v18631_v2 = vld [vmem:[#allocation20_spill] sm:$0xff] }
 0x7fe   :  { %18627 = vst [vmem:[#allocation38_spill] sm:$0xff] %v17636_v57  ;;  %13255 = vmatmul.mubr.msk.bf16.gmra.mxu0 %vm1855_vm3, %v17303_v42  ;;  %v12852_v30 = vpop.f32.mrf.mxu1  ;;  %v8675_v42 = vpack.c.bf16 %v8666_v52, %v8665_v27 }
 0x7ff   :  { %13258 = vmatprep.mubr.msk.bf16.mxu0 %vm13685_vm12, %v18515_v63  ;;  %v12984_v9 = vpop.f32.mrf.mxu0 }
 0x800   :  { %v7706_v24 = vpop.f32.mrf.mxu1 }
 0x801   :  { %v17646_v11 = vadd.f32 %v7706_v24, %v7544_v23  ;;  %v17648_v15 = vpop.f32.mrf.mxu0  ;;  %v7552_v23 = vadd.f32 %v18631_v2, %v17510_v60 }
 0x802   :  { %18629 = vst [vmem:[#allocation26_spill] sm:$0xff] %v17648_v15  ;;  %v12853_v13 = vpop.f32.mrf.mxu1 }
 0x803   :  { %v12985_v30 = vpop.f32.mrf.mxu0  ;;  %v18632_v13 = vld [vmem:[#allocation33_spill] sm:$0xff] }
 0x804   :  { %v7711_v57 = vpop.f32.mrf.mxu1  ;;  %13083 = vmatmul.mubr.msk.bf16.gmra.mxu1 %vm1855_vm3, %v8675_v42 }
 0x805   :  { %v17653_v51 = vadd.f32 %v7711_v57, %v7549_v56  ;;  %v17655_v50 = vpop.f32.mrf.mxu0  ;;  %13086 = vmatprep.mubr.msk.bf16.mxu1 %vm13685_vm12, %v18515_v63 }
 0x806   :  { %13259 = vmatmul.mubr.msk.bf16.gmra.mxu0 %vm1855_vm3, %v17324_v59  ;;  %v12856_v53 = vpop.f32.mrf.mxu1  ;;  %v7557_v59 = vadd.f32 %v18632_v13, %v17516_v14  ;;  %v18633_v14 = vld [vmem:[#allocation21_spill] sm:$0xff] }
 0x807   :  { %13262 = vmatprep.mubr.msk.bf16.mxu0 %vm13685_vm12, %v18515_v63  ;;  %v13032_v9 = vpop.f32.mrf.mxu0  ;;  %v7560_v53 = vadd.f32 %v18633_v14, %v17527_v28 }
 0x808   :  { %v7714_v27 = vpop.f32.mrf.mxu1 }
 0x809   :  { %v17665_v52 = vadd.f32 %v7714_v27, %v7552_v23  ;;  %v17667_v57 = vpop.f32.mrf.mxu0 }
 0x80a   :  { %v12857_v24 = vpop.f32.mrf.mxu1 }
 0x80b   :  { %v13033_v42 = vpop.f32.mrf.mxu0 }
 0x80c   :  { %v7719_v6 = vpop.f32.mrf.mxu1  ;;  %13087 = vmatmul.mubr.msk.bf16.gmra.mxu1 %vm1855_vm3, %v17422_v47  ;;  %v9539_v47 = vld [vmem:[#allocation4 + $0x1d9] sm:$0xff] }
 0x80d   :  { %v17673_v56 = vadd.f32 %v7719_v6, %v7557_v59  ;;  %v17675_v30 = vpop.f32.mrf.mxu0  ;;  %13090 = vmatprep.mubr.msk.bf16.mxu1 %vm13685_vm12, %v18515_v63  ;;  %v9547_v42 = vpack.c.bf16 %v9539_v47, %v17377_v35 }
 0x80e   :  { %13263 = vmatmul.mubr.msk.bf16.gmra.mxu0 %vm1855_vm3, %v17360_v8  ;;  %v12860_v60 = vpop.f32.mrf.mxu1  ;;  %v18634_v8 = vld [vmem:[#allocation34_spill] sm:$0xff] }
 0x80f   :  { %13266 = vmatprep.mubr.msk.bf16.mxu0 %vm13685_vm12, %v18515_v63  ;;  %v13036_v2 = vpop.f32.mrf.mxu0  ;;  %v7565_v13 = vadd.f32 %v18634_v8, %v17535_v38  ;;  %v18635_v38 = vld [vmem:[#allocation22_spill] sm:$0xff]  ;;  %v13652_v8 = vld [vmem:[%s18488_s7 + $0x78] sm:$0xff]  }
 0x810   :  { %v7722_v23 = vpop.f32.mrf.mxu1  ;;  %v7568_v35 = vadd.f32 %v18635_v38, %v17552_v32 }
 0x811   :  { %v17685_v9 = vadd.f32 %v7722_v23, %v7560_v53  ;;  %v17687_v27 = vpop.f32.mrf.mxu0  ;;  %v9540_v23 = vld [vmem:[#allocation4 + $0x1e1] sm:$0xff] }
 0x812   :  { %v12861_v24 = vpop.f32.mrf.mxu1 }
 0x813   :  { %v13037_v59 = vpop.f32.mrf.mxu0 }
 0x814   :  { %v7727_v6 = vpop.f32.mrf.mxu1  ;;  %13091 = vmatmul.mubr.msk.bf16.gmra.mxu1 %vm1855_vm3, %v17453_v44  ;;  %v9541_v44 = vld [vmem:[#allocation4 + $0x1e9] sm:$0x3f]  ;;  %v18636_v59 = vld [vmem:[#allocation35_spill] sm:$0xff] }
 0x815   :  { %v17694_v60 = vadd.f32 %v7727_v6, %v7565_v13  ;;  %v17696_v28 = vpop.f32.mrf.mxu0  ;;  %13138 = vmatprep.mubr.msk.bf16.mxu1 %vm13685_vm12, %v18515_v63 }
 0x816   :  { %13267 = vmatmul.mubr.msk.bf16.gmra.mxu0 %vm1855_vm3, %v9547_v42  ;;  %v12864_v14 = vpop.f32.mrf.mxu1  ;;  %v7573_v42 = vadd.f32 %v18636_v59, %v17559_v34 }
 0x817   :  { %13270 = vmatprep.mubr.msk.bf16.mxu0 %vm13685_vm12, %v18515_v63  ;;  %v13040_v53 = vpop.f32.mrf.mxu0  ;;  %v9548_v14 = vpack.c.bf16 %v9541_v44, %v9540_v23  ;;  %v9882_v23 = vld [vmem:[#allocation4 + $0x190] sm:$0xff]  ;;  %v9883_v44 = vld [vmem:[#allocation4 + $0x198] sm:$0xff] }
 0x818   :  { %v7730_v2 = vpop.f32.mrf.mxu1 }
 0x819   :  { %v17705_v47 = vadd.f32 %v7730_v2, %v7568_v35  ;;  %v17707_v24 = vpop.f32.mrf.mxu0  ;;  %v13655_v35 = vld [vmem:[%s18488_s7 + $0x70] sm:$0xff]  }
 0x81a   :  { %v12865_v13 = vpop.f32.mrf.mxu1 }
 0x81b   :  { %v13041_v6 = vpop.f32.mrf.mxu0 }
 0x81c   :  { %v7735_v15 = vpop.f32.mrf.mxu1  ;;  %13139 = vmatmul.mubr.msk.bf16.vlgmr.msra.gmra.mxu1 %vm1855_vm3, %v17514_v0  ;;  %v18637_v0 = vld [vmem:[#allocation23_spill] sm:$0xff] }
 0x81d   :  { %v17716_v32 = vadd.f32 %v7735_v15, %v7573_v42  ;;  %v17718_v38 = vpop.f32.mrf.mxu0  ;;  %13203 = vmatpush3.bf16.msra.mxu1 %v13652_v8  ;;  %13142 = vmatprep.mubr.msk.bf16.mxu1 %vm13685_vm12, %v18515_v63  ;;  %v7576_v34 = vadd.f32 %v18637_v0, %v17573_v18  ;;  %v13656_v42 = vld [vmem:[%s18488_s7 + $0x68] sm:$0xff]   ;;  %v18638_v18 = vld [vmem:[#allocation36_spill] sm:$0xff] }
 0x81e   :  { %13271 = vmatmul.mubr.msk.bf16.gmra.mxu0 %vm1855_vm3, %v9548_v14  ;;  %v12868_v53 = vpop.f32.mrf.mxu1  ;;  %13204 = vmatprep.subr.bf16.mxu1 %v18515_v63  ;;  %v7581_v6 = vadd.f32 %v18638_v18, %v17584_v58  ;;  %v13658_v0 = vld [vmem:[%s18488_s7 + $0x118] sm:$0xff]   ;;  %v13659_v18 = vld [vmem:[%s18488_s7 + $0x110] sm:$0xff]  }
 0x81f   :  { %13318 = vmatprep.mubr.msk.bf16.mxu0 %vm13685_vm12, %v18515_v63  ;;  %v13044_v15 = vpop.f32.mrf.mxu0  ;;  %v17741_v53 = vpack.c.bf16 %v9883_v44, %v9882_v23  ;;  %v18640_v23 = vld [vmem:[#allocation24_spill] sm:$0xff] }
 0x820   :  { %v7738_v2 = vpop.f32.mrf.mxu1  ;;  %v7584_v44 = vadd.f32 %v18640_v23, %v17601_v55  ;;  %v7589_v55 = vadd.f32 %v17284_v39, %v17610_v10  ;;  %v7592_v10 = vadd.f32 %v17298_v25, %v17625_v17  ;;  %v7935_v25 = vadd.f32 %v17309_v1, %v17634_v43 }
 0x821   :  { %v17731_v8 = vadd.f32 %v7738_v2, %v7576_v34  ;;  %v17733_v13 = vpop.f32.mrf.mxu0  ;;  %13205 = vmatpush3.bf16.msra.mxu1 %v13655_v35  ;;  %v13657_v2 = vld [vmem:[%s18488_s7 + $0x60] sm:$0xff]   ;;  %v7936_v43 = vadd.f32 %v17322_v26, %v17646_v11 }
 0x822   :  { %v12869_v59 = vpop.f32.mrf.mxu1  ;;  %13206 = vmatprep.subr.bf16.mxu1 %v18515_v63 }
 0x823   :  { %v13045_v14 = vpop.f32.mrf.mxu0 }
 0x824   :  { %v7743_v34 = vpop.f32.mrf.mxu1  ;;  %13143 = vmatmul.mubr.msk.bf16.gmra.mxu1 %vm1855_vm3, %v17533_v16  ;;  %v9884_v14 = vld [vmem:[#allocation4 + $0x1a0] sm:$0xff] }
 0x825   :  { %v17748_v35 = vadd.f32 %v7743_v34, %v7581_v6  ;;  %v17750_v15 = vpop.f32.mrf.mxu0  ;;  %13146 = vmatprep.mubr.msk.bf16.mxu1 %vm13685_vm12, %v18515_v63  ;;  %13207 = vmatpush3.bf16.msra.mxu1 %v13656_v42  ;;  %v9885_v34 = vld [vmem:[#allocation4 + $0x1a8] sm:$0xff] }
 0x826   :  { %18639 = vst [vmem:[#allocation39_spill] sm:$0xff] %v17750_v15  ;;  %13319 = vmatmul.mubr.msk.bf16.vlgmr.msra.gmra.mxu0 %vm1855_vm3, %v17741_v53  ;;  %v12872_v58 = vpop.f32.mrf.mxu1  ;;  %13208 = vmatprep.subr.bf16.mxu1 %v18515_v63 }
 0x827   :  { %13322 = vmatprep.mubr.msk.bf16.mxu0 %vm13685_vm12, %v18515_v63  ;;  %v13048_v59 = vpop.f32.mrf.mxu0  ;;  %13383 = vmatpush3.bf16.msra.mxu0 %v13658_v0  ;;  %v17774_v0 = vpack.c.bf16 %v9885_v34, %v9884_v14  ;;  %v9887_v14 = vld [vmem:[#allocation4 + $0x1b8] sm:$0xff] }
 0x828   :  { %v7746_v6 = vpop.f32.mrf.mxu1  ;;  %13384 = vmatprep.subr.bf16.mxu0 %v18515_v63  ;;  %v13661_v59 = vld [vmem:[%s18488_s7 + $0x108] sm:$0xff]  }
 0x829   :  { %v17768_v42 = vadd.f32 %v7746_v6, %v7584_v44  ;;  %v17770_v58 = vpop.f32.mrf.mxu0  ;;  %13209 = vmatpush3.bf16.msra.mxu1 %v13657_v2  ;;  %v9886_v6 = vld [vmem:[#allocation4 + $0x1b0] sm:$0xff] }
 0x82a   :  { %v12873_v22 = vpop.f32.mrf.mxu1  ;;  %13274 = vmatprep.subr.bf16.mxu1 %v18515_v63  ;;  %v17805_v17 = vpack.c.bf16 %v9887_v14, %v9886_v6  ;;  %v9889_v6 = vld [vmem:[#allocation4 + $0x1c8] sm:$0xff] }
 0x82b   :  { %v13049_v23 = vpop.f32.mrf.mxu0  ;;  %13385 = vmatpush3.bf16.msra.mxu0 %v13659_v18 }
 0x82c   :  { %v7751_v15 = vpop.f32.mrf.mxu1  ;;  %13147 = vmatmul.mubr.msk.bf16.gmra.mxu1 %vm1855_vm3, %v17741_v53  ;;  %13386 = vmatprep.subr.bf16.mxu0 %v18515_v63 }
 0x82d   :  { %v17783_v22 = vadd.f32 %v7751_v15, %v7589_v55  ;;  %v17785_v2 = vpop.f32.mrf.mxu0  ;;  %13150 = vmatprep.mubr.msk.bf16.mxu1 %vm13685_vm12, %v18515_v63  ;;  %v13662_v15 = vld [vmem:[%s18488_s7 + $0x100] sm:$0xff]  }
 0x82e   :  { %18641 = vst [vmem:[#allocation27_spill] sm:$0xff] %v17785_v2  ;;  %13323 = vmatmul.mubr.msk.bf16.gmra.mxu0 %vm1855_vm3, %v17774_v0  ;;  %v12876_v39 = vpop.f32.mrf.mxu1 }
 0x82f   :  { %13326 = vmatprep.mubr.msk.bf16.mxu0 %vm13685_vm12, %v18515_v63  ;;  %v13052_v44 = vpop.f32.mrf.mxu0  ;;  %13387 = vmatpush3.bf16.msra.mxu0 %v13661_v59 }
 0x830   :  { %v7754_v18 = vpop.f32.mrf.mxu1  ;;  %13388 = vmatprep.subr.bf16.mxu0 %v18515_v63 }
 0x831   :  { %v17799_v34 = vadd.f32 %v7754_v18, %v7592_v10  ;;  %v17801_v55 = vpop.f32.mrf.mxu0  ;;  %v9888_v18 = vld [vmem:[#allocation4 + $0x1c0] sm:$0xff] }
 0x832   :  { %v12877_v23 = vpop.f32.mrf.mxu1 }
 0x833   :  { %v13053_v39 = vpop.f32.mrf.mxu0  ;;  %13389 = vmatpush3.bf16.msra.mxu0 %v13662_v15 }
 0x834   :  { %v8057_v59 = vpop.f32.mrf.mxu1  ;;  %13151 = vmatmul.mubr.msk.bf16.gmra.mxu1 %vm1855_vm3, %v17774_v0 }
 0x835   :  { %v17809_v44 = vadd.f32 %v8057_v59, %v7935_v25  ;;  %v17811_v2 = vpop.f32.mrf.mxu0  ;;  %13154 = vmatprep.mubr.msk.bf16.mxu1 %vm13685_vm12, %v18515_v63  ;;  %v7937_v59 = vadd.f32 %v17339_v40, %v17653_v51  ;;  %v7938_v51 = vadd.f32 %v17355_v19, %v17665_v52 }
 0x836   :  { %18642 = vst [vmem:[#allocation40_spill] sm:$0xff] %v17811_v2  ;;  %13327 = vmatmul.mubr.msk.bf16.gmra.mxu0 %vm1855_vm3, %v17805_v17  ;;  %v12924_v10 = vpop.f32.mrf.mxu1 }
 0x837   :  { %13330 = vmatprep.mubr.msk.bf16.mxu0 %vm13685_vm12, %v18515_v63  ;;  %v13056_v1 = vpop.f32.mrf.mxu0  ;;  %v17827_v10 = vpack.c.bf16 %v9889_v6, %v9888_v18 }
 0x838   :  { %v8060_v15 = vpop.f32.mrf.mxu1 }
 0x839   :  { %v17821_v14 = vadd.f32 %v8060_v15, %v7936_v43  ;;  %v17823_v23 = vpop.f32.mrf.mxu0  ;;  %v9890_v15 = vld [vmem:[#allocation4 + $0x1d0] sm:$0xff] }
 0x83a   :  { %18643 = vst [vmem:[#allocation10_spill] sm:$0xff] %v17823_v23  ;;  %v12925_v39 = vpop.f32.mrf.mxu1 }
 0x83b   :  { %v13057_v25 = vpop.f32.mrf.mxu0 }
 0x83c   :  { %v8065_v2 = vpop.f32.mrf.mxu1  ;;  %13155 = vmatmul.mubr.msk.bf16.gmra.mxu1 %vm1855_vm3, %v17805_v17 }
 0x83d   :  { %v17831_v1 = vadd.f32 %v8065_v2, %v7937_v59  ;;  %v17833_v26 = vpop.f32.mrf.mxu0  ;;  %13158 = vmatprep.mubr.msk.bf16.mxu1 %vm13685_vm12, %v18515_v63  ;;  %v9891_v2 = vld [vmem:[#allocation4 + $0x1d8] sm:$0xff]  ;;  %v7939_v59 = vadd.f32 %v17366_v21, %v17673_v56  ;;  %v7940_v56 = vadd.f32 %v17381_v29, %v17685_v9 }
 0x83e   :  { %18644 = vst [vmem:[#allocation41_spill] sm:$0xff] %v17833_v26  ;;  %13331 = vmatmul.mubr.msk.bf16.gmra.mxu0 %vm1855_vm3, %v17827_v10  ;;  %v12928_v11 = vpop.f32.mrf.mxu1 }
 0x83f   :  { %13334 = vmatprep.mubr.msk.bf16.mxu0 %vm13685_vm12, %v18515_v63  ;;  %v13104_v40 = vpop.f32.mrf.mxu0  ;;  %v17849_v11 = vpack.c.bf16 %v9891_v2, %v9890_v15  ;;  %v9893_v2 = vld [vmem:[#allocation4 + $0x1e8] sm:$0xff] }
 0x840   :  { %v8068_v43 = vpop.f32.mrf.mxu1 }
 0x841   :  { %v17843_v18 = vadd.f32 %v8068_v43, %v7938_v51  ;;  %v17845_v6 = vpop.f32.mrf.mxu0  ;;  %v8861_v51 = vld [vmem:[#allocation4 + $0x1d8] sm:$0x3f] }
 0x842   :  { %18645 = vst [vmem:[#allocation7_spill] sm:$0xff] %v17845_v6  ;;  %v12929_v39 = vpop.f32.mrf.mxu1 }
 0x843   :  { %v13105_v25 = vpop.f32.mrf.mxu0 }
 0x844   :  { %v8073_v26 = vpop.f32.mrf.mxu1  ;;  %13159 = vmatmul.mubr.msk.bf16.gmra.mxu1 %vm1855_vm3, %v17827_v10 }
 0x845   :  { %v17853_v40 = vadd.f32 %v8073_v26, %v7939_v59  ;;  %v17855_v19 = vpop.f32.mrf.mxu0  ;;  %13162 = vmatprep.mubr.msk.bf16.mxu1 %vm13685_vm12, %v18515_v63  ;;  %v17865_v26 = vld [vmem:[#allocation4 + $0x1e0] sm:$0xff] }
 0x846   :  { %18646 = vst [vmem:[#allocation42_spill] sm:$0xff] %v17855_v19  ;;  %13335 = vmatmul.mubr.msk.bf16.gmra.mxu0 %vm1855_vm3, %v17849_v11  ;;  %v12932_v52 = vpop.f32.mrf.mxu1  ;;  %v8868_v19 = vpack.c.bf16 %v8861_v51, %v9890_v15  ;;  %v9894_v15 = vld [vmem:[#allocation4 + $0x1f0] sm:$0xff] }
 0x847   :  { %13338 = vmatprep.mubr.msk.bf16.mxu0 %vm13685_vm12, %v18515_v63  ;;  %v13108_v21 = vpop.f32.mrf.mxu0  ;;  %v7941_v52 = vadd.f32 %v17394_v4, %v17694_v60  ;;  %v9895_v4 = vld [vmem:[#allocation4 + $0x1f8] sm:$0x3f] }
 0x848   :  { %v8076_v43 = vpop.f32.mrf.mxu1  ;;  %v9901_v21 = vpack.c.bf16 %v9893_v2, %v17865_v26  ;;  %v9902_v2 = vpack.c.bf16 %v9895_v4, %v9894_v15  ;;  %v13663_v15 = vld [vmem:[%s18488_s7 + $0xb0] sm:$0xff]  }
 0x849   :  { %v17867_v39 = vadd.f32 %v8076_v43, %v7940_v56  ;;  %v17869_v25 = vpop.f32.mrf.mxu0  ;;  %v13660_v43 = vld [vmem:[%s18488_s7 + $0xb8] sm:$0xff]  }
 0x84a   :  { %18647 = vst [vmem:[#allocation11_spill] sm:$0xff] %v17869_v25  ;;  %v12933_v59 = vpop.f32.mrf.mxu1 }
 0x84b   :  { %v13109_v6 = vpop.f32.mrf.mxu0 }
 0x84c   :  { %v8081_v23 = vpop.f32.mrf.mxu1  ;;  %13163 = vmatmul.mubr.msk.bf16.gmra.mxu1 %vm1855_vm3, %v8868_v19  ;;  %v7942_v6 = vadd.f32 %v17413_v36, %v17705_v47 }
 0x84d   :  { %v17875_v29 = vadd.f32 %v8081_v23, %v7941_v52  ;;  %v17877_v9 = vpop.f32.mrf.mxu0  ;;  %13210 = vmatprep.mubr.msk.bf16.mxu1 %vm13685_vm12, %v18515_v63 }
 0x84e   :  { %18648 = vst [vmem:[#allocation43_spill] sm:$0xff] %v17877_v9  ;;  %13339 = vmatmul.mubr.msk.bf16.gmra.mxu0 %vm1855_vm3, %v9901_v21  ;;  %v12936_v56 = vpop.f32.mrf.mxu1  ;;  %v7943_v21 = vadd.f32 %v17430_v33, %v17716_v32 }
 0x84f   :  { %13342 = vmatprep.mubr.msk.bf16.mxu0 %vm13685_vm12, %v18515_v63  ;;  %v13112_v60 = vpop.f32.mrf.mxu0 }
 0x850   :  { %v8084_v19 = vpop.f32.mrf.mxu1  ;;  %v10236_v60 = vld [vmem:[#allocation4 + $0x192] sm:$0xff] }
 0x851   :  { %v17886_v23 = vadd.f32 %v8084_v19, %v7942_v6  ;;  %v17888_v51 = vpop.f32.mrf.mxu0  ;;  %v10237_v6 = vld [vmem:[#allocation4 + $0x19a] sm:$0xff] }
 0x852   :  { %18649 = vst [vmem:[#allocation8_spill] sm:$0xff] %v17888_v51  ;;  %v12937_v59 = vpop.f32.mrf.mxu1  ;;  %v9705_v51 = vld [vmem:[#allocation4 + $0x182] sm:$0xff] }
 0x853   :  { %v13113_v52 = vpop.f32.mrf.mxu0  ;;  %v13664_v59 = vld [vmem:[%s18488_s7 + $0xa8] sm:$0xff]  }
 0x854   :  { %v8089_v56 = vpop.f32.mrf.mxu1  ;;  %13211 = vmatmul.mubr.msk.bf16.vlgmr.msra.gmra.mxu1 %vm1855_vm3, %v17533_v16  ;;  %v7944_v16 = vadd.f32 %v17451_v3, %v17731_v8  ;;  %v7945_v3 = vadd.f32 %v17464_v12, %v17748_v35  ;;  %v17922_v8 = vpack.c.bf16 %v10237_v6, %v10236_v60  ;;  %v13665_v12 = vld [vmem:[%s18488_s7 + $0xa0] sm:$0xff]   ;;  %v7946_v35 = vadd.f32 %v17478_v62, %v17768_v42 }
 0x855   :  { %v17897_v36 = vadd.f32 %v8089_v56, %v7943_v21  ;;  %v17899_v47 = vpop.f32.mrf.mxu0  ;;  %13275 = vmatpush3.bf16.msra.mxu1 %v13660_v43  ;;  %13214 = vmatprep.mubr.msk.bf16.mxu1 %vm13685_vm12, %v18515_v63 }
 0x856   :  { %18650 = vst [vmem:[#allocation44_spill] sm:$0xff] %v17899_v47  ;;  %13343 = vmatmul.mubr.msk.bf16.gmra.mxu0 %vm1855_vm3, %v9902_v2  ;;  %v12940_v4 = vpop.f32.mrf.mxu1  ;;  %13276 = vmatprep.subr.bf16.mxu1 %v18515_v63 }
 0x857   :  { %13390 = vmatprep.mubr.msk.bf16.mxu0 %vm13685_vm12, %v18515_v63  ;;  %v13116_v33 = vpop.f32.mrf.mxu0 }
 0x858   :  { %v8092_v32 = vpop.f32.mrf.mxu1 }
 0x859   :  { %v17912_v19 = vadd.f32 %v8092_v32, %v7944_v16  ;;  %v17914_v43 = vpop.f32.mrf.mxu0  ;;  %13277 = vmatpush3.bf16.msra.mxu1 %v13663_v15  ;;  %v10238_v16 = vld [vmem:[#allocation4 + $0x1a2] sm:$0xff]  ;;  %v10239_v32 = vld [vmem:[#allocation4 + $0x1aa] sm:$0xff] }
 0x85a   :  { %18651 = vst [vmem:[#allocation12_spill] sm:$0xff] %v17914_v43  ;;  %v12941_v2 = vpop.f32.mrf.mxu1  ;;  %13278 = vmatprep.subr.bf16.mxu1 %v18515_v63 }
 0x85b   :  { %v13117_v52 = vpop.f32.mrf.mxu0 }
 0x85c   :  { %v8097_v21 = vpop.f32.mrf.mxu1  ;;  %13215 = vmatmul.mubr.msk.bf16.gmra.mxu1 %vm1855_vm3, %v17741_v53  ;;  %v7947_v52 = vadd.f32 %v17485_v5, %v17783_v22  ;;  %v7948_v22 = vadd.f32 %v17495_v41, %v17799_v34 }
 0x85d   :  { %v17926_v56 = vadd.f32 %v8097_v21, %v7945_v3  ;;  %v17928_v15 = vpop.f32.mrf.mxu0  ;;  %13218 = vmatprep.mubr.msk.bf16.mxu1 %vm13685_vm12, %v18515_v63  ;;  %13279 = vmatpush3.bf16.msra.mxu1 %v13664_v59  ;;  %v17948_v3 = vpack.c.bf16 %v10239_v32, %v10238_v16 }
 0x85e   :  { %18652 = vst [vmem:[#allocation45_spill] sm:$0xff] %v17928_v15  ;;  %13391 = vmatmul.mubr.msk.bf16.vlgmr.msra.gmra.mxu0 %vm1855_vm3, %v17922_v8  ;;  %v12944_v4 = vpop.f32.mrf.mxu1  ;;  %13280 = vmatprep.subr.bf16.mxu1 %v18515_v63 }
 0x85f   :  { %13394 = vmatprep.mubr.msk.bf16.mxu0 %vm13685_vm12, %v18515_v63  ;;  %v13120_v53 = vpop.f32.mrf.mxu0 }
 0x860   :  { %v8100_v33 = vpop.f32.mrf.mxu1  ;;  %v10241_v53 = vld [vmem:[#allocation4 + $0x1ba] sm:$0xff] }
 0x861   :  { %v17942_v60 = vadd.f32 %v8100_v33, %v7946_v35  ;;  %v17944_v6 = vpop.f32.mrf.mxu0  ;;  %13281 = vmatpush3.bf16.msra.mxu1 %v13665_v12 }
 0x862   :  { %18653 = vst [vmem:[#allocation9_spill] sm:$0xff] %v17944_v6  ;;  %v12945_v2 = vpop.f32.mrf.mxu1  ;;  %13346 = vmatprep.subr.bf16.mxu1 %v18515_v63 }
 0x863   :  { %v13121_v59 = vpop.f32.mrf.mxu0 }
 0x864   :  { %v8105_v62 = vpop.f32.mrf.mxu1  ;;  %13219 = vmatmul.mubr.msk.bf16.gmra.mxu1 %vm1855_vm3, %v17774_v0  ;;  %v10240_v0 = vld [vmem:[#allocation4 + $0x1b2] sm:$0xff] }
 0x865   :  { %v17953_v42 = vadd.f32 %v8105_v62, %v7947_v52  ;;  %v17955_v21 = vpop.f32.mrf.mxu0  ;;  %13222 = vmatprep.mubr.msk.bf16.mxu1 %vm13685_vm12, %v18515_v63  ;;  %v17969_v2 = vpack.c.bf16 %v10241_v53, %v10240_v0 }
 0x866   :  { %18654 = vst [vmem:[#allocation16_spill] sm:$0xff] %v17955_v21  ;;  %13395 = vmatmul.mubr.msk.bf16.gmra.mxu0 %vm1855_vm3, %v17948_v3  ;;  %v12948_v4 = vpop.f32.mrf.mxu1 }
 0x867   :  { %13398 = vmatprep.mubr.msk.bf16.mxu0 %vm13685_vm12, %v18515_v63  ;;  %v13124_v5 = vpop.f32.mrf.mxu0  ;;  %v10242_v4 = vld [vmem:[#allocation4 + $0x1c2] sm:$0xff] }
 0x868   :  { %v8108_v12 = vpop.f32.mrf.mxu1  ;;  %v10243_v5 = vld [vmem:[#allocation4 + $0x1ca] sm:$0xff] }
 0x869   :  { %v17965_v35 = vadd.f32 %v8108_v12, %v7948_v22  ;;  %v17967_v33 = vpop.f32.mrf.mxu0  ;;  %v17987_v0 = vpack.c.bf16 %v10243_v5, %v10242_v4  ;;  %v10244_v4 = vld [vmem:[#allocation4 + $0x1d2] sm:$0xff]  ;;  %v10245_v5 = vld [vmem:[#allocation4 + $0x1da] sm:$0xff] }
 0x86a   :  { %18655 = vst [vmem:[#allocation14_spill] sm:$0xff] %v17967_v33  ;;  %v12949_v16 = vpop.f32.mrf.mxu1  ;;  %v10247_v33 = vld [vmem:[#allocation4 + $0x1ea] sm:$0xff] }
 0x86b   :  { %v13125_v32 = vpop.f32.mrf.mxu0 }
 0x86c   :  { %v17971_v59 = vpop.f32.mrf.mxu1  ;;  %13223 = vmatmul.mubr.msk.bf16.gmra.mxu1 %vm1855_vm3, %v17805_v17 }
 0x86d   :  { %13226 = vmatprep.mubr.msk.bf16.mxu1 %vm13685_vm12, %v18515_v63 }
 0x86e   :  { %v17975_v52 = vpop.f32.mrf.mxu0  ;;  %13399 = vmatmul.mubr.msk.bf16.gmra.mxu0 %vm1855_vm3, %v17969_v2  ;;  %v12996_v41 = vpop.f32.mrf.mxu1 }
 0x86f   :  { %18656 = vst [vmem:[#allocation29_spill] sm:$0xff] %v17975_v52  ;;  %13402 = vmatprep.mubr.msk.bf16.mxu0 %vm13685_vm12, %v18515_v63 }
 0x870   :  { %v13128_v34 = vpop.f32.mrf.mxu0  ;;  %v17983_v62 = vpop.f32.mrf.mxu1 }
 0x872   :  { %v17985_v22 = vpop.f32.mrf.mxu0  ;;  %v12997_v17 = vpop.f32.mrf.mxu1 }
 0x873   :  { %18657 = vst [vmem:[#allocation13_spill] sm:$0xff] %v17985_v22  ;;  %v18005_v22 = vpack.c.bf16 %v10245_v5, %v10244_v4  ;;  %v9364_v4 = vld [vmem:[#allocation4 + $0x1e8] sm:$0x3f] }
 0x874   :  { %v13129_v12 = vpop.f32.mrf.mxu0  ;;  %v17989_v53 = vpop.f32.mrf.mxu1  ;;  %13227 = vmatmul.mubr.msk.bf16.gmra.mxu1 %vm1855_vm3, %v17827_v10  ;;  %v9371_v6 = vpack.c.bf16 %v9364_v4, %v17865_v26 }
 0x875   :  { %13230 = vmatprep.mubr.msk.bf16.mxu1 %vm13685_vm12, %v18515_v63 }
 0x876   :  { %v17993_v16 = vpop.f32.mrf.mxu0  ;;  %13403 = vmatmul.mubr.msk.bf16.gmra.mxu0 %vm1855_vm3, %v17987_v0  ;;  %v13000_v32 = vpop.f32.mrf.mxu1 }
 0x877   :  { %13406 = vmatprep.mubr.msk.bf16.mxu0 %vm13685_vm12, %v18515_v63 }
 0x878   :  { %v13176_v41 = vpop.f32.mrf.mxu0  ;;  %v18001_v34 = vpop.f32.mrf.mxu1 }
 0x87a   :  { %v18003_v17 = vpop.f32.mrf.mxu0  ;;  %v13001_v10 = vpop.f32.mrf.mxu1 }
 0x87c   :  { %v13177_v12 = vpop.f32.mrf.mxu0  ;;  %v18007_v52 = vpop.f32.mrf.mxu1  ;;  %13231 = vmatmul.mubr.msk.bf16.gmra.mxu1 %vm1855_vm3, %v17849_v11 }
 0x87d   :  { %13234 = vmatprep.mubr.msk.bf16.mxu1 %vm13685_vm12, %v18515_v63  ;;  %v18021_v12 = vld [vmem:[#allocation4 + $0x1e2] sm:$0xff] }
 0x87e   :  { %v18011_v32 = vpop.f32.mrf.mxu0  ;;  %13407 = vmatmul.mubr.msk.bf16.gmra.mxu0 %vm1855_vm3, %v18005_v22  ;;  %v13004_v41 = vpop.f32.mrf.mxu1  ;;  %v10255_v43 = vpack.c.bf16 %v10247_v33, %v18021_v12  ;;  %v10249_v33 = vld [vmem:[#allocation4 + $0x1fa] sm:$0x3f] }
 0x87f   :  { %18658 = vst [vmem:[#allocation17_spill] sm:$0xff] %v18011_v32  ;;  %13410 = vmatprep.mubr.msk.bf16.mxu0 %vm13685_vm12, %v18515_v63 }
 0x880   :  { %v13180_v10 = vpop.f32.mrf.mxu0  ;;  %v18019_v5 = vpop.f32.mrf.mxu1 }
 0x882   :  { %v18023_v11 = vpop.f32.mrf.mxu0  ;;  %v13005_v21 = vpop.f32.mrf.mxu1 }
 0x883   :  { %18659 = vst [vmem:[#allocation15_spill] sm:$0xff] %v18023_v11  ;;  %v10248_v21 = vld [vmem:[#allocation4 + $0x1f2] sm:$0xff] }
 0x884   :  { %v13181_v15 = vpop.f32.mrf.mxu0  ;;  %v18027_v47 = vpop.f32.mrf.mxu1  ;;  %13235 = vmatmul.mubr.msk.bf16.gmra.mxu1 %vm1855_vm3, %v9371_v6  ;;  %v10256_v9 = vpack.c.bf16 %v10249_v33, %v10248_v21 }
 0x885   :  { %13282 = vmatprep.mubr.msk.bf16.mxu1 %vm13685_vm12, %v18515_v63  ;;  %v9706_v15 = vld [vmem:[#allocation4 + $0x18a] sm:$0xff] }
 0x886   :  { %v18030_v41 = vpop.f32.mrf.mxu0  ;;  %13411 = vmatmul.mubr.msk.bf16.gmra.mxu0 %vm1855_vm3, %v10255_v43  ;;  %v13008_v10 = vpop.f32.mrf.mxu1  ;;  %v13666_v43 = vld [vmem:[%s18488_s7 + $0xf8] sm:$0xff]  }
 0x887   :  { %18660 = vst [vmem:[#allocation30_spill] sm:$0xff] %v18030_v41  ;;  %13414 = vmatprep.mubr.msk.bf16.mxu0 %vm13685_vm12, %v18515_v63  ;;  %v9719_v41 = vpack.c.bf16 %v9706_v15, %v9705_v51 }
 0x888   :  { %v13184_v26 = vpop.f32.mrf.mxu0  ;;  %v18037_v4 = vpop.f32.mrf.mxu1 }
 0x88a   :  { %v18039_v11 = vpop.f32.mrf.mxu0  ;;  %v13009_v6 = vpop.f32.mrf.mxu1 }
 0x88b   :  { %18661 = vst [vmem:[#allocation28_spill] sm:$0xff] %v18039_v11  ;;  %v13667_v11 = vld [vmem:[%s18488_s7 + $0xf0] sm:$0xff]  }
 0x88c   :  { %v13185_v10 = vpop.f32.mrf.mxu0  ;;  %v18044_v32 = vpop.f32.mrf.mxu1  ;;  %13283 = vmatmul.mubr.msk.bf16.vlgmr.msra.gmra.mxu1 %vm1855_vm3, %v9719_v41  ;;  %v13668_v41 = vld [vmem:[%s18488_s7 + $0xe8] sm:$0xff]  }
 0x88d   :  { %13347 = vmatpush3.bf16.msra.mxu1 %v13666_v43  ;;  %13286 = vmatprep.mubr.msk.bf16.mxu1 %vm13685_vm12, %v18515_v63 }
 0x88e   :  { %v18047_v26 = vpop.f32.mrf.mxu0  ;;  %v13012_v25 = vpop.f32.mrf.mxu1  ;;  %13348 = vmatprep.subr.bf16.mxu1 %v18515_v63  ;;  %13415 = vmatmul.mubr.msk.bf16.gmra.mxu0 %vm1855_vm3, %v10256_v9  ;;  %v13669_v9 = vld [vmem:[%s18488_s7 + $0xe0] sm:$0xff]  }
 0x88f   :  { %18662 = vst [vmem:[#allocation18_spill] sm:$0xff] %v18047_v26 }
 0x890   :  { %v13188_v51 = vpop.f32.mrf.mxu0  ;;  %v18056_v15 = vpop.f32.mrf.mxu1 }
 0x891   :  { %13349 = vmatpush3.bf16.msra.mxu1 %v13667_v11 }
 0x892   :  { %v18058_v21 = vpop.f32.mrf.mxu0  ;;  %v13013_v33 = vpop.f32.mrf.mxu1  ;;  %13350 = vmatprep.subr.bf16.mxu1 %v18515_v63 }
 0x893   :  { %18663 = vst [vmem:[#allocation31_spill] sm:$0xff] %v18058_v21 }
 0x894   :  { %v13189_v43 = vpop.f32.mrf.mxu0  ;;  %v18064_v6 = vpop.f32.mrf.mxu1  ;;  %13287 = vmatmul.mubr.msk.bf16.gmra.mxu1 %vm1855_vm3, %v17922_v8 }
 0x895   :  { %13290 = vmatprep.mubr.msk.bf16.mxu1 %vm13685_vm12, %v18515_v63  ;;  %13351 = vmatpush3.bf16.msra.mxu1 %v13668_v41  ;;  %v8289_v41 = vadd.f32 %v17503_v20, %v17809_v44 }
 0x896   :  { %v18068_v25 = vpop.f32.mrf.mxu0  ;;  %v13016_v11 = vpop.f32.mrf.mxu1  ;;  %13352 = vmatprep.subr.bf16.mxu1 %v18515_v63 }
 0x897   :  { %18664 = vst [vmem:[#allocation19_spill] sm:$0xff] %v18068_v25 }
 0x898   :  { %v13192_v10 = vpop.f32.mrf.mxu0  ;;  %v18076_v51 = vpop.f32.mrf.mxu1 }
 0x899   :  { %13353 = vmatpush3.bf16.msra.mxu1 %v13669_v9  ;;  %v8466_v10 = vadd.f32 %v17971_v59, %v8289_v41  ;;  %v8291_v59 = vadd.f32 %v17520_v31, %v17831_v1 }
 0x89a   :  { %v18078_v33 = vpop.f32.mrf.mxu0  ;;  %v13017_v8 = vpop.f32.mrf.mxu1 }
 0x89b   :  { %18665 = vst [vmem:[#allocation32_spill] sm:$0xff] %v18078_v33  ;;  %v8290_v8 = vadd.f32 %v17512_v45, %v17821_v14  ;;  %v8643_v44 = vadd.f32 %v17655_v50, %v8466_v10  ;;  %v8468_v14 = vadd.f32 %v17989_v53, %v8291_v59  ;;  %v8292_v10 = vadd.f32 %v17529_v46, %v17843_v18 }
 0x89c   :  { %v13193_v43 = vpop.f32.mrf.mxu0  ;;  %v18080_v25 = vpop.f32.mrf.mxu1  ;;  %13291 = vmatmul.mubr.msk.bf16.gmra.mxu1 %vm1855_vm3, %v17948_v3 }
 0x89d   :  { %13294 = vmatprep.mubr.msk.bf16.mxu1 %vm13685_vm12, %v18515_v63  ;;  %v8467_v26 = vadd.f32 %v17983_v62, %v8290_v8  ;;  %v8469_v1 = vadd.f32 %v18001_v34, %v8292_v10 }
 0x89e   :  { %v18086_v21 = vpop.f32.mrf.mxu0  ;;  %v13020_v11 = vpop.f32.mrf.mxu1 }
 0x89f   :  { %18666 = vst [vmem:[#allocation20_spill] sm:$0xff] %v18086_v21  ;;  %v8644_v11 = vadd.f32 %v17667_v57, %v8467_v26  ;;  %v8293_v57 = vadd.f32 %v17539_v48, %v17853_v40 }
 0x8a0   :  { %v13196_v33 = vpop.f32.mrf.mxu0  ;;  %v18091_v9 = vpop.f32.mrf.mxu1 }
 0x8a1   :  { %v8470_v18 = vadd.f32 %v18007_v52, %v8293_v57 }
 0x8a2   :  { %v18095_v43 = vpop.f32.mrf.mxu0  ;;  %v13021_v3 = vpop.f32.mrf.mxu1 }
 0x8a3   :  { %v8645_v3 = vadd.f32 %v17675_v30, %v8468_v14  ;;  %v8646_v30 = vadd.f32 %v17687_v27, %v8469_v1  ;;  %v8295_v27 = vadd.f32 %v17562_v37, %v17875_v29 }
 0x8a4   :  { %v13197_v20 = vpop.f32.mrf.mxu0  ;;  %v8765_v21 = vpop.f32.mrf.mxu1  ;;  %13295 = vmatmul.mubr.msk.bf16.gmra.mxu1 %vm1855_vm3, %v17969_v2 }
 0x8a5   :  { %v8820_v33 = vadd.f32 %v8765_v21, %v8643_v44  ;;  %13298 = vmatprep.mubr.msk.bf16.mxu1 %vm13685_vm12, %v18515_v63 }
 0x8a6   :  { %v18103_v41 = vpop.f32.mrf.mxu0  ;;  %v13068_v45 = vpop.f32.mrf.mxu1 }
 0x8a8   :  { %v13200_v62 = vpop.f32.mrf.mxu0  ;;  %v8768_v50 = vpop.f32.mrf.mxu1 }
 0x8a9   :  { %v8821_v2 = vadd.f32 %v8768_v50, %v8644_v11  ;;  %v8647_v11 = vadd.f32 %v17696_v28, %v8470_v18  ;;  %v9718_v28 = vld [vmem:[#allocation4 + $0x1ea] sm:$0x3f] }
 0x8aa   :  { %v18111_v8 = vpop.f32.mrf.mxu0  ;;  %v13069_v31 = vpop.f32.mrf.mxu1 }
 0x8ab   :  { %8835 = vst [vmem:[#allocation5 + $0xc0] sm:$0xff] %v8821_v2 }
 0x8ac   :  { %v13201_v21 = vpop.f32.mrf.mxu0  ;;  %v8773_v20 = vpop.f32.mrf.mxu1  ;;  %13299 = vmatmul.mubr.msk.bf16.gmra.mxu1 %vm1855_vm3, %v17987_v0  ;;  %v8294_v0 = vadd.f32 %v17554_v54, %v17867_v39 }
 0x8ad   :  { %v8822_v53 = vadd.f32 %v8773_v20, %v8645_v3  ;;  %13302 = vmatprep.mubr.msk.bf16.mxu1 %vm13685_vm12, %v18515_v63  ;;  %v9725_v3 = vpack.c.bf16 %v9718_v28, %v18021_v12 }
 0x8ae   :  { %v18119_v26 = vpop.f32.mrf.mxu0  ;;  %v13072_v46 = vpop.f32.mrf.mxu1  ;;  %v8471_v14 = vadd.f32 %v18019_v5, %v8294_v0  ;;  %v8472_v5 = vadd.f32 %v18027_v47, %v8295_v27 }
 0x8af   :  { %v10431_v34 = vmax.f32 %v8820_v33, %v8822_v53 }
 0x8b0   :  { %v13248_v44 = vpop.f32.mrf.mxu0  ;;  %v8776_v59 = vpop.f32.mrf.mxu1  ;;  %v8648_v10 = vadd.f32 %v17707_v24, %v8471_v14  ;;  %v8649_v24 = vadd.f32 %v17718_v38, %v8472_v5 }
 0x8b1   :  { %10433 = vst [vmem:[#allocation6 + $0x70] sm:$0xff] %v10431_v34  ;;  %v8823_v45 = vadd.f32 %v8776_v59, %v8646_v30  ;;  %v10059_v44 = vld [vmem:[#allocation4 + $0x191] sm:$0xff]  ;;  %v10060_v30 = vld [vmem:[#allocation4 + $0x199] sm:$0xff] }
 0x8b2   :  { %v18127_v48 = vpop.f32.mrf.mxu0  ;;  %v13073_v40 = vpop.f32.mrf.mxu1  ;;  %v10428_v37 = vld [vmem:[#allocation5 + $0xc0] sm:$0x3f] }
 0x8b3   :  { %8837 = vst [vmem:[#allocation5 + $0xc8] sm:$0xff] %v8823_v45  ;;  %v10073_v40 = vpack.c.bf16 %v10060_v30, %v10059_v44 }
 0x8b4   :  { %v13249_v62 = vpop.f32.mrf.mxu0  ;;  %v8781_v52 = vpop.f32.mrf.mxu1  ;;  %13303 = vmatmul.mubr.msk.bf16.gmra.mxu1 %vm1855_vm3, %v18005_v22  ;;  %v8296_v22 = vadd.f32 %v17575_v49, %v17886_v23  ;;  %v8297_v49 = vadd.f32 %v17587_v61, %v17897_v36  ;;  %v8298_v61 = vadd.f32 %v17604_v7, %v17912_v19 }
 0x8b5   :  { %v8824_v33 = vadd.f32 %v8781_v52, %v8647_v11  ;;  %13306 = vmatprep.mubr.msk.bf16.mxu1 %vm13685_vm12, %v18515_v63  ;;  %v18667_v62 = vld [vmem:[#allocation39_spill] sm:$0xff] }
 0x8b6   :  { %v18135_v54 = vpop.f32.mrf.mxu0  ;;  %v13076_v39 = vpop.f32.mrf.mxu1  ;;  %v8473_v20 = vadd.f32 %v18037_v4, %v8296_v22  ;;  %v8474_v4 = vadd.f32 %v18044_v32, %v8297_v49  ;;  %v8475_v14 = vadd.f32 %v18056_v15, %v8298_v61  ;;  %v18670_v49 = vld [vmem:[#allocation27_spill] sm:$0xff] }
 0x8b8   :  { %v13252_v50 = vpop.f32.mrf.mxu0  ;;  %v8784_v2 = vpop.f32.mrf.mxu1  ;;  %v8650_v38 = vadd.f32 %v17733_v13, %v8473_v20  ;;  %v8651_v11 = vadd.f32 %v18667_v62, %v8474_v4  ;;  %v18668_v13 = vld [vmem:[#allocation37_spill] sm:$0xff]  ;;  %v8652_v5 = vadd.f32 %v17770_v58, %v8475_v14  ;;  %v18671_v4 = vld [vmem:[#allocation38_spill] sm:$0xff] }
 0x8b9   :  { %v8825_v31 = vadd.f32 %v8784_v2, %v8648_v10  ;;  %v8299_v27 = vadd.f32 %v18668_v13, %v17926_v56  ;;  %v10061_v50 = vld [vmem:[#allocation4 + $0x1a1] sm:$0xff]  ;;  %v10062_v10 = vld [vmem:[#allocation4 + $0x1a9] sm:$0xff]  ;;  %v18672_v14 = vld [vmem:[#allocation26_spill] sm:$0xff] }
 0x8ba   :  { %v18143_v1 = vpop.f32.mrf.mxu0  ;;  %v10430_v29 = vld [vmem:[#allocation5 + $0xc8] sm:$0x3f]  ;;  %v13077_v21 = vpop.f32.mrf.mxu1  ;;  %v18180_v58 = vld [vmem:[%s18493_s8] ss:$0 sm:$0xff] }
 0x8bb   :  { %v10432_v57 = vmax.f32 %v10428_v37, %v10430_v29  ;;  %8839 = vst [vmem:[#allocation5 + $0x68] sm:$0xff] %v8825_v31  ;;  %v8476_v39 = vadd.f32 %v18064_v6, %v8299_v27  ;;  %v18669_v31 = vld [vmem:[#allocation25_spill] sm:$0xff] }
 0x8bc   :  { %v13253_v47 = vpop.f32.mrf.mxu0  ;;  %v8789_v53 = vpop.f32.mrf.mxu1  ;;  %13307 = vmatmul.mubr.msk.bf16.gmra.mxu1 %vm1855_vm3, %v9725_v3  ;;  %v8300_v56 = vadd.f32 %v18669_v31, %v17942_v60 }
 0x8bd   :  { %10434 = vst [vmem:[#allocation6 + $0x78] sm:$0x3f] %v10432_v57  ;;  %v8826_v23 = vadd.f32 %v8789_v53, %v8649_v24  ;;  %13354 = vmatprep.mubr.msk.bf16.mxu1 %vm13685_vm12, %v18515_v63  ;;  %v10074_v47 = vpack.c.bf16 %v10062_v10, %v10061_v50  ;;  %v18674_v50 = vld [vmem:[#allocation10_spill] sm:$0xff] }
 0x8be   :  { %v18151_v46 = vpop.f32.mrf.mxu0  ;;  %v13080_v12 = vpop.f32.mrf.mxu1  ;;  %v8477_v6 = vadd.f32 %v18076_v51, %v8300_v56 }
 0x8bf   :  { %v10439_v18 = vmax.f32 %v8824_v33, %v8826_v23  ;;  %v8653_v23 = vadd.f32 %v18670_v49, %v8476_v39 }
 0x8c0   :  { %v13256_v34 = vpop.f32.mrf.mxu0  ;;  %v8792_v59 = vpop.f32.mrf.mxu1 }
 0x8c1   :  { %10441 = vst [vmem:[#allocation6 + $0x7e] sm:$0xff] %v10439_v18  ;;  %v8827_v36 = vadd.f32 %v8792_v59, %v8650_v38  ;;  %v8301_v18 = vadd.f32 %v18671_v4, %v17953_v42  ;;  %v10063_v42 = vld [vmem:[#allocation4 + $0x1b1] sm:$0xff] }
 0x8c2   :  { %v18159_v0 = vpop.f32.mrf.mxu0  ;;  %v13081_v45 = vpop.f32.mrf.mxu1  ;;  %v10436_v3 = vld [vmem:[#allocation5 + $0x68] sm:$0x3f] }
 0x8c3   :  { %8841 = vst [vmem:[#allocation5 + $0x8] sm:$0xff] %v8827_v36  ;;  %v8478_v30 = vadd.f32 %v18080_v25, %v8301_v18  ;;  %v8654_v36 = vadd.f32 %v17801_v55, %v8477_v6  ;;  %v10064_v45 = vld [vmem:[#allocation4 + $0x1b9] sm:$0xff]  ;;  %v10067_v18 = vld [vmem:[#allocation4 + $0x1d1] sm:$0xff] }
 0x8c4   :  { %v13257_v32 = vpop.f32.mrf.mxu0  ;;  %v8797_v52 = vpop.f32.mrf.mxu1  ;;  %13355 = vmatmul.mubr.msk.bf16.vlgmr.msra.gmra.mxu1 %vm1855_vm3, %v10073_v40  ;;  %v10075_v25 = vpack.c.bf16 %v10064_v45, %v10063_v42 }
 0x8c5   :  { %v8828_v33 = vadd.f32 %v8797_v52, %v8651_v11  ;;  %13358 = vmatprep.mubr.msk.bf16.mxu1 %vm13685_vm12, %v18515_v63  ;;  %v8302_v32 = vadd.f32 %v18672_v14, %v17965_v35  ;;  %v10069_v14 = vld [vmem:[#allocation4 + $0x1e1] sm:$0xff] }
 0x8c6   :  { %v18166_v7 = vpop.f32.mrf.mxu0  ;;  %v13084_v19 = vpop.f32.mrf.mxu1 }
 0x8c7   :  { %v8479_v13 = vadd.f32 %v18091_v9, %v8302_v32  ;;  %v10066_v9 = vld [vmem:[#allocation4 + $0x1c9] sm:$0xff] }
 0x8c8   :  { %v13260_v15 = vpop.f32.mrf.mxu0  ;;  %v10484_v28 = vld [vmem:[#allocation6 + $0x70] ss:$2 sm:$0xff]  ;;  %v10498_v2 = vld [vmem:[#allocation6 + $0x71] ss:$2 sm:$0xff]  ;;  %v8800_v22 = vpop.f32.mrf.mxu1 }
 0x8c9   :  { %v10511_v37 = vmax.f32 %v10484_v28, %v10498_v2  ;;  %v8829_v29 = vadd.f32 %v8800_v22, %v8652_v5  ;;  %v8656_v10 = vadd.f32 %v18674_v50, %v8479_v13  ;;  %v10065_v28 = vld [vmem:[#allocation4 + $0x1c1] sm:$0xff]  ;;  %v10070_v32 = vld [vmem:[#allocation4 + $0x1e9] sm:$0xff] }
 0x8ca   :  { %v18174_v21 = vpop.f32.mrf.mxu0  ;;  %v10438_v20 = vld [vmem:[#allocation5 + $0x8] sm:$0x3f]  ;;  %v13085_v57 = vpop.f32.mrf.mxu1  ;;  %v10078_v13 = vpack.c.bf16 %v10070_v32, %v10069_v14 }
 0x8cb   :  { %v10518_v24 = vadd.f32 %v18180_v58, %v10511_v37  ;;  %v10440_v53 = vmax.f32 %v10436_v3, %v10438_v20  ;;  %8843 = vst [vmem:[#allocation5 + $0xa8] sm:$0xff] %v8829_v29 }
 0x8cc   :  { %v13261_v60 = vpop.f32.mrf.mxu0  ;;  %v8805_v12 = vpop.f32.mrf.mxu1  ;;  %13359 = vmatmul.mubr.msk.bf16.gmra.mxu1 %vm1855_vm3, %v10074_v47  ;;  %v10076_v47 = vpack.c.bf16 %v10066_v9, %v10065_v28 }
 0x8cd   :  { %v10525_v34 = vmax.f32 %v10518_v24, 0.0  ;;  %10442 = vst [vmem:[#allocation6 + $0x86] sm:$0x3f] %v10440_v53  ;;  %v8830_v51 = vadd.f32 %v8805_v12, %v8653_v23  ;;  %13362 = vmatprep.mubr.msk.bf16.mxu1 %vm13685_vm12, %v18515_v63 }
 0x8ce   :  { %v18187_v38 = vpop.f32.mrf.mxu0  ;;  %v13088_v44 = vpop.f32.mrf.mxu1 }
 0x8cf   :  { %11158 = vst [vmem:[%s18494_s9 + $0x38] sm:$0xff] %v10525_v34  ;;  %v10447_v59 = vmax.f32 %v8828_v33, %v8830_v51  ;;  %v18673_v33 = vld [vmem:[#allocation40_spill] sm:$0xff]  ;;  %v10068_v34 = vld [vmem:[#allocation4 + $0x1d9] sm:$0xff] }
 0x8d0   :  { %v13264_v61 = vpop.f32.mrf.mxu0  ;;  %v8808_v40 = vpop.f32.mrf.mxu1  ;;  %v8655_v19 = vadd.f32 %v18673_v33, %v8478_v30 }
 0x8d1   :  { %10449 = vst [vmem:[#allocation6 + $0x8c] sm:$0xff] %v10447_v59  ;;  %v8831_v62 = vadd.f32 %v8808_v40, %v8654_v36  ;;  %v10077_v59 = vpack.c.bf16 %v10068_v34, %v10067_v18 }
 0x8d2   :  { %v18198_v11 = vpop.f32.mrf.mxu0  ;;  %v13089_v52 = vpop.f32.mrf.mxu1  ;;  %v10444_v3 = vld [vmem:[#allocation5 + $0xa8] sm:$0x3f] }
 0x8d3   :  { %8845 = vst [vmem:[#allocation5 + $0x1a0] sm:$0xff] %v8831_v62 }
 0x8d4   :  { %v13265_v27 = vpop.f32.mrf.mxu0  ;;  %v8813_v39 = vpop.f32.mrf.mxu1  ;;  %13363 = vmatmul.mubr.msk.bf16.gmra.mxu1 %vm1855_vm3, %v10075_v25 }
 0x8d5   :  { %v18203_v55 = vadd.f32 %v8813_v39, %v8655_v19  ;;  %13366 = vmatprep.mubr.msk.bf16.mxu1 %vm13685_vm12, %v18515_v63  ;;  %v10071_v39 = vld [vmem:[#allocation4 + $0x1f1] sm:$0xff] }
 0x8d6   :  { %v18205_v15 = vpop.f32.mrf.mxu0  ;;  %v13092_v35 = vpop.f32.mrf.mxu1 }
 0x8d7   :  { %v10072_v35 = vld [vmem:[#allocation4 + $0x1f9] sm:$0x3f] }
 0x8d8   :  { %v13268_v5 = vpop.f32.mrf.mxu0  ;;  %v10486_v2 = vld [vmem:[#allocation6 + $0x80] ss:$2 sm:$0xff]  ;;  %v10500_v22 = vld [vmem:[#allocation6 + $0x81] ss:$2 sm:$0xff]  ;;  %v8816_v31 = vpop.f32.mrf.mxu1  ;;  %v10079_v28 = vpack.c.bf16 %v10072_v35, %v10071_v39  ;;  %v18680_v35 = vld [vmem:[#allocation41_spill] sm:$0xff] }
 0x8d9   :  { %v10512_v56 = vmax.f32 %v10486_v2, %v10500_v22  ;;  %v8833_v37 = vadd.f32 %v8816_v31, %v8656_v10 }
 0x8da   :  { %v18210_v29 = vpop.f32.mrf.mxu0  ;;  %v10446_v20 = vld [vmem:[#allocation5 + $0x1a0] sm:$0x3f]  ;;  %v13093_v57 = vpop.f32.mrf.mxu1 }
 0x8db   :  { %18675 = vst [vmem:[#allocation33_spill] sm:$0xff] %v18210_v29  ;;  %v10519_v6 = vadd.f32 %v18180_v58, %v10512_v56  ;;  %v10448_v24 = vmax.f32 %v10444_v3, %v10446_v20  ;;  %8847 = vst [vmem:[#allocation5 + $0x100] sm:$0xff] %v8833_v37 }
 0x8dc   :  { %v13269_v53 = vpop.f32.mrf.mxu0  ;;  %v18213_v60 = vpop.f32.mrf.mxu1  ;;  %13367 = vmatmul.mubr.msk.bf16.gmra.mxu1 %vm1855_vm3, %v10076_v47 }
 0x8dd   :  { %v10526_v49 = vmax.f32 %v10519_v6, 0.0  ;;  %10450 = vst [vmem:[#allocation6 + $0x94] sm:$0x3f] %v10448_v24  ;;  %13370 = vmatprep.mubr.msk.bf16.mxu1 %vm13685_vm12, %v18515_v63 }
 0x8de   :  { %v18216_v23 = vpop.f32.mrf.mxu0  ;;  %v13140_v12 = vpop.f32.mrf.mxu1 }
 0x8df   :  { %18676 = vst [vmem:[#allocation21_spill] sm:$0xff] %v18216_v23  ;;  %11159 = vst [vmem:[%s18494_s9 + $0x40] sm:$0xff] %v10526_v49 }
 0x8e0   :  { %v13272_v4 = vpop.f32.mrf.mxu0  ;;  %v18223_v51 = vpop.f32.mrf.mxu1 }
 0x8e2   :  { %v18225_v44 = vpop.f32.mrf.mxu0  ;;  %v13141_v30 = vpop.f32.mrf.mxu1 }
 0x8e3   :  { %18677 = vst [vmem:[#allocation34_spill] sm:$0xff] %v18225_v44 }
 0x8e4   :  { %v13273_v61 = vpop.f32.mrf.mxu0  ;;  %v18227_v36 = vpop.f32.mrf.mxu1  ;;  %13371 = vmatmul.mubr.msk.bf16.gmra.mxu1 %vm1855_vm3, %v10077_v59 }
 0x8e5   :  { %13374 = vmatprep.mubr.msk.bf16.mxu1 %vm13685_vm12, %v18515_v63 }
 0x8e6   :  { %v18230_v42 = vpop.f32.mrf.mxu0  ;;  %v13144_v45 = vpop.f32.mrf.mxu1 }
 0x8e8   :  { %v13320_v40 = vpop.f32.mrf.mxu0  ;;  %v18234_v62 = vpop.f32.mrf.mxu1 }
 0x8ea   :  { %v18236_v52 = vpop.f32.mrf.mxu0  ;;  %v13145_v25 = vpop.f32.mrf.mxu1 }
 0x8ec   :  { %v13321_v27 = vpop.f32.mrf.mxu0  ;;  %v18238_v33 = vpop.f32.mrf.mxu1  ;;  %13375 = vmatmul.mubr.msk.bf16.gmra.mxu1 %vm1855_vm3, %v10078_v13 }
 0x8ed   :  { %13378 = vmatprep.mubr.msk.bf16.mxu1 %vm13685_vm12, %v18515_v63 }
 0x8ee   :  { %v18241_v19 = vpop.f32.mrf.mxu0  ;;  %v13148_v5 = vpop.f32.mrf.mxu1 }
 0x8ef   :  { %v9120_v5 = vadd.f32 %v18213_v60, %v18680_v35 }
 0x8f0   :  { %v13324_v50 = vpop.f32.mrf.mxu0  ;;  %v18245_v10 = vpop.f32.mrf.mxu1 }
 0x8f2   :  { %v18247_v9 = vpop.f32.mrf.mxu0  ;;  %v13149_v2 = vpop.f32.mrf.mxu1 }
 0x8f4   :  { %v13325_v22 = vpop.f32.mrf.mxu0  ;;  %v18249_v31 = vpop.f32.mrf.mxu1  ;;  %13379 = vmatmul.mubr.msk.bf16.gmra.mxu1 %vm1855_vm3, %v10079_v28 }
 0x8f6   :  { %v18252_v56 = vpop.f32.mrf.mxu0  ;;  %v13152_v37 = vpop.f32.mrf.mxu1 }
 0x8f7   :  { %v18682_v37 = vld [vmem:[#allocation7_spill] sm:$0xff] }
 0x8f8   :  { %v13328_v3 = vpop.f32.mrf.mxu0  ;;  %v18254_v63 = vpop.f32.mrf.mxu1 }
 0x8f9   :  { %v9123_v3 = vadd.f32 %v18223_v51, %v18682_v37 }
 0x8fa   :  { %v18256_v20 = vpop.f32.mrf.mxu0  ;;  %v13153_v57 = vpop.f32.mrf.mxu1 }
 0x8fc   :  { %v13329_v47 = vpop.f32.mrf.mxu0  ;;  %v18258_v6 = vpop.f32.mrf.mxu1 }
 0x8fd   :  { %v9337_v47 = vadd.f32 %v17993_v16, %v9120_v5 }
 0x8fe   :  { %v18260_v24 = vpop.f32.mrf.mxu0  ;;  %v13156_v53 = vpop.f32.mrf.mxu1 }
 0x900   :  { %v13332_v49 = vpop.f32.mrf.mxu0  ;;  %v18262_v12 = vpop.f32.mrf.mxu1 }
 0x902   :  { %v18264_v4 = vpop.f32.mrf.mxu0  ;;  %v13157_v18 = vpop.f32.mrf.mxu1 }
 0x904   :  { %v13333_v34 = vpop.f32.mrf.mxu0  ;;  %v18266_v30 = vpop.f32.mrf.mxu1 }
 0x906   :  { %v18268_v59 = vpop.f32.mrf.mxu0  ;;  %v13160_v61 = vpop.f32.mrf.mxu1 }
 0x907   :  { %v18684_v61 = vld [vmem:[#allocation42_spill] sm:$0xff] }
 0x908   :  { %v13336_v45 = vpop.f32.mrf.mxu0  ;;  %v18270_v40 = vpop.f32.mrf.mxu1  ;;  %v9128_v60 = vadd.f32 %v18227_v36, %v18684_v61  ;;  %v18689_v61 = vld [vmem:[#allocation15_spill] sm:$0xff] }
 0x90a   :  { %v18272_v14 = vpop.f32.mrf.mxu0  ;;  %v13161_v32 = vpop.f32.mrf.mxu1 }
 0x90b   :  { %18678 = vst [vmem:[#allocation22_spill] sm:$0xff] %v18272_v14  ;;  %v9338_v32 = vadd.f32 %v18003_v17, %v9123_v3 }
 0x90c   :  { %v13337_v25 = vpop.f32.mrf.mxu0  ;;  %v18274_v13 = vpop.f32.mrf.mxu1 }
 0x90e   :  { %v18276_v27 = vpop.f32.mrf.mxu0  ;;  %v13164_v39 = vpop.f32.mrf.mxu1 }
 0x90f   :  { %18679 = vst [vmem:[#allocation35_spill] sm:$0xff] %v18276_v27 }
 0x910   :  { %v13340_v50 = vpop.f32.mrf.mxu0  ;;  %v18280_v28 = vpop.f32.mrf.mxu1 }
 0x911   :  { %v18686_v50 = vld [vmem:[#allocation11_spill] sm:$0xff] }
 0x912   :  { %v18282_v2 = vpop.f32.mrf.mxu0  ;;  %v13165_v22 = vpop.f32.mrf.mxu1  ;;  %v9131_v16 = vadd.f32 %v18234_v62, %v18686_v50  ;;  %v18690_v50 = vld [vmem:[#allocation8_spill] sm:$0xff] }
 0x913   :  { %18681 = vst [vmem:[#allocation23_spill] sm:$0xff] %v18282_v2  ;;  %v18687_v22 = vld [vmem:[#allocation17_spill] sm:$0xff] }
 0x914   :  { %v13341_v57 = vpop.f32.mrf.mxu0  ;;  %v9459_v53 = vpop.f32.mrf.mxu1  ;;  %v9339_v37 = vadd.f32 %v18687_v22, %v9128_v60  ;;  %v9139_v60 = vadd.f32 %v18245_v10, %v18690_v50  ;;  %v18691_v22 = vld [vmem:[#allocation30_spill] sm:$0xff]  ;;  %v18694_v50 = vld [vmem:[#allocation12_spill] sm:$0xff] }
 0x915   :  { %v18287_v49 = vadd.f32 %v9459_v53, %v9337_v47 }
 0x916   :  { %v18289_v18 = vpop.f32.mrf.mxu0  ;;  %v13212_v34 = vpop.f32.mrf.mxu1 }
 0x917   :  { %18683 = vst [vmem:[#allocation36_spill] sm:$0xff] %v18289_v18  ;;  %v18688_v34 = vld [vmem:[#allocation43_spill] sm:$0xff] }
 0x918   :  { %v13344_v45 = vpop.f32.mrf.mxu0  ;;  %v9462_v25 = vpop.f32.mrf.mxu1  ;;  %v9136_v17 = vadd.f32 %v18238_v33, %v18688_v34  ;;  %v18692_v34 = vld [vmem:[#allocation44_spill] sm:$0xff] }
 0x919   :  { %v18294_v39 = vadd.f32 %v9462_v25, %v9338_v32  ;;  %v9340_v45 = vadd.f32 %v18689_v61, %v9131_v16  ;;  %v9144_v16 = vadd.f32 %v18249_v31, %v18692_v34  ;;  %v18693_v61 = vld [vmem:[#allocation28_spill] sm:$0xff]  ;;  %v18696_v34 = vld [vmem:[#allocation45_spill] sm:$0xff] }
 0x91a   :  { %v18296_v35 = vpop.f32.mrf.mxu0  ;;  %v13213_v51 = vpop.f32.mrf.mxu1 }
 0x91b   :  { %18685 = vst [vmem:[#allocation24_spill] sm:$0xff] %v18296_v35 }
 0x91c   :  { %v13345_v5 = vpop.f32.mrf.mxu0  ;;  %v9467_v57 = vpop.f32.mrf.mxu1 }
 0x91d   :  { %v18301_v47 = vadd.f32 %v9467_v57, %v9339_v37  ;;  %v9341_v37 = vadd.f32 %v18691_v22, %v9136_v17  ;;  %v9147_v17 = vadd.f32 %v18254_v63, %v18694_v50  ;;  %v18695_v22 = vld [vmem:[#allocation18_spill] sm:$0xff]  ;;  %v18698_v50 = vld [vmem:[#allocation9_spill] sm:$0xff] }
 0x91e   :  { %v18303_v53 = vpop.f32.mrf.mxu0  ;;  %v13216_v36 = vpop.f32.mrf.mxu1 }
 0x920   :  { %v13392_v3 = vpop.f32.mrf.mxu0  ;;  %v9470_v32 = vpop.f32.mrf.mxu1 }
 0x921   :  { %v18308_v25 = vadd.f32 %v9470_v32, %v9340_v45  ;;  %v9342_v45 = vadd.f32 %v18693_v61, %v9139_v60  ;;  %v9152_v60 = vadd.f32 %v18258_v6, %v18696_v34  ;;  %v18697_v61 = vld [vmem:[#allocation31_spill] sm:$0xff]  ;;  %v18700_v34 = vld [vmem:[#allocation16_spill] sm:$0xff] }
 0x922   :  { %v18310_v51 = vpop.f32.mrf.mxu0  ;;  %v13217_v62 = vpop.f32.mrf.mxu1 }
 0x924   :  { %v13393_v5 = vpop.f32.mrf.mxu0  ;;  %v9475_v57 = vpop.f32.mrf.mxu1 }
 0x925   :  { %v18315_v36 = vadd.f32 %v9475_v57, %v9341_v37  ;;  %v9343_v37 = vadd.f32 %v18695_v22, %v9144_v16  ;;  %v9155_v16 = vadd.f32 %v18262_v12, %v18698_v50  ;;  %v18699_v22 = vld [vmem:[#allocation19_spill] sm:$0xff]  ;;  %v18702_v50 = vld [vmem:[#allocation14_spill] sm:$0xff] }
 0x926   :  { %v18317_v35 = vpop.f32.mrf.mxu0  ;;  %v13220_v33 = vpop.f32.mrf.mxu1 }
 0x928   :  { %v13396_v3 = vpop.f32.mrf.mxu0  ;;  %v9478_v32 = vpop.f32.mrf.mxu1 }
 0x929   :  { %v18322_v62 = vadd.f32 %v9478_v32, %v9342_v45  ;;  %v9344_v45 = vadd.f32 %v18697_v61, %v9147_v17  ;;  %v9160_v17 = vadd.f32 %v18266_v30, %v18700_v34  ;;  %v18701_v61 = vld [vmem:[#allocation32_spill] sm:$0xff]  ;;  %v18705_v34 = vld [vmem:[#allocation29_spill] sm:$0xff] }
 0x92a   :  { %v18324_v18 = vpop.f32.mrf.mxu0  ;;  %v13221_v10 = vpop.f32.mrf.mxu1 }
 0x92c   :  { %v13397_v5 = vpop.f32.mrf.mxu0  ;;  %v9483_v57 = vpop.f32.mrf.mxu1 }
 0x92d   :  { %v18329_v33 = vadd.f32 %v9483_v57, %v9343_v37  ;;  %v9345_v37 = vadd.f32 %v18699_v22, %v9152_v60  ;;  %v9163_v60 = vadd.f32 %v18270_v40, %v18702_v50  ;;  %v18703_v22 = vld [vmem:[#allocation20_spill] sm:$0xff]  ;;  %v18708_v50 = vld [vmem:[#allocation13_spill] sm:$0xff] }
 0x92e   :  { %v18331_v44 = vpop.f32.mrf.mxu0  ;;  %v13224_v31 = vpop.f32.mrf.mxu1 }
 0x930   :  { %v13400_v3 = vpop.f32.mrf.mxu0  ;;  %v9486_v32 = vpop.f32.mrf.mxu1 }
 0x931   :  { %v18336_v10 = vadd.f32 %v9486_v32, %v9344_v45  ;;  %v9346_v45 = vadd.f32 %v18701_v61, %v9155_v16  ;;  %v9168_v16 = vadd.f32 %v18274_v13, %v18705_v34  ;;  %v9348_v61 = vadd.f32 %v18095_v43, %v9163_v60 }
 0x932   :  { %v18338_v2 = vpop.f32.mrf.mxu0  ;;  %v13225_v63 = vpop.f32.mrf.mxu1 }
 0x934   :  { %v13401_v5 = vpop.f32.mrf.mxu0  ;;  %v9491_v57 = vpop.f32.mrf.mxu1 }
 0x935   :  { %v18343_v31 = vadd.f32 %v9491_v57, %v9345_v37  ;;  %v9347_v37 = vadd.f32 %v18703_v22, %v9160_v17  ;;  %v9171_v17 = vadd.f32 %v18280_v28, %v18708_v50  ;;  %v9349_v22 = vadd.f32 %v18103_v41, %v9168_v16 }
 0x936   :  { %v18345_v23 = vpop.f32.mrf.mxu0  ;;  %v13228_v6 = vpop.f32.mrf.mxu1 }
 0x937   :  { %v9350_v43 = vadd.f32 %v18111_v8, %v9171_v17 }
 0x938   :  { %v13404_v3 = vpop.f32.mrf.mxu0  ;;  %v9494_v32 = vpop.f32.mrf.mxu1 }
 0x939   :  { %v18350_v63 = vadd.f32 %v9494_v32, %v9346_v45 }
 0x93a   :  { %v18352_v27 = vpop.f32.mrf.mxu0  ;;  %v13229_v12 = vpop.f32.mrf.mxu1 }
 0x93c   :  { %v13405_v5 = vpop.f32.mrf.mxu0  ;;  %v9499_v57 = vpop.f32.mrf.mxu1 }
 0x93d   :  { %v18357_v6 = vadd.f32 %v9499_v57, %v9347_v37 }
 0x93e   :  { %v18359_v29 = vpop.f32.mrf.mxu0  ;;  %v13232_v30 = vpop.f32.mrf.mxu1 }
 0x93f   :  { %18704 = vst [vmem:[#allocation39_spill] sm:$0xff] %v18359_v29 }
 0x940   :  { %v13408_v3 = vpop.f32.mrf.mxu0  ;;  %v9502_v45 = vpop.f32.mrf.mxu1 }
 0x941   :  { %v18364_v32 = vadd.f32 %v9502_v45, %v9348_v61 }
 0x942   :  { %v18366_v12 = vpop.f32.mrf.mxu0  ;;  %v13233_v40 = vpop.f32.mrf.mxu1 }
 0x943   :  { %18706 = vst [vmem:[#allocation37_spill] sm:$0xff] %v18364_v32  ;;  %18707 = vst [vmem:[#allocation25_spill] sm:$0xff] %v18366_v12 }
 0x944   :  { %v13409_v5 = vpop.f32.mrf.mxu0  ;;  %v9507_v37 = vpop.f32.mrf.mxu1 }
 0x945   :  { %v18371_v57 = vadd.f32 %v9507_v37, %v9349_v22 }
 0x946   :  { %v18373_v30 = vpop.f32.mrf.mxu0  ;;  %v13236_v13 = vpop.f32.mrf.mxu1 }
 0x947   :  { %18709 = vst [vmem:[#allocation27_spill] sm:$0xff] %v18371_v57  ;;  %18710 = vst [vmem:[#allocation38_spill] sm:$0xff] %v18373_v30 }
 0x948   :  { %v13412_v34 = vpop.f32.mrf.mxu0  ;;  %v9510_v60 = vpop.f32.mrf.mxu1 }
 0x949   :  { %v18376_v3 = vadd.f32 %v9510_v60, %v9350_v43 }
 0x94a   :  { %v18378_v61 = vpop.f32.mrf.mxu0  ;;  %v13237_v45 = vpop.f32.mrf.mxu1 }
 0x94b   :  { %18711 = vst [vmem:[#allocation26_spill] sm:$0xff] %v18376_v3  ;;  %18712 = vst [vmem:[#allocation40_spill] sm:$0xff] %v18378_v61 }
 0x94c   :  { %v13413_v40 = vpop.f32.mrf.mxu0  ;;  %v9813_v28 = vpop.f32.mrf.mxu1 }
 0x94e   :  { %v13284_v50 = vpop.f32.mrf.mxu1  ;;  %v18380_v5 = vpop.f32.mrf.mxu0 }
 0x94f   :  { %18713 = vst [vmem:[#allocation10_spill] sm:$0xff] %v18380_v5 }
 0x950   :  { %v9816_v41 = vpop.f32.mrf.mxu1  ;;  %v13416_v16 = vpop.f32.mrf.mxu0 }
 0x952   :  { %v13285_v22 = vpop.f32.mrf.mxu1  ;;  %v18382_v37 = vpop.f32.mrf.mxu0 }
 0x953   :  { %18714 = vst [vmem:[#allocation41_spill] sm:$0xff] %v18382_v37 }
 0x954   :  { %v9821_v13 = vpop.f32.mrf.mxu1  ;;  %v13417_v34 = vpop.f32.mrf.mxu0 }
 0x956   :  { %v13288_v30 = vpop.f32.mrf.mxu1 }
 0x958   :  { %v9824_v8 = vpop.f32.mrf.mxu1 }
 0x95a   :  { %v13289_v17 = vpop.f32.mrf.mxu1 }
 0x95c   :  { %v9829_v43 = vpop.f32.mrf.mxu1 }
 0x95e   :  { %v13292_v60 = vpop.f32.mrf.mxu1 }
 0x960   :  { %v9832_v3 = vpop.f32.mrf.mxu1 }
 0x962   :  { %v13293_v61 = vpop.f32.mrf.mxu1 }
 0x963   :  { %v9691_v61 = vadd.f32 %v18119_v26, %v18287_v49 }
 0x964   :  { %v18384_v45 = vpop.f32.mrf.mxu1 }
 0x965   :  { %v9868_v32 = vadd.f32 %v9813_v28, %v9691_v61  ;;  %v9694_v61 = vadd.f32 %v18143_v1, %v18308_v25 }
 0x966   :  { %v13296_v40 = vpop.f32.mrf.mxu1 }
 0x967   :  { %v10045_v29 = vadd.f32 %v18230_v42, %v9868_v32  ;;  %v9871_v42 = vadd.f32 %v9824_v8, %v9694_v61 }
 0x968   :  { %v18386_v50 = vpop.f32.mrf.mxu1 }
 0x96a   :  { %v13297_v5 = vpop.f32.mrf.mxu1 }
 0x96c   :  { %v18388_v57 = vpop.f32.mrf.mxu1 }
 0x96e   :  { %v13300_v16 = vpop.f32.mrf.mxu1 }
 0x96f   :  { %v9692_v16 = vadd.f32 %v18127_v48, %v18294_v39 }
 0x970   :  { %v18390_v22 = vpop.f32.mrf.mxu1 }
 0x972   :  { %v13301_v37 = vpop.f32.mrf.mxu1 }
 0x973   :  { %v9869_v37 = vadd.f32 %v9816_v41, %v9692_v16  ;;  %v9696_v41 = vadd.f32 %v18159_v0, %v18322_v62 }
 0x974   :  { %v18392_v34 = vpop.f32.mrf.mxu1 }
 0x975   :  { %18715 = vst [vmem:[#allocation7_spill] sm:$0xff] %v18392_v34  ;;  %v10046_v49 = vadd.f32 %v18236_v52, %v9869_v37 }
 0x976   :  { %v13304_v30 = vpop.f32.mrf.mxu1 }
 0x978   :  { %v18394_v17 = vpop.f32.mrf.mxu1 }
 0x979   :  { %18716 = vst [vmem:[#allocation42_spill] sm:$0xff] %v18394_v17 }
 0x97a   :  { %v13305_v60 = vpop.f32.mrf.mxu1 }
 0x97b   :  { %v9693_v60 = vadd.f32 %v18135_v54, %v18301_v47  ;;  %v9695_v47 = vadd.f32 %v18151_v46, %v18315_v36 }
 0x97c   :  { %v18396_v12 = vpop.f32.mrf.mxu1 }
 0x97d   :  { %18717 = vst [vmem:[#allocation11_spill] sm:$0xff] %v18396_v12  ;;  %v9870_v34 = vadd.f32 %v9821_v13, %v9693_v60 }
 0x97e   :  { %v13308_v40 = vpop.f32.mrf.mxu1 }
 0x97f   :  { %v10047_v54 = vadd.f32 %v18241_v19, %v9870_v34  ;;  %v9873_v34 = vadd.f32 %v9832_v3, %v9696_v41  ;;  %v10452_v40 = vld [vmem:[#allocation5 + $0x100] sm:$0x3f]  ;;  %v18720_v41 = vld [vmem:[#allocation22_spill] sm:$0xff] }
 0x980   :  { %v18400_v5 = vpop.f32.mrf.mxu1 }
 0x982   :  { %v13309_v14 = vpop.f32.mrf.mxu1 }
 0x984   :  { %v10167_v30 = vpop.f32.mrf.mxu1 }
 0x985   :  { %v10222_v17 = vadd.f32 %v10167_v30, %v10045_v29 }
 0x986   :  { %v13356_v12 = vpop.f32.mrf.mxu1 }
 0x987   :  { %v10399_v26 = vadd.f32 %v18303_v53, %v10222_v17  ;;  %v9872_v12 = vadd.f32 %v9829_v43, %v9695_v47 }
 0x988   :  { %v10170_v28 = vpop.f32.mrf.mxu1 }
 0x989   :  { %v10455_v48 = vmax.f32 %v18203_v55, %v10399_v26  ;;  %v10223_v14 = vadd.f32 %v10170_v28, %v10046_v49  ;;  %v10048_v55 = vadd.f32 %v18247_v9, %v9871_v42  ;;  %v10049_v36 = vadd.f32 %v18252_v56, %v9872_v12 }
 0x98a   :  { %v13357_v39 = vpop.f32.mrf.mxu1  ;;  %v9697_v9 = vadd.f32 %v18166_v7, %v18329_v33  ;;  %v10050_v56 = vadd.f32 %v18256_v20, %v9873_v34  ;;  %v9698_v26 = vadd.f32 %v18174_v21, %v18336_v10  ;;  %v9699_v20 = vadd.f32 %v18187_v38, %v18343_v31 }
 0x98b   :  { %10457 = vst [vmem:[#allocation6 + $0x9a] sm:$0xff] %v10455_v48  ;;  %v10400_v32 = vadd.f32 %v18310_v51, %v10223_v14 }
 0x98c   :  { %v10175_v29 = vpop.f32.mrf.mxu1  ;;  %v9874_v30 = vadd.f32 %v18384_v45, %v9697_v9  ;;  %v9875_v28 = vadd.f32 %v18386_v50, %v9698_v26  ;;  %v9876_v48 = vadd.f32 %v18388_v57, %v9699_v20  ;;  %v9700_v50 = vadd.f32 %v18198_v11, %v18350_v63  ;;  %v18730_v26 = vld [vmem:[#allocation23_spill] sm:$0xff] }
 0x98d   :  { %10414 = vst [vmem:[#allocation5 + $0x20] sm:$0xff] %v10400_v32  ;;  %v10224_v52 = vadd.f32 %v10175_v29, %v10047_v54 }
 0x98e   :  { %v13360_v53 = vpop.f32.mrf.mxu1  ;;  %v10052_v39 = vadd.f32 %v18264_v4, %v9875_v28  ;;  %v9877_v29 = vadd.f32 %v18390_v22, %v9700_v50  ;;  %v10053_v47 = vadd.f32 %v18268_v59, %v9876_v48  ;;  %v9701_v4 = vadd.f32 %v18205_v15, %v18357_v6  ;;  %v18732_v28 = vld [vmem:[#allocation34_spill] sm:$0xff]  ;;  %v18734_v48 = vld [vmem:[#allocation36_spill] sm:$0xff] }
 0x98f   :  { %v10401_v1 = vadd.f32 %v18317_v35, %v10224_v52 }
 0x990   :  { %v10178_v25 = vpop.f32.mrf.mxu1  ;;  %v10054_v59 = vadd.f32 %v18720_v41, %v9877_v29 }
 0x991   :  { %v10225_v13 = vadd.f32 %v10178_v25, %v10048_v55  ;;  %v18719_v25 = vld [vmem:[#allocation39_spill] sm:$0xff] }
 0x992   :  { %v10488_v51 = vld [vmem:[#allocation6 + $0x90] ss:$2 sm:$0xff]  ;;  %v10502_v8 = vld [vmem:[#allocation6 + $0x91] ss:$2 sm:$0xff]  ;;  %v13361_v19 = vpop.f32.mrf.mxu1 }
 0x993   :  { %v10513_v17 = vmax.f32 %v10488_v51, %v10502_v8  ;;  %v10402_v46 = vadd.f32 %v18324_v18, %v10225_v13  ;;  %v18721_v51 = vld [vmem:[#allocation37_spill] sm:$0xff] }
 0x994   :  { %v10454_v43 = vld [vmem:[#allocation5 + $0x20] sm:$0x3f]  ;;  %v10183_v16 = vpop.f32.mrf.mxu1  ;;  %v18722_v8 = vld [vmem:[#allocation33_spill] sm:$0xff] }
 0x995   :  { %v10520_v35 = vadd.f32 %v18180_v58, %v10513_v17  ;;  %v10456_v37 = vmax.f32 %v10452_v40, %v10454_v43  ;;  %10416 = vst [vmem:[#allocation5 + $0x78] sm:$0xff] %v10402_v46  ;;  %v10226_v0 = vadd.f32 %v10183_v16, %v10049_v36  ;;  %v9702_v19 = vadd.f32 %v18722_v8, %v18721_v51  ;;  %v18723_v17 = vld [vmem:[#allocation42_spill] sm:$0xff]  ;;  %v18724_v36 = vld [vmem:[#allocation25_spill] sm:$0xff]  ;;  %v18725_v43 = vld [vmem:[#allocation35_spill] sm:$0xff] }
 0x996   :  { %v13364_v62 = vpop.f32.mrf.mxu1 }
 0x997   :  { %v10527_v3 = vmax.f32 %v10520_v35, 0.0  ;;  %10458 = vst [vmem:[#allocation6 + $0xa2] sm:$0x3f] %v10456_v37  ;;  %v10403_v18 = vadd.f32 %v18331_v44, %v10226_v0  ;;  %v10051_v44 = vadd.f32 %v18260_v24, %v9874_v30  ;;  %v9879_v46 = vadd.f32 %v18723_v17, %v9702_v19  ;;  %v18726_v35 = vld [vmem:[#allocation27_spill] sm:$0xff]  ;;  %v18727_v37 = vld [vmem:[#allocation21_spill] sm:$0xff] }
 0x998   :  { %v10186_v60 = vpop.f32.mrf.mxu1  ;;  %v9703_v0 = vadd.f32 %v18727_v37, %v18726_v35 }
 0x999   :  { %11160 = vst [vmem:[%s18494_s9 + $0x48] sm:$0xff] %v10527_v3  ;;  %v10463_v7 = vmax.f32 %v10401_v1, %v10403_v18  ;;  %v10227_v33 = vadd.f32 %v10186_v60, %v10050_v56  ;;  %v18718_v1 = vld [vmem:[#allocation7_spill] sm:$0xff]  ;;  %v18729_v56 = vld [vmem:[#allocation38_spill] sm:$0xff] }
 0x99a   :  { %v13365_v49 = vpop.f32.mrf.mxu1  ;;  %v9878_v55 = vadd.f32 %v18718_v1, %v9701_v4  ;;  %v18728_v3 = vld [vmem:[#allocation11_spill] sm:$0xff] }
 0x99b   :  { %10465 = vst [vmem:[#allocation6 + $0xa8] sm:$0xff] %v10463_v7  ;;  %v10404_v45 = vadd.f32 %v18338_v2, %v10227_v33  ;;  %v9880_v18 = vadd.f32 %v18728_v3, %v9703_v0  ;;  %v10056_v7 = vadd.f32 %v18730_v26, %v9879_v46  ;;  %v18731_v49 = vld [vmem:[#allocation26_spill] sm:$0xff] }
 0x99c   :  { %v10191_v61 = vpop.f32.mrf.mxu1  ;;  %v10460_v57 = vld [vmem:[#allocation5 + $0x78] sm:$0x3f]  ;;  %v10055_v16 = vadd.f32 %v18725_v43, %v9878_v55 }
 0x99d   :  { %10418 = vst [vmem:[#allocation5 + $0x158] sm:$0xff] %v10404_v45  ;;  %v10228_v21 = vadd.f32 %v10191_v61, %v10051_v44  ;;  %v9704_v45 = vadd.f32 %v18732_v28, %v18731_v49 }
 0x99e   :  { %v13368_v10 = vpop.f32.mrf.mxu1 }
 0x99f   :  { %v10405_v14 = vadd.f32 %v18345_v23, %v10228_v21  ;;  %v9881_v20 = vadd.f32 %v18400_v5, %v9704_v45  ;;  %v18733_v21 = vld [vmem:[#allocation40_spill] sm:$0xff] }
 0x9a0   :  { %v10194_v42 = vpop.f32.mrf.mxu1 }
 0x9a1   :  { %v10229_v2 = vadd.f32 %v10194_v42, %v10052_v39 }
 0x9a2   :  { %v10490_v32 = vld [vmem:[#allocation6 + $0xa0] ss:$2 sm:$0xff]  ;;  %v10504_v24 = vld [vmem:[#allocation6 + $0xa1] ss:$2 sm:$0xff]  ;;  %v13369_v54 = vpop.f32.mrf.mxu1 }
 0x9a3   :  { %v10514_v38 = vmax.f32 %v10490_v32, %v10504_v24  ;;  %v10406_v31 = vadd.f32 %v18352_v27, %v10229_v2  ;;  %v18735_v54 = vld [vmem:[#allocation10_spill] sm:$0xff] }
 0x9a4   :  { %v10462_v52 = vld [vmem:[#allocation5 + $0x158] sm:$0x3f]  ;;  %v10199_v23 = vpop.f32.mrf.mxu1 }
 0x9a5   :  { %v10521_v53 = vadd.f32 %v18180_v58, %v10514_v38  ;;  %v10464_v11 = vmax.f32 %v10460_v57, %v10462_v52  ;;  %10420 = vst [vmem:[#allocation5 + $0x38] sm:$0xff] %v10406_v31  ;;  %v10230_v63 = vadd.f32 %v10199_v23, %v10053_v47  ;;  %v18736_v38 = vld [vmem:[#allocation24_spill] sm:$0xff]  ;;  %v18737_v23 = vld [vmem:[#allocation41_spill] sm:$0xff] }
 0x9a6   :  { %v13372_v12 = vpop.f32.mrf.mxu1  ;;  %v10058_v31 = vadd.f32 %v18736_v38, %v9881_v20 }
 0x9a7   :  { %v10528_v22 = vmax.f32 %v10521_v53, 0.0  ;;  %10466 = vst [vmem:[#allocation6 + $0xb0] sm:$0x3f] %v10464_v11  ;;  %v10407_v27 = vadd.f32 %v18719_v25, %v10230_v63 }
 0x9a8   :  { %v10202_v13 = vpop.f32.mrf.mxu1 }
 0x9a9   :  { %11161 = vst [vmem:[%s18494_s9 + $0x50] sm:$0xff] %v10528_v22  ;;  %v10471_v15 = vmax.f32 %v10405_v14, %v10407_v27  ;;  %v10231_v6 = vadd.f32 %v10202_v13, %v10054_v59  ;;  %v10057_v14 = vadd.f32 %v18734_v48, %v9880_v18 }
 0x9aa   :  { %v13373_v34 = vpop.f32.mrf.mxu1 }
 0x9ab   :  { %10473 = vst [vmem:[#allocation6 + $0xb6] sm:$0xff] %v10471_v15  ;;  %v10408_v40 = vadd.f32 %v18724_v36, %v10231_v6 }
 0x9ac   :  { %v10207_v9 = vpop.f32.mrf.mxu1  ;;  %v10468_v39 = vld [vmem:[#allocation5 + $0x38] sm:$0x3f] }
 0x9ad   :  { %10422 = vst [vmem:[#allocation5 + $0x170] sm:$0xff] %v10408_v40  ;;  %v10232_v62 = vadd.f32 %v10207_v9, %v10055_v16 }
 0x9ae   :  { %v13376_v30 = vpop.f32.mrf.mxu1 }
 0x9af   :  { %v10409_v60 = vadd.f32 %v18729_v56, %v10232_v62 }
 0x9b0   :  { %v10210_v33 = vpop.f32.mrf.mxu1 }
 0x9b1   :  { %v10233_v44 = vadd.f32 %v10210_v33, %v10056_v7 }
 0x9b2   :  { %v13377_v61 = vpop.f32.mrf.mxu1 }
 0x9b3   :  { %v10410_v10 = vadd.f32 %v18733_v21, %v10233_v44 }
 0x9b4   :  { %v10470_v42 = vld [vmem:[#allocation5 + $0x170] sm:$0x3f]  ;;  %v10215_v50 = vpop.f32.mrf.mxu1 }
 0x9b5   :  { %v10472_v2 = vmax.f32 %v10468_v39, %v10470_v42  ;;  %10424 = vst [vmem:[#allocation5 + $0xf0] sm:$0xff] %v10410_v10  ;;  %v10234_v32 = vadd.f32 %v10215_v50, %v10057_v14 }
 0x9b6   :  { %v13380_v24 = vpop.f32.mrf.mxu1 }
 0x9b7   :  { %10474 = vst [vmem:[#allocation6 + $0xbe] sm:$0x3f] %v10472_v2  ;;  %v10411_v29 = vadd.f32 %v18735_v54, %v10234_v32 }
 0x9b8   :  { %v10218_v47 = vpop.f32.mrf.mxu1 }
 0x9b9   :  { %v10479_v57 = vmax.f32 %v10409_v60, %v10411_v29  ;;  %v10235_v52 = vadd.f32 %v10218_v47, %v10058_v31 }
 0x9ba   :  { %v13381_v5 = vpop.f32.mrf.mxu1 }
 0x9bb   :  { %10481 = vst [vmem:[#allocation6 + $0xc4] sm:$0xff] %v10479_v57  ;;  %v10412_v4 = vadd.f32 %v18737_v23, %v10235_v52 }
 0x9bc   :  { %v10476_v55 = vld [vmem:[#allocation5 + $0xf0] sm:$0x3f] }
 0x9bd   :  { %10426 = vst [vmem:[#allocation5 + $0x198] sm:$0x3f] %v10412_v4 }
 0x9be   :  { %v10492_v53 = vld [vmem:[#allocation6 + $0xb0] ss:$2 sm:$0xff]  ;;  %v10506_v11 = vld [vmem:[#allocation6 + $0xb1] ss:$2 sm:$0xff] }
 0x9bf   :  { %v10515_v63 = vmax.f32 %v10492_v53, %v10506_v11 }
 0x9c1   :  { %v10522_v12 = vadd.f32 %v18180_v58, %v10515_v63 }
 0x9c3   :  { %v10529_v1 = vmax.f32 %v10522_v12, 0.0 }
 0x9c4   :  { %v10478_v22 = vld [vmem:[#allocation5 + $0x198] sm:$0x3f] }
 0x9c5   :  { %11162 = vst [vmem:[%s18494_s9 + $0x58] sm:$0xff] %v10529_v1  ;;  %v10480_v25 = vmax.f32 %v10476_v55, %v10478_v22 }
 0x9c7   :  { %10482 = vst [vmem:[#allocation6 + $0xcc] sm:$0x3f] %v10480_v25 }
 0x9ce   :  { %v10494_v27 = vld [vmem:[#allocation6 + $0xc0] ss:$2 sm:$0xff]  ;;  %v10496_v41 = vld [vmem:[#allocation6 + $0xd0] ss:$2 sm:$0x1] }
 0x9cf   :  { %v10508_v59 = vld [vmem:[#allocation6 + $0xc1] ss:$2 sm:$0xff]  ;;  %v10510_v13 = vld [vmem:[#allocation6 + $0xd1] ss:$2 sm:$0x1] }
 0x9d0   :  { %v10516_v51 = vmax.f32 %v10494_v27, %v10508_v59  ;;  %v10517_v8 = vmax.f32 %v10496_v41, %v10510_v13 }
 0x9d2   :  { %v10523_v19 = vadd.f32 %v18180_v58, %v10516_v51  ;;  %v10524_v15 = vadd.f32 %v18180_v58, %v10517_v8 }
 0x9d4   :  { %v10530_v6 = vmax.f32 %v10523_v19, 0.0  ;;  %v10531_v34 = vmax.f32 %v10524_v15, 0.0 }
 0x9d6   :  { %11163 = vst [vmem:[%s18494_s9 + $0x60] sm:$0xff] %v10530_v6  ;;  %11164 = vst [vmem:[%s18494_s9 + $0x68] sm:$0x1] %v10531_v34 }

</bundles_post_ra>
